<compile_context>
chip_gen: v7x
topology: tpu7x:2x2x1
jax: 0.10.0
libtpu: 0.0.40
codegen_flags: <defaults>
</compile_context>

<pallas_src>
import functools

import jax
import jax.numpy as jnp
from jax.experimental import pallas as pl
from jax.experimental.pallas import tpu as pltpu

KSIZE = 7   # conv kernel size for every layer
PAD = 3     # per-layer zero padding (kernel_size=7, padding=3 -> "same")


def _conv_stack_kernel(center_ref, lhalo_ref, rhalo_ref, w_ref, b_ref, o_ref,
                       *, true_l, halo_w):
    # center_ref: (1, cmax, block_l)   current tile, channels on sublanes
    # lhalo_ref : (1, cmax, 128)       aligned 128-lane block left of the tile
    # rhalo_ref : (1, cmax, 128)       aligned 128-lane block right of the tile
    # w_ref     : (n_layers*KSIZE, cmax, cmax)  per-tap weight matrices
    # b_ref     : (n_layers, cmax, 1)           biases
    # o_ref     : (1, 1, block_l)      sigmoid(relu(conv14)), channel 0
    n_layers = b_ref.shape[0]
    ksize = w_ref.shape[0] // n_layers
    cmax = center_ref.shape[1]
    block_l = center_ref.shape[2]
    w_width = block_l + 2 * halo_w          # multiple of 128 (lane-group dense)

    # Assemble the working window: [halo_w | block_l | halo_w] columns.
    left = lhalo_ref[0, :, 128 - halo_w:]
    right = rhalo_ref[0, :, :halo_w]
    a = jnp.concatenate([left, center_ref[0], right], axis=-1)
    a = a.astype(jnp.float32)

    # Validity mask in global sequence coordinates, hoisted out of the layer
    # loop.  It zeroes (a) data pulled in by the clamped halo reads at the
    # sequence ends and (b) columns >= true_l, reproducing PyTorch's
    # per-layer zero padding exactly.  Required for edge tiles.
    tile = pl.program_id(1)
    col = jax.lax.broadcasted_iota(jnp.int32, (cmax, w_width), 1)
    g = col + (tile * block_l - halo_w)
    maskf = jnp.logical_and(g >= 0, g < true_l).astype(jnp.float32)

    a = a * maskf
    for layer in range(n_layers):            # static unroll (14 layers)
        acc = jnp.broadcast_to(b_ref[layer], (cmax, w_width))   # bias init
        for t in range(ksize):               # tap accumulation: 7 tiny dots
            s = (PAD - t) % w_width          # static, non-negative shift
            at = a if s == 0 else pltpu.roll(a, shift=s, axis=1)
            acc = acc + jnp.dot(w_ref[layer * ksize + t], at,
                                preferred_element_type=jnp.float32)
        a = jnp.maximum(acc, 0.0) * maskf    # ReLU + re-apply zero padding

    # Final activation; keep channel 0 of the centre (real) columns only.
    out = jax.nn.sigmoid(a[0:1, halo_w:halo_w + block_l])       # (1, block_l)
    o_ref[...] = out.reshape(o_ref.shape).astype(o_ref.dtype)


def new_model4_forward(x, weights, biases, *, block_l=512):
    """x: (N, C_in, L) float32.  weights[i]: (cout_i, cin_i, 7).  biases[i]: (cout_i,).

    Returns (N, 1, L) float32, matching NewModel4.forward (dropout is unused
    in the reference forward).
    """
    n, c_in, length = x.shape
    n_layers = len(weights)
    assert block_l >= 128 and block_l % 128 == 0, \
        "block_l must be a positive multiple of 128 (lane width)"

    # Halo containment: the circular rolls only stay correct because the
    # wrap/edge garbage advances inward by exactly PAD per layer and the halo
    # is at least PAD * n_layers wide.  Do not weaken this.
    halo_req = PAD * n_layers                # 3 * 14 = 42
    assert halo_req <= 128, "halo must fit within one neighbouring 128-block"
    halo_w = 64 if halo_req <= 64 else 128   # keeps window width a x128 mult

    # Uniform internal channel width (multiple of 8 for sublane alignment).
    c_all = [c_in] + [int(w.shape[0]) for w in weights]
    cmax = ((max(c_all) + 7) // 8) * 8

    num_tiles = int(pl.cdiv(length, block_l))
    lp = num_tiles * block_l
    lblocks = block_l // 128
    total_lblocks = lp // 128

    # Single small wrapper-side copy: pad channels to cmax and L to lp.
    xb = x.astype(jnp.float32)
    if cmax != c_in or lp != length:
        xb = jnp.pad(xb, ((0, 0), (0, cmax - c_in), (0, lp - length)))

    # ---- parameter packing (tiny, once per call) ---------------------------
    # w_all[l*KSIZE + t] is the (cmax, cmax) matrix of tap t of layer l.
    w_taps, b_rows = [], []
    for w, b in zip(weights, biases):
        cout, cin, _ = w.shape
        wp = jnp.zeros((KSIZE, cmax, cmax), jnp.float32)
        wp = wp.at[:, :cout, :cin].set(
            jnp.transpose(w.astype(jnp.float32), (2, 0, 1)))
        w_taps.append(wp)
        b_rows.append(jnp.zeros((cmax, 1), jnp.float32).at[:cout, 0].set(
            b.astype(jnp.float32)))
    w_all = jnp.concatenate(w_taps, axis=0)   # (n_layers*KSIZE, cmax, cmax)
    b_all = jnp.stack(b_rows)                 # (n_layers, cmax, 1)

    out = pl.pallas_call(
        functools.partial(_conv_stack_kernel, true_l=length, halo_w=halo_w),
        out_shape=jax.ShapeDtypeStruct((n, 1, lp), jnp.float32),
        grid=(n, num_tiles),
        in_specs=[
            # centre tile
            pl.BlockSpec((1, cmax, block_l), lambda i, j: (i, 0, j)),
            # aligned 128-lane block from the left neighbour (clamped at j=0)
            pl.BlockSpec((1, cmax, 128),
                         lambda i, j: (i, 0, jnp.maximum(j * lblocks - 1, 0))),
            # aligned 128-lane block from the right neighbour (clamped at end)
            pl.BlockSpec((1, cmax, 128),
                         lambda i, j: (i, 0, jnp.minimum((j + 1) * lblocks,
                                                         total_lblocks - 1))),
            pl.BlockSpec((n_layers * KSIZE, cmax, cmax), lambda i, j: (0, 0, 0)),
            pl.BlockSpec((n_layers, cmax, 1), lambda i, j: (0, 0, 0)),
        ],
        out_specs=pl.BlockSpec((1, 1, block_l), lambda i, j: (i, 0, j)),
        compiler_params=pltpu.CompilerParams(
            dimension_semantics=("parallel", "parallel")),
    )(xb, xb, xb, w_all, b_all)

    return out[:, :, :length] if lp != length else out


def reference_forward(x, weights, biases):
    """Pure-JAX reference of NewModel4.forward."""
    y = x.astype(jnp.float32)
    for w, b in zip(weights, biases):
        y = jax.lax.conv_general_dilated(
            y, w.astype(jnp.float32), window_strides=(1,),
            padding=[(PAD, PAD)], dimension_numbers=("NCH", "OIH", "NCH"))
        y = jax.nn.relu(y + b.reshape(1, -1, 1))
    return jax.nn.sigmoid(y)


if __name__ == "__main__":
    # Small shapes consistent with the module: batch=2, data_channels=3,
    # input_length=1024 (module default).  block_l=512 -> grid (2, 2), so
    # both grid axes stay parallel-splittable (v7x megacore friendly).
    N, C_IN, L = 2, 3, 1024
    BLOCK_L = 512

    chans = [C_IN, 4, 4, 6, 6, 8, 8, 6, 6, 4, 4, 2, 2, 2, 1]

    key = jax.random.PRNGKey(0)
    key, kx = jax.random.split(key)
    x = jax.random.normal(kx, (N, C_IN, L), dtype=jnp.float32)

    weights, biases = [], []
    for i in range(len(chans) - 1):
        cin, cout = chans[i], chans[i + 1]
        key, kw, kb = jax.random.split(key, 3)
        bound = 1.0 / float(cin * KSIZE) ** 0.5      # PyTorch Conv1d default init
        weights.append(jax.random.uniform(kw, (cout, cin, KSIZE), jnp.float32,
                                          minval=-bound, maxval=bound))
        biases.append(jax.random.uniform(kb, (cout,), jnp.float32,
                                         minval=-bound, maxval=bound))
    weights, biases = tuple(weights), tuple(biases)

    fwd = jax.jit(functools.partial(new_model4_forward, block_l=BLOCK_L))
    out = fwd(x, weights, biases)
    jax.block_until_ready(out)
    assert out.shape == (N, 1, L), out.shape

    ref = reference_forward(x, weights, biases)
    err = float(jnp.max(jnp.abs(out - ref)))
    assert err < 1e-4, f"max abs error vs reference: {err}"

    print("KERNEL_OK")
</pallas_src>

<mosaic_0001>
module attributes {stable_mosaic.version = 11 : i64} {
  func.func @_conv_stack_kernel(%arg0: i32, %arg1: i32, %arg2: memref<1x8x512xf32, #tpu.memory_space<vmem>>, %arg3: memref<1x8x128xf32, #tpu.memory_space<vmem>>, %arg4: memref<1x8x128xf32, #tpu.memory_space<vmem>>, %arg5: memref<98x8x8xf32, #tpu.memory_space<vmem>>, %arg6: memref<14x8x1xf32, #tpu.memory_space<vmem>>, %arg7: memref<1x1x512xf32, #tpu.memory_space<vmem>>) attributes {dimension_semantics = [#tpu.dimension_semantics<parallel>, #tpu.dimension_semantics<parallel>], iteration_bounds = array<i64: 2, 2>, scalar_prefetch = 0 : i64, scratch_operands = 0 : i64, tpu.core_type = #tpu.core_type<tc>, window_params = [{transform_indices = @transform_0, window_bounds = array<i64: 1, 8, 512>}, {transform_indices = @transform_1, window_bounds = array<i64: 1, 8, 128>}, {transform_indices = @transform_2, window_bounds = array<i64: 1, 8, 128>}, {pipeline_mode = #tpu.pipeline_mode<synchronous>, transform_indices = @transform_3, window_bounds = array<i64: 98, 8, 8>}, {pipeline_mode = #tpu.pipeline_mode<synchronous>, transform_indices = @transform_4, window_bounds = array<i64: 14, 8, 1>}, {transform_indices = @transform_5, window_bounds = array<i64: 1, 1, 512>}]} {
    %c0 = arith.constant 0 : index
    %c0_0 = arith.constant 0 : index
    %c64 = arith.constant 64 : index
    %0 = vector.load %arg3[%c0, %c0_0, %c64] : memref<1x8x128xf32, #tpu.memory_space<vmem>>, vector<1x8x64xf32>
    %1 = vector.shape_cast %0 : vector<1x8x64xf32> to vector<8x64xf32>
    %c0_1 = arith.constant 0 : index
    %c0_2 = arith.constant 0 : index
    %c0_3 = arith.constant 0 : index
    %2 = vector.load %arg4[%c0_1, %c0_2, %c0_3] : memref<1x8x128xf32, #tpu.memory_space<vmem>>, vector<1x8x64xf32>
    %3 = vector.shape_cast %2 : vector<1x8x64xf32> to vector<8x64xf32>
    %c0_4 = arith.constant 0 : index
    %c0_5 = arith.constant 0 : index
    %c0_6 = arith.constant 0 : index
    %4 = vector.load %arg2[%c0_4, %c0_5, %c0_6] : memref<1x8x512xf32, #tpu.memory_space<vmem>>, vector<1x8x512xf32>
    %5 = vector.shape_cast %4 : vector<1x8x512xf32> to vector<8x512xf32>
    %6 = tpu.concatenate %1, %5, %3 in 1 : vector<8x64xf32>, vector<8x512xf32>, vector<8x64xf32> -> vector<8x640xf32>
    %7 = tpu.iota {dimensions = array<i32: 1>} : vector<8x640xi32>
    %c512_i32 = arith.constant 512 : i32
    %8 = arith.muli %arg1, %c512_i32 : i32
    %c64_i32 = arith.constant 64 : i32
    %9 = arith.subi %8, %c64_i32 : i32
    %10 = vector.broadcast %9 : i32 to vector<8x640xi32>
    %11 = arith.addi %7, %10 : vector<8x640xi32>
    %c0_i32 = arith.constant 0 : i32
    %12 = vector.broadcast %c0_i32 : i32 to vector<8x640xi32>
    %13 = arith.cmpi sge, %11, %12 : vector<8x640xi32>
    %c1024_i32 = arith.constant 1024 : i32
    %14 = vector.broadcast %c1024_i32 : i32 to vector<8x640xi32>
    %15 = arith.cmpi slt, %11, %14 : vector<8x640xi32>
    %16 = arith.andi %13, %15 : vector<8x640xi1>
    %17 = arith.extui %16 : vector<8x640xi1> to vector<8x640xi32>
    %18 = arith.sitofp %17 : vector<8x640xi32> to vector<8x640xf32>
    %19 = arith.mulf %6, %18 : vector<8x640xf32>
    %c0_7 = arith.constant 0 : index
    %c0_8 = arith.constant 0 : index
    %c0_9 = arith.constant 0 : index
    %20 = vector.load %arg6[%c0_7, %c0_8, %c0_9] : memref<14x8x1xf32, #tpu.memory_space<vmem>>, vector<1x8x1xf32>
    %21 = vector.shape_cast %20 : vector<1x8x1xf32> to vector<8x1xf32>
    %22 = vector.shape_cast %21 : vector<8x1xf32> to vector<8x1xf32>
    %23 = vector.broadcast %22 : vector<8x1xf32> to vector<8x640xf32>
    %c3_i32 = arith.constant 3 : i32
    %24 = tpu.dynamic_rotate %19 by %c3_i32 dim 1 : vector<8x640xf32>, i32 -> vector<8x640xf32>
    %c0_10 = arith.constant 0 : index
    %c0_11 = arith.constant 0 : index
    %c0_12 = arith.constant 0 : index
    %25 = vector.load %arg5[%c0_10, %c0_11, %c0_12] : memref<98x8x8xf32, #tpu.memory_space<vmem>>, vector<1x8x8xf32>
    %26 = vector.shape_cast %25 : vector<1x8x8xf32> to vector<8x8xf32>
    %cst = arith.constant dense<0.000000e+00> : vector<8x640xf32>
    %27 = tpu.matmul %26, %24, %cst {dimension_numbers = #tpu.dot_dimension_numbers<[1], [0], [0], [1], [0, 0, 1, 1], [], []>} : vector<8x8xf32>, vector<8x640xf32>, vector<8x640xf32> -> vector<8x640xf32>
    %28 = arith.addf %23, %27 : vector<8x640xf32>
    %c2_i32 = arith.constant 2 : i32
    %29 = tpu.dynamic_rotate %19 by %c2_i32 dim 1 : vector<8x640xf32>, i32 -> vector<8x640xf32>
    %c1 = arith.constant 1 : index
    %c0_13 = arith.constant 0 : index
    %c0_14 = arith.constant 0 : index
    %30 = vector.load %arg5[%c1, %c0_13, %c0_14] : memref<98x8x8xf32, #tpu.memory_space<vmem>>, vector<1x8x8xf32>
    %31 = vector.shape_cast %30 : vector<1x8x8xf32> to vector<8x8xf32>
    %cst_15 = arith.constant dense<0.000000e+00> : vector<8x640xf32>
    %32 = tpu.matmul %31, %29, %cst_15 {dimension_numbers = #tpu.dot_dimension_numbers<[1], [0], [0], [1], [0, 0, 1, 1], [], []>} : vector<8x8xf32>, vector<8x640xf32>, vector<8x640xf32> -> vector<8x640xf32>
    %33 = arith.addf %28, %32 : vector<8x640xf32>
    %c1_i32 = arith.constant 1 : i32
    %34 = tpu.dynamic_rotate %19 by %c1_i32 dim 1 : vector<8x640xf32>, i32 -> vector<8x640xf32>
    %c2 = arith.constant 2 : index
    %c0_16 = arith.constant 0 : index
    %c0_17 = arith.constant 0 : index
    %35 = vector.load %arg5[%c2, %c0_16, %c0_17] : memref<98x8x8xf32, #tpu.memory_space<vmem>>, vector<1x8x8xf32>
    %36 = vector.shape_cast %35 : vector<1x8x8xf32> to vector<8x8xf32>
    %cst_18 = arith.constant dense<0.000000e+00> : vector<8x640xf32>
    %37 = tpu.matmul %36, %34, %cst_18 {dimension_numbers = #tpu.dot_dimension_numbers<[1], [0], [0], [1], [0, 0, 1, 1], [], []>} : vector<8x8xf32>, vector<8x640xf32>, vector<8x640xf32> -> vector<8x640xf32>
    %38 = arith.addf %33, %37 : vector<8x640xf32>
    %c3 = arith.constant 3 : index
    %c0_19 = arith.constant 0 : index
    %c0_20 = arith.constant 0 : index
    %39 = vector.load %arg5[%c3, %c0_19, %c0_20] : memref<98x8x8xf32, #tpu.memory_space<vmem>>, vector<1x8x8xf32>
    %40 = vector.shape_cast %39 : vector<1x8x8xf32> to vector<8x8xf32>
    %cst_21 = arith.constant dense<0.000000e+00> : vector<8x640xf32>
    %41 = tpu.matmul %40, %19, %cst_21 {dimension_numbers = #tpu.dot_dimension_numbers<[1], [0], [0], [1], [0, 0, 1, 1], [], []>} : vector<8x8xf32>, vector<8x640xf32>, vector<8x640xf32> -> vector<8x640xf32>
    %42 = arith.addf %38, %41 : vector<8x640xf32>
    %c639_i32 = arith.constant 639 : i32
    %43 = tpu.dynamic_rotate %19 by %c639_i32 dim 1 : vector<8x640xf32>, i32 -> vector<8x640xf32>
    %c4 = arith.constant 4 : index
    %c0_22 = arith.constant 0 : index
    %c0_23 = arith.constant 0 : index
    %44 = vector.load %arg5[%c4, %c0_22, %c0_23] : memref<98x8x8xf32, #tpu.memory_space<vmem>>, vector<1x8x8xf32>
    %45 = vector.shape_cast %44 : vector<1x8x8xf32> to vector<8x8xf32>
    %cst_24 = arith.constant dense<0.000000e+00> : vector<8x640xf32>
    %46 = tpu.matmul %45, %43, %cst_24 {dimension_numbers = #tpu.dot_dimension_numbers<[1], [0], [0], [1], [0, 0, 1, 1], [], []>} : vector<8x8xf32>, vector<8x640xf32>, vector<8x640xf32> -> vector<8x640xf32>
    %47 = arith.addf %42, %46 : vector<8x640xf32>
    %c638_i32 = arith.constant 638 : i32
    %48 = tpu.dynamic_rotate %19 by %c638_i32 dim 1 : vector<8x640xf32>, i32 -> vector<8x640xf32>
    %c5 = arith.constant 5 : index
    %c0_25 = arith.constant 0 : index
    %c0_26 = arith.constant 0 : index
    %49 = vector.load %arg5[%c5, %c0_25, %c0_26] : memref<98x8x8xf32, #tpu.memory_space<vmem>>, vector<1x8x8xf32>
    %50 = vector.shape_cast %49 : vector<1x8x8xf32> to vector<8x8xf32>
    %cst_27 = arith.constant dense<0.000000e+00> : vector<8x640xf32>
    %51 = tpu.matmul %50, %48, %cst_27 {dimension_numbers = #tpu.dot_dimension_numbers<[1], [0], [0], [1], [0, 0, 1, 1], [], []>} : vector<8x8xf32>, vector<8x640xf32>, vector<8x640xf32> -> vector<8x640xf32>
    %52 = arith.addf %47, %51 : vector<8x640xf32>
    %c637_i32 = arith.constant 637 : i32
    %53 = tpu.dynamic_rotate %19 by %c637_i32 dim 1 : vector<8x640xf32>, i32 -> vector<8x640xf32>
    %c6 = arith.constant 6 : index
    %c0_28 = arith.constant 0 : index
    %c0_29 = arith.constant 0 : index
    %54 = vector.load %arg5[%c6, %c0_28, %c0_29] : memref<98x8x8xf32, #tpu.memory_space<vmem>>, vector<1x8x8xf32>
    %55 = vector.shape_cast %54 : vector<1x8x8xf32> to vector<8x8xf32>
    %cst_30 = arith.constant dense<0.000000e+00> : vector<8x640xf32>
    %56 = tpu.matmul %55, %53, %cst_30 {dimension_numbers = #tpu.dot_dimension_numbers<[1], [0], [0], [1], [0, 0, 1, 1], [], []>} : vector<8x8xf32>, vector<8x640xf32>, vector<8x640xf32> -> vector<8x640xf32>
    %57 = arith.addf %52, %56 : vector<8x640xf32>
    %cst_31 = arith.constant 0.000000e+00 : f32
    %58 = vector.broadcast %cst_31 : f32 to vector<8x640xf32>
    %59 = arith.maximumf %57, %58 : vector<8x640xf32>
    %60 = arith.mulf %59, %18 : vector<8x640xf32>
    %c1_32 = arith.constant 1 : index
    %c0_33 = arith.constant 0 : index
    %c0_34 = arith.constant 0 : index
    %61 = vector.load %arg6[%c1_32, %c0_33, %c0_34] : memref<14x8x1xf32, #tpu.memory_space<vmem>>, vector<1x8x1xf32>
    %62 = vector.shape_cast %61 : vector<1x8x1xf32> to vector<8x1xf32>
    %63 = vector.shape_cast %62 : vector<8x1xf32> to vector<8x1xf32>
    %64 = vector.broadcast %63 : vector<8x1xf32> to vector<8x640xf32>
    %c3_i32_35 = arith.constant 3 : i32
    %65 = tpu.dynamic_rotate %60 by %c3_i32_35 dim 1 : vector<8x640xf32>, i32 -> vector<8x640xf32>
    %c7 = arith.constant 7 : index
    %c0_36 = arith.constant 0 : index
    %c0_37 = arith.constant 0 : index
    %66 = vector.load %arg5[%c7, %c0_36, %c0_37] : memref<98x8x8xf32, #tpu.memory_space<vmem>>, vector<1x8x8xf32>
    %67 = vector.shape_cast %66 : vector<1x8x8xf32> to vector<8x8xf32>
    %cst_38 = arith.constant dense<0.000000e+00> : vector<8x640xf32>
    %68 = tpu.matmul %67, %65, %cst_38 {dimension_numbers = #tpu.dot_dimension_numbers<[1], [0], [0], [1], [0, 0, 1, 1], [], []>} : vector<8x8xf32>, vector<8x640xf32>, vector<8x640xf32> -> vector<8x640xf32>
    %69 = arith.addf %64, %68 : vector<8x640xf32>
    %c2_i32_39 = arith.constant 2 : i32
    %70 = tpu.dynamic_rotate %60 by %c2_i32_39 dim 1 : vector<8x640xf32>, i32 -> vector<8x640xf32>
    %c8 = arith.constant 8 : index
    %c0_40 = arith.constant 0 : index
    %c0_41 = arith.constant 0 : index
    %71 = vector.load %arg5[%c8, %c0_40, %c0_41] : memref<98x8x8xf32, #tpu.memory_space<vmem>>, vector<1x8x8xf32>
    %72 = vector.shape_cast %71 : vector<1x8x8xf32> to vector<8x8xf32>
    %cst_42 = arith.constant dense<0.000000e+00> : vector<8x640xf32>
    %73 = tpu.matmul %72, %70, %cst_42 {dimension_numbers = #tpu.dot_dimension_numbers<[1], [0], [0], [1], [0, 0, 1, 1], [], []>} : vector<8x8xf32>, vector<8x640xf32>, vector<8x640xf32> -> vector<8x640xf32>
    %74 = arith.addf %69, %73 : vector<8x640xf32>
    %c1_i32_43 = arith.constant 1 : i32
    %75 = tpu.dynamic_rotate %60 by %c1_i32_43 dim 1 : vector<8x640xf32>, i32 -> vector<8x640xf32>
    %c9 = arith.constant 9 : index
    %c0_44 = arith.constant 0 : index
    %c0_45 = arith.constant 0 : index
    %76 = vector.load %arg5[%c9, %c0_44, %c0_45] : memref<98x8x8xf32, #tpu.memory_space<vmem>>, vector<1x8x8xf32>
    %77 = vector.shape_cast %76 : vector<1x8x8xf32> to vector<8x8xf32>
    %cst_46 = arith.constant dense<0.000000e+00> : vector<8x640xf32>
    %78 = tpu.matmul %77, %75, %cst_46 {dimension_numbers = #tpu.dot_dimension_numbers<[1], [0], [0], [1], [0, 0, 1, 1], [], []>} : vector<8x8xf32>, vector<8x640xf32>, vector<8x640xf32> -> vector<8x640xf32>
    %79 = arith.addf %74, %78 : vector<8x640xf32>
    %c10 = arith.constant 10 : index
    %c0_47 = arith.constant 0 : index
    %c0_48 = arith.constant 0 : index
    %80 = vector.load %arg5[%c10, %c0_47, %c0_48] : memref<98x8x8xf32, #tpu.memory_space<vmem>>, vector<1x8x8xf32>
    %81 = vector.shape_cast %80 : vector<1x8x8xf32> to vector<8x8xf32>
    %cst_49 = arith.constant dense<0.000000e+00> : vector<8x640xf32>
    %82 = tpu.matmul %81, %60, %cst_49 {dimension_numbers = #tpu.dot_dimension_numbers<[1], [0], [0], [1], [0, 0, 1, 1], [], []>} : vector<8x8xf32>, vector<8x640xf32>, vector<8x640xf32> -> vector<8x640xf32>
    %83 = arith.addf %79, %82 : vector<8x640xf32>
    %c639_i32_50 = arith.constant 639 : i32
    %84 = tpu.dynamic_rotate %60 by %c639_i32_50 dim 1 : vector<8x640xf32>, i32 -> vector<8x640xf32>
    %c11 = arith.constant 11 : index
    %c0_51 = arith.constant 0 : index
    %c0_52 = arith.constant 0 : index
    %85 = vector.load %arg5[%c11, %c0_51, %c0_52] : memref<98x8x8xf32, #tpu.memory_space<vmem>>, vector<1x8x8xf32>
    %86 = vector.shape_cast %85 : vector<1x8x8xf32> to vector<8x8xf32>
    %cst_53 = arith.constant dense<0.000000e+00> : vector<8x640xf32>
    %87 = tpu.matmul %86, %84, %cst_53 {dimension_numbers = #tpu.dot_dimension_numbers<[1], [0], [0], [1], [0, 0, 1, 1], [], []>} : vector<8x8xf32>, vector<8x640xf32>, vector<8x640xf32> -> vector<8x640xf32>
    %88 = arith.addf %83, %87 : vector<8x640xf32>
    %c638_i32_54 = arith.constant 638 : i32
    %89 = tpu.dynamic_rotate %60 by %c638_i32_54 dim 1 : vector<8x640xf32>, i32 -> vector<8x640xf32>
    %c12 = arith.constant 12 : index
    %c0_55 = arith.constant 0 : index
    %c0_56 = arith.constant 0 : index
    %90 = vector.load %arg5[%c12, %c0_55, %c0_56] : memref<98x8x8xf32, #tpu.memory_space<vmem>>, vector<1x8x8xf32>
    %91 = vector.shape_cast %90 : vector<1x8x8xf32> to vector<8x8xf32>
    %cst_57 = arith.constant dense<0.000000e+00> : vector<8x640xf32>
    %92 = tpu.matmul %91, %89, %cst_57 {dimension_numbers = #tpu.dot_dimension_numbers<[1], [0], [0], [1], [0, 0, 1, 1], [], []>} : vector<8x8xf32>, vector<8x640xf32>, vector<8x640xf32> -> vector<8x640xf32>
    %93 = arith.addf %88, %92 : vector<8x640xf32>
    %c637_i32_58 = arith.constant 637 : i32
    %94 = tpu.dynamic_rotate %60 by %c637_i32_58 dim 1 : vector<8x640xf32>, i32 -> vector<8x640xf32>
    %c13 = arith.constant 13 : index
    %c0_59 = arith.constant 0 : index
    %c0_60 = arith.constant 0 : index
    %95 = vector.load %arg5[%c13, %c0_59, %c0_60] : memref<98x8x8xf32, #tpu.memory_space<vmem>>, vector<1x8x8xf32>
    %96 = vector.shape_cast %95 : vector<1x8x8xf32> to vector<8x8xf32>
    %cst_61 = arith.constant dense<0.000000e+00> : vector<8x640xf32>
    %97 = tpu.matmul %96, %94, %cst_61 {dimension_numbers = #tpu.dot_dimension_numbers<[1], [0], [0], [1], [0, 0, 1, 1], [], []>} : vector<8x8xf32>, vector<8x640xf32>, vector<8x640xf32> -> vector<8x640xf32>
    %98 = arith.addf %93, %97 : vector<8x640xf32>
    %cst_62 = arith.constant 0.000000e+00 : f32
    %99 = vector.broadcast %cst_62 : f32 to vector<8x640xf32>
    %100 = arith.maximumf %98, %99 : vector<8x640xf32>
    %101 = arith.mulf %100, %18 : vector<8x640xf32>
    %c2_63 = arith.constant 2 : index
    %c0_64 = arith.constant 0 : index
    %c0_65 = arith.constant 0 : index
    %102 = vector.load %arg6[%c2_63, %c0_64, %c0_65] : memref<14x8x1xf32, #tpu.memory_space<vmem>>, vector<1x8x1xf32>
    %103 = vector.shape_cast %102 : vector<1x8x1xf32> to vector<8x1xf32>
    %104 = vector.shape_cast %103 : vector<8x1xf32> to vector<8x1xf32>
    %105 = vector.broadcast %104 : vector<8x1xf32> to vector<8x640xf32>
    %c3_i32_66 = arith.constant 3 : i32
    %106 = tpu.dynamic_rotate %101 by %c3_i32_66 dim 1 : vector<8x640xf32>, i32 -> vector<8x640xf32>
    %c14 = arith.constant 14 : index
    %c0_67 = arith.constant 0 : index
    %c0_68 = arith.constant 0 : index
    %107 = vector.load %arg5[%c14, %c0_67, %c0_68] : memref<98x8x8xf32, #tpu.memory_space<vmem>>, vector<1x8x8xf32>
    %108 = vector.shape_cast %107 : vector<1x8x8xf32> to vector<8x8xf32>
    %cst_69 = arith.constant dense<0.000000e+00> : vector<8x640xf32>
    %109 = tpu.matmul %108, %106, %cst_69 {dimension_numbers = #tpu.dot_dimension_numbers<[1], [0], [0], [1], [0, 0, 1, 1], [], []>} : vector<8x8xf32>, vector<8x640xf32>, vector<8x640xf32> -> vector<8x640xf32>
    %110 = arith.addf %105, %109 : vector<8x640xf32>
    %c2_i32_70 = arith.constant 2 : i32
    %111 = tpu.dynamic_rotate %101 by %c2_i32_70 dim 1 : vector<8x640xf32>, i32 -> vector<8x640xf32>
    %c15 = arith.constant 15 : index
    %c0_71 = arith.constant 0 : index
    %c0_72 = arith.constant 0 : index
    %112 = vector.load %arg5[%c15, %c0_71, %c0_72] : memref<98x8x8xf32, #tpu.memory_space<vmem>>, vector<1x8x8xf32>
    %113 = vector.shape_cast %112 : vector<1x8x8xf32> to vector<8x8xf32>
    %cst_73 = arith.constant dense<0.000000e+00> : vector<8x640xf32>
    %114 = tpu.matmul %113, %111, %cst_73 {dimension_numbers = #tpu.dot_dimension_numbers<[1], [0], [0], [1], [0, 0, 1, 1], [], []>} : vector<8x8xf32>, vector<8x640xf32>, vector<8x640xf32> -> vector<8x640xf32>
    %115 = arith.addf %110, %114 : vector<8x640xf32>
    %c1_i32_74 = arith.constant 1 : i32
    %116 = tpu.dynamic_rotate %101 by %c1_i32_74 dim 1 : vector<8x640xf32>, i32 -> vector<8x640xf32>
    %c16 = arith.constant 16 : index
    %c0_75 = arith.constant 0 : index
    %c0_76 = arith.constant 0 : index
    %117 = vector.load %arg5[%c16, %c0_75, %c0_76] : memref<98x8x8xf32, #tpu.memory_space<vmem>>, vector<1x8x8xf32>
    %118 = vector.shape_cast %117 : vector<1x8x8xf32> to vector<8x8xf32>
    %cst_77 = arith.constant dense<0.000000e+00> : vector<8x640xf32>
    %119 = tpu.matmul %118, %116, %cst_77 {dimension_numbers = #tpu.dot_dimension_numbers<[1], [0], [0], [1], [0, 0, 1, 1], [], []>} : vector<8x8xf32>, vector<8x640xf32>, vector<8x640xf32> -> vector<8x640xf32>
    %120 = arith.addf %115, %119 : vector<8x640xf32>
    %c17 = arith.constant 17 : index
    %c0_78 = arith.constant 0 : index
    %c0_79 = arith.constant 0 : index
    %121 = vector.load %arg5[%c17, %c0_78, %c0_79] : memref<98x8x8xf32, #tpu.memory_space<vmem>>, vector<1x8x8xf32>
    %122 = vector.shape_cast %121 : vector<1x8x8xf32> to vector<8x8xf32>
    %cst_80 = arith.constant dense<0.000000e+00> : vector<8x640xf32>
    %123 = tpu.matmul %122, %101, %cst_80 {dimension_numbers = #tpu.dot_dimension_numbers<[1], [0], [0], [1], [0, 0, 1, 1], [], []>} : vector<8x8xf32>, vector<8x640xf32>, vector<8x640xf32> -> vector<8x640xf32>
    %124 = arith.addf %120, %123 : vector<8x640xf32>
    %c639_i32_81 = arith.constant 639 : i32
    %125 = tpu.dynamic_rotate %101 by %c639_i32_81 dim 1 : vector<8x640xf32>, i32 -> vector<8x640xf32>
    %c18 = arith.constant 18 : index
    %c0_82 = arith.constant 0 : index
    %c0_83 = arith.constant 0 : index
    %126 = vector.load %arg5[%c18, %c0_82, %c0_83] : memref<98x8x8xf32, #tpu.memory_space<vmem>>, vector<1x8x8xf32>
    %127 = vector.shape_cast %126 : vector<1x8x8xf32> to vector<8x8xf32>
    %cst_84 = arith.constant dense<0.000000e+00> : vector<8x640xf32>
    %128 = tpu.matmul %127, %125, %cst_84 {dimension_numbers = #tpu.dot_dimension_numbers<[1], [0], [0], [1], [0, 0, 1, 1], [], []>} : vector<8x8xf32>, vector<8x640xf32>, vector<8x640xf32> -> vector<8x640xf32>
    %129 = arith.addf %124, %128 : vector<8x640xf32>
    %c638_i32_85 = arith.constant 638 : i32
    %130 = tpu.dynamic_rotate %101 by %c638_i32_85 dim 1 : vector<8x640xf32>, i32 -> vector<8x640xf32>
    %c19 = arith.constant 19 : index
    %c0_86 = arith.constant 0 : index
    %c0_87 = arith.constant 0 : index
    %131 = vector.load %arg5[%c19, %c0_86, %c0_87] : memref<98x8x8xf32, #tpu.memory_space<vmem>>, vector<1x8x8xf32>
    %132 = vector.shape_cast %131 : vector<1x8x8xf32> to vector<8x8xf32>
    %cst_88 = arith.constant dense<0.000000e+00> : vector<8x640xf32>
    %133 = tpu.matmul %132, %130, %cst_88 {dimension_numbers = #tpu.dot_dimension_numbers<[1], [0], [0], [1], [0, 0, 1, 1], [], []>} : vector<8x8xf32>, vector<8x640xf32>, vector<8x640xf32> -> vector<8x640xf32>
    %134 = arith.addf %129, %133 : vector<8x640xf32>
    %c637_i32_89 = arith.constant 637 : i32
    %135 = tpu.dynamic_rotate %101 by %c637_i32_89 dim 1 : vector<8x640xf32>, i32 -> vector<8x640xf32>
    %c20 = arith.constant 20 : index
    %c0_90 = arith.constant 0 : index
    %c0_91 = arith.constant 0 : index
    %136 = vector.load %arg5[%c20, %c0_90, %c0_91] : memref<98x8x8xf32, #tpu.memory_space<vmem>>, vector<1x8x8xf32>
    %137 = vector.shape_cast %136 : vector<1x8x8xf32> to vector<8x8xf32>
    %cst_92 = arith.constant dense<0.000000e+00> : vector<8x640xf32>
    %138 = tpu.matmul %137, %135, %cst_92 {dimension_numbers = #tpu.dot_dimension_numbers<[1], [0], [0], [1], [0, 0, 1, 1], [], []>} : vector<8x8xf32>, vector<8x640xf32>, vector<8x640xf32> -> vector<8x640xf32>
    %139 = arith.addf %134, %138 : vector<8x640xf32>
    %cst_93 = arith.constant 0.000000e+00 : f32
    %140 = vector.broadcast %cst_93 : f32 to vector<8x640xf32>
    %141 = arith.maximumf %139, %140 : vector<8x640xf32>
    %142 = arith.mulf %141, %18 : vector<8x640xf32>
    %c3_94 = arith.constant 3 : index
    %c0_95 = arith.constant 0 : index
    %c0_96 = arith.constant 0 : index
    %143 = vector.load %arg6[%c3_94, %c0_95, %c0_96] : memref<14x8x1xf32, #tpu.memory_space<vmem>>, vector<1x8x1xf32>
    %144 = vector.shape_cast %143 : vector<1x8x1xf32> to vector<8x1xf32>
    %145 = vector.shape_cast %144 : vector<8x1xf32> to vector<8x1xf32>
    %146 = vector.broadcast %145 : vector<8x1xf32> to vector<8x640xf32>
    %c3_i32_97 = arith.constant 3 : i32
    %147 = tpu.dynamic_rotate %142 by %c3_i32_97 dim 1 : vector<8x640xf32>, i32 -> vector<8x640xf32>
    %c21 = arith.constant 21 : index
    %c0_98 = arith.constant 0 : index
    %c0_99 = arith.constant 0 : index
    %148 = vector.load %arg5[%c21, %c0_98, %c0_99] : memref<98x8x8xf32, #tpu.memory_space<vmem>>, vector<1x8x8xf32>
    %149 = vector.shape_cast %148 : vector<1x8x8xf32> to vector<8x8xf32>
    %cst_100 = arith.constant dense<0.000000e+00> : vector<8x640xf32>
    %150 = tpu.matmul %149, %147, %cst_100 {dimension_numbers = #tpu.dot_dimension_numbers<[1], [0], [0], [1], [0, 0, 1, 1], [], []>} : vector<8x8xf32>, vector<8x640xf32>, vector<8x640xf32> -> vector<8x640xf32>
    %151 = arith.addf %146, %150 : vector<8x640xf32>
    %c2_i32_101 = arith.constant 2 : i32
    %152 = tpu.dynamic_rotate %142 by %c2_i32_101 dim 1 : vector<8x640xf32>, i32 -> vector<8x640xf32>
    %c22 = arith.constant 22 : index
    %c0_102 = arith.constant 0 : index
    %c0_103 = arith.constant 0 : index
    %153 = vector.load %arg5[%c22, %c0_102, %c0_103] : memref<98x8x8xf32, #tpu.memory_space<vmem>>, vector<1x8x8xf32>
    %154 = vector.shape_cast %153 : vector<1x8x8xf32> to vector<8x8xf32>
    %cst_104 = arith.constant dense<0.000000e+00> : vector<8x640xf32>
    %155 = tpu.matmul %154, %152, %cst_104 {dimension_numbers = #tpu.dot_dimension_numbers<[1], [0], [0], [1], [0, 0, 1, 1], [], []>} : vector<8x8xf32>, vector<8x640xf32>, vector<8x640xf32> -> vector<8x640xf32>
    %156 = arith.addf %151, %155 : vector<8x640xf32>
    %c1_i32_105 = arith.constant 1 : i32
    %157 = tpu.dynamic_rotate %142 by %c1_i32_105 dim 1 : vector<8x640xf32>, i32 -> vector<8x640xf32>
    %c23 = arith.constant 23 : index
    %c0_106 = arith.constant 0 : index
    %c0_107 = arith.constant 0 : index
    %158 = vector.load %arg5[%c23, %c0_106, %c0_107] : memref<98x8x8xf32, #tpu.memory_space<vmem>>, vector<1x8x8xf32>
    %159 = vector.shape_cast %158 : vector<1x8x8xf32> to vector<8x8xf32>
    %cst_108 = arith.constant dense<0.000000e+00> : vector<8x640xf32>
    %160 = tpu.matmul %159, %157, %cst_108 {dimension_numbers = #tpu.dot_dimension_numbers<[1], [0], [0], [1], [0, 0, 1, 1], [], []>} : vector<8x8xf32>, vector<8x640xf32>, vector<8x640xf32> -> vector<8x640xf32>
    %161 = arith.addf %156, %160 : vector<8x640xf32>
    %c24 = arith.constant 24 : index
    %c0_109 = arith.constant 0 : index
    %c0_110 = arith.constant 0 : index
    %162 = vector.load %arg5[%c24, %c0_109, %c0_110] : memref<98x8x8xf32, #tpu.memory_space<vmem>>, vector<1x8x8xf32>
    %163 = vector.shape_cast %162 : vector<1x8x8xf32> to vector<8x8xf32>
    %cst_111 = arith.constant dense<0.000000e+00> : vector<8x640xf32>
    %164 = tpu.matmul %163, %142, %cst_111 {dimension_numbers = #tpu.dot_dimension_numbers<[1], [0], [0], [1], [0, 0, 1, 1], [], []>} : vector<8x8xf32>, vector<8x640xf32>, vector<8x640xf32> -> vector<8x640xf32>
    %165 = arith.addf %161, %164 : vector<8x640xf32>
    %c639_i32_112 = arith.constant 639 : i32
    %166 = tpu.dynamic_rotate %142 by %c639_i32_112 dim 1 : vector<8x640xf32>, i32 -> vector<8x640xf32>
    %c25 = arith.constant 25 : index
    %c0_113 = arith.constant 0 : index
    %c0_114 = arith.constant 0 : index
    %167 = vector.load %arg5[%c25, %c0_113, %c0_114] : memref<98x8x8xf32, #tpu.memory_space<vmem>>, vector<1x8x8xf32>
    %168 = vector.shape_cast %167 : vector<1x8x8xf32> to vector<8x8xf32>
    %cst_115 = arith.constant dense<0.000000e+00> : vector<8x640xf32>
    %169 = tpu.matmul %168, %166, %cst_115 {dimension_numbers = #tpu.dot_dimension_numbers<[1], [0], [0], [1], [0, 0, 1, 1], [], []>} : vector<8x8xf32>, vector<8x640xf32>, vector<8x640xf32> -> vector<8x640xf32>
    %170 = arith.addf %165, %169 : vector<8x640xf32>
    %c638_i32_116 = arith.constant 638 : i32
    %171 = tpu.dynamic_rotate %142 by %c638_i32_116 dim 1 : vector<8x640xf32>, i32 -> vector<8x640xf32>
    %c26 = arith.constant 26 : index
    %c0_117 = arith.constant 0 : index
    %c0_118 = arith.constant 0 : index
    %172 = vector.load %arg5[%c26, %c0_117, %c0_118] : memref<98x8x8xf32, #tpu.memory_space<vmem>>, vector<1x8x8xf32>
    %173 = vector.shape_cast %172 : vector<1x8x8xf32> to vector<8x8xf32>
    %cst_119 = arith.constant dense<0.000000e+00> : vector<8x640xf32>
    %174 = tpu.matmul %173, %171, %cst_119 {dimension_numbers = #tpu.dot_dimension_numbers<[1], [0], [0], [1], [0, 0, 1, 1], [], []>} : vector<8x8xf32>, vector<8x640xf32>, vector<8x640xf32> -> vector<8x640xf32>
    %175 = arith.addf %170, %174 : vector<8x640xf32>
    %c637_i32_120 = arith.constant 637 : i32
    %176 = tpu.dynamic_rotate %142 by %c637_i32_120 dim 1 : vector<8x640xf32>, i32 -> vector<8x640xf32>
    %c27 = arith.constant 27 : index
    %c0_121 = arith.constant 0 : index
    %c0_122 = arith.constant 0 : index
    %177 = vector.load %arg5[%c27, %c0_121, %c0_122] : memref<98x8x8xf32, #tpu.memory_space<vmem>>, vector<1x8x8xf32>
    %178 = vector.shape_cast %177 : vector<1x8x8xf32> to vector<8x8xf32>
    %cst_123 = arith.constant dense<0.000000e+00> : vector<8x640xf32>
    %179 = tpu.matmul %178, %176, %cst_123 {dimension_numbers = #tpu.dot_dimension_numbers<[1], [0], [0], [1], [0, 0, 1, 1], [], []>} : vector<8x8xf32>, vector<8x640xf32>, vector<8x640xf32> -> vector<8x640xf32>
    %180 = arith.addf %175, %179 : vector<8x640xf32>
    %cst_124 = arith.constant 0.000000e+00 : f32
    %181 = vector.broadcast %cst_124 : f32 to vector<8x640xf32>
    %182 = arith.maximumf %180, %181 : vector<8x640xf32>
    %183 = arith.mulf %182, %18 : vector<8x640xf32>
    %c4_125 = arith.constant 4 : index
    %c0_126 = arith.constant 0 : index
    %c0_127 = arith.constant 0 : index
    %184 = vector.load %arg6[%c4_125, %c0_126, %c0_127] : memref<14x8x1xf32, #tpu.memory_space<vmem>>, vector<1x8x1xf32>
    %185 = vector.shape_cast %184 : vector<1x8x1xf32> to vector<8x1xf32>
    %186 = vector.shape_cast %185 : vector<8x1xf32> to vector<8x1xf32>
    %187 = vector.broadcast %186 : vector<8x1xf32> to vector<8x640xf32>
    %c3_i32_128 = arith.constant 3 : i32
    %188 = tpu.dynamic_rotate %183 by %c3_i32_128 dim 1 : vector<8x640xf32>, i32 -> vector<8x640xf32>
    %c28 = arith.constant 28 : index
    %c0_129 = arith.constant 0 : index
    %c0_130 = arith.constant 0 : index
    %189 = vector.load %arg5[%c28, %c0_129, %c0_130] : memref<98x8x8xf32, #tpu.memory_space<vmem>>, vector<1x8x8xf32>
    %190 = vector.shape_cast %189 : vector<1x8x8xf32> to vector<8x8xf32>
    %cst_131 = arith.constant dense<0.000000e+00> : vector<8x640xf32>
    %191 = tpu.matmul %190, %188, %cst_131 {dimension_numbers = #tpu.dot_dimension_numbers<[1], [0], [0], [1], [0, 0, 1, 1], [], []>} : vector<8x8xf32>, vector<8x640xf32>, vector<8x640xf32> -> vector<8x640xf32>
    %192 = arith.addf %187, %191 : vector<8x640xf32>
    %c2_i32_132 = arith.constant 2 : i32
    %193 = tpu.dynamic_rotate %183 by %c2_i32_132 dim 1 : vector<8x640xf32>, i32 -> vector<8x640xf32>
    %c29 = arith.constant 29 : index
    %c0_133 = arith.constant 0 : index
    %c0_134 = arith.constant 0 : index
    %194 = vector.load %arg5[%c29, %c0_133, %c0_134] : memref<98x8x8xf32, #tpu.memory_space<vmem>>, vector<1x8x8xf32>
    %195 = vector.shape_cast %194 : vector<1x8x8xf32> to vector<8x8xf32>
    %cst_135 = arith.constant dense<0.000000e+00> : vector<8x640xf32>
    %196 = tpu.matmul %195, %193, %cst_135 {dimension_numbers = #tpu.dot_dimension_numbers<[1], [0], [0], [1], [0, 0, 1, 1], [], []>} : vector<8x8xf32>, vector<8x640xf32>, vector<8x640xf32> -> vector<8x640xf32>
    %197 = arith.addf %192, %196 : vector<8x640xf32>
    %c1_i32_136 = arith.constant 1 : i32
    %198 = tpu.dynamic_rotate %183 by %c1_i32_136 dim 1 : vector<8x640xf32>, i32 -> vector<8x640xf32>
    %c30 = arith.constant 30 : index
    %c0_137 = arith.constant 0 : index
    %c0_138 = arith.constant 0 : index
    %199 = vector.load %arg5[%c30, %c0_137, %c0_138] : memref<98x8x8xf32, #tpu.memory_space<vmem>>, vector<1x8x8xf32>
    %200 = vector.shape_cast %199 : vector<1x8x8xf32> to vector<8x8xf32>
    %cst_139 = arith.constant dense<0.000000e+00> : vector<8x640xf32>
    %201 = tpu.matmul %200, %198, %cst_139 {dimension_numbers = #tpu.dot_dimension_numbers<[1], [0], [0], [1], [0, 0, 1, 1], [], []>} : vector<8x8xf32>, vector<8x640xf32>, vector<8x640xf32> -> vector<8x640xf32>
    %202 = arith.addf %197, %201 : vector<8x640xf32>
    %c31 = arith.constant 31 : index
    %c0_140 = arith.constant 0 : index
    %c0_141 = arith.constant 0 : index
    %203 = vector.load %arg5[%c31, %c0_140, %c0_141] : memref<98x8x8xf32, #tpu.memory_space<vmem>>, vector<1x8x8xf32>
    %204 = vector.shape_cast %203 : vector<1x8x8xf32> to vector<8x8xf32>
    %cst_142 = arith.constant dense<0.000000e+00> : vector<8x640xf32>
    %205 = tpu.matmul %204, %183, %cst_142 {dimension_numbers = #tpu.dot_dimension_numbers<[1], [0], [0], [1], [0, 0, 1, 1], [], []>} : vector<8x8xf32>, vector<8x640xf32>, vector<8x640xf32> -> vector<8x640xf32>
    %206 = arith.addf %202, %205 : vector<8x640xf32>
    %c639_i32_143 = arith.constant 639 : i32
    %207 = tpu.dynamic_rotate %183 by %c639_i32_143 dim 1 : vector<8x640xf32>, i32 -> vector<8x640xf32>
    %c32 = arith.constant 32 : index
    %c0_144 = arith.constant 0 : index
    %c0_145 = arith.constant 0 : index
    %208 = vector.load %arg5[%c32, %c0_144, %c0_145] : memref<98x8x8xf32, #tpu.memory_space<vmem>>, vector<1x8x8xf32>
    %209 = vector.shape_cast %208 : vector<1x8x8xf32> to vector<8x8xf32>
    %cst_146 = arith.constant dense<0.000000e+00> : vector<8x640xf32>
    %210 = tpu.matmul %209, %207, %cst_146 {dimension_numbers = #tpu.dot_dimension_numbers<[1], [0], [0], [1], [0, 0, 1, 1], [], []>} : vector<8x8xf32>, vector<8x640xf32>, vector<8x640xf32> -> vector<8x640xf32>
    %211 = arith.addf %206, %210 : vector<8x640xf32>
    %c638_i32_147 = arith.constant 638 : i32
    %212 = tpu.dynamic_rotate %183 by %c638_i32_147 dim 1 : vector<8x640xf32>, i32 -> vector<8x640xf32>
    %c33 = arith.constant 33 : index
    %c0_148 = arith.constant 0 : index
    %c0_149 = arith.constant 0 : index
    %213 = vector.load %arg5[%c33, %c0_148, %c0_149] : memref<98x8x8xf32, #tpu.memory_space<vmem>>, vector<1x8x8xf32>
    %214 = vector.shape_cast %213 : vector<1x8x8xf32> to vector<8x8xf32>
    %cst_150 = arith.constant dense<0.000000e+00> : vector<8x640xf32>
    %215 = tpu.matmul %214, %212, %cst_150 {dimension_numbers = #tpu.dot_dimension_numbers<[1], [0], [0], [1], [0, 0, 1, 1], [], []>} : vector<8x8xf32>, vector<8x640xf32>, vector<8x640xf32> -> vector<8x640xf32>
    %216 = arith.addf %211, %215 : vector<8x640xf32>
    %c637_i32_151 = arith.constant 637 : i32
    %217 = tpu.dynamic_rotate %183 by %c637_i32_151 dim 1 : vector<8x640xf32>, i32 -> vector<8x640xf32>
    %c34 = arith.constant 34 : index
    %c0_152 = arith.constant 0 : index
    %c0_153 = arith.constant 0 : index
    %218 = vector.load %arg5[%c34, %c0_152, %c0_153] : memref<98x8x8xf32, #tpu.memory_space<vmem>>, vector<1x8x8xf32>
    %219 = vector.shape_cast %218 : vector<1x8x8xf32> to vector<8x8xf32>
    %cst_154 = arith.constant dense<0.000000e+00> : vector<8x640xf32>
    %220 = tpu.matmul %219, %217, %cst_154 {dimension_numbers = #tpu.dot_dimension_numbers<[1], [0], [0], [1], [0, 0, 1, 1], [], []>} : vector<8x8xf32>, vector<8x640xf32>, vector<8x640xf32> -> vector<8x640xf32>
    %221 = arith.addf %216, %220 : vector<8x640xf32>
    %cst_155 = arith.constant 0.000000e+00 : f32
    %222 = vector.broadcast %cst_155 : f32 to vector<8x640xf32>
    %223 = arith.maximumf %221, %222 : vector<8x640xf32>
    %224 = arith.mulf %223, %18 : vector<8x640xf32>
    %c5_156 = arith.constant 5 : index
    %c0_157 = arith.constant 0 : index
    %c0_158 = arith.constant 0 : index
    %225 = vector.load %arg6[%c5_156, %c0_157, %c0_158] : memref<14x8x1xf32, #tpu.memory_space<vmem>>, vector<1x8x1xf32>
    %226 = vector.shape_cast %225 : vector<1x8x1xf32> to vector<8x1xf32>
    %227 = vector.shape_cast %226 : vector<8x1xf32> to vector<8x1xf32>
    %228 = vector.broadcast %227 : vector<8x1xf32> to vector<8x640xf32>
    %c3_i32_159 = arith.constant 3 : i32
    %229 = tpu.dynamic_rotate %224 by %c3_i32_159 dim 1 : vector<8x640xf32>, i32 -> vector<8x640xf32>
    %c35 = arith.constant 35 : index
    %c0_160 = arith.constant 0 : index
    %c0_161 = arith.constant 0 : index
    %230 = vector.load %arg5[%c35, %c0_160, %c0_161] : memref<98x8x8xf32, #tpu.memory_space<vmem>>, vector<1x8x8xf32>
    %231 = vector.shape_cast %230 : vector<1x8x8xf32> to vector<8x8xf32>
    %cst_162 = arith.constant dense<0.000000e+00> : vector<8x640xf32>
    %232 = tpu.matmul %231, %229, %cst_162 {dimension_numbers = #tpu.dot_dimension_numbers<[1], [0], [0], [1], [0, 0, 1, 1], [], []>} : vector<8x8xf32>, vector<8x640xf32>, vector<8x640xf32> -> vector<8x640xf32>
    %233 = arith.addf %228, %232 : vector<8x640xf32>
    %c2_i32_163 = arith.constant 2 : i32
    %234 = tpu.dynamic_rotate %224 by %c2_i32_163 dim 1 : vector<8x640xf32>, i32 -> vector<8x640xf32>
    %c36 = arith.constant 36 : index
    %c0_164 = arith.constant 0 : index
    %c0_165 = arith.constant 0 : index
    %235 = vector.load %arg5[%c36, %c0_164, %c0_165] : memref<98x8x8xf32, #tpu.memory_space<vmem>>, vector<1x8x8xf32>
    %236 = vector.shape_cast %235 : vector<1x8x8xf32> to vector<8x8xf32>
    %cst_166 = arith.constant dense<0.000000e+00> : vector<8x640xf32>
    %237 = tpu.matmul %236, %234, %cst_166 {dimension_numbers = #tpu.dot_dimension_numbers<[1], [0], [0], [1], [0, 0, 1, 1], [], []>} : vector<8x8xf32>, vector<8x640xf32>, vector<8x640xf32> -> vector<8x640xf32>
    %238 = arith.addf %233, %237 : vector<8x640xf32>
    %c1_i32_167 = arith.constant 1 : i32
    %239 = tpu.dynamic_rotate %224 by %c1_i32_167 dim 1 : vector<8x640xf32>, i32 -> vector<8x640xf32>
    %c37 = arith.constant 37 : index
    %c0_168 = arith.constant 0 : index
    %c0_169 = arith.constant 0 : index
    %240 = vector.load %arg5[%c37, %c0_168, %c0_169] : memref<98x8x8xf32, #tpu.memory_space<vmem>>, vector<1x8x8xf32>
    %241 = vector.shape_cast %240 : vector<1x8x8xf32> to vector<8x8xf32>
    %cst_170 = arith.constant dense<0.000000e+00> : vector<8x640xf32>
    %242 = tpu.matmul %241, %239, %cst_170 {dimension_numbers = #tpu.dot_dimension_numbers<[1], [0], [0], [1], [0, 0, 1, 1], [], []>} : vector<8x8xf32>, vector<8x640xf32>, vector<8x640xf32> -> vector<8x640xf32>
    %243 = arith.addf %238, %242 : vector<8x640xf32>
    %c38 = arith.constant 38 : index
    %c0_171 = arith.constant 0 : index
    %c0_172 = arith.constant 0 : index
    %244 = vector.load %arg5[%c38, %c0_171, %c0_172] : memref<98x8x8xf32, #tpu.memory_space<vmem>>, vector<1x8x8xf32>
    %245 = vector.shape_cast %244 : vector<1x8x8xf32> to vector<8x8xf32>
    %cst_173 = arith.constant dense<0.000000e+00> : vector<8x640xf32>
    %246 = tpu.matmul %245, %224, %cst_173 {dimension_numbers = #tpu.dot_dimension_numbers<[1], [0], [0], [1], [0, 0, 1, 1], [], []>} : vector<8x8xf32>, vector<8x640xf32>, vector<8x640xf32> -> vector<8x640xf32>
    %247 = arith.addf %243, %246 : vector<8x640xf32>
    %c639_i32_174 = arith.constant 639 : i32
    %248 = tpu.dynamic_rotate %224 by %c639_i32_174 dim 1 : vector<8x640xf32>, i32 -> vector<8x640xf32>
    %c39 = arith.constant 39 : index
    %c0_175 = arith.constant 0 : index
    %c0_176 = arith.constant 0 : index
    %249 = vector.load %arg5[%c39, %c0_175, %c0_176] : memref<98x8x8xf32, #tpu.memory_space<vmem>>, vector<1x8x8xf32>
    %250 = vector.shape_cast %249 : vector<1x8x8xf32> to vector<8x8xf32>
    %cst_177 = arith.constant dense<0.000000e+00> : vector<8x640xf32>
    %251 = tpu.matmul %250, %248, %cst_177 {dimension_numbers = #tpu.dot_dimension_numbers<[1], [0], [0], [1], [0, 0, 1, 1], [], []>} : vector<8x8xf32>, vector<8x640xf32>, vector<8x640xf32> -> vector<8x640xf32>
    %252 = arith.addf %247, %251 : vector<8x640xf32>
    %c638_i32_178 = arith.constant 638 : i32
    %253 = tpu.dynamic_rotate %224 by %c638_i32_178 dim 1 : vector<8x640xf32>, i32 -> vector<8x640xf32>
    %c40 = arith.constant 40 : index
    %c0_179 = arith.constant 0 : index
    %c0_180 = arith.constant 0 : index
    %254 = vector.load %arg5[%c40, %c0_179, %c0_180] : memref<98x8x8xf32, #tpu.memory_space<vmem>>, vector<1x8x8xf32>
    %255 = vector.shape_cast %254 : vector<1x8x8xf32> to vector<8x8xf32>
    %cst_181 = arith.constant dense<0.000000e+00> : vector<8x640xf32>
    %256 = tpu.matmul %255, %253, %cst_181 {dimension_numbers = #tpu.dot_dimension_numbers<[1], [0], [0], [1], [0, 0, 1, 1], [], []>} : vector<8x8xf32>, vector<8x640xf32>, vector<8x640xf32> -> vector<8x640xf32>
    %257 = arith.addf %252, %256 : vector<8x640xf32>
    %c637_i32_182 = arith.constant 637 : i32
    %258 = tpu.dynamic_rotate %224 by %c637_i32_182 dim 1 : vector<8x640xf32>, i32 -> vector<8x640xf32>
    %c41 = arith.constant 41 : index
    %c0_183 = arith.constant 0 : index
    %c0_184 = arith.constant 0 : index
    %259 = vector.load %arg5[%c41, %c0_183, %c0_184] : memref<98x8x8xf32, #tpu.memory_space<vmem>>, vector<1x8x8xf32>
    %260 = vector.shape_cast %259 : vector<1x8x8xf32> to vector<8x8xf32>
    %cst_185 = arith.constant dense<0.000000e+00> : vector<8x640xf32>
    %261 = tpu.matmul %260, %258, %cst_185 {dimension_numbers = #tpu.dot_dimension_numbers<[1], [0], [0], [1], [0, 0, 1, 1], [], []>} : vector<8x8xf32>, vector<8x640xf32>, vector<8x640xf32> -> vector<8x640xf32>
    %262 = arith.addf %257, %261 : vector<8x640xf32>
    %cst_186 = arith.constant 0.000000e+00 : f32
    %263 = vector.broadcast %cst_186 : f32 to vector<8x640xf32>
    %264 = arith.maximumf %262, %263 : vector<8x640xf32>
    %265 = arith.mulf %264, %18 : vector<8x640xf32>
    %c6_187 = arith.constant 6 : index
    %c0_188 = arith.constant 0 : index
    %c0_189 = arith.constant 0 : index
    %266 = vector.load %arg6[%c6_187, %c0_188, %c0_189] : memref<14x8x1xf32, #tpu.memory_space<vmem>>, vector<1x8x1xf32>
    %267 = vector.shape_cast %266 : vector<1x8x1xf32> to vector<8x1xf32>
    %268 = vector.shape_cast %267 : vector<8x1xf32> to vector<8x1xf32>
    %269 = vector.broadcast %268 : vector<8x1xf32> to vector<8x640xf32>
    %c3_i32_190 = arith.constant 3 : i32
    %270 = tpu.dynamic_rotate %265 by %c3_i32_190 dim 1 : vector<8x640xf32>, i32 -> vector<8x640xf32>
    %c42 = arith.constant 42 : index
    %c0_191 = arith.constant 0 : index
    %c0_192 = arith.constant 0 : index
    %271 = vector.load %arg5[%c42, %c0_191, %c0_192] : memref<98x8x8xf32, #tpu.memory_space<vmem>>, vector<1x8x8xf32>
    %272 = vector.shape_cast %271 : vector<1x8x8xf32> to vector<8x8xf32>
    %cst_193 = arith.constant dense<0.000000e+00> : vector<8x640xf32>
    %273 = tpu.matmul %272, %270, %cst_193 {dimension_numbers = #tpu.dot_dimension_numbers<[1], [0], [0], [1], [0, 0, 1, 1], [], []>} : vector<8x8xf32>, vector<8x640xf32>, vector<8x640xf32> -> vector<8x640xf32>
    %274 = arith.addf %269, %273 : vector<8x640xf32>
    %c2_i32_194 = arith.constant 2 : i32
    %275 = tpu.dynamic_rotate %265 by %c2_i32_194 dim 1 : vector<8x640xf32>, i32 -> vector<8x640xf32>
    %c43 = arith.constant 43 : index
    %c0_195 = arith.constant 0 : index
    %c0_196 = arith.constant 0 : index
    %276 = vector.load %arg5[%c43, %c0_195, %c0_196] : memref<98x8x8xf32, #tpu.memory_space<vmem>>, vector<1x8x8xf32>
    %277 = vector.shape_cast %276 : vector<1x8x8xf32> to vector<8x8xf32>
    %cst_197 = arith.constant dense<0.000000e+00> : vector<8x640xf32>
    %278 = tpu.matmul %277, %275, %cst_197 {dimension_numbers = #tpu.dot_dimension_numbers<[1], [0], [0], [1], [0, 0, 1, 1], [], []>} : vector<8x8xf32>, vector<8x640xf32>, vector<8x640xf32> -> vector<8x640xf32>
    %279 = arith.addf %274, %278 : vector<8x640xf32>
    %c1_i32_198 = arith.constant 1 : i32
    %280 = tpu.dynamic_rotate %265 by %c1_i32_198 dim 1 : vector<8x640xf32>, i32 -> vector<8x640xf32>
    %c44 = arith.constant 44 : index
    %c0_199 = arith.constant 0 : index
    %c0_200 = arith.constant 0 : index
    %281 = vector.load %arg5[%c44, %c0_199, %c0_200] : memref<98x8x8xf32, #tpu.memory_space<vmem>>, vector<1x8x8xf32>
    %282 = vector.shape_cast %281 : vector<1x8x8xf32> to vector<8x8xf32>
    %cst_201 = arith.constant dense<0.000000e+00> : vector<8x640xf32>
    %283 = tpu.matmul %282, %280, %cst_201 {dimension_numbers = #tpu.dot_dimension_numbers<[1], [0], [0], [1], [0, 0, 1, 1], [], []>} : vector<8x8xf32>, vector<8x640xf32>, vector<8x640xf32> -> vector<8x640xf32>
    %284 = arith.addf %279, %283 : vector<8x640xf32>
    %c45 = arith.constant 45 : index
    %c0_202 = arith.constant 0 : index
    %c0_203 = arith.constant 0 : index
    %285 = vector.load %arg5[%c45, %c0_202, %c0_203] : memref<98x8x8xf32, #tpu.memory_space<vmem>>, vector<1x8x8xf32>
    %286 = vector.shape_cast %285 : vector<1x8x8xf32> to vector<8x8xf32>
    %cst_204 = arith.constant dense<0.000000e+00> : vector<8x640xf32>
    %287 = tpu.matmul %286, %265, %cst_204 {dimension_numbers = #tpu.dot_dimension_numbers<[1], [0], [0], [1], [0, 0, 1, 1], [], []>} : vector<8x8xf32>, vector<8x640xf32>, vector<8x640xf32> -> vector<8x640xf32>
    %288 = arith.addf %284, %287 : vector<8x640xf32>
    %c639_i32_205 = arith.constant 639 : i32
    %289 = tpu.dynamic_rotate %265 by %c639_i32_205 dim 1 : vector<8x640xf32>, i32 -> vector<8x640xf32>
    %c46 = arith.constant 46 : index
    %c0_206 = arith.constant 0 : index
    %c0_207 = arith.constant 0 : index
    %290 = vector.load %arg5[%c46, %c0_206, %c0_207] : memref<98x8x8xf32, #tpu.memory_space<vmem>>, vector<1x8x8xf32>
    %291 = vector.shape_cast %290 : vector<1x8x8xf32> to vector<8x8xf32>
    %cst_208 = arith.constant dense<0.000000e+00> : vector<8x640xf32>
    %292 = tpu.matmul %291, %289, %cst_208 {dimension_numbers = #tpu.dot_dimension_numbers<[1], [0], [0], [1], [0, 0, 1, 1], [], []>} : vector<8x8xf32>, vector<8x640xf32>, vector<8x640xf32> -> vector<8x640xf32>
    %293 = arith.addf %288, %292 : vector<8x640xf32>
    %c638_i32_209 = arith.constant 638 : i32
    %294 = tpu.dynamic_rotate %265 by %c638_i32_209 dim 1 : vector<8x640xf32>, i32 -> vector<8x640xf32>
    %c47 = arith.constant 47 : index
    %c0_210 = arith.constant 0 : index
    %c0_211 = arith.constant 0 : index
    %295 = vector.load %arg5[%c47, %c0_210, %c0_211] : memref<98x8x8xf32, #tpu.memory_space<vmem>>, vector<1x8x8xf32>
    %296 = vector.shape_cast %295 : vector<1x8x8xf32> to vector<8x8xf32>
    %cst_212 = arith.constant dense<0.000000e+00> : vector<8x640xf32>
    %297 = tpu.matmul %296, %294, %cst_212 {dimension_numbers = #tpu.dot_dimension_numbers<[1], [0], [0], [1], [0, 0, 1, 1], [], []>} : vector<8x8xf32>, vector<8x640xf32>, vector<8x640xf32> -> vector<8x640xf32>
    %298 = arith.addf %293, %297 : vector<8x640xf32>
    %c637_i32_213 = arith.constant 637 : i32
    %299 = tpu.dynamic_rotate %265 by %c637_i32_213 dim 1 : vector<8x640xf32>, i32 -> vector<8x640xf32>
    %c48 = arith.constant 48 : index
    %c0_214 = arith.constant 0 : index
    %c0_215 = arith.constant 0 : index
    %300 = vector.load %arg5[%c48, %c0_214, %c0_215] : memref<98x8x8xf32, #tpu.memory_space<vmem>>, vector<1x8x8xf32>
    %301 = vector.shape_cast %300 : vector<1x8x8xf32> to vector<8x8xf32>
    %cst_216 = arith.constant dense<0.000000e+00> : vector<8x640xf32>
    %302 = tpu.matmul %301, %299, %cst_216 {dimension_numbers = #tpu.dot_dimension_numbers<[1], [0], [0], [1], [0, 0, 1, 1], [], []>} : vector<8x8xf32>, vector<8x640xf32>, vector<8x640xf32> -> vector<8x640xf32>
    %303 = arith.addf %298, %302 : vector<8x640xf32>
    %cst_217 = arith.constant 0.000000e+00 : f32
    %304 = vector.broadcast %cst_217 : f32 to vector<8x640xf32>
    %305 = arith.maximumf %303, %304 : vector<8x640xf32>
    %306 = arith.mulf %305, %18 : vector<8x640xf32>
    %c7_218 = arith.constant 7 : index
    %c0_219 = arith.constant 0 : index
    %c0_220 = arith.constant 0 : index
    %307 = vector.load %arg6[%c7_218, %c0_219, %c0_220] : memref<14x8x1xf32, #tpu.memory_space<vmem>>, vector<1x8x1xf32>
    %308 = vector.shape_cast %307 : vector<1x8x1xf32> to vector<8x1xf32>
    %309 = vector.shape_cast %308 : vector<8x1xf32> to vector<8x1xf32>
    %310 = vector.broadcast %309 : vector<8x1xf32> to vector<8x640xf32>
    %c3_i32_221 = arith.constant 3 : i32
    %311 = tpu.dynamic_rotate %306 by %c3_i32_221 dim 1 : vector<8x640xf32>, i32 -> vector<8x640xf32>
    %c49 = arith.constant 49 : index
    %c0_222 = arith.constant 0 : index
    %c0_223 = arith.constant 0 : index
    %312 = vector.load %arg5[%c49, %c0_222, %c0_223] : memref<98x8x8xf32, #tpu.memory_space<vmem>>, vector<1x8x8xf32>
    %313 = vector.shape_cast %312 : vector<1x8x8xf32> to vector<8x8xf32>
    %cst_224 = arith.constant dense<0.000000e+00> : vector<8x640xf32>
    %314 = tpu.matmul %313, %311, %cst_224 {dimension_numbers = #tpu.dot_dimension_numbers<[1], [0], [0], [1], [0, 0, 1, 1], [], []>} : vector<8x8xf32>, vector<8x640xf32>, vector<8x640xf32> -> vector<8x640xf32>
    %315 = arith.addf %310, %314 : vector<8x640xf32>
    %c2_i32_225 = arith.constant 2 : i32
    %316 = tpu.dynamic_rotate %306 by %c2_i32_225 dim 1 : vector<8x640xf32>, i32 -> vector<8x640xf32>
    %c50 = arith.constant 50 : index
    %c0_226 = arith.constant 0 : index
    %c0_227 = arith.constant 0 : index
    %317 = vector.load %arg5[%c50, %c0_226, %c0_227] : memref<98x8x8xf32, #tpu.memory_space<vmem>>, vector<1x8x8xf32>
    %318 = vector.shape_cast %317 : vector<1x8x8xf32> to vector<8x8xf32>
    %cst_228 = arith.constant dense<0.000000e+00> : vector<8x640xf32>
    %319 = tpu.matmul %318, %316, %cst_228 {dimension_numbers = #tpu.dot_dimension_numbers<[1], [0], [0], [1], [0, 0, 1, 1], [], []>} : vector<8x8xf32>, vector<8x640xf32>, vector<8x640xf32> -> vector<8x640xf32>
    %320 = arith.addf %315, %319 : vector<8x640xf32>
    %c1_i32_229 = arith.constant 1 : i32
    %321 = tpu.dynamic_rotate %306 by %c1_i32_229 dim 1 : vector<8x640xf32>, i32 -> vector<8x640xf32>
    %c51 = arith.constant 51 : index
    %c0_230 = arith.constant 0 : index
    %c0_231 = arith.constant 0 : index
    %322 = vector.load %arg5[%c51, %c0_230, %c0_231] : memref<98x8x8xf32, #tpu.memory_space<vmem>>, vector<1x8x8xf32>
    %323 = vector.shape_cast %322 : vector<1x8x8xf32> to vector<8x8xf32>
    %cst_232 = arith.constant dense<0.000000e+00> : vector<8x640xf32>
    %324 = tpu.matmul %323, %321, %cst_232 {dimension_numbers = #tpu.dot_dimension_numbers<[1], [0], [0], [1], [0, 0, 1, 1], [], []>} : vector<8x8xf32>, vector<8x640xf32>, vector<8x640xf32> -> vector<8x640xf32>
    %325 = arith.addf %320, %324 : vector<8x640xf32>
    %c52 = arith.constant 52 : index
    %c0_233 = arith.constant 0 : index
    %c0_234 = arith.constant 0 : index
    %326 = vector.load %arg5[%c52, %c0_233, %c0_234] : memref<98x8x8xf32, #tpu.memory_space<vmem>>, vector<1x8x8xf32>
    %327 = vector.shape_cast %326 : vector<1x8x8xf32> to vector<8x8xf32>
    %cst_235 = arith.constant dense<0.000000e+00> : vector<8x640xf32>
    %328 = tpu.matmul %327, %306, %cst_235 {dimension_numbers = #tpu.dot_dimension_numbers<[1], [0], [0], [1], [0, 0, 1, 1], [], []>} : vector<8x8xf32>, vector<8x640xf32>, vector<8x640xf32> -> vector<8x640xf32>
    %329 = arith.addf %325, %328 : vector<8x640xf32>
    %c639_i32_236 = arith.constant 639 : i32
    %330 = tpu.dynamic_rotate %306 by %c639_i32_236 dim 1 : vector<8x640xf32>, i32 -> vector<8x640xf32>
    %c53 = arith.constant 53 : index
    %c0_237 = arith.constant 0 : index
    %c0_238 = arith.constant 0 : index
    %331 = vector.load %arg5[%c53, %c0_237, %c0_238] : memref<98x8x8xf32, #tpu.memory_space<vmem>>, vector<1x8x8xf32>
    %332 = vector.shape_cast %331 : vector<1x8x8xf32> to vector<8x8xf32>
    %cst_239 = arith.constant dense<0.000000e+00> : vector<8x640xf32>
    %333 = tpu.matmul %332, %330, %cst_239 {dimension_numbers = #tpu.dot_dimension_numbers<[1], [0], [0], [1], [0, 0, 1, 1], [], []>} : vector<8x8xf32>, vector<8x640xf32>, vector<8x640xf32> -> vector<8x640xf32>
    %334 = arith.addf %329, %333 : vector<8x640xf32>
    %c638_i32_240 = arith.constant 638 : i32
    %335 = tpu.dynamic_rotate %306 by %c638_i32_240 dim 1 : vector<8x640xf32>, i32 -> vector<8x640xf32>
    %c54 = arith.constant 54 : index
    %c0_241 = arith.constant 0 : index
    %c0_242 = arith.constant 0 : index
    %336 = vector.load %arg5[%c54, %c0_241, %c0_242] : memref<98x8x8xf32, #tpu.memory_space<vmem>>, vector<1x8x8xf32>
    %337 = vector.shape_cast %336 : vector<1x8x8xf32> to vector<8x8xf32>
    %cst_243 = arith.constant dense<0.000000e+00> : vector<8x640xf32>
    %338 = tpu.matmul %337, %335, %cst_243 {dimension_numbers = #tpu.dot_dimension_numbers<[1], [0], [0], [1], [0, 0, 1, 1], [], []>} : vector<8x8xf32>, vector<8x640xf32>, vector<8x640xf32> -> vector<8x640xf32>
    %339 = arith.addf %334, %338 : vector<8x640xf32>
    %c637_i32_244 = arith.constant 637 : i32
    %340 = tpu.dynamic_rotate %306 by %c637_i32_244 dim 1 : vector<8x640xf32>, i32 -> vector<8x640xf32>
    %c55 = arith.constant 55 : index
    %c0_245 = arith.constant 0 : index
    %c0_246 = arith.constant 0 : index
    %341 = vector.load %arg5[%c55, %c0_245, %c0_246] : memref<98x8x8xf32, #tpu.memory_space<vmem>>, vector<1x8x8xf32>
    %342 = vector.shape_cast %341 : vector<1x8x8xf32> to vector<8x8xf32>
    %cst_247 = arith.constant dense<0.000000e+00> : vector<8x640xf32>
    %343 = tpu.matmul %342, %340, %cst_247 {dimension_numbers = #tpu.dot_dimension_numbers<[1], [0], [0], [1], [0, 0, 1, 1], [], []>} : vector<8x8xf32>, vector<8x640xf32>, vector<8x640xf32> -> vector<8x640xf32>
    %344 = arith.addf %339, %343 : vector<8x640xf32>
    %cst_248 = arith.constant 0.000000e+00 : f32
    %345 = vector.broadcast %cst_248 : f32 to vector<8x640xf32>
    %346 = arith.maximumf %344, %345 : vector<8x640xf32>
    %347 = arith.mulf %346, %18 : vector<8x640xf32>
    %c8_249 = arith.constant 8 : index
    %c0_250 = arith.constant 0 : index
    %c0_251 = arith.constant 0 : index
    %348 = vector.load %arg6[%c8_249, %c0_250, %c0_251] : memref<14x8x1xf32, #tpu.memory_space<vmem>>, vector<1x8x1xf32>
    %349 = vector.shape_cast %348 : vector<1x8x1xf32> to vector<8x1xf32>
    %350 = vector.shape_cast %349 : vector<8x1xf32> to vector<8x1xf32>
    %351 = vector.broadcast %350 : vector<8x1xf32> to vector<8x640xf32>
    %c3_i32_252 = arith.constant 3 : i32
    %352 = tpu.dynamic_rotate %347 by %c3_i32_252 dim 1 : vector<8x640xf32>, i32 -> vector<8x640xf32>
    %c56 = arith.constant 56 : index
    %c0_253 = arith.constant 0 : index
    %c0_254 = arith.constant 0 : index
    %353 = vector.load %arg5[%c56, %c0_253, %c0_254] : memref<98x8x8xf32, #tpu.memory_space<vmem>>, vector<1x8x8xf32>
    %354 = vector.shape_cast %353 : vector<1x8x8xf32> to vector<8x8xf32>
    %cst_255 = arith.constant dense<0.000000e+00> : vector<8x640xf32>
    %355 = tpu.matmul %354, %352, %cst_255 {dimension_numbers = #tpu.dot_dimension_numbers<[1], [0], [0], [1], [0, 0, 1, 1], [], []>} : vector<8x8xf32>, vector<8x640xf32>, vector<8x640xf32> -> vector<8x640xf32>
    %356 = arith.addf %351, %355 : vector<8x640xf32>
    %c2_i32_256 = arith.constant 2 : i32
    %357 = tpu.dynamic_rotate %347 by %c2_i32_256 dim 1 : vector<8x640xf32>, i32 -> vector<8x640xf32>
    %c57 = arith.constant 57 : index
    %c0_257 = arith.constant 0 : index
    %c0_258 = arith.constant 0 : index
    %358 = vector.load %arg5[%c57, %c0_257, %c0_258] : memref<98x8x8xf32, #tpu.memory_space<vmem>>, vector<1x8x8xf32>
    %359 = vector.shape_cast %358 : vector<1x8x8xf32> to vector<8x8xf32>
    %cst_259 = arith.constant dense<0.000000e+00> : vector<8x640xf32>
    %360 = tpu.matmul %359, %357, %cst_259 {dimension_numbers = #tpu.dot_dimension_numbers<[1], [0], [0], [1], [0, 0, 1, 1], [], []>} : vector<8x8xf32>, vector<8x640xf32>, vector<8x640xf32> -> vector<8x640xf32>
    %361 = arith.addf %356, %360 : vector<8x640xf32>
    %c1_i32_260 = arith.constant 1 : i32
    %362 = tpu.dynamic_rotate %347 by %c1_i32_260 dim 1 : vector<8x640xf32>, i32 -> vector<8x640xf32>
    %c58 = arith.constant 58 : index
    %c0_261 = arith.constant 0 : index
    %c0_262 = arith.constant 0 : index
    %363 = vector.load %arg5[%c58, %c0_261, %c0_262] : memref<98x8x8xf32, #tpu.memory_space<vmem>>, vector<1x8x8xf32>
    %364 = vector.shape_cast %363 : vector<1x8x8xf32> to vector<8x8xf32>
    %cst_263 = arith.constant dense<0.000000e+00> : vector<8x640xf32>
    %365 = tpu.matmul %364, %362, %cst_263 {dimension_numbers = #tpu.dot_dimension_numbers<[1], [0], [0], [1], [0, 0, 1, 1], [], []>} : vector<8x8xf32>, vector<8x640xf32>, vector<8x640xf32> -> vector<8x640xf32>
    %366 = arith.addf %361, %365 : vector<8x640xf32>
    %c59 = arith.constant 59 : index
    %c0_264 = arith.constant 0 : index
    %c0_265 = arith.constant 0 : index
    %367 = vector.load %arg5[%c59, %c0_264, %c0_265] : memref<98x8x8xf32, #tpu.memory_space<vmem>>, vector<1x8x8xf32>
    %368 = vector.shape_cast %367 : vector<1x8x8xf32> to vector<8x8xf32>
    %cst_266 = arith.constant dense<0.000000e+00> : vector<8x640xf32>
    %369 = tpu.matmul %368, %347, %cst_266 {dimension_numbers = #tpu.dot_dimension_numbers<[1], [0], [0], [1], [0, 0, 1, 1], [], []>} : vector<8x8xf32>, vector<8x640xf32>, vector<8x640xf32> -> vector<8x640xf32>
    %370 = arith.addf %366, %369 : vector<8x640xf32>
    %c639_i32_267 = arith.constant 639 : i32
    %371 = tpu.dynamic_rotate %347 by %c639_i32_267 dim 1 : vector<8x640xf32>, i32 -> vector<8x640xf32>
    %c60 = arith.constant 60 : index
    %c0_268 = arith.constant 0 : index
    %c0_269 = arith.constant 0 : index
    %372 = vector.load %arg5[%c60, %c0_268, %c0_269] : memref<98x8x8xf32, #tpu.memory_space<vmem>>, vector<1x8x8xf32>
    %373 = vector.shape_cast %372 : vector<1x8x8xf32> to vector<8x8xf32>
    %cst_270 = arith.constant dense<0.000000e+00> : vector<8x640xf32>
    %374 = tpu.matmul %373, %371, %cst_270 {dimension_numbers = #tpu.dot_dimension_numbers<[1], [0], [0], [1], [0, 0, 1, 1], [], []>} : vector<8x8xf32>, vector<8x640xf32>, vector<8x640xf32> -> vector<8x640xf32>
    %375 = arith.addf %370, %374 : vector<8x640xf32>
    %c638_i32_271 = arith.constant 638 : i32
    %376 = tpu.dynamic_rotate %347 by %c638_i32_271 dim 1 : vector<8x640xf32>, i32 -> vector<8x640xf32>
    %c61 = arith.constant 61 : index
    %c0_272 = arith.constant 0 : index
    %c0_273 = arith.constant 0 : index
    %377 = vector.load %arg5[%c61, %c0_272, %c0_273] : memref<98x8x8xf32, #tpu.memory_space<vmem>>, vector<1x8x8xf32>
    %378 = vector.shape_cast %377 : vector<1x8x8xf32> to vector<8x8xf32>
    %cst_274 = arith.constant dense<0.000000e+00> : vector<8x640xf32>
    %379 = tpu.matmul %378, %376, %cst_274 {dimension_numbers = #tpu.dot_dimension_numbers<[1], [0], [0], [1], [0, 0, 1, 1], [], []>} : vector<8x8xf32>, vector<8x640xf32>, vector<8x640xf32> -> vector<8x640xf32>
    %380 = arith.addf %375, %379 : vector<8x640xf32>
    %c637_i32_275 = arith.constant 637 : i32
    %381 = tpu.dynamic_rotate %347 by %c637_i32_275 dim 1 : vector<8x640xf32>, i32 -> vector<8x640xf32>
    %c62 = arith.constant 62 : index
    %c0_276 = arith.constant 0 : index
    %c0_277 = arith.constant 0 : index
    %382 = vector.load %arg5[%c62, %c0_276, %c0_277] : memref<98x8x8xf32, #tpu.memory_space<vmem>>, vector<1x8x8xf32>
    %383 = vector.shape_cast %382 : vector<1x8x8xf32> to vector<8x8xf32>
    %cst_278 = arith.constant dense<0.000000e+00> : vector<8x640xf32>
    %384 = tpu.matmul %383, %381, %cst_278 {dimension_numbers = #tpu.dot_dimension_numbers<[1], [0], [0], [1], [0, 0, 1, 1], [], []>} : vector<8x8xf32>, vector<8x640xf32>, vector<8x640xf32> -> vector<8x640xf32>
    %385 = arith.addf %380, %384 : vector<8x640xf32>
    %cst_279 = arith.constant 0.000000e+00 : f32
    %386 = vector.broadcast %cst_279 : f32 to vector<8x640xf32>
    %387 = arith.maximumf %385, %386 : vector<8x640xf32>
    %388 = arith.mulf %387, %18 : vector<8x640xf32>
    %c9_280 = arith.constant 9 : index
    %c0_281 = arith.constant 0 : index
    %c0_282 = arith.constant 0 : index
    %389 = vector.load %arg6[%c9_280, %c0_281, %c0_282] : memref<14x8x1xf32, #tpu.memory_space<vmem>>, vector<1x8x1xf32>
    %390 = vector.shape_cast %389 : vector<1x8x1xf32> to vector<8x1xf32>
    %391 = vector.shape_cast %390 : vector<8x1xf32> to vector<8x1xf32>
    %392 = vector.broadcast %391 : vector<8x1xf32> to vector<8x640xf32>
    %c3_i32_283 = arith.constant 3 : i32
    %393 = tpu.dynamic_rotate %388 by %c3_i32_283 dim 1 : vector<8x640xf32>, i32 -> vector<8x640xf32>
    %c63 = arith.constant 63 : index
    %c0_284 = arith.constant 0 : index
    %c0_285 = arith.constant 0 : index
    %394 = vector.load %arg5[%c63, %c0_284, %c0_285] : memref<98x8x8xf32, #tpu.memory_space<vmem>>, vector<1x8x8xf32>
    %395 = vector.shape_cast %394 : vector<1x8x8xf32> to vector<8x8xf32>
    %cst_286 = arith.constant dense<0.000000e+00> : vector<8x640xf32>
    %396 = tpu.matmul %395, %393, %cst_286 {dimension_numbers = #tpu.dot_dimension_numbers<[1], [0], [0], [1], [0, 0, 1, 1], [], []>} : vector<8x8xf32>, vector<8x640xf32>, vector<8x640xf32> -> vector<8x640xf32>
    %397 = arith.addf %392, %396 : vector<8x640xf32>
    %c2_i32_287 = arith.constant 2 : i32
    %398 = tpu.dynamic_rotate %388 by %c2_i32_287 dim 1 : vector<8x640xf32>, i32 -> vector<8x640xf32>
    %c64_288 = arith.constant 64 : index
    %c0_289 = arith.constant 0 : index
    %c0_290 = arith.constant 0 : index
    %399 = vector.load %arg5[%c64_288, %c0_289, %c0_290] : memref<98x8x8xf32, #tpu.memory_space<vmem>>, vector<1x8x8xf32>
    %400 = vector.shape_cast %399 : vector<1x8x8xf32> to vector<8x8xf32>
    %cst_291 = arith.constant dense<0.000000e+00> : vector<8x640xf32>
    %401 = tpu.matmul %400, %398, %cst_291 {dimension_numbers = #tpu.dot_dimension_numbers<[1], [0], [0], [1], [0, 0, 1, 1], [], []>} : vector<8x8xf32>, vector<8x640xf32>, vector<8x640xf32> -> vector<8x640xf32>
    %402 = arith.addf %397, %401 : vector<8x640xf32>
    %c1_i32_292 = arith.constant 1 : i32
    %403 = tpu.dynamic_rotate %388 by %c1_i32_292 dim 1 : vector<8x640xf32>, i32 -> vector<8x640xf32>
    %c65 = arith.constant 65 : index
    %c0_293 = arith.constant 0 : index
    %c0_294 = arith.constant 0 : index
    %404 = vector.load %arg5[%c65, %c0_293, %c0_294] : memref<98x8x8xf32, #tpu.memory_space<vmem>>, vector<1x8x8xf32>
    %405 = vector.shape_cast %404 : vector<1x8x8xf32> to vector<8x8xf32>
    %cst_295 = arith.constant dense<0.000000e+00> : vector<8x640xf32>
    %406 = tpu.matmul %405, %403, %cst_295 {dimension_numbers = #tpu.dot_dimension_numbers<[1], [0], [0], [1], [0, 0, 1, 1], [], []>} : vector<8x8xf32>, vector<8x640xf32>, vector<8x640xf32> -> vector<8x640xf32>
    %407 = arith.addf %402, %406 : vector<8x640xf32>
    %c66 = arith.constant 66 : index
    %c0_296 = arith.constant 0 : index
    %c0_297 = arith.constant 0 : index
    %408 = vector.load %arg5[%c66, %c0_296, %c0_297] : memref<98x8x8xf32, #tpu.memory_space<vmem>>, vector<1x8x8xf32>
    %409 = vector.shape_cast %408 : vector<1x8x8xf32> to vector<8x8xf32>
    %cst_298 = arith.constant dense<0.000000e+00> : vector<8x640xf32>
    %410 = tpu.matmul %409, %388, %cst_298 {dimension_numbers = #tpu.dot_dimension_numbers<[1], [0], [0], [1], [0, 0, 1, 1], [], []>} : vector<8x8xf32>, vector<8x640xf32>, vector<8x640xf32> -> vector<8x640xf32>
    %411 = arith.addf %407, %410 : vector<8x640xf32>
    %c639_i32_299 = arith.constant 639 : i32
    %412 = tpu.dynamic_rotate %388 by %c639_i32_299 dim 1 : vector<8x640xf32>, i32 -> vector<8x640xf32>
    %c67 = arith.constant 67 : index
    %c0_300 = arith.constant 0 : index
    %c0_301 = arith.constant 0 : index
    %413 = vector.load %arg5[%c67, %c0_300, %c0_301] : memref<98x8x8xf32, #tpu.memory_space<vmem>>, vector<1x8x8xf32>
    %414 = vector.shape_cast %413 : vector<1x8x8xf32> to vector<8x8xf32>
    %cst_302 = arith.constant dense<0.000000e+00> : vector<8x640xf32>
    %415 = tpu.matmul %414, %412, %cst_302 {dimension_numbers = #tpu.dot_dimension_numbers<[1], [0], [0], [1], [0, 0, 1, 1], [], []>} : vector<8x8xf32>, vector<8x640xf32>, vector<8x640xf32> -> vector<8x640xf32>
    %416 = arith.addf %411, %415 : vector<8x640xf32>
    %c638_i32_303 = arith.constant 638 : i32
    %417 = tpu.dynamic_rotate %388 by %c638_i32_303 dim 1 : vector<8x640xf32>, i32 -> vector<8x640xf32>
    %c68 = arith.constant 68 : index
    %c0_304 = arith.constant 0 : index
    %c0_305 = arith.constant 0 : index
    %418 = vector.load %arg5[%c68, %c0_304, %c0_305] : memref<98x8x8xf32, #tpu.memory_space<vmem>>, vector<1x8x8xf32>
    %419 = vector.shape_cast %418 : vector<1x8x8xf32> to vector<8x8xf32>
    %cst_306 = arith.constant dense<0.000000e+00> : vector<8x640xf32>
    %420 = tpu.matmul %419, %417, %cst_306 {dimension_numbers = #tpu.dot_dimension_numbers<[1], [0], [0], [1], [0, 0, 1, 1], [], []>} : vector<8x8xf32>, vector<8x640xf32>, vector<8x640xf32> -> vector<8x640xf32>
    %421 = arith.addf %416, %420 : vector<8x640xf32>
    %c637_i32_307 = arith.constant 637 : i32
    %422 = tpu.dynamic_rotate %388 by %c637_i32_307 dim 1 : vector<8x640xf32>, i32 -> vector<8x640xf32>
    %c69 = arith.constant 69 : index
    %c0_308 = arith.constant 0 : index
    %c0_309 = arith.constant 0 : index
    %423 = vector.load %arg5[%c69, %c0_308, %c0_309] : memref<98x8x8xf32, #tpu.memory_space<vmem>>, vector<1x8x8xf32>
    %424 = vector.shape_cast %423 : vector<1x8x8xf32> to vector<8x8xf32>
    %cst_310 = arith.constant dense<0.000000e+00> : vector<8x640xf32>
    %425 = tpu.matmul %424, %422, %cst_310 {dimension_numbers = #tpu.dot_dimension_numbers<[1], [0], [0], [1], [0, 0, 1, 1], [], []>} : vector<8x8xf32>, vector<8x640xf32>, vector<8x640xf32> -> vector<8x640xf32>
    %426 = arith.addf %421, %425 : vector<8x640xf32>
    %cst_311 = arith.constant 0.000000e+00 : f32
    %427 = vector.broadcast %cst_311 : f32 to vector<8x640xf32>
    %428 = arith.maximumf %426, %427 : vector<8x640xf32>
    %429 = arith.mulf %428, %18 : vector<8x640xf32>
    %c10_312 = arith.constant 10 : index
    %c0_313 = arith.constant 0 : index
    %c0_314 = arith.constant 0 : index
    %430 = vector.load %arg6[%c10_312, %c0_313, %c0_314] : memref<14x8x1xf32, #tpu.memory_space<vmem>>, vector<1x8x1xf32>
    %431 = vector.shape_cast %430 : vector<1x8x1xf32> to vector<8x1xf32>
    %432 = vector.shape_cast %431 : vector<8x1xf32> to vector<8x1xf32>
    %433 = vector.broadcast %432 : vector<8x1xf32> to vector<8x640xf32>
    %c3_i32_315 = arith.constant 3 : i32
    %434 = tpu.dynamic_rotate %429 by %c3_i32_315 dim 1 : vector<8x640xf32>, i32 -> vector<8x640xf32>
    %c70 = arith.constant 70 : index
    %c0_316 = arith.constant 0 : index
    %c0_317 = arith.constant 0 : index
    %435 = vector.load %arg5[%c70, %c0_316, %c0_317] : memref<98x8x8xf32, #tpu.memory_space<vmem>>, vector<1x8x8xf32>
    %436 = vector.shape_cast %435 : vector<1x8x8xf32> to vector<8x8xf32>
    %cst_318 = arith.constant dense<0.000000e+00> : vector<8x640xf32>
    %437 = tpu.matmul %436, %434, %cst_318 {dimension_numbers = #tpu.dot_dimension_numbers<[1], [0], [0], [1], [0, 0, 1, 1], [], []>} : vector<8x8xf32>, vector<8x640xf32>, vector<8x640xf32> -> vector<8x640xf32>
    %438 = arith.addf %433, %437 : vector<8x640xf32>
    %c2_i32_319 = arith.constant 2 : i32
    %439 = tpu.dynamic_rotate %429 by %c2_i32_319 dim 1 : vector<8x640xf32>, i32 -> vector<8x640xf32>
    %c71 = arith.constant 71 : index
    %c0_320 = arith.constant 0 : index
    %c0_321 = arith.constant 0 : index
    %440 = vector.load %arg5[%c71, %c0_320, %c0_321] : memref<98x8x8xf32, #tpu.memory_space<vmem>>, vector<1x8x8xf32>
    %441 = vector.shape_cast %440 : vector<1x8x8xf32> to vector<8x8xf32>
    %cst_322 = arith.constant dense<0.000000e+00> : vector<8x640xf32>
    %442 = tpu.matmul %441, %439, %cst_322 {dimension_numbers = #tpu.dot_dimension_numbers<[1], [0], [0], [1], [0, 0, 1, 1], [], []>} : vector<8x8xf32>, vector<8x640xf32>, vector<8x640xf32> -> vector<8x640xf32>
    %443 = arith.addf %438, %442 : vector<8x640xf32>
    %c1_i32_323 = arith.constant 1 : i32
    %444 = tpu.dynamic_rotate %429 by %c1_i32_323 dim 1 : vector<8x640xf32>, i32 -> vector<8x640xf32>
    %c72 = arith.constant 72 : index
    %c0_324 = arith.constant 0 : index
    %c0_325 = arith.constant 0 : index
    %445 = vector.load %arg5[%c72, %c0_324, %c0_325] : memref<98x8x8xf32, #tpu.memory_space<vmem>>, vector<1x8x8xf32>
    %446 = vector.shape_cast %445 : vector<1x8x8xf32> to vector<8x8xf32>
    %cst_326 = arith.constant dense<0.000000e+00> : vector<8x640xf32>
    %447 = tpu.matmul %446, %444, %cst_326 {dimension_numbers = #tpu.dot_dimension_numbers<[1], [0], [0], [1], [0, 0, 1, 1], [], []>} : vector<8x8xf32>, vector<8x640xf32>, vector<8x640xf32> -> vector<8x640xf32>
    %448 = arith.addf %443, %447 : vector<8x640xf32>
    %c73 = arith.constant 73 : index
    %c0_327 = arith.constant 0 : index
    %c0_328 = arith.constant 0 : index
    %449 = vector.load %arg5[%c73, %c0_327, %c0_328] : memref<98x8x8xf32, #tpu.memory_space<vmem>>, vector<1x8x8xf32>
    %450 = vector.shape_cast %449 : vector<1x8x8xf32> to vector<8x8xf32>
    %cst_329 = arith.constant dense<0.000000e+00> : vector<8x640xf32>
    %451 = tpu.matmul %450, %429, %cst_329 {dimension_numbers = #tpu.dot_dimension_numbers<[1], [0], [0], [1], [0, 0, 1, 1], [], []>} : vector<8x8xf32>, vector<8x640xf32>, vector<8x640xf32> -> vector<8x640xf32>
    %452 = arith.addf %448, %451 : vector<8x640xf32>
    %c639_i32_330 = arith.constant 639 : i32
    %453 = tpu.dynamic_rotate %429 by %c639_i32_330 dim 1 : vector<8x640xf32>, i32 -> vector<8x640xf32>
    %c74 = arith.constant 74 : index
    %c0_331 = arith.constant 0 : index
    %c0_332 = arith.constant 0 : index
    %454 = vector.load %arg5[%c74, %c0_331, %c0_332] : memref<98x8x8xf32, #tpu.memory_space<vmem>>, vector<1x8x8xf32>
    %455 = vector.shape_cast %454 : vector<1x8x8xf32> to vector<8x8xf32>
    %cst_333 = arith.constant dense<0.000000e+00> : vector<8x640xf32>
    %456 = tpu.matmul %455, %453, %cst_333 {dimension_numbers = #tpu.dot_dimension_numbers<[1], [0], [0], [1], [0, 0, 1, 1], [], []>} : vector<8x8xf32>, vector<8x640xf32>, vector<8x640xf32> -> vector<8x640xf32>
    %457 = arith.addf %452, %456 : vector<8x640xf32>
    %c638_i32_334 = arith.constant 638 : i32
    %458 = tpu.dynamic_rotate %429 by %c638_i32_334 dim 1 : vector<8x640xf32>, i32 -> vector<8x640xf32>
    %c75 = arith.constant 75 : index
    %c0_335 = arith.constant 0 : index
    %c0_336 = arith.constant 0 : index
    %459 = vector.load %arg5[%c75, %c0_335, %c0_336] : memref<98x8x8xf32, #tpu.memory_space<vmem>>, vector<1x8x8xf32>
    %460 = vector.shape_cast %459 : vector<1x8x8xf32> to vector<8x8xf32>
    %cst_337 = arith.constant dense<0.000000e+00> : vector<8x640xf32>
    %461 = tpu.matmul %460, %458, %cst_337 {dimension_numbers = #tpu.dot_dimension_numbers<[1], [0], [0], [1], [0, 0, 1, 1], [], []>} : vector<8x8xf32>, vector<8x640xf32>, vector<8x640xf32> -> vector<8x640xf32>
    %462 = arith.addf %457, %461 : vector<8x640xf32>
    %c637_i32_338 = arith.constant 637 : i32
    %463 = tpu.dynamic_rotate %429 by %c637_i32_338 dim 1 : vector<8x640xf32>, i32 -> vector<8x640xf32>
    %c76 = arith.constant 76 : index
    %c0_339 = arith.constant 0 : index
    %c0_340 = arith.constant 0 : index
    %464 = vector.load %arg5[%c76, %c0_339, %c0_340] : memref<98x8x8xf32, #tpu.memory_space<vmem>>, vector<1x8x8xf32>
    %465 = vector.shape_cast %464 : vector<1x8x8xf32> to vector<8x8xf32>
    %cst_341 = arith.constant dense<0.000000e+00> : vector<8x640xf32>
    %466 = tpu.matmul %465, %463, %cst_341 {dimension_numbers = #tpu.dot_dimension_numbers<[1], [0], [0], [1], [0, 0, 1, 1], [], []>} : vector<8x8xf32>, vector<8x640xf32>, vector<8x640xf32> -> vector<8x640xf32>
    %467 = arith.addf %462, %466 : vector<8x640xf32>
    %cst_342 = arith.constant 0.000000e+00 : f32
    %468 = vector.broadcast %cst_342 : f32 to vector<8x640xf32>
    %469 = arith.maximumf %467, %468 : vector<8x640xf32>
    %470 = arith.mulf %469, %18 : vector<8x640xf32>
    %c11_343 = arith.constant 11 : index
    %c0_344 = arith.constant 0 : index
    %c0_345 = arith.constant 0 : index
    %471 = vector.load %arg6[%c11_343, %c0_344, %c0_345] : memref<14x8x1xf32, #tpu.memory_space<vmem>>, vector<1x8x1xf32>
    %472 = vector.shape_cast %471 : vector<1x8x1xf32> to vector<8x1xf32>
    %473 = vector.shape_cast %472 : vector<8x1xf32> to vector<8x1xf32>
    %474 = vector.broadcast %473 : vector<8x1xf32> to vector<8x640xf32>
    %c3_i32_346 = arith.constant 3 : i32
    %475 = tpu.dynamic_rotate %470 by %c3_i32_346 dim 1 : vector<8x640xf32>, i32 -> vector<8x640xf32>
    %c77 = arith.constant 77 : index
    %c0_347 = arith.constant 0 : index
    %c0_348 = arith.constant 0 : index
    %476 = vector.load %arg5[%c77, %c0_347, %c0_348] : memref<98x8x8xf32, #tpu.memory_space<vmem>>, vector<1x8x8xf32>
    %477 = vector.shape_cast %476 : vector<1x8x8xf32> to vector<8x8xf32>
    %cst_349 = arith.constant dense<0.000000e+00> : vector<8x640xf32>
    %478 = tpu.matmul %477, %475, %cst_349 {dimension_numbers = #tpu.dot_dimension_numbers<[1], [0], [0], [1], [0, 0, 1, 1], [], []>} : vector<8x8xf32>, vector<8x640xf32>, vector<8x640xf32> -> vector<8x640xf32>
    %479 = arith.addf %474, %478 : vector<8x640xf32>
    %c2_i32_350 = arith.constant 2 : i32
    %480 = tpu.dynamic_rotate %470 by %c2_i32_350 dim 1 : vector<8x640xf32>, i32 -> vector<8x640xf32>
    %c78 = arith.constant 78 : index
    %c0_351 = arith.constant 0 : index
    %c0_352 = arith.constant 0 : index
    %481 = vector.load %arg5[%c78, %c0_351, %c0_352] : memref<98x8x8xf32, #tpu.memory_space<vmem>>, vector<1x8x8xf32>
    %482 = vector.shape_cast %481 : vector<1x8x8xf32> to vector<8x8xf32>
    %cst_353 = arith.constant dense<0.000000e+00> : vector<8x640xf32>
    %483 = tpu.matmul %482, %480, %cst_353 {dimension_numbers = #tpu.dot_dimension_numbers<[1], [0], [0], [1], [0, 0, 1, 1], [], []>} : vector<8x8xf32>, vector<8x640xf32>, vector<8x640xf32> -> vector<8x640xf32>
    %484 = arith.addf %479, %483 : vector<8x640xf32>
    %c1_i32_354 = arith.constant 1 : i32
    %485 = tpu.dynamic_rotate %470 by %c1_i32_354 dim 1 : vector<8x640xf32>, i32 -> vector<8x640xf32>
    %c79 = arith.constant 79 : index
    %c0_355 = arith.constant 0 : index
    %c0_356 = arith.constant 0 : index
    %486 = vector.load %arg5[%c79, %c0_355, %c0_356] : memref<98x8x8xf32, #tpu.memory_space<vmem>>, vector<1x8x8xf32>
    %487 = vector.shape_cast %486 : vector<1x8x8xf32> to vector<8x8xf32>
    %cst_357 = arith.constant dense<0.000000e+00> : vector<8x640xf32>
    %488 = tpu.matmul %487, %485, %cst_357 {dimension_numbers = #tpu.dot_dimension_numbers<[1], [0], [0], [1], [0, 0, 1, 1], [], []>} : vector<8x8xf32>, vector<8x640xf32>, vector<8x640xf32> -> vector<8x640xf32>
    %489 = arith.addf %484, %488 : vector<8x640xf32>
    %c80 = arith.constant 80 : index
    %c0_358 = arith.constant 0 : index
    %c0_359 = arith.constant 0 : index
    %490 = vector.load %arg5[%c80, %c0_358, %c0_359] : memref<98x8x8xf32, #tpu.memory_space<vmem>>, vector<1x8x8xf32>
    %491 = vector.shape_cast %490 : vector<1x8x8xf32> to vector<8x8xf32>
    %cst_360 = arith.constant dense<0.000000e+00> : vector<8x640xf32>
    %492 = tpu.matmul %491, %470, %cst_360 {dimension_numbers = #tpu.dot_dimension_numbers<[1], [0], [0], [1], [0, 0, 1, 1], [], []>} : vector<8x8xf32>, vector<8x640xf32>, vector<8x640xf32> -> vector<8x640xf32>
    %493 = arith.addf %489, %492 : vector<8x640xf32>
    %c639_i32_361 = arith.constant 639 : i32
    %494 = tpu.dynamic_rotate %470 by %c639_i32_361 dim 1 : vector<8x640xf32>, i32 -> vector<8x640xf32>
    %c81 = arith.constant 81 : index
    %c0_362 = arith.constant 0 : index
    %c0_363 = arith.constant 0 : index
    %495 = vector.load %arg5[%c81, %c0_362, %c0_363] : memref<98x8x8xf32, #tpu.memory_space<vmem>>, vector<1x8x8xf32>
    %496 = vector.shape_cast %495 : vector<1x8x8xf32> to vector<8x8xf32>
    %cst_364 = arith.constant dense<0.000000e+00> : vector<8x640xf32>
    %497 = tpu.matmul %496, %494, %cst_364 {dimension_numbers = #tpu.dot_dimension_numbers<[1], [0], [0], [1], [0, 0, 1, 1], [], []>} : vector<8x8xf32>, vector<8x640xf32>, vector<8x640xf32> -> vector<8x640xf32>
    %498 = arith.addf %493, %497 : vector<8x640xf32>
    %c638_i32_365 = arith.constant 638 : i32
    %499 = tpu.dynamic_rotate %470 by %c638_i32_365 dim 1 : vector<8x640xf32>, i32 -> vector<8x640xf32>
    %c82 = arith.constant 82 : index
    %c0_366 = arith.constant 0 : index
    %c0_367 = arith.constant 0 : index
    %500 = vector.load %arg5[%c82, %c0_366, %c0_367] : memref<98x8x8xf32, #tpu.memory_space<vmem>>, vector<1x8x8xf32>
    %501 = vector.shape_cast %500 : vector<1x8x8xf32> to vector<8x8xf32>
    %cst_368 = arith.constant dense<0.000000e+00> : vector<8x640xf32>
    %502 = tpu.matmul %501, %499, %cst_368 {dimension_numbers = #tpu.dot_dimension_numbers<[1], [0], [0], [1], [0, 0, 1, 1], [], []>} : vector<8x8xf32>, vector<8x640xf32>, vector<8x640xf32> -> vector<8x640xf32>
    %503 = arith.addf %498, %502 : vector<8x640xf32>
    %c637_i32_369 = arith.constant 637 : i32
    %504 = tpu.dynamic_rotate %470 by %c637_i32_369 dim 1 : vector<8x640xf32>, i32 -> vector<8x640xf32>
    %c83 = arith.constant 83 : index
    %c0_370 = arith.constant 0 : index
    %c0_371 = arith.constant 0 : index
    %505 = vector.load %arg5[%c83, %c0_370, %c0_371] : memref<98x8x8xf32, #tpu.memory_space<vmem>>, vector<1x8x8xf32>
    %506 = vector.shape_cast %505 : vector<1x8x8xf32> to vector<8x8xf32>
    %cst_372 = arith.constant dense<0.000000e+00> : vector<8x640xf32>
    %507 = tpu.matmul %506, %504, %cst_372 {dimension_numbers = #tpu.dot_dimension_numbers<[1], [0], [0], [1], [0, 0, 1, 1], [], []>} : vector<8x8xf32>, vector<8x640xf32>, vector<8x640xf32> -> vector<8x640xf32>
    %508 = arith.addf %503, %507 : vector<8x640xf32>
    %cst_373 = arith.constant 0.000000e+00 : f32
    %509 = vector.broadcast %cst_373 : f32 to vector<8x640xf32>
    %510 = arith.maximumf %508, %509 : vector<8x640xf32>
    %511 = arith.mulf %510, %18 : vector<8x640xf32>
    %c12_374 = arith.constant 12 : index
    %c0_375 = arith.constant 0 : index
    %c0_376 = arith.constant 0 : index
    %512 = vector.load %arg6[%c12_374, %c0_375, %c0_376] : memref<14x8x1xf32, #tpu.memory_space<vmem>>, vector<1x8x1xf32>
    %513 = vector.shape_cast %512 : vector<1x8x1xf32> to vector<8x1xf32>
    %514 = vector.shape_cast %513 : vector<8x1xf32> to vector<8x1xf32>
    %515 = vector.broadcast %514 : vector<8x1xf32> to vector<8x640xf32>
    %c3_i32_377 = arith.constant 3 : i32
    %516 = tpu.dynamic_rotate %511 by %c3_i32_377 dim 1 : vector<8x640xf32>, i32 -> vector<8x640xf32>
    %c84 = arith.constant 84 : index
    %c0_378 = arith.constant 0 : index
    %c0_379 = arith.constant 0 : index
    %517 = vector.load %arg5[%c84, %c0_378, %c0_379] : memref<98x8x8xf32, #tpu.memory_space<vmem>>, vector<1x8x8xf32>
    %518 = vector.shape_cast %517 : vector<1x8x8xf32> to vector<8x8xf32>
    %cst_380 = arith.constant dense<0.000000e+00> : vector<8x640xf32>
    %519 = tpu.matmul %518, %516, %cst_380 {dimension_numbers = #tpu.dot_dimension_numbers<[1], [0], [0], [1], [0, 0, 1, 1], [], []>} : vector<8x8xf32>, vector<8x640xf32>, vector<8x640xf32> -> vector<8x640xf32>
    %520 = arith.addf %515, %519 : vector<8x640xf32>
    %c2_i32_381 = arith.constant 2 : i32
    %521 = tpu.dynamic_rotate %511 by %c2_i32_381 dim 1 : vector<8x640xf32>, i32 -> vector<8x640xf32>
    %c85 = arith.constant 85 : index
    %c0_382 = arith.constant 0 : index
    %c0_383 = arith.constant 0 : index
    %522 = vector.load %arg5[%c85, %c0_382, %c0_383] : memref<98x8x8xf32, #tpu.memory_space<vmem>>, vector<1x8x8xf32>
    %523 = vector.shape_cast %522 : vector<1x8x8xf32> to vector<8x8xf32>
    %cst_384 = arith.constant dense<0.000000e+00> : vector<8x640xf32>
    %524 = tpu.matmul %523, %521, %cst_384 {dimension_numbers = #tpu.dot_dimension_numbers<[1], [0], [0], [1], [0, 0, 1, 1], [], []>} : vector<8x8xf32>, vector<8x640xf32>, vector<8x640xf32> -> vector<8x640xf32>
    %525 = arith.addf %520, %524 : vector<8x640xf32>
    %c1_i32_385 = arith.constant 1 : i32
    %526 = tpu.dynamic_rotate %511 by %c1_i32_385 dim 1 : vector<8x640xf32>, i32 -> vector<8x640xf32>
    %c86 = arith.constant 86 : index
    %c0_386 = arith.constant 0 : index
    %c0_387 = arith.constant 0 : index
    %527 = vector.load %arg5[%c86, %c0_386, %c0_387] : memref<98x8x8xf32, #tpu.memory_space<vmem>>, vector<1x8x8xf32>
    %528 = vector.shape_cast %527 : vector<1x8x8xf32> to vector<8x8xf32>
    %cst_388 = arith.constant dense<0.000000e+00> : vector<8x640xf32>
    %529 = tpu.matmul %528, %526, %cst_388 {dimension_numbers = #tpu.dot_dimension_numbers<[1], [0], [0], [1], [0, 0, 1, 1], [], []>} : vector<8x8xf32>, vector<8x640xf32>, vector<8x640xf32> -> vector<8x640xf32>
    %530 = arith.addf %525, %529 : vector<8x640xf32>
    %c87 = arith.constant 87 : index
    %c0_389 = arith.constant 0 : index
    %c0_390 = arith.constant 0 : index
    %531 = vector.load %arg5[%c87, %c0_389, %c0_390] : memref<98x8x8xf32, #tpu.memory_space<vmem>>, vector<1x8x8xf32>
    %532 = vector.shape_cast %531 : vector<1x8x8xf32> to vector<8x8xf32>
    %cst_391 = arith.constant dense<0.000000e+00> : vector<8x640xf32>
    %533 = tpu.matmul %532, %511, %cst_391 {dimension_numbers = #tpu.dot_dimension_numbers<[1], [0], [0], [1], [0, 0, 1, 1], [], []>} : vector<8x8xf32>, vector<8x640xf32>, vector<8x640xf32> -> vector<8x640xf32>
    %534 = arith.addf %530, %533 : vector<8x640xf32>
    %c639_i32_392 = arith.constant 639 : i32
    %535 = tpu.dynamic_rotate %511 by %c639_i32_392 dim 1 : vector<8x640xf32>, i32 -> vector<8x640xf32>
    %c88 = arith.constant 88 : index
    %c0_393 = arith.constant 0 : index
    %c0_394 = arith.constant 0 : index
    %536 = vector.load %arg5[%c88, %c0_393, %c0_394] : memref<98x8x8xf32, #tpu.memory_space<vmem>>, vector<1x8x8xf32>
    %537 = vector.shape_cast %536 : vector<1x8x8xf32> to vector<8x8xf32>
    %cst_395 = arith.constant dense<0.000000e+00> : vector<8x640xf32>
    %538 = tpu.matmul %537, %535, %cst_395 {dimension_numbers = #tpu.dot_dimension_numbers<[1], [0], [0], [1], [0, 0, 1, 1], [], []>} : vector<8x8xf32>, vector<8x640xf32>, vector<8x640xf32> -> vector<8x640xf32>
    %539 = arith.addf %534, %538 : vector<8x640xf32>
    %c638_i32_396 = arith.constant 638 : i32
    %540 = tpu.dynamic_rotate %511 by %c638_i32_396 dim 1 : vector<8x640xf32>, i32 -> vector<8x640xf32>
    %c89 = arith.constant 89 : index
    %c0_397 = arith.constant 0 : index
    %c0_398 = arith.constant 0 : index
    %541 = vector.load %arg5[%c89, %c0_397, %c0_398] : memref<98x8x8xf32, #tpu.memory_space<vmem>>, vector<1x8x8xf32>
    %542 = vector.shape_cast %541 : vector<1x8x8xf32> to vector<8x8xf32>
    %cst_399 = arith.constant dense<0.000000e+00> : vector<8x640xf32>
    %543 = tpu.matmul %542, %540, %cst_399 {dimension_numbers = #tpu.dot_dimension_numbers<[1], [0], [0], [1], [0, 0, 1, 1], [], []>} : vector<8x8xf32>, vector<8x640xf32>, vector<8x640xf32> -> vector<8x640xf32>
    %544 = arith.addf %539, %543 : vector<8x640xf32>
    %c637_i32_400 = arith.constant 637 : i32
    %545 = tpu.dynamic_rotate %511 by %c637_i32_400 dim 1 : vector<8x640xf32>, i32 -> vector<8x640xf32>
    %c90 = arith.constant 90 : index
    %c0_401 = arith.constant 0 : index
    %c0_402 = arith.constant 0 : index
    %546 = vector.load %arg5[%c90, %c0_401, %c0_402] : memref<98x8x8xf32, #tpu.memory_space<vmem>>, vector<1x8x8xf32>
    %547 = vector.shape_cast %546 : vector<1x8x8xf32> to vector<8x8xf32>
    %cst_403 = arith.constant dense<0.000000e+00> : vector<8x640xf32>
    %548 = tpu.matmul %547, %545, %cst_403 {dimension_numbers = #tpu.dot_dimension_numbers<[1], [0], [0], [1], [0, 0, 1, 1], [], []>} : vector<8x8xf32>, vector<8x640xf32>, vector<8x640xf32> -> vector<8x640xf32>
    %549 = arith.addf %544, %548 : vector<8x640xf32>
    %cst_404 = arith.constant 0.000000e+00 : f32
    %550 = vector.broadcast %cst_404 : f32 to vector<8x640xf32>
    %551 = arith.maximumf %549, %550 : vector<8x640xf32>
    %552 = arith.mulf %551, %18 : vector<8x640xf32>
    %c13_405 = arith.constant 13 : index
    %c0_406 = arith.constant 0 : index
    %c0_407 = arith.constant 0 : index
    %553 = vector.load %arg6[%c13_405, %c0_406, %c0_407] : memref<14x8x1xf32, #tpu.memory_space<vmem>>, vector<1x8x1xf32>
    %554 = vector.shape_cast %553 : vector<1x8x1xf32> to vector<8x1xf32>
    %555 = vector.shape_cast %554 : vector<8x1xf32> to vector<8x1xf32>
    %556 = vector.broadcast %555 : vector<8x1xf32> to vector<8x640xf32>
    %c3_i32_408 = arith.constant 3 : i32
    %557 = tpu.dynamic_rotate %552 by %c3_i32_408 dim 1 : vector<8x640xf32>, i32 -> vector<8x640xf32>
    %c91 = arith.constant 91 : index
    %c0_409 = arith.constant 0 : index
    %c0_410 = arith.constant 0 : index
    %558 = vector.load %arg5[%c91, %c0_409, %c0_410] : memref<98x8x8xf32, #tpu.memory_space<vmem>>, vector<1x8x8xf32>
    %559 = vector.shape_cast %558 : vector<1x8x8xf32> to vector<8x8xf32>
    %cst_411 = arith.constant dense<0.000000e+00> : vector<8x640xf32>
    %560 = tpu.matmul %559, %557, %cst_411 {dimension_numbers = #tpu.dot_dimension_numbers<[1], [0], [0], [1], [0, 0, 1, 1], [], []>} : vector<8x8xf32>, vector<8x640xf32>, vector<8x640xf32> -> vector<8x640xf32>
    %561 = arith.addf %556, %560 : vector<8x640xf32>
    %c2_i32_412 = arith.constant 2 : i32
    %562 = tpu.dynamic_rotate %552 by %c2_i32_412 dim 1 : vector<8x640xf32>, i32 -> vector<8x640xf32>
    %c92 = arith.constant 92 : index
    %c0_413 = arith.constant 0 : index
    %c0_414 = arith.constant 0 : index
    %563 = vector.load %arg5[%c92, %c0_413, %c0_414] : memref<98x8x8xf32, #tpu.memory_space<vmem>>, vector<1x8x8xf32>
    %564 = vector.shape_cast %563 : vector<1x8x8xf32> to vector<8x8xf32>
    %cst_415 = arith.constant dense<0.000000e+00> : vector<8x640xf32>
    %565 = tpu.matmul %564, %562, %cst_415 {dimension_numbers = #tpu.dot_dimension_numbers<[1], [0], [0], [1], [0, 0, 1, 1], [], []>} : vector<8x8xf32>, vector<8x640xf32>, vector<8x640xf32> -> vector<8x640xf32>
    %566 = arith.addf %561, %565 : vector<8x640xf32>
    %c1_i32_416 = arith.constant 1 : i32
    %567 = tpu.dynamic_rotate %552 by %c1_i32_416 dim 1 : vector<8x640xf32>, i32 -> vector<8x640xf32>
    %c93 = arith.constant 93 : index
    %c0_417 = arith.constant 0 : index
    %c0_418 = arith.constant 0 : index
    %568 = vector.load %arg5[%c93, %c0_417, %c0_418] : memref<98x8x8xf32, #tpu.memory_space<vmem>>, vector<1x8x8xf32>
    %569 = vector.shape_cast %568 : vector<1x8x8xf32> to vector<8x8xf32>
    %cst_419 = arith.constant dense<0.000000e+00> : vector<8x640xf32>
    %570 = tpu.matmul %569, %567, %cst_419 {dimension_numbers = #tpu.dot_dimension_numbers<[1], [0], [0], [1], [0, 0, 1, 1], [], []>} : vector<8x8xf32>, vector<8x640xf32>, vector<8x640xf32> -> vector<8x640xf32>
    %571 = arith.addf %566, %570 : vector<8x640xf32>
    %c94 = arith.constant 94 : index
    %c0_420 = arith.constant 0 : index
    %c0_421 = arith.constant 0 : index
    %572 = vector.load %arg5[%c94, %c0_420, %c0_421] : memref<98x8x8xf32, #tpu.memory_space<vmem>>, vector<1x8x8xf32>
    %573 = vector.shape_cast %572 : vector<1x8x8xf32> to vector<8x8xf32>
    %cst_422 = arith.constant dense<0.000000e+00> : vector<8x640xf32>
    %574 = tpu.matmul %573, %552, %cst_422 {dimension_numbers = #tpu.dot_dimension_numbers<[1], [0], [0], [1], [0, 0, 1, 1], [], []>} : vector<8x8xf32>, vector<8x640xf32>, vector<8x640xf32> -> vector<8x640xf32>
    %575 = arith.addf %571, %574 : vector<8x640xf32>
    %c639_i32_423 = arith.constant 639 : i32
    %576 = tpu.dynamic_rotate %552 by %c639_i32_423 dim 1 : vector<8x640xf32>, i32 -> vector<8x640xf32>
    %c95 = arith.constant 95 : index
    %c0_424 = arith.constant 0 : index
    %c0_425 = arith.constant 0 : index
    %577 = vector.load %arg5[%c95, %c0_424, %c0_425] : memref<98x8x8xf32, #tpu.memory_space<vmem>>, vector<1x8x8xf32>
    %578 = vector.shape_cast %577 : vector<1x8x8xf32> to vector<8x8xf32>
    %cst_426 = arith.constant dense<0.000000e+00> : vector<8x640xf32>
    %579 = tpu.matmul %578, %576, %cst_426 {dimension_numbers = #tpu.dot_dimension_numbers<[1], [0], [0], [1], [0, 0, 1, 1], [], []>} : vector<8x8xf32>, vector<8x640xf32>, vector<8x640xf32> -> vector<8x640xf32>
    %580 = arith.addf %575, %579 : vector<8x640xf32>
    %c638_i32_427 = arith.constant 638 : i32
    %581 = tpu.dynamic_rotate %552 by %c638_i32_427 dim 1 : vector<8x640xf32>, i32 -> vector<8x640xf32>
    %c96 = arith.constant 96 : index
    %c0_428 = arith.constant 0 : index
    %c0_429 = arith.constant 0 : index
    %582 = vector.load %arg5[%c96, %c0_428, %c0_429] : memref<98x8x8xf32, #tpu.memory_space<vmem>>, vector<1x8x8xf32>
    %583 = vector.shape_cast %582 : vector<1x8x8xf32> to vector<8x8xf32>
    %cst_430 = arith.constant dense<0.000000e+00> : vector<8x640xf32>
    %584 = tpu.matmul %583, %581, %cst_430 {dimension_numbers = #tpu.dot_dimension_numbers<[1], [0], [0], [1], [0, 0, 1, 1], [], []>} : vector<8x8xf32>, vector<8x640xf32>, vector<8x640xf32> -> vector<8x640xf32>
    %585 = arith.addf %580, %584 : vector<8x640xf32>
    %c637_i32_431 = arith.constant 637 : i32
    %586 = tpu.dynamic_rotate %552 by %c637_i32_431 dim 1 : vector<8x640xf32>, i32 -> vector<8x640xf32>
    %c97 = arith.constant 97 : index
    %c0_432 = arith.constant 0 : index
    %c0_433 = arith.constant 0 : index
    %587 = vector.load %arg5[%c97, %c0_432, %c0_433] : memref<98x8x8xf32, #tpu.memory_space<vmem>>, vector<1x8x8xf32>
    %588 = vector.shape_cast %587 : vector<1x8x8xf32> to vector<8x8xf32>
    %cst_434 = arith.constant dense<0.000000e+00> : vector<8x640xf32>
    %589 = tpu.matmul %588, %586, %cst_434 {dimension_numbers = #tpu.dot_dimension_numbers<[1], [0], [0], [1], [0, 0, 1, 1], [], []>} : vector<8x8xf32>, vector<8x640xf32>, vector<8x640xf32> -> vector<8x640xf32>
    %590 = arith.addf %585, %589 : vector<8x640xf32>
    %cst_435 = arith.constant 0.000000e+00 : f32
    %591 = vector.broadcast %cst_435 : f32 to vector<8x640xf32>
    %592 = arith.maximumf %590, %591 : vector<8x640xf32>
    %593 = arith.mulf %592, %18 : vector<8x640xf32>
    %594 = vector.extract_strided_slice %593 {offsets = [0, 64], sizes = [1, 512], strides = [1, 1]} : vector<8x640xf32> to vector<1x512xf32>
    %595 = arith.negf %594 : vector<1x512xf32>
    %596 = math.exp %595 : vector<1x512xf32>
    %cst_436 = arith.constant 1.000000e+00 : f32
    %597 = vector.broadcast %cst_436 : f32 to vector<1x512xf32>
    %598 = arith.addf %597, %596 : vector<1x512xf32>
    %599 = arith.divf %597, %598 : vector<1x512xf32>
    %600 = vector.shape_cast %599 : vector<1x512xf32> to vector<1x1x512xf32>
    %c0_437 = arith.constant 0 : index
    %c0_438 = arith.constant 0 : index
    %c0_439 = arith.constant 0 : index
    %601 = vector.load %arg7[%c0_437, %c0_438, %c0_439] : memref<1x1x512xf32, #tpu.memory_space<vmem>>, vector<1x1x512xf32>
    tpu.vector_store %arg7[%c0_437, %c0_438, %c0_439], %600 {strides = array<i32>} : memref<1x1x512xf32, #tpu.memory_space<vmem>>, vector<1x1x512xf32>,
    return
  }
  func.func @transform_0(%arg0: i32, %arg1: i32) -> (i32, i32, i32) {
    %c0_i32 = arith.constant 0 : i32
    %c0_i32_0 = arith.constant 0 : i32
    return %arg0, %c0_i32, %arg1 : i32, i32, i32
  }
  func.func @transform_1(%arg0: i32, %arg1: i32) -> (i32, i32, i32) {
    %c4_i32 = arith.constant 4 : i32
    %0 = arith.muli %arg1, %c4_i32 : i32
    %c1_i32 = arith.constant 1 : i32
    %1 = arith.subi %0, %c1_i32 : i32
    %c0_i32 = arith.constant 0 : i32
    %2 = arith.maxsi %1, %c0_i32 : i32
    %c0_i32_0 = arith.constant 0 : i32
    %c0_i32_1 = arith.constant 0 : i32
    return %arg0, %c0_i32_0, %2 : i32, i32, i32
  }
  func.func @transform_2(%arg0: i32, %arg1: i32) -> (i32, i32, i32) {
    %c1_i32 = arith.constant 1 : i32
    %0 = arith.addi %arg1, %c1_i32 : i32
    %c4_i32 = arith.constant 4 : i32
    %1 = arith.muli %0, %c4_i32 : i32
    %c7_i32 = arith.constant 7 : i32
    %2 = arith.minsi %1, %c7_i32 : i32
    %c0_i32 = arith.constant 0 : i32
    %c0_i32_0 = arith.constant 0 : i32
    return %arg0, %c0_i32, %2 : i32, i32, i32
  }
  func.func @transform_3(%arg0: i32, %arg1: i32) -> (i32, i32, i32) {
    %c0_i32 = arith.constant 0 : i32
    %c0_i32_0 = arith.constant 0 : i32
    %c0_i32_1 = arith.constant 0 : i32
    %c0_i32_2 = arith.constant 0 : i32
    return %c0_i32, %c0_i32_0, %c0_i32_1 : i32, i32, i32
  }
  func.func @transform_4(%arg0: i32, %arg1: i32) -> (i32, i32, i32) {
    %c0_i32 = arith.constant 0 : i32
    %c0_i32_0 = arith.constant 0 : i32
    %c0_i32_1 = arith.constant 0 : i32
    %c0_i32_2 = arith.constant 0 : i32
    return %c0_i32, %c0_i32_0, %c0_i32_1 : i32, i32, i32
  }
  func.func @transform_5(%arg0: i32, %arg1: i32) -> (i32, i32, i32) {
    %c0_i32 = arith.constant 0 : i32
    %c0_i32_0 = arith.constant 0 : i32
    return %arg0, %c0_i32, %arg1 : i32, i32, i32
  }
}

</mosaic_0001>

<bundles_post_ra>
// kernel: new_model4_forward.1
= control target key start
LH: loop header
LB: loop body
LE: loop exit
PB: predicated region body
PF: predicated region fallthrough
CT: control target
= control target key end

     0   :  { %s29168_s0 = inlined_call_operand.vmem [shape: f32[2,8,1024], index: 0, kind: input, shape index: {}, may-alias: {0,1,2}]   ;;  %s29169_s1 = inlined_call_operand.vmem [shape: f32[2,8,1024], index: 1, kind: input, shape index: {}, may-alias: {0,1,2}]   ;;  %s29170_s2 = inlined_call_operand.vmem [shape: f32[2,8,1024], index: 2, kind: input, shape index: {}, may-alias: {0,1,2}]   ;;  %s29171_s3 = inlined_call_operand.vmem [shape: f32[98,8,8], index: 3, kind: input, shape index: {}]   ;;  %s29172_s4 = inlined_call_operand.vmem [shape: f32[14,8,1], index: 4, kind: input, shape index: {}]   ;;  %s29173_s5 = inlined_call_operand.hbm [shape: f32[2,1,1024], index: 5, kind: output, shape index: {}]  }
   0x1   :  { %29176 = sst [smem:[#allocation7_spill]] %s29168_s0 }
   0x2   :  { %10 = vsyncpa [#allocation3], 0 }
   0x3   :  { %12 = vsyncpa [#allocation3 + $0x1], 0  ;;  %s25890_s18 = smov 0   ;;  %s25892_s19 = smov 0  }
   0x4   :  { %s25894_s20 = smov 0   ;;  %s25896_s21 = smov 0  }
   0x5   :  { %s25898_s22 = smov 0   ;;  %s25900_s23 = smov 0  }
   0x6   :  { %s25902_s24 = smov 0   ;;  %s25904_s25 = smov 0  }
   0x7 LB: > { %s23928_s26 = sadd.s32 4294967295, %s25846_s25   ;;  %s23929_s27 = sadd.s32 4294967294, %s25846_s25   ;;  %s25846_s25 = sphi %s25904_s25, %s18_s25   ;;  %s25842_s24 = sphi %s25902_s24, %s29190_s24   ;;  %s25838_s23 = sphi %s25900_s23, %s29189_s23   ;;  %s25834_s22 = sphi %s25898_s22, %s29188_s22   ;;  %s25830_s21 = sphi %s25896_s21, %s29187_s21   ;;  %s25826_s20 = sphi %s25894_s20, %s29186_s20   ;;  %s25822_s19 = sphi %s25892_s19, %s29185_s19   ;;  %s25818_s18 = sphi %s25890_s18, %s29184_s18  }
   0x8   : > { %s27_s28 = sadd.s32 1, %s25838_s23  ;;  %s30_s29 = sadd.s32 1, %s25842_s24 }
   0x9   : > { %p28_p0 = scmp.ge.s32.totalorder %s27_s28, 2  ;;  %p191_p1 = scmp.ne.s32.totalorder %s25826_s20, %s25822_s19 }
   0xa   : > { %p192_p2 = scmp.eq.s32.totalorder %s23928_s26, 3  ;;  %p197_p5 = scmp.ne.s32.totalorder %s25822_s19, %s25818_s18 }
   0xb   : > { %s29192_s28 = smov (%p28_p0, %s27_s28), 0  ;;  %s29194_s29 = smov (!%p28_p0, %s30_s29), %s25842_s24 }
   0xc   : > { %29177 = sst [smem:[#allocation5_spill]] %s29192_s28  ;;  %s177_s30 = ssub.s32 %s25838_s23, %s29192_s28 }
   0xd   : > { %p25941_p3 = por %p192_p2, %p191_p1  ;;  %p32_p4 = scmp.ge.s32.totalorder %s29194_s29, 2 }
   0xe   : > { %p198_p6 = scmp.eq.s32.totalorder %s23929_s27, 3  ;;  %p23938_p7 = scmp.ge.s32.totalorder %s25846_s25, 1 }
   0xf   : > { %s29196_s29 = smov (%p32_p4, %s29194_s29), 0  ;;  %p273_p9 = scmp.lt.s32.totalorder %s25846_s25, 5 }
  0x10   : > { %29179 = sst [smem:[#allocation6_spill]] %s29196_s29  ;;  %p25950_p8 = por %p198_p6, %p197_p5 }
  0x11   : > { %s176_s8 = ssub.s32 %s25842_s24, %s29196_s29  ;;  %s181_s9 = sadd.s32 1, %s25826_s20 }
  0x12   : > { %s178_s10 = sor.u32 %s177_s30, %s176_s8  ;;  %p274_p10 = pnand %p23938_p7, %p273_p9 }
  0x13   : > { %p179_p11 = scmp.eq.s32.totalorder %s178_s10, 0  ;;  %s25962_s12 = sshll.u32 (!%p274_p10), %s25830_s21, 2  ;;  %v25848_v0 = vmov (!%p274_p10), 0.0   ;;  %v409_v7 = vlaneseq (!%p274_p10)  ;;  %vm394_vm3 = vcmask (!%p274_p10), 523264   ;;  %v453_v40 = vld [vmem:[%s29172_s4] sm:$0xff] (!%p274_p10)  ;;  %v25856_v41 = vmov (!%p274_p10), 0  }
  0x14   : > { %277 = sbr.rel (%p274_p10) target bundleno = 6149 (0x1805), region = 40  ;;  %p330_p12 = scmp.lt.s32.totalorder (!%p274_p10), %s25834_s22, 1  ;;  %544 = vmatprep.mubr.f32.mxu0 (!%p274_p10), %v25848_v0  ;;  %2210 = vmatprep.mubr.f32.mxu1 (!%p274_p10), %v25848_v0  ;;  %v475_v48 = vld [vmem:[%s29171_s3] sm:$0xff] (!%p274_p10)  ;;  %v23968_v61 = vld [vmem:[%s29171_s3 + $0x8] sm:$0xff] (!%p274_p10) }
  0x15   : > { %s25959_s11 = scalar_select %p179_p11, %s25826_s20, %s181_s9  }
  0x16   : > { %p332_p13 = scmp.lt.s32.totalorder (!%p274_p10), %s25962_s12, 7  ;;  %s23944_s16 = sadd.s32 (!%p274_p10), 4294967295, %s25962_s12  ;;  %v25989_v8 = vand.u32 (!%p274_p10), 127, %v409_v7  ;;  %25730 = vset.pattern.permute.xlu0 (!%p274_p10), %v25856_v41  ;;  %25731 = vset.pattern.permute.xlu1 (!%p274_p10), %v25856_v41 }
  0x17   : > { %p341_p0 = scmp.gt.s32.totalorder (!%p274_p10), %s23944_s16, 0  ;;  %p23945_p1 = scmp.lt.s32.totalorder (!%p274_p10), %s23944_s16, 7 }
  0x18   : > { %s29181_s0 = sld [smem:[#allocation7_spill]] (!%p274_p10)  ;;  %s24387_s9 = sadd.s32 (!%p274_p10), 4, %s25962_s12  ;;  %v411_v9 = vadd.s32 (!%p274_p10), 128, %v25989_v8  ;;  %v412_v12 = vadd.s32 (!%p274_p10), 256, %v25989_v8  ;;  %v414_v15 = vadd.s32 (!%p274_p10), 512, %v25989_v8  ;;  %v413_v19 = vadd.s32 (!%p274_p10), 384, %v25989_v8 }
  0x19   : > { %s25849_s10 = smov (!%p274_p10), 64   ;;  %p357_p2 = scmp.lt.s32.totalorder (!%p274_p10), %s24387_s9, 7 }
  0x1a   : > { %s25852_s28 = smov (!%p274_p10), 1   ;;  %s25853_s29 = smov (!%p274_p10), 127  }
  0x1b   : > { %s331_s13 = scalar_select %p330_p12, %s25834_s22, 1 }
  0x1c   : > { %s333_s14 = scalar_select %p332_p13, %s25962_s12, 7 }
  0x1d   : > { %s23941_s15 = sshll.u32 %s331_s13, 3  ;;  %s29198_s16 = smov (!%p341_p0, %s23944_s16), 0 }
  0x1e   : > { %s335_s17 = sadd.s32 %s23941_s15, %s333_s14  ;;  %s29200_s16 = smov (!%p23945_p1, %s29198_s16), 7 }
  0x1f   : > { %s23942_s26 = sshll.u32 %s335_s17, 3  ;;  %s29202_s9 = smov (!%p357_p2, %s24387_s9), 7 }
  0x20   : > { %s337_s8 = scalar_lea.vmem %s29181_s0, %s23942_s26  ;;  %s348_s13 = sadd.s32 %s29200_s16, %s23941_s15 }
  0x21   : > { %v375_v1 = vld [vmem:[%s337_s8 + $0x8] sm:$0xff]  ;;  %v374_v2 = vld [vmem:[%s337_s8] sm:$0xff]  ;;  %v377_v3 = vld [vmem:[%s337_s8 + $0x18] sm:$0xff]  ;;  %s23951_s14 = sshll.u32 %s348_s13, 3  ;;  %s29204_s9 = smov (!%p357_p2, %s29202_s9), 7 }
  0x22   : > { %388 = vrot.lane.b32.xlu1 %v375_v1, %s25849_s10  ;;  %386 = vrot.lane.b32.xlu0 %v374_v2, %s25849_s10  ;;  %s350_s27 = scalar_lea.vmem %s29169_s1, %s23951_s14  ;;  %v376_v4 = vld [vmem:[%s337_s8 + $0x10] sm:$0xff]  ;;  %s364_s30 = sadd.s32 %s23941_s15, %s29204_s9 }
  0x23   : > { %v372_v5 = vld [vmem:[%s350_s27] sm:$0xff]  ;;  %s23957_s0 = sshll.u32 %s364_s30, 3  ;;  %s23958_s13 = sshll.u32 %s25830_s21, 9 }
  0x24   : > { %s366_s16 = scalar_lea.vmem %s29170_s2, %s23957_s0  ;;  %s23959_s8 = sadd.s32 4294967232, %s23958_s13 }
  0x25   : > { %v373_v6 = vld [vmem:[%s366_s16] sm:$0xff]  ;;  %v417_v10 = vstv %s23959_s8  ;;  %s25850_s0 = smov 3   ;;  %s25851_s21 = smov 2  }
  0x26   : > { %392 = vrot.lane.b32.xlu1 %v377_v3, %s25849_s10  ;;  %379 = vrot.lane.b32.xlu0 %v372_v5, %s25849_s10  ;;  %v419_v11 = vadd.s32 %v417_v10, %v411_v9  ;;  %v418_v13 = vadd.s32 %v417_v10, %v25989_v8  ;;  %v420_v14 = vadd.s32 %v417_v10, %v412_v12  ;;  %s25854_s15 = smov 126   ;;  %s25855_s9 = smov 125  }
  0x27   : > { %v422_v21 = vadd.s32 %v417_v10, %v414_v15  ;;  %v421_v24 = vadd.s32 %v417_v10, %v413_v19 }
  0x28   : > { %vm424_vm0 = vcmp.ge.s32.totalorder %v419_v11, 0  ;;  %vm429_vm1 = vcmp.lt.s32.totalorder %v419_v11, 1024  ;;  %vm423_vm4 = vcmp.ge.s32.totalorder %v418_v13, 0  ;;  %vm428_vm5 = vcmp.lt.s32.totalorder %v418_v13, 1024  ;;  %v23972_v11 = vld [vmem:[%s29171_s3 + $0x10] sm:$0xff] }
  0x29   : > { %vm434_vm2 = vmand %vm424_vm0, %vm429_vm1  ;;  %vm425_vm6 = vcmp.ge.s32.totalorder %v420_v14, 0  ;;  %vm430_vm7 = vcmp.lt.s32.totalorder %v420_v14, 1024  ;;  %vm427_vm10 = vcmp.ge.s32.totalorder %v422_v21, 0  ;;  %vm432_vm11 = vcmp.lt.s32.totalorder %v422_v21, 1024 }
  0x2a   : > { %390 = vrot.lane.b32.xlu1 %v376_v4, %s25849_s10  ;;  %404 = vrot.lane.b32.xlu0 %v373_v6, %s25849_s10  ;;  %v25996_v16 = vsel %vm434_vm2, 1.0, %v25848_v0  ;;  %vm433_vm8 = vmand %vm423_vm4, %vm428_vm5  ;;  %vm426_vm13 = vcmp.ge.s32.totalorder %v421_v24, 0  ;;  %vm431_vm14 = vcmp.lt.s32.totalorder %v421_v24, 1024  ;;  %vm469_vm0 = vcmp.lt.s32.totalorder %v25989_v8, 3 }
  0x2b   : > { %vm435_vm9 = vmand %vm425_vm6, %vm430_vm7  ;;  %v26006_v25 = vsel %vm433_vm8, 1.0, %v25848_v0  ;;  %vm476_vm1 = vcmask 64512   ;;  %vm707_vm2 = vcmp.lt.s32.totalorder %v25989_v8, 2  ;;  %vm25857_vm4 = vmmov 0  }
  0x2c   : > { %v26009_v27 = vsel %vm435_vm9, 1.0, %v25848_v0  ;;  %vm437_vm12 = vmand %vm427_vm10, %vm432_vm11  ;;  %vm945_vm5 = vcmp.lt.s32.totalorder %v25989_v8, 1  ;;  %vm1405_vm6 = vcmp.lt.s32.totalorder %v25989_v8, 127  ;;  %vm1643_vm7 = vcmp.lt.s32.totalorder %v25989_v8, 126 }
  0x2d   : > { %v26022_v33 = vsel %vm437_vm12, 1.0, %v25848_v0  ;;  %vm436_vm15 = vmand %vm426_vm13, %vm431_vm14  ;;  %vm1881_vm8 = vcmp.lt.s32.totalorder %v25989_v8, 125  ;;  %vm23793_vm9 = vcmp.lt.s32.totalorder %v409_v7, 512 }
  0x2e   : > { %v26031_v37 = vsel %vm436_vm15, 1.0, %v25848_v0 }
  0x94   : > { %v389_v17 = vpop.permute.xlu1 %388  ;;  %v387_v18 = vpop.permute.xlu0 %386 }
  0x95   : > { %v395_v20 = vsel %vm394_vm3, %v387_v18, %v389_v17 }
  0x96   : > { %v26001_v22 = vmul.f32 %v25996_v16, %v395_v20 }
  0x98   : > { %v393_v23 = vpop.permute.xlu1 %392  ;;  %461 = vrot.lane.b32.xlu1 %v26001_v22, %s25850_s0  ;;  %v380_v26 = vpop.permute.xlu0 %379 }
  0x99   : > { %v407_v28 = vsel %vm394_vm3, %v380_v26, %v387_v18  ;;  %v23976_v18 = vld [vmem:[%s29171_s3 + $0x18] sm:$0xff] }
  0x9a   : > { %v26013_v30 = vmul.f32 %v26006_v25, %v407_v28  ;;  %v23980_v28 = vld [vmem:[%s29171_s3 + $0x20] sm:$0xff] }
  0x9c   : > { %v391_v29 = vpop.permute.xlu1 %390  ;;  %459 = vrot.lane.b32.xlu0 %v26013_v30, %s25850_s0  ;;  %v405_v34 = vpop.permute.xlu0 %404 }
  0x9d   : > { %v396_v31 = vsel %vm394_vm3, %v389_v17, %v391_v29  ;;  %v408_v35 = vsel %vm394_vm3, %v393_v23, %v405_v34  ;;  %v397_v38 = vsel %vm394_vm3, %v391_v29, %v393_v23 }
  0x9e   : > { %v26017_v32 = vmul.f32 %v26009_v27, %v396_v31  ;;  %v26028_v36 = vmul.f32 %v26022_v33, %v408_v35  ;;  %v26039_v39 = vmul.f32 %v26031_v37, %v397_v38 }
  0xa0   : > { %463 = vrot.lane.b32.xlu1 %v26017_v32, %s25850_s0  ;;  %467 = vrot.lane.b32.xlu0 %v26028_v36, %s25850_s0 }
  0xa4   : > { %697 = vrot.lane.b32.xlu1 %v26013_v30, %s25851_s21  ;;  %465 = vrot.lane.b32.xlu0 %v26039_v39, %s25850_s0 }
  0xa8   : > { %705 = vrot.lane.b32.xlu1 %v26028_v36, %s25851_s21  ;;  %699 = vrot.lane.b32.xlu0 %v26001_v22, %s25851_s21 }
  0xac   : > { %703 = vrot.lane.b32.xlu1 %v26039_v39, %s25851_s21  ;;  %701 = vrot.lane.b32.xlu0 %v26017_v32, %s25851_s21 }
  0xb0   : > { %937 = vrot.lane.b32.xlu1 %v26001_v22, %s25852_s28  ;;  %935 = vrot.lane.b32.xlu0 %v26013_v30, %s25852_s28 }
  0xb4   : > { %939 = vrot.lane.b32.xlu1 %v26017_v32, %s25852_s28  ;;  %943 = vrot.lane.b32.xlu0 %v26028_v36, %s25852_s28 }
  0xb8   : > { %1397 = vrot.lane.b32.xlu1 %v26001_v22, %s25853_s29  ;;  %941 = vrot.lane.b32.xlu0 %v26039_v39, %s25852_s28 }
  0xbc   : > { %1395 = vrot.lane.b32.xlu1 %v26013_v30, %s25853_s29  ;;  %1399 = vrot.lane.b32.xlu0 %v26017_v32, %s25853_s29 }
  0xc0   : > { %1403 = vrot.lane.b32.xlu1 %v26028_v36, %s25853_s29  ;;  %1401 = vrot.lane.b32.xlu0 %v26039_v39, %s25853_s29 }
  0xc4   : > { %1637 = vrot.lane.b32.xlu1 %v26017_v32, %s25854_s15  ;;  %1635 = vrot.lane.b32.xlu0 %v26001_v22, %s25854_s15 }
  0xc8   : > { %1639 = vrot.lane.b32.xlu1 %v26039_v39, %s25854_s15  ;;  %1633 = vrot.lane.b32.xlu0 %v26013_v30, %s25854_s15 }
  0xcc   : > { %1873 = vrot.lane.b32.xlu1 %v26001_v22, %s25855_s9  ;;  %1641 = vrot.lane.b32.xlu0 %v26028_v36, %s25854_s15 }
  0xd0   : > { %1871 = vrot.lane.b32.xlu1 %v26013_v30, %s25855_s9  ;;  %1875 = vrot.lane.b32.xlu0 %v26017_v32, %s25855_s9 }
  0xd4   : > { %1879 = vrot.lane.b32.xlu1 %v26028_v36, %s25855_s9  ;;  %1877 = vrot.lane.b32.xlu0 %v26039_v39, %s25855_s9 }
  0xd8   : > { %456 = vperm.xlu0 %25730, %v453_v40   ;;  %v23984_v40 = vld [vmem:[%s29171_s3 + $0x28] sm:$0xff] }
 0x10a   : > { %v462_v42 = vpop.permute.xlu1 %461 }
 0x10e   : > { %v460_v43 = vpop.permute.xlu0 %459 }
 0x10f   : > { %v473_v44 = vsel %vm469_vm0, %v460_v43, %v462_v42 }
 0x110   : > { %480 = vmatprep.subr.mxu0 %v473_v44 }
 0x112   : > { %v464_v45 = vpop.permute.xlu1 %463  ;;  %v468_v46 = vpop.permute.xlu0 %467 }
 0x113   : > { %v474_v49 = vsel %vm469_vm0, %v468_v46, %v460_v43  ;;  %v472_v53 = vsel %vm469_vm0, %v462_v42, %v464_v45 }
 0x114   : > { %481 = vmatpush1.msra.mxu0 %v474_v49 }
 0x115   : > { %23965 = vmatmul.mubr.msk.f32.vlgmr.msra.gmra.mrb[0].mxu0 %vm476_vm1, %v475_v48 }
 0x116   : > { %v698_v47 = vpop.permute.xlu1 %697  ;;  %v466_v50 = vpop.permute.xlu0 %465  ;;  %615 = vmatprep.mubr.f32.mxu0 %v25848_v0 }
 0x117   : > { %v471_v52 = vsel %vm469_vm0, %v464_v45, %v466_v50  ;;  %v470_v55 = vsel %vm469_vm0, %v466_v50, %v468_v46  ;;  %v23988_v50 = vld [vmem:[%s29171_s3 + $0x30] sm:$0xff] }
 0x118   : > { %551 = vmatprep.subr.mxu0 %v471_v52 }
 0x119   : > { %552 = vmatpush1.msra.mxu0 %v472_v53 }
 0x11a   : > { %v706_v51 = vpop.permute.xlu1 %705  ;;  %23966 = vmatmul.mubr.msk.f32.vlgmr.msra.gmra.mrb[2].mxu0 %vm476_vm1, %v475_v48  ;;  %24584 = vmatprep.subr.mxu0 %v25848_v0  ;;  %v700_v54 = vpop.permute.xlu0 %699 }
 0x11b   : > { %24585 = vmatpush3.msra.mxu0 %v470_v55  ;;  %v711_v56 = vsel %vm707_vm2, %v698_v47, %v700_v54  ;;  %24586 = vmatprep.mubr.msk.f32.mxu0 %vm25857_vm4, %v25848_v0  ;;  %v712_v58 = vsel %vm707_vm2, %v706_v51, %v698_v47 }
 0x11c   : > { %718 = vmatprep.subr.mxu0 %v711_v56 }
 0x11e   : > { %v704_v57 = vpop.permute.xlu1 %703  ;;  %24587 = vmatmul.mubr.msk.f32.vlgmr.msra.gmra.mrb[4].mxu0 %vm476_vm1, %v475_v48  ;;  %v702_v59 = vpop.permute.xlu0 %701 }
 0x11f   : > { %719 = vmatpush1.msra.mxu0 %v712_v58  ;;  %v709_v60 = vsel %vm707_vm2, %v702_v59, %v704_v57  ;;  %782 = vmatprep.mubr.f32.mxu0 %v25848_v0  ;;  %v710_v63 = vsel %vm707_vm2, %v700_v54, %v702_v59  ;;  %v708_v2 = vsel %vm707_vm2, %v704_v57, %v706_v51 }
 0x120   : > { %789 = vmatprep.subr.mxu0 %v709_v60 }
 0x122   : > { %v938_v62 = vpop.permute.xlu1 %937  ;;  %23969 = vmatmul.mubr.msk.f32.vlgmr.msra.gmra.mrb[0].mxu0 %vm476_vm1, %v23968_v61  ;;  %v936_v1 = vpop.permute.xlu0 %935 }
 0x123   : > { %790 = vmatpush1.msra.mxu0 %v710_v63  ;;  %853 = vmatprep.mubr.f32.mxu0 %v25848_v0  ;;  %v949_v4 = vsel %vm945_vm5, %v936_v1, %v938_v62 }
 0x124   : > { %24589 = vmatprep.subr.mxu0 %v25848_v0 }
 0x126   : > { %23970 = vmatmul.mubr.msk.f32.vlgmr.msra.gmra.mrb[2].mxu0 %vm476_vm1, %v23968_v61  ;;  %v944_v3 = vpop.permute.xlu0 %943  ;;  %v940_v5 = vpop.permute.xlu1 %939 }
 0x127   : > { %24590 = vmatpush3.msra.mxu0 %v708_v2  ;;  %24591 = vmatprep.mubr.msk.f32.mxu0 %vm25857_vm4, %v25848_v0  ;;  %v950_v6 = vsel %vm945_vm5, %v944_v3, %v936_v1  ;;  %v948_v13 = vsel %vm945_vm5, %v938_v62, %v940_v5 }
 0x128   : > { %956 = vmatprep.subr.mxu0 %v949_v4 }
 0x12a   : > { %24592 = vmatmul.mubr.msk.f32.vlgmr.msra.gmra.mrb[4].mxu0 %vm476_vm1, %v23968_v61  ;;  %v942_v9 = vpop.permute.xlu0 %941  ;;  %v1398_v12 = vpop.permute.xlu1 %1397 }
 0x12b   : > { %957 = vmatpush1.msra.mxu0 %v950_v6  ;;  %v947_v10 = vsel %vm945_vm5, %v940_v5, %v942_v9  ;;  %1020 = vmatprep.mubr.f32.mxu0 %v25848_v0  ;;  %v946_v14 = vsel %vm945_vm5, %v942_v9, %v944_v3 }
 0x12c   : > { %1027 = vmatprep.subr.mxu0 %v947_v10 }
 0x12e   : > { %23973 = vmatmul.mubr.msk.f32.vlgmr.msra.gmra.mrb[0].mxu0 %vm476_vm1, %v23972_v11  ;;  %v1396_v15 = vpop.permute.xlu1 %1395  ;;  %v1400_v17 = vpop.permute.xlu0 %1399 }
 0x12f   : > { %1028 = vmatpush1.msra.mxu0 %v948_v13  ;;  %1091 = vmatprep.mubr.f32.mxu0 %v25848_v0  ;;  %v1408_v21 = vsel %vm1405_vm6, %v1398_v12, %v1400_v17  ;;  %v1409_v24 = vsel %vm1405_vm6, %v1396_v15, %v1398_v12 }
 0x130   : > { %24594 = vmatprep.subr.mxu0 %v25848_v0 }
 0x132   : > { %23974 = vmatmul.mubr.msk.f32.vlgmr.msra.gmra.mrb[2].mxu0 %vm476_vm1, %v23972_v11  ;;  %v1404_v19 = vpop.permute.xlu1 %1403  ;;  %v1402_v20 = vpop.permute.xlu0 %1401 }
 0x133   : > { %24595 = vmatpush3.msra.mxu0 %v946_v14  ;;  %24596 = vmatprep.mubr.msk.f32.mxu0 %vm25857_vm4, %v25848_v0  ;;  %v1406_v26 = vsel %vm1405_vm6, %v1402_v20, %v1404_v19  ;;  %v1407_v31 = vsel %vm1405_vm6, %v1400_v17, %v1402_v20  ;;  %v23992_v14 = vld [vmem:[%s29172_s4 + $0x8] sm:$0xff] }
 0x134   : > { %1178 = vmatprep.subr.mxu0 %v26001_v22 }
 0x136   : > { %24597 = vmatmul.mubr.msk.f32.vlgmr.msra.gmra.mrb[4].mxu0 %vm476_vm1, %v23972_v11  ;;  %v1638_v22 = vpop.permute.xlu1 %1637  ;;  %v1636_v23 = vpop.permute.xlu0 %1635 }
 0x137   : > { %1179 = vmatpush1.msra.mxu0 %v26013_v30  ;;  %1242 = vmatprep.mubr.f32.mxu0 %v25848_v0  ;;  %v1646_v34 = vsel %vm1643_vm7, %v1636_v23, %v1638_v22 }
 0x138   : > { %1249 = vmatprep.subr.mxu0 %v26039_v39 }
 0x13a   : > { %23977 = vmatmul.mubr.msk.f32.vlgmr.msra.gmra.mrb[0].mxu0 %vm476_vm1, %v23976_v18  ;;  %v1640_v29 = vpop.permute.xlu1 %1639  ;;  %v1634_v30 = vpop.permute.xlu0 %1633 }
 0x13b   : > { %1250 = vmatpush1.msra.mxu0 %v26017_v32  ;;  %1313 = vmatprep.mubr.f32.mxu0 %v25848_v0  ;;  %v1410_v32 = vsel %vm1405_vm6, %v1404_v19, %v1396_v15  ;;  %v1647_v38 = vsel %vm1643_vm7, %v1634_v30, %v1636_v23  ;;  %v1645_v43 = vsel %vm1643_vm7, %v1638_v22, %v1640_v29 }
 0x13c   : > { %24599 = vmatprep.subr.mxu0 %v25848_v0 }
 0x13e   : > { %23978 = vmatmul.mubr.msk.f32.vlgmr.msra.gmra.mrb[2].mxu0 %vm476_vm1, %v23976_v18  ;;  %v1874_v35 = vpop.permute.xlu1 %1873 }
 0x13f   : > { %24600 = vmatpush3.msra.mxu0 %v26028_v36  ;;  %24601 = vmatprep.mubr.msk.f32.mxu0 %vm25857_vm4, %v25848_v0  ;;  %v1642_v36 = vpop.permute.xlu0 %1641 }
 0x140   : > { %1416 = vmatprep.subr.mxu0 %v1408_v21  ;;  %v1644_v39 = vsel %vm1643_vm7, %v1640_v29, %v1642_v36  ;;  %v1648_v44 = vsel %vm1643_vm7, %v1642_v36, %v1634_v30  ;;  %v23993_v21 = vld [vmem:[%s29171_s3 + $0x38] sm:$0xff] }
 0x142   : > { %24602 = vmatmul.mubr.msk.f32.vlgmr.msra.gmra.mrb[4].mxu0 %vm476_vm1, %v23976_v18  ;;  %v1872_v41 = vpop.permute.xlu1 %1871 }
 0x143   : > { %1417 = vmatpush1.msra.mxu0 %v1409_v24  ;;  %1480 = vmatprep.mubr.f32.mxu0 %v25848_v0  ;;  %v1876_v42 = vpop.permute.xlu0 %1875  ;;  %v1885_v48 = vsel %vm1881_vm8, %v1872_v41, %v1874_v35 }
 0x144   : > { %1487 = vmatprep.subr.mxu0 %v1406_v26  ;;  %v1884_v45 = vsel %vm1881_vm8, %v1874_v35, %v1876_v42 }
 0x146   : > { %23981 = vmatmul.mubr.msk.f32.vlgmr.msra.gmra.mrb[0].mxu0 %vm476_vm1, %v23980_v28  ;;  %v1880_v46 = vpop.permute.xlu1 %1879 }
 0x147   : > { %1488 = vmatpush1.msra.mxu0 %v1407_v31  ;;  %1551 = vmatprep.mubr.f32.mxu0 %v25848_v0  ;;  %v1878_v47 = vpop.permute.xlu0 %1877  ;;  %v1886_v52 = vsel %vm1881_vm8, %v1880_v46, %v1872_v41 }
 0x148   : > { %24604 = vmatprep.subr.mxu0 %v25848_v0  ;;  %v1882_v49 = vsel %vm1881_vm8, %v1878_v47, %v1880_v46  ;;  %v1883_v51 = vsel %vm1881_vm8, %v1876_v42, %v1878_v47 }
 0x14a   : > { %23982 = vmatmul.mubr.msk.f32.vlgmr.msra.gmra.mrb[2].mxu0 %vm476_vm1, %v23980_v28 }
 0x14b   : > { %24605 = vmatpush3.msra.mxu0 %v1410_v32  ;;  %24606 = vmatprep.mubr.msk.f32.mxu0 %vm25857_vm4, %v25848_v0 }
 0x14c   : > { %1654 = vmatprep.subr.mxu0 %v1646_v34 }
 0x14e   : > { %24607 = vmatmul.mubr.msk.f32.vlgmr.msra.gmra.mrb[4].mxu0 %vm476_vm1, %v23980_v28 }
 0x14f   : > { %1655 = vmatpush1.msra.mxu0 %v1647_v38  ;;  %1718 = vmatprep.mubr.f32.mxu0 %v25848_v0 }
 0x150   : > { %1725 = vmatprep.subr.mxu0 %v1644_v39  ;;  %v23997_v39 = vld [vmem:[%s29171_s3 + $0x40] sm:$0xff] }
 0x152   : > { %23985 = vmatmul.mubr.msk.f32.vlgmr.msra.gmra.mrb[0].mxu0 %vm476_vm1, %v23984_v40 }
 0x153   : > { %1726 = vmatpush1.msra.mxu0 %v1645_v43  ;;  %1789 = vmatprep.mubr.f32.mxu0 %v25848_v0 }
 0x154   : > { %24609 = vmatprep.subr.mxu0 %v25848_v0 }
 0x156   : > { %23986 = vmatmul.mubr.msk.f32.vlgmr.msra.gmra.mrb[2].mxu0 %vm476_vm1, %v23984_v40 }
 0x157   : > { %24610 = vmatpush3.msra.mxu0 %v1648_v44  ;;  %24611 = vmatprep.mubr.msk.f32.mxu0 %vm25857_vm4, %v25848_v0  ;;  %v457_v53 = vpop.permute.xlu0 %456 }
 0x158   : > { %1892 = vmatprep.subr.mxu0 %v1884_v45 }
 0x15a   : > { %24612 = vmatmul.mubr.msk.f32.vlgmr.msra.gmra.mrb[4].mxu0 %vm476_vm1, %v23984_v40 }
 0x15b   : > { %1893 = vmatpush1.msra.mxu0 %v1885_v48  ;;  %1956 = vmatprep.mubr.f32.mxu0 %v25848_v0 }
 0x15c   : > { %1963 = vmatprep.subr.mxu0 %v1882_v49 }
 0x15e   : > { %23989 = vmatmul.mubr.msk.f32.vlgmr.msra.gmra.mrb[0].mxu0 %vm476_vm1, %v23988_v50 }
 0x15f   : > { %1964 = vmatpush1.msra.mxu0 %v1883_v51  ;;  %2027 = vmatprep.mubr.f32.mxu0 %v25848_v0 }
 0x160   : > { %24614 = vmatprep.subr.mxu0 %v25848_v0 }
 0x162   : > { %23990 = vmatmul.mubr.msk.f32.vlgmr.msra.gmra.mrb[2].mxu0 %vm476_vm1, %v23988_v50 }
 0x163   : > { %24615 = vmatpush3.msra.mxu0 %v1886_v52  ;;  %24616 = vmatprep.mubr.msk.f32.mxu0 %vm25857_vm4, %v25848_v0 }
 0x166   : > { %24617 = vmatmul.mubr.msk.f32.vlgmr.msra.gmra.mrb[4].mxu0 %vm476_vm1, %v23988_v50  ;;  %v24001_v50 = vld [vmem:[%s29171_s3 + $0x48] sm:$0xff] }
 0x167   : > { %3871 = vmatprep.mubr.f32.mxu0 %v25848_v0 }
 0x231   : > { %v1958_v54 = vpop.f32.mrb[0].mxu0 }
 0x232   : > { %v25074_v55 = vadd.f32 %v1958_v54, %v457_v53  ;;  %v1960_v56 = vpop.f32.mrb[1].mxu0 }
 0x233   : > { %v25075_v57 = vadd.f32 %v1960_v56, %v457_v53  ;;  %v24005_v56 = vld [vmem:[%s29171_s3 + $0x50] sm:$0xff] }
 0x234   : > { %v2109_v58 = vmax.f32 %v25074_v55, 0.0 }
 0x235   : > { %v2029_v59 = vpop.f32.mrb[2].mxu0  ;;  %v2110_v61 = vmax.f32 %v25075_v57, 0.0 }
 0x236   : > { %v26243_v60 = vmul.f32 %v26006_v25, %v2109_v58  ;;  %v25076_v62 = vadd.f32 %v2029_v59, %v457_v53  ;;  %v2031_v63 = vpop.f32.mrb[3].mxu0 }
 0x237   : > { %v26248_v2 = vmul.f32 %v25996_v16, %v2110_v61  ;;  %v25077_v4 = vadd.f32 %v2031_v63, %v457_v53 }
 0x238   : > { %2126 = vrot.lane.b32.xlu1 %v26243_v60, %s25850_s0  ;;  %v2111_v3 = vmax.f32 %v25076_v62, 0.0 }
 0x239   : > { %v2100_v1 = vpop.f32.mrb[4].mxu0  ;;  %v2112_v11 = vmax.f32 %v25077_v4, 0.0 }
 0x23a   : > { %v25078_v5 = vadd.f32 %v2100_v1, %v457_v53  ;;  %v24618_v6 = vpop.f32.mrb[5].mxu0  ;;  %v26253_v10 = vmul.f32 %v26009_v27, %v2111_v3  ;;  %v24009_v1 = vld [vmem:[%s29171_s3 + $0x58] sm:$0xff] }
 0x23b   : > { %v26263_v13 = vmul.f32 %v26031_v37, %v2112_v11 }
 0x23c   : > { %v2113_v9 = vmax.f32 %v25078_v5, 0.0  ;;  %2128 = vrot.lane.b32.xlu1 %v26248_v2, %s25850_s0 }
 0x23e   : > { %v26256_v12 = vmul.f32 %v26022_v33, %v2113_v9 }
 0x240   : > { %2134 = vrot.lane.b32.xlu0 %v26256_v12, %s25850_s0  ;;  %2130 = vrot.lane.b32.xlu1 %v26253_v10, %s25850_s0 }
 0x244   : > { %2132 = vrot.lane.b32.xlu0 %v26263_v13, %s25850_s0  ;;  %2363 = vrot.lane.b32.xlu1 %v26243_v60, %s25851_s21 }
 0x248   : > { %2365 = vrot.lane.b32.xlu0 %v26248_v2, %s25851_s21  ;;  %2371 = vrot.lane.b32.xlu1 %v26256_v12, %s25851_s21 }
 0x24c   : > { %2367 = vrot.lane.b32.xlu0 %v26253_v10, %s25851_s21  ;;  %2369 = vrot.lane.b32.xlu1 %v26263_v13, %s25851_s21 }
 0x250   : > { %2600 = vrot.lane.b32.xlu0 %v26243_v60, %s25852_s28  ;;  %2602 = vrot.lane.b32.xlu1 %v26248_v2, %s25852_s28 }
 0x254   : > { %2608 = vrot.lane.b32.xlu0 %v26256_v12, %s25852_s28  ;;  %2604 = vrot.lane.b32.xlu1 %v26253_v10, %s25852_s28 }
 0x258   : > { %2606 = vrot.lane.b32.xlu0 %v26263_v13, %s25852_s28  ;;  %3061 = vrot.lane.b32.xlu1 %v26248_v2, %s25853_s29 }
 0x25c   : > { %3063 = vrot.lane.b32.xlu0 %v26253_v10, %s25853_s29  ;;  %3059 = vrot.lane.b32.xlu1 %v26243_v60, %s25853_s29 }
 0x260   : > { %3065 = vrot.lane.b32.xlu0 %v26263_v13, %s25853_s29  ;;  %3067 = vrot.lane.b32.xlu1 %v26256_v12, %s25853_s29 }
 0x264   : > { %3298 = vrot.lane.b32.xlu0 %v26248_v2, %s25854_s15  ;;  %3300 = vrot.lane.b32.xlu1 %v26253_v10, %s25854_s15 }
 0x268   : > { %3296 = vrot.lane.b32.xlu0 %v26243_v60, %s25854_s15  ;;  %3302 = vrot.lane.b32.xlu1 %v26263_v13, %s25854_s15 }
 0x26c   : > { %3304 = vrot.lane.b32.xlu0 %v26256_v12, %s25854_s15  ;;  %3535 = vrot.lane.b32.xlu1 %v26248_v2, %s25855_s9 }
 0x270   : > { %3537 = vrot.lane.b32.xlu0 %v26253_v10, %s25855_s9  ;;  %3533 = vrot.lane.b32.xlu1 %v26243_v60, %s25855_s9 }
 0x274   : > { %3539 = vrot.lane.b32.xlu0 %v26263_v13, %s25855_s9  ;;  %3541 = vrot.lane.b32.xlu1 %v26256_v12, %s25855_s9 }
 0x278   : > { %2123 = vperm.xlu0 %25730, %v23992_v14  }
 0x2aa   : > { %v2127_v15 = vpop.permute.xlu1 %2126 }
 0x2ae   : > { %v2129_v17 = vpop.permute.xlu1 %2128 }
 0x2af   : > { %v2139_v18 = vsel %vm469_vm0, %v2127_v15, %v2129_v17 }
 0x2b0   : > { %2146 = vmatprep.subr.mxu1 %v2139_v18 }
 0x2b2   : > { %v2135_v19 = vpop.permute.xlu0 %2134  ;;  %v2131_v20 = vpop.permute.xlu1 %2130 }
 0x2b3   : > { %v2140_v22 = vsel %vm469_vm0, %v2135_v19, %v2127_v15  ;;  %v2138_v28 = vsel %vm469_vm0, %v2129_v17, %v2131_v20 }
 0x2b4   : > { %2147 = vmatpush1.msra.mxu1 %v2140_v22 }
 0x2b5   : > { %23994 = vmatmul.mubr.msk.f32.vlgmr.msra.gmra.mrb[0].mxu1 %vm476_vm1, %v23993_v21 }
 0x2b6   : > { %v2133_v23 = vpop.permute.xlu0 %2132  ;;  %v2364_v24 = vpop.permute.xlu1 %2363  ;;  %2281 = vmatprep.mubr.f32.mxu1 %v25848_v0 }
 0x2b7   : > { %v2137_v26 = vsel %vm469_vm0, %v2131_v20, %v2133_v23  ;;  %v2136_v31 = vsel %vm469_vm0, %v2133_v23, %v2135_v19 }
 0x2b8   : > { %2217 = vmatprep.subr.mxu1 %v2137_v26 }
 0x2b9   : > { %2218 = vmatpush1.msra.mxu1 %v2138_v28 }
 0x2ba   : > { %v2366_v29 = vpop.permute.xlu0 %2365  ;;  %23995 = vmatmul.mubr.msk.f32.vlgmr.msra.gmra.mrb[2].mxu1 %vm476_vm1, %v23993_v21  ;;  %24619 = vmatprep.subr.mxu1 %v25848_v0  ;;  %v2372_v30 = vpop.permute.xlu1 %2371 }
 0x2bb   : > { %24620 = vmatpush3.msra.mxu1 %v2136_v31  ;;  %v2376_v32 = vsel %vm707_vm2, %v2364_v24, %v2366_v29  ;;  %24621 = vmatprep.mubr.msk.f32.mxu1 %vm25857_vm4, %v25848_v0  ;;  %v2377_v35 = vsel %vm707_vm2, %v2372_v30, %v2364_v24  ;;  %v24017_v24 = vld [vmem:[%s29171_s3 + $0x68] sm:$0xff] }
 0x2bc   : > { %2383 = vmatprep.subr.mxu1 %v2376_v32 }
 0x2be   : > { %v2368_v34 = vpop.permute.xlu0 %2367  ;;  %24622 = vmatmul.mubr.msk.f32.vlgmr.msra.gmra.mrb[4].mxu1 %vm476_vm1, %v23993_v21  ;;  %v2370_v36 = vpop.permute.xlu1 %2369 }
 0x2bf   : > { %2384 = vmatpush1.msra.mxu1 %v2377_v35  ;;  %v2374_v38 = vsel %vm707_vm2, %v2368_v34, %v2370_v36  ;;  %2447 = vmatprep.mubr.f32.mxu1 %v25848_v0  ;;  %v2375_v41 = vsel %vm707_vm2, %v2366_v29, %v2368_v34  ;;  %v2373_v44 = vsel %vm707_vm2, %v2370_v36, %v2372_v30 }
 0x2c0   : > { %2454 = vmatprep.subr.mxu1 %v2374_v38 }
 0x2c2   : > { %v2601_v40 = vpop.permute.xlu0 %2600  ;;  %23998 = vmatmul.mubr.msk.f32.vlgmr.msra.gmra.mrb[0].mxu1 %vm476_vm1, %v23997_v39  ;;  %v2603_v42 = vpop.permute.xlu1 %2602 }
 0x2c3   : > { %2455 = vmatpush1.msra.mxu1 %v2375_v41  ;;  %2518 = vmatprep.mubr.f32.mxu1 %v25848_v0  ;;  %v2613_v45 = vsel %vm945_vm5, %v2601_v40, %v2603_v42 }
 0x2c4   : > { %24624 = vmatprep.subr.mxu1 %v25848_v0 }
 0x2c6   : > { %v2609_v43 = vpop.permute.xlu0 %2608  ;;  %23999 = vmatmul.mubr.msk.f32.vlgmr.msra.gmra.mrb[2].mxu1 %vm476_vm1, %v23997_v39  ;;  %v2605_v46 = vpop.permute.xlu1 %2604 }
 0x2c7   : > { %24625 = vmatpush3.msra.mxu1 %v2373_v44  ;;  %24626 = vmatprep.mubr.msk.f32.mxu1 %vm25857_vm4, %v25848_v0  ;;  %v2614_v48 = vsel %vm945_vm5, %v2609_v43, %v2601_v40  ;;  %v2612_v52 = vsel %vm945_vm5, %v2603_v42, %v2605_v46 }
 0x2c8   : > { %2620 = vmatprep.subr.mxu1 %v2613_v45 }
 0x2ca   : > { %v2607_v47 = vpop.permute.xlu0 %2606  ;;  %24627 = vmatmul.mubr.msk.f32.vlgmr.msra.gmra.mrb[4].mxu1 %vm476_vm1, %v23997_v39  ;;  %v3062_v51 = vpop.permute.xlu1 %3061 }
 0x2cb   : > { %2621 = vmatpush1.msra.mxu1 %v2614_v48  ;;  %v2611_v49 = vsel %vm945_vm5, %v2605_v46, %v2607_v47  ;;  %2684 = vmatprep.mubr.f32.mxu1 %v25848_v0  ;;  %v2610_v53 = vsel %vm945_vm5, %v2607_v47, %v2609_v43 }
 0x2cc   : > { %2691 = vmatprep.subr.mxu1 %v2611_v49 }
 0x2ce   : > { %24002 = vmatmul.mubr.msk.f32.vlgmr.msra.gmra.mrb[0].mxu1 %vm476_vm1, %v24001_v50  ;;  %v3064_v54 = vpop.permute.xlu0 %3063  ;;  %v3060_v55 = vpop.permute.xlu1 %3059 }
 0x2cf   : > { %2692 = vmatpush1.msra.mxu1 %v2612_v52  ;;  %2755 = vmatprep.mubr.f32.mxu1 %v25848_v0  ;;  %v3071_v59 = vsel %vm1405_vm6, %v3062_v51, %v3064_v54  ;;  %v3072_v62 = vsel %vm1405_vm6, %v3060_v55, %v3062_v51 }
 0x2d0   : > { %24629 = vmatprep.subr.mxu1 %v25848_v0 }
 0x2d2   : > { %24003 = vmatmul.mubr.msk.f32.vlgmr.msra.gmra.mrb[2].mxu1 %vm476_vm1, %v24001_v50  ;;  %v3066_v57 = vpop.permute.xlu0 %3065  ;;  %v3068_v58 = vpop.permute.xlu1 %3067 }
 0x2d3   : > { %24630 = vmatpush3.msra.mxu1 %v2610_v53  ;;  %24631 = vmatprep.mubr.msk.f32.mxu1 %vm25857_vm4, %v25848_v0  ;;  %v3069_v63 = vsel %vm1405_vm6, %v3066_v57, %v3068_v58  ;;  %v3070_v4 = vsel %vm1405_vm6, %v3064_v54, %v3066_v57  ;;  %v3073_v5 = vsel %vm1405_vm6, %v3068_v58, %v3060_v55  ;;  %v24021_v53 = vld [vmem:[%s29172_s4 + $0x10] sm:$0xff] }
 0x2d4   : > { %2842 = vmatprep.subr.mxu1 %v26248_v2 }
 0x2d6   : > { %24632 = vmatmul.mubr.msk.f32.vlgmr.msra.gmra.mrb[4].mxu1 %vm476_vm1, %v24001_v50  ;;  %v3301_v61 = vpop.permute.xlu1 %3300 }
 0x2d7   : > { %2843 = vmatpush1.msra.mxu1 %v26243_v60  ;;  %2906 = vmatprep.mubr.f32.mxu1 %v25848_v0  ;;  %v3299_v60 = vpop.permute.xlu0 %3298 }
 0x2d8   : > { %2913 = vmatprep.subr.mxu1 %v26263_v13  ;;  %v3308_v6 = vsel %vm1643_vm7, %v3299_v60, %v3301_v61  ;;  %v24013_v13 = vld [vmem:[%s29171_s3 + $0x60] sm:$0xff] }
 0x2da   : > { %24006 = vmatmul.mubr.msk.f32.vlgmr.msra.gmra.mrb[0].mxu1 %vm476_vm1, %v24005_v56  ;;  %v3303_v3 = vpop.permute.xlu1 %3302 }
 0x2db   : > { %2914 = vmatpush1.msra.mxu1 %v26253_v10  ;;  %2977 = vmatprep.mubr.f32.mxu1 %v25848_v0  ;;  %v3297_v2 = vpop.permute.xlu0 %3296  ;;  %v3307_v17 = vsel %vm1643_vm7, %v3301_v61, %v3303_v3 }
 0x2dc   : > { %24634 = vmatprep.subr.mxu1 %v25848_v0  ;;  %v3309_v11 = vsel %vm1643_vm7, %v3297_v2, %v3299_v60 }
 0x2de   : > { %24007 = vmatmul.mubr.msk.f32.vlgmr.msra.gmra.mrb[2].mxu1 %vm476_vm1, %v24005_v56  ;;  %v3536_v10 = vpop.permute.xlu1 %3535 }
 0x2df   : > { %24635 = vmatpush3.msra.mxu1 %v26256_v12  ;;  %24636 = vmatprep.mubr.msk.f32.mxu1 %vm25857_vm4, %v25848_v0  ;;  %v3305_v9 = vpop.permute.xlu0 %3304 }
 0x2e0   : > { %3079 = vmatprep.subr.mxu1 %v3071_v59  ;;  %v3306_v12 = vsel %vm1643_vm7, %v3303_v3, %v3305_v9  ;;  %v3310_v18 = vsel %vm1643_vm7, %v3305_v9, %v3297_v2  ;;  %v24022_v59 = vld [vmem:[%s29171_s3 + $0x70] sm:$0xff] }
 0x2e2   : > { %24637 = vmatmul.mubr.msk.f32.vlgmr.msra.gmra.mrb[4].mxu1 %vm476_vm1, %v24005_v56  ;;  %v3534_v15 = vpop.permute.xlu1 %3533 }
 0x2e3   : > { %3080 = vmatpush1.msra.mxu1 %v3072_v62  ;;  %3143 = vmatprep.mubr.f32.mxu1 %v25848_v0  ;;  %v3538_v14 = vpop.permute.xlu0 %3537  ;;  %v3546_v22 = vsel %vm1881_vm8, %v3534_v15, %v3536_v10 }
 0x2e4   : > { %3150 = vmatprep.subr.mxu1 %v3069_v63  ;;  %v3545_v19 = vsel %vm1881_vm8, %v3536_v10, %v3538_v14 }
 0x2e6   : > { %24010 = vmatmul.mubr.msk.f32.vlgmr.msra.gmra.mrb[0].mxu1 %vm476_vm1, %v24009_v1  ;;  %v3542_v21 = vpop.permute.xlu1 %3541 }
 0x2e7   : > { %3151 = vmatpush1.msra.mxu1 %v3070_v4  ;;  %3214 = vmatprep.mubr.f32.mxu1 %v25848_v0  ;;  %v3540_v20 = vpop.permute.xlu0 %3539  ;;  %v3547_v28 = vsel %vm1881_vm8, %v3542_v21, %v3534_v15 }
 0x2e8   : > { %24639 = vmatprep.subr.mxu1 %v25848_v0  ;;  %v3543_v23 = vsel %vm1881_vm8, %v3540_v20, %v3542_v21  ;;  %v3544_v26 = vsel %vm1881_vm8, %v3538_v14, %v3540_v20 }
 0x2ea   : > { %24011 = vmatmul.mubr.msk.f32.vlgmr.msra.gmra.mrb[2].mxu1 %vm476_vm1, %v24009_v1 }
 0x2eb   : > { %24640 = vmatpush3.msra.mxu1 %v3073_v5  ;;  %24641 = vmatprep.mubr.msk.f32.mxu1 %vm25857_vm4, %v25848_v0 }
 0x2ec   : > { %3316 = vmatprep.subr.mxu1 %v3308_v6 }
 0x2ee   : > { %24642 = vmatmul.mubr.msk.f32.vlgmr.msra.gmra.mrb[4].mxu1 %vm476_vm1, %v24009_v1 }
 0x2ef   : > { %3317 = vmatpush1.msra.mxu1 %v3309_v11  ;;  %3380 = vmatprep.mubr.f32.mxu1 %v25848_v0 }
 0x2f0   : > { %3387 = vmatprep.subr.mxu1 %v3306_v12  ;;  %v24026_v12 = vld [vmem:[%s29171_s3 + $0x78] sm:$0xff] }
 0x2f2   : > { %24014 = vmatmul.mubr.msk.f32.vlgmr.msra.gmra.mrb[0].mxu1 %vm476_vm1, %v24013_v13 }
 0x2f3   : > { %3388 = vmatpush1.msra.mxu1 %v3307_v17  ;;  %3451 = vmatprep.mubr.f32.mxu1 %v25848_v0 }
 0x2f4   : > { %24644 = vmatprep.subr.mxu1 %v25848_v0 }
 0x2f6   : > { %24015 = vmatmul.mubr.msk.f32.vlgmr.msra.gmra.mrb[2].mxu1 %vm476_vm1, %v24013_v13 }
 0x2f7   : > { %24645 = vmatpush3.msra.mxu1 %v3310_v18  ;;  %24646 = vmatprep.mubr.msk.f32.mxu1 %vm25857_vm4, %v25848_v0  ;;  %v2124_v29 = vpop.permute.xlu0 %2123 }
 0x2f8   : > { %3553 = vmatprep.subr.mxu1 %v3545_v19 }
 0x2fa   : > { %24647 = vmatmul.mubr.msk.f32.vlgmr.msra.gmra.mrb[4].mxu1 %vm476_vm1, %v24013_v13 }
 0x2fb   : > { %3554 = vmatpush1.msra.mxu1 %v3546_v22  ;;  %3617 = vmatprep.mubr.f32.mxu1 %v25848_v0 }
 0x2fc   : > { %3624 = vmatprep.subr.mxu1 %v3543_v23 }
 0x2fe   : > { %24018 = vmatmul.mubr.msk.f32.vlgmr.msra.gmra.mrb[0].mxu1 %vm476_vm1, %v24017_v24 }
 0x2ff   : > { %3625 = vmatpush1.msra.mxu1 %v3544_v26  ;;  %3688 = vmatprep.mubr.f32.mxu1 %v25848_v0 }
 0x300   : > { %24649 = vmatprep.subr.mxu1 %v25848_v0 }
 0x302   : > { %24019 = vmatmul.mubr.msk.f32.vlgmr.msra.gmra.mrb[2].mxu1 %vm476_vm1, %v24017_v24 }
 0x303   : > { %24650 = vmatpush3.msra.mxu1 %v3547_v28  ;;  %24651 = vmatprep.mubr.msk.f32.mxu1 %vm25857_vm4, %v25848_v0 }
 0x306   : > { %24652 = vmatmul.mubr.msk.f32.vlgmr.msra.gmra.mrb[4].mxu1 %vm476_vm1, %v24017_v24  ;;  %v24030_v24 = vld [vmem:[%s29171_s3 + $0x80] sm:$0xff] }
 0x307   : > { %5532 = vmatprep.mubr.f32.mxu1 %v25848_v0 }
 0x3d1   : > { %v3619_v30 = vpop.f32.mrb[0].mxu1 }
 0x3d2   : > { %v25079_v31 = vadd.f32 %v3619_v30, %v2124_v29  ;;  %v3621_v32 = vpop.f32.mrb[1].mxu1 }
 0x3d3   : > { %v25080_v34 = vadd.f32 %v3621_v32, %v2124_v29  ;;  %v24034_v32 = vld [vmem:[%s29171_s3 + $0x88] sm:$0xff] }
 0x3d4   : > { %v3770_v35 = vmax.f32 %v25079_v31, 0.0 }
 0x3d5   : > { %v3771_v36 = vmax.f32 %v25080_v34, 0.0  ;;  %v3690_v38 = vpop.f32.mrb[2].mxu1 }
 0x3d6   : > { %v26463_v39 = vmul.f32 %v26006_v25, %v3770_v35  ;;  %v25081_v40 = vadd.f32 %v3690_v38, %v2124_v29  ;;  %v3692_v41 = vpop.f32.mrb[3].mxu1 }
 0x3d7   : > { %v26466_v42 = vmul.f32 %v25996_v16, %v3771_v36  ;;  %v25082_v46 = vadd.f32 %v3692_v41, %v2124_v29 }
 0x3d8   : > { %v3772_v43 = vmax.f32 %v25081_v40, 0.0  ;;  %3787 = vrot.lane.b32.xlu1 %v26463_v39, %s25850_s0 }
 0x3d9   : > { %3789 = vrot.lane.b32.xlu0 %v26466_v42, %s25850_s0  ;;  %v3761_v44 = vpop.f32.mrb[4].mxu1  ;;  %v3773_v50 = vmax.f32 %v25082_v46, 0.0 }
 0x3da   : > { %v26473_v45 = vmul.f32 %v26009_v27, %v3772_v43  ;;  %v25083_v47 = vadd.f32 %v3761_v44, %v2124_v29  ;;  %v24653_v48 = vpop.f32.mrb[5].mxu1 }
 0x3db   : > { %v26485_v52 = vmul.f32 %v26031_v37, %v3773_v50 }
 0x3dc   : > { %v3774_v49 = vmax.f32 %v25083_v47, 0.0 }
 0x3dd   : > { %3791 = vrot.lane.b32.xlu0 %v26473_v45, %s25850_s0 }
 0x3de   : > { %v26478_v51 = vmul.f32 %v26022_v33, %v3774_v49 }
 0x3e0   : > { %3795 = vrot.lane.b32.xlu1 %v26478_v51, %s25850_s0 }
 0x3e1   : > { %4024 = vrot.lane.b32.xlu0 %v26463_v39, %s25851_s21 }
 0x3e4   : > { %3793 = vrot.lane.b32.xlu1 %v26485_v52, %s25850_s0 }
 0x3e5   : > { %4032 = vrot.lane.b32.xlu0 %v26478_v51, %s25851_s21 }
 0x3e8   : > { %4026 = vrot.lane.b32.xlu1 %v26466_v42, %s25851_s21 }
 0x3e9   : > { %4030 = vrot.lane.b32.xlu0 %v26485_v52, %s25851_s21 }
 0x3ec   : > { %4028 = vrot.lane.b32.xlu1 %v26473_v45, %s25851_s21 }
 0x3ed   : > { %4263 = vrot.lane.b32.xlu0 %v26466_v42, %s25852_s28 }
 0x3f0   : > { %4261 = vrot.lane.b32.xlu1 %v26463_v39, %s25852_s28 }
 0x3f1   : > { %4265 = vrot.lane.b32.xlu0 %v26473_v45, %s25852_s28 }
 0x3f4   : > { %4269 = vrot.lane.b32.xlu1 %v26478_v51, %s25852_s28 }
 0x3f5   : > { %4722 = vrot.lane.b32.xlu0 %v26466_v42, %s25853_s29 }
 0x3f8   : > { %4267 = vrot.lane.b32.xlu1 %v26485_v52, %s25852_s28 }
 0x3f9   : > { %4720 = vrot.lane.b32.xlu0 %v26463_v39, %s25853_s29 }
 0x3fc   : > { %4724 = vrot.lane.b32.xlu1 %v26473_v45, %s25853_s29 }
 0x3fd   : > { %4728 = vrot.lane.b32.xlu0 %v26478_v51, %s25853_s29 }
 0x400   : > { %4726 = vrot.lane.b32.xlu1 %v26485_v52, %s25853_s29 }
 0x401   : > { %4961 = vrot.lane.b32.xlu0 %v26473_v45, %s25854_s15 }
 0x404   : > { %4959 = vrot.lane.b32.xlu1 %v26466_v42, %s25854_s15 }
 0x405   : > { %4963 = vrot.lane.b32.xlu0 %v26485_v52, %s25854_s15 }
 0x408   : > { %4957 = vrot.lane.b32.xlu1 %v26463_v39, %s25854_s15 }
 0x409   : > { %5196 = vrot.lane.b32.xlu0 %v26466_v42, %s25855_s9 }
 0x40c   : > { %4965 = vrot.lane.b32.xlu1 %v26478_v51, %s25854_s15 }
 0x40d   : > { %5194 = vrot.lane.b32.xlu0 %v26463_v39, %s25855_s9 }
 0x410   : > { %5198 = vrot.lane.b32.xlu1 %v26473_v45, %s25855_s9 }
 0x411   : > { %5202 = vrot.lane.b32.xlu0 %v26478_v51, %s25855_s9 }
 0x414   : > { %5200 = vrot.lane.b32.xlu1 %v26485_v52, %s25855_s9 }
 0x418   : > { %3784 = vperm.xlu1 %25731, %v24021_v53  }
 0x44a   : > { %v3788_v54 = vpop.permute.xlu1 %3787 }
 0x44b   : > { %v3790_v55 = vpop.permute.xlu0 %3789 }
 0x44c   : > { %v3800_v56 = vsel %vm469_vm0, %v3788_v54, %v3790_v55 }
 0x44d   : > { %3807 = vmatprep.subr.mxu0 %v3800_v56 }
 0x44f   : > { %v3792_v57 = vpop.permute.xlu0 %3791 }
 0x450   : > { %v3799_v2 = vsel %vm469_vm0, %v3790_v55, %v3792_v57 }
 0x452   : > { %v3796_v58 = vpop.permute.xlu1 %3795 }
 0x453   : > { %v4025_v60 = vpop.permute.xlu0 %4024  ;;  %v3801_v61 = vsel %vm469_vm0, %v3796_v58, %v3788_v54 }
 0x454   : > { %3808 = vmatpush1.msra.mxu0 %v3801_v61 }
 0x455   : > { %24023 = vmatmul.mubr.msk.f32.vlgmr.msra.gmra.mrb[6].mxu0 %vm476_vm1, %v24022_v59 }
 0x456   : > { %v3794_v62 = vpop.permute.xlu1 %3793  ;;  %3942 = vmatprep.mubr.f32.mxu0 %v25848_v0 }
 0x457   : > { %v3798_v63 = vsel %vm469_vm0, %v3792_v57, %v3794_v62  ;;  %v4033_v1 = vpop.permute.xlu0 %4032  ;;  %v3797_v4 = vsel %vm469_vm0, %v3794_v62, %v3796_v58  ;;  %v24046_v62 = vld [vmem:[%s29171_s3 + $0xa0] sm:$0xff] }
 0x458   : > { %3878 = vmatprep.subr.mxu0 %v3798_v63  ;;  %v4038_v9 = vsel %vm707_vm2, %v4033_v1, %v4025_v60 }
 0x459   : > { %3879 = vmatpush1.msra.mxu0 %v3799_v2 }
 0x45a   : > { %24024 = vmatmul.mubr.msk.f32.vlgmr.msra.gmra.mrb[8].mxu0 %vm476_vm1, %v24022_v59  ;;  %24654 = vmatprep.subr.mxu0 %v25848_v0  ;;  %v4027_v3 = vpop.permute.xlu1 %4026 }
 0x45b   : > { %24655 = vmatpush3.msra.mxu0 %v3797_v4  ;;  %v4037_v5 = vsel %vm707_vm2, %v4025_v60, %v4027_v3  ;;  %24656 = vmatprep.mubr.msk.f32.mxu0 %vm25857_vm4, %v25848_v0  ;;  %v4031_v6 = vpop.permute.xlu0 %4030 }
 0x45c   : > { %4044 = vmatprep.subr.mxu0 %v4037_v5  ;;  %v4034_v17 = vsel %vm707_vm2, %v4031_v6, %v4033_v1 }
 0x45e   : > { %24657 = vmatmul.mubr.msk.f32.vlgmr.msra.gmra.mrb[10].mxu0 %vm476_vm1, %v24022_v59  ;;  %v4029_v10 = vpop.permute.xlu1 %4028 }
 0x45f   : > { %4045 = vmatpush1.msra.mxu0 %v4038_v9  ;;  %v4035_v11 = vsel %vm707_vm2, %v4029_v10, %v4031_v6  ;;  %4108 = vmatprep.mubr.f32.mxu0 %v25848_v0  ;;  %v4036_v13 = vsel %vm707_vm2, %v4027_v3, %v4029_v10  ;;  %v4264_v15 = vpop.permute.xlu0 %4263 }
 0x460   : > { %4115 = vmatprep.subr.mxu0 %v4035_v11 }
 0x462   : > { %24027 = vmatmul.mubr.msk.f32.vlgmr.msra.gmra.mrb[6].mxu0 %vm476_vm1, %v24026_v12  ;;  %v4262_v14 = vpop.permute.xlu1 %4261 }
 0x463   : > { %4116 = vmatpush1.msra.mxu0 %v4036_v13  ;;  %4179 = vmatprep.mubr.f32.mxu0 %v25848_v0  ;;  %v4274_v19 = vsel %vm945_vm5, %v4262_v14, %v4264_v15  ;;  %v4266_v20 = vpop.permute.xlu0 %4265 }
 0x464   : > { %24659 = vmatprep.subr.mxu0 %v25848_v0  ;;  %v4273_v26 = vsel %vm945_vm5, %v4264_v15, %v4266_v20 }
 0x466   : > { %24028 = vmatmul.mubr.msk.f32.vlgmr.msra.gmra.mrb[8].mxu0 %vm476_vm1, %v24026_v12  ;;  %v4270_v18 = vpop.permute.xlu1 %4269 }
 0x467   : > { %24660 = vmatpush3.msra.mxu0 %v4034_v17  ;;  %24661 = vmatprep.mubr.msk.f32.mxu0 %vm25857_vm4, %v25848_v0  ;;  %v4275_v21 = vsel %vm945_vm5, %v4270_v18, %v4262_v14  ;;  %v4723_v28 = vpop.permute.xlu0 %4722 }
 0x468   : > { %4281 = vmatprep.subr.mxu0 %v4274_v19 }
 0x46a   : > { %24662 = vmatmul.mubr.msk.f32.vlgmr.msra.gmra.mrb[10].mxu0 %vm476_vm1, %v24026_v12  ;;  %v4268_v22 = vpop.permute.xlu1 %4267 }
 0x46b   : > { %4282 = vmatpush1.msra.mxu0 %v4275_v21  ;;  %v4272_v23 = vsel %vm945_vm5, %v4266_v20, %v4268_v22  ;;  %4345 = vmatprep.mubr.f32.mxu0 %v25848_v0  ;;  %v4271_v29 = vsel %vm945_vm5, %v4268_v22, %v4270_v18  ;;  %v4721_v31 = vpop.permute.xlu0 %4720 }
 0x46c   : > { %4352 = vmatprep.subr.mxu0 %v4272_v23  ;;  %v4733_v40 = vsel %vm1405_vm6, %v4721_v31, %v4723_v28 }
 0x46e   : > { %24031 = vmatmul.mubr.msk.f32.vlgmr.msra.gmra.mrb[6].mxu0 %vm476_vm1, %v24030_v24  ;;  %v4725_v30 = vpop.permute.xlu1 %4724 }
 0x46f   : > { %4353 = vmatpush1.msra.mxu0 %v4273_v26  ;;  %4416 = vmatprep.mubr.f32.mxu0 %v25848_v0  ;;  %v4729_v35 = vpop.permute.xlu0 %4728  ;;  %v4732_v36 = vsel %vm1405_vm6, %v4723_v28, %v4725_v30 }
 0x470   : > { %24664 = vmatprep.subr.mxu0 %v25848_v0  ;;  %v4734_v46 = vsel %vm1405_vm6, %v4729_v35, %v4721_v31 }
 0x472   : > { %24032 = vmatmul.mubr.msk.f32.vlgmr.msra.gmra.mrb[8].mxu0 %vm476_vm1, %v24030_v24  ;;  %v4727_v34 = vpop.permute.xlu1 %4726 }
 0x473   : > { %24665 = vmatpush3.msra.mxu0 %v4271_v29  ;;  %24666 = vmatprep.mubr.msk.f32.mxu0 %vm25857_vm4, %v25848_v0  ;;  %v4730_v41 = vsel %vm1405_vm6, %v4727_v34, %v4729_v35  ;;  %v4731_v44 = vsel %vm1405_vm6, %v4725_v30, %v4727_v34  ;;  %v24050_v29 = vld [vmem:[%s29172_s4 + $0x18] sm:$0xff] }
 0x474   : > { %4503 = vmatprep.subr.mxu0 %v26466_v42  ;;  %v24038_v42 = vld [vmem:[%s29171_s3 + $0x90] sm:$0xff] }
 0x476   : > { %24667 = vmatmul.mubr.msk.f32.vlgmr.msra.gmra.mrb[10].mxu0 %vm476_vm1, %v24030_v24  ;;  %v4960_v38 = vpop.permute.xlu1 %4959 }
 0x477   : > { %4504 = vmatpush1.msra.mxu0 %v26463_v39  ;;  %4567 = vmatprep.mubr.f32.mxu0 %v25848_v0  ;;  %v4962_v39 = vpop.permute.xlu0 %4961 }
 0x478   : > { %4574 = vmatprep.subr.mxu0 %v26485_v52  ;;  %v4969_v47 = vsel %vm1643_vm7, %v4960_v38, %v4962_v39  ;;  %v24042_v52 = vld [vmem:[%s29171_s3 + $0x98] sm:$0xff] }
 0x47a   : > { %24035 = vmatmul.mubr.msk.f32.vlgmr.msra.gmra.mrb[6].mxu0 %vm476_vm1, %v24034_v32  ;;  %v4958_v43 = vpop.permute.xlu1 %4957 }
 0x47b   : > { %4575 = vmatpush1.msra.mxu0 %v26473_v45  ;;  %4638 = vmatprep.mubr.f32.mxu0 %v25848_v0  ;;  %v4964_v45 = vpop.permute.xlu0 %4963  ;;  %v4970_v50 = vsel %vm1643_vm7, %v4958_v43, %v4960_v38 }
 0x47c   : > { %24669 = vmatprep.subr.mxu0 %v25848_v0  ;;  %v4968_v54 = vsel %vm1643_vm7, %v4962_v39, %v4964_v45 }
 0x47e   : > { %24036 = vmatmul.mubr.msk.f32.vlgmr.msra.gmra.mrb[8].mxu0 %vm476_vm1, %v24034_v32  ;;  %v4966_v48 = vpop.permute.xlu1 %4965 }
 0x47f   : > { %24670 = vmatpush3.msra.mxu0 %v26478_v51  ;;  %24671 = vmatprep.mubr.msk.f32.mxu0 %vm25857_vm4, %v25848_v0  ;;  %v5197_v49 = vpop.permute.xlu0 %5196  ;;  %v4967_v51 = vsel %vm1643_vm7, %v4964_v45, %v4966_v48  ;;  %v4971_v56 = vsel %vm1643_vm7, %v4966_v48, %v4958_v43 }
 0x480   : > { %4740 = vmatprep.subr.mxu0 %v4732_v36  ;;  %v24051_v36 = vld [vmem:[%s29171_s3 + $0xa8] sm:$0xff] }
 0x482   : > { %24672 = vmatmul.mubr.msk.f32.vlgmr.msra.gmra.mrb[10].mxu0 %vm476_vm1, %v24034_v32  ;;  %v5199_v53 = vpop.permute.xlu1 %5198 }
 0x483   : > { %4741 = vmatpush1.msra.mxu0 %v4733_v40  ;;  %4804 = vmatprep.mubr.f32.mxu0 %v25848_v0  ;;  %v5195_v55 = vpop.permute.xlu0 %5194  ;;  %v5206_v57 = vsel %vm1881_vm8, %v5197_v49, %v5199_v53 }
 0x484   : > { %4811 = vmatprep.subr.mxu0 %v4730_v41  ;;  %v5207_v60 = vsel %vm1881_vm8, %v5195_v55, %v5197_v49 }
 0x486   : > { %24039 = vmatmul.mubr.msk.f32.vlgmr.msra.gmra.mrb[6].mxu0 %vm476_vm1, %v24038_v42  ;;  %v5201_v58 = vpop.permute.xlu1 %5200 }
 0x487   : > { %4812 = vmatpush1.msra.mxu0 %v4731_v44  ;;  %4875 = vmatprep.mubr.f32.mxu0 %v25848_v0  ;;  %v5203_v59 = vpop.permute.xlu0 %5202  ;;  %v5205_v63 = vsel %vm1881_vm8, %v5199_v53, %v5201_v58 }
 0x488   : > { %24674 = vmatprep.subr.mxu0 %v25848_v0  ;;  %v5204_v61 = vsel %vm1881_vm8, %v5201_v58, %v5203_v59  ;;  %v5208_v1 = vsel %vm1881_vm8, %v5203_v59, %v5195_v55 }
 0x48a   : > { %24040 = vmatmul.mubr.msk.f32.vlgmr.msra.gmra.mrb[8].mxu0 %vm476_vm1, %v24038_v42 }
 0x48b   : > { %24675 = vmatpush3.msra.mxu0 %v4734_v46  ;;  %24676 = vmatprep.mubr.msk.f32.mxu0 %vm25857_vm4, %v25848_v0 }
 0x48c   : > { %4977 = vmatprep.subr.mxu0 %v4969_v47 }
 0x48e   : > { %24677 = vmatmul.mubr.msk.f32.vlgmr.msra.gmra.mrb[10].mxu0 %vm476_vm1, %v24038_v42 }
 0x48f   : > { %4978 = vmatpush1.msra.mxu0 %v4970_v50  ;;  %5041 = vmatprep.mubr.f32.mxu0 %v25848_v0 }
 0x490   : > { %5048 = vmatprep.subr.mxu0 %v4967_v51  ;;  %v24055_v51 = vld [vmem:[%s29171_s3 + $0xb0] sm:$0xff] }
 0x492   : > { %24043 = vmatmul.mubr.msk.f32.vlgmr.msra.gmra.mrb[6].mxu0 %vm476_vm1, %v24042_v52 }
 0x493   : > { %5049 = vmatpush1.msra.mxu0 %v4968_v54  ;;  %5112 = vmatprep.mubr.f32.mxu0 %v25848_v0 }
 0x494   : > { %24679 = vmatprep.subr.mxu0 %v25848_v0 }
 0x496   : > { %24044 = vmatmul.mubr.msk.f32.vlgmr.msra.gmra.mrb[8].mxu0 %vm476_vm1, %v24042_v52 }
 0x497   : > { %24680 = vmatpush3.msra.mxu0 %v4971_v56  ;;  %24681 = vmatprep.mubr.msk.f32.mxu0 %vm25857_vm4, %v25848_v0  ;;  %v3785_v2 = vpop.permute.xlu1 %3784 }
 0x498   : > { %5214 = vmatprep.subr.mxu0 %v5206_v57 }
 0x49a   : > { %24682 = vmatmul.mubr.msk.f32.vlgmr.msra.gmra.mrb[10].mxu0 %vm476_vm1, %v24042_v52 }
 0x49b   : > { %5215 = vmatpush1.msra.mxu0 %v5207_v60  ;;  %5278 = vmatprep.mubr.f32.mxu0 %v25848_v0 }
 0x49c   : > { %5285 = vmatprep.subr.mxu0 %v5204_v61 }
 0x49e   : > { %24047 = vmatmul.mubr.msk.f32.vlgmr.msra.gmra.mrb[6].mxu0 %vm476_vm1, %v24046_v62 }
 0x49f   : > { %5286 = vmatpush1.msra.mxu0 %v5205_v63  ;;  %5349 = vmatprep.mubr.f32.mxu0 %v25848_v0 }
 0x4a0   : > { %24684 = vmatprep.subr.mxu0 %v25848_v0 }
 0x4a2   : > { %24048 = vmatmul.mubr.msk.f32.vlgmr.msra.gmra.mrb[8].mxu0 %vm476_vm1, %v24046_v62 }
 0x4a3   : > { %24685 = vmatpush3.msra.mxu0 %v5208_v1  ;;  %24686 = vmatprep.mubr.msk.f32.mxu0 %vm25857_vm4, %v25848_v0 }
 0x4a6   : > { %24687 = vmatmul.mubr.msk.f32.vlgmr.msra.gmra.mrb[10].mxu0 %vm476_vm1, %v24046_v62  ;;  %v24059_v62 = vld [vmem:[%s29171_s3 + $0xb8] sm:$0xff] }
 0x4a7   : > { %7193 = vmatprep.mubr.f32.mxu0 %v25848_v0 }
 0x571   : > { %v5280_v3 = vpop.f32.mrb[6].mxu0 }
 0x572   : > { %v25084_v4 = vadd.f32 %v5280_v3, %v3785_v2  ;;  %v5282_v5 = vpop.f32.mrb[7].mxu0 }
 0x573   : > { %v25085_v6 = vadd.f32 %v5282_v5, %v3785_v2  ;;  %v24063_v5 = vld [vmem:[%s29171_s3 + $0xc0] sm:$0xff] }
 0x574   : > { %v5431_v9 = vmax.f32 %v25084_v4, 0.0 }
 0x575   : > { %v5432_v10 = vmax.f32 %v25085_v6, 0.0  ;;  %v5351_v11 = vpop.f32.mrb[8].mxu0 }
 0x576   : > { %v26683_v12 = vmul.f32 %v26006_v25, %v5431_v9  ;;  %v25086_v13 = vadd.f32 %v5351_v11, %v3785_v2  ;;  %v5353_v14 = vpop.f32.mrb[9].mxu0 }
 0x577   : > { %v26686_v15 = vmul.f32 %v25996_v16, %v5432_v10  ;;  %v25087_v20 = vadd.f32 %v5353_v14, %v3785_v2 }
 0x578   : > { %v5433_v17 = vmax.f32 %v25086_v13, 0.0  ;;  %5448 = vrot.lane.b32.xlu0 %v26683_v12, %s25850_s0 }
 0x579   : > { %v5422_v18 = vpop.f32.mrb[10].mxu0  ;;  %5450 = vrot.lane.b32.xlu1 %v26686_v15, %s25850_s0  ;;  %v5434_v24 = vmax.f32 %v25087_v20, 0.0 }
 0x57a   : > { %v26693_v19 = vmul.f32 %v26009_v27, %v5433_v17  ;;  %v25088_v21 = vadd.f32 %v5422_v18, %v3785_v2  ;;  %v24688_v22 = vpop.f32.mrb[11].mxu0 }
 0x57b   : > { %v26705_v28 = vmul.f32 %v26031_v37, %v5434_v24 }
 0x57c   : > { %v5435_v23 = vmax.f32 %v25088_v21, 0.0 }
 0x57d   : > { %5452 = vrot.lane.b32.xlu1 %v26693_v19, %s25850_s0 }
 0x57e   : > { %v26698_v26 = vmul.f32 %v26022_v33, %v5435_v23 }
 0x580   : > { %5456 = vrot.lane.b32.xlu0 %v26698_v26, %s25850_s0 }
 0x581   : > { %5685 = vrot.lane.b32.xlu1 %v26683_v12, %s25851_s21 }
 0x584   : > { %5454 = vrot.lane.b32.xlu0 %v26705_v28, %s25850_s0 }
 0x585   : > { %5693 = vrot.lane.b32.xlu1 %v26698_v26, %s25851_s21 }
 0x588   : > { %5687 = vrot.lane.b32.xlu0 %v26686_v15, %s25851_s21 }
 0x589   : > { %5691 = vrot.lane.b32.xlu1 %v26705_v28, %s25851_s21 }
 0x58c   : > { %5689 = vrot.lane.b32.xlu0 %v26693_v19, %s25851_s21 }
 0x58d   : > { %5924 = vrot.lane.b32.xlu1 %v26686_v15, %s25852_s28 }
 0x590   : > { %5922 = vrot.lane.b32.xlu0 %v26683_v12, %s25852_s28 }
 0x591   : > { %5926 = vrot.lane.b32.xlu1 %v26693_v19, %s25852_s28 }
 0x594   : > { %5930 = vrot.lane.b32.xlu0 %v26698_v26, %s25852_s28 }
 0x595   : > { %6383 = vrot.lane.b32.xlu1 %v26686_v15, %s25853_s29 }
 0x598   : > { %5928 = vrot.lane.b32.xlu0 %v26705_v28, %s25852_s28 }
 0x599   : > { %6381 = vrot.lane.b32.xlu1 %v26683_v12, %s25853_s29 }
 0x59c   : > { %6385 = vrot.lane.b32.xlu0 %v26693_v19, %s25853_s29 }
 0x59d   : > { %6389 = vrot.lane.b32.xlu1 %v26698_v26, %s25853_s29 }
 0x5a0   : > { %6387 = vrot.lane.b32.xlu0 %v26705_v28, %s25853_s29 }
 0x5a1   : > { %6622 = vrot.lane.b32.xlu1 %v26693_v19, %s25854_s15 }
 0x5a4   : > { %6620 = vrot.lane.b32.xlu0 %v26686_v15, %s25854_s15 }
 0x5a5   : > { %6624 = vrot.lane.b32.xlu1 %v26705_v28, %s25854_s15 }
 0x5a8   : > { %6618 = vrot.lane.b32.xlu0 %v26683_v12, %s25854_s15 }
 0x5a9   : > { %6857 = vrot.lane.b32.xlu1 %v26686_v15, %s25855_s9 }
 0x5ac   : > { %6626 = vrot.lane.b32.xlu0 %v26698_v26, %s25854_s15 }
 0x5ad   : > { %6855 = vrot.lane.b32.xlu1 %v26683_v12, %s25855_s9 }
 0x5b0   : > { %6859 = vrot.lane.b32.xlu0 %v26693_v19, %s25855_s9 }
 0x5b1   : > { %6863 = vrot.lane.b32.xlu1 %v26698_v26, %s25855_s9 }
 0x5b4   : > { %6861 = vrot.lane.b32.xlu0 %v26705_v28, %s25855_s9 }
 0x5b8   : > { %5445 = vperm.xlu0 %25730, %v24050_v29  }
 0x5ea   : > { %v5449_v30 = vpop.permute.xlu0 %5448 }
 0x5eb   : > { %v5451_v31 = vpop.permute.xlu1 %5450 }
 0x5ec   : > { %v5461_v32 = vsel %vm469_vm0, %v5449_v30, %v5451_v31 }
 0x5ed   : > { %5468 = vmatprep.subr.mxu1 %v5461_v32 }
 0x5ef   : > { %v5453_v34 = vpop.permute.xlu1 %5452 }
 0x5f0   : > { %v5460_v43 = vsel %vm469_vm0, %v5451_v31, %v5453_v34 }
 0x5f2   : > { %v5457_v35 = vpop.permute.xlu0 %5456 }
 0x5f3   : > { %v5686_v38 = vpop.permute.xlu1 %5685  ;;  %v5462_v39 = vsel %vm469_vm0, %v5457_v35, %v5449_v30 }
 0x5f4   : > { %5469 = vmatpush1.msra.mxu1 %v5462_v39 }
 0x5f5   : > { %24052 = vmatmul.mubr.msk.f32.vlgmr.msra.gmra.mrb[6].mxu1 %vm476_vm1, %v24051_v36 }
 0x5f6   : > { %v5455_v40 = vpop.permute.xlu0 %5454  ;;  %5603 = vmatprep.mubr.f32.mxu1 %v25848_v0 }
 0x5f7   : > { %v5459_v41 = vsel %vm469_vm0, %v5453_v34, %v5455_v40  ;;  %v5694_v42 = vpop.permute.xlu1 %5693  ;;  %v5458_v45 = vsel %vm469_vm0, %v5455_v40, %v5457_v35  ;;  %v24075_v40 = vld [vmem:[%s29171_s3 + $0xd8] sm:$0xff] }
 0x5f8   : > { %5539 = vmatprep.subr.mxu1 %v5459_v41  ;;  %v5699_v48 = vsel %vm707_vm2, %v5694_v42, %v5686_v38 }
 0x5f9   : > { %5540 = vmatpush1.msra.mxu1 %v5460_v43 }
 0x5fa   : > { %24053 = vmatmul.mubr.msk.f32.vlgmr.msra.gmra.mrb[8].mxu1 %vm476_vm1, %v24051_v36  ;;  %24689 = vmatprep.subr.mxu1 %v25848_v0  ;;  %v5688_v44 = vpop.permute.xlu0 %5687 }
 0x5fb   : > { %24690 = vmatpush3.msra.mxu1 %v5458_v45  ;;  %v5698_v46 = vsel %vm707_vm2, %v5686_v38, %v5688_v44  ;;  %24691 = vmatprep.mubr.msk.f32.mxu1 %vm25857_vm4, %v25848_v0  ;;  %v5692_v47 = vpop.permute.xlu1 %5691 }
 0x5fc   : > { %5705 = vmatprep.subr.mxu1 %v5698_v46  ;;  %v5695_v55 = vsel %vm707_vm2, %v5692_v47, %v5694_v42 }
 0x5fe   : > { %24692 = vmatmul.mubr.msk.f32.vlgmr.msra.gmra.mrb[10].mxu1 %vm476_vm1, %v24051_v36  ;;  %v5690_v49 = vpop.permute.xlu0 %5689 }
 0x5ff   : > { %5706 = vmatpush1.msra.mxu1 %v5699_v48  ;;  %v5696_v50 = vsel %vm707_vm2, %v5690_v49, %v5692_v47  ;;  %5769 = vmatprep.mubr.f32.mxu1 %v25848_v0  ;;  %v5697_v52 = vsel %vm707_vm2, %v5688_v44, %v5690_v49  ;;  %v5925_v54 = vpop.permute.xlu1 %5924 }
 0x600   : > { %5776 = vmatprep.subr.mxu1 %v5696_v50 }
 0x602   : > { %24056 = vmatmul.mubr.msk.f32.vlgmr.msra.gmra.mrb[6].mxu1 %vm476_vm1, %v24055_v51  ;;  %v5923_v53 = vpop.permute.xlu0 %5922 }
 0x603   : > { %5777 = vmatpush1.msra.mxu1 %v5697_v52  ;;  %5840 = vmatprep.mubr.f32.mxu1 %v25848_v0  ;;  %v5935_v57 = vsel %vm945_vm5, %v5923_v53, %v5925_v54  ;;  %v5927_v58 = vpop.permute.xlu1 %5926 }
 0x604   : > { %24694 = vmatprep.subr.mxu1 %v25848_v0  ;;  %v5934_v63 = vsel %vm945_vm5, %v5925_v54, %v5927_v58 }
 0x606   : > { %24057 = vmatmul.mubr.msk.f32.vlgmr.msra.gmra.mrb[8].mxu1 %vm476_vm1, %v24055_v51  ;;  %v5931_v56 = vpop.permute.xlu0 %5930 }
 0x607   : > { %24695 = vmatpush3.msra.mxu1 %v5695_v55  ;;  %24696 = vmatprep.mubr.msk.f32.mxu1 %vm25857_vm4, %v25848_v0  ;;  %v5936_v59 = vsel %vm945_vm5, %v5931_v56, %v5923_v53  ;;  %v6384_v1 = vpop.permute.xlu1 %6383 }
 0x608   : > { %5942 = vmatprep.subr.mxu1 %v5935_v57 }
 0x60a   : > { %24697 = vmatmul.mubr.msk.f32.vlgmr.msra.gmra.mrb[10].mxu1 %vm476_vm1, %v24055_v51  ;;  %v5929_v60 = vpop.permute.xlu0 %5928 }
 0x60b   : > { %5943 = vmatpush1.msra.mxu1 %v5936_v59  ;;  %v5933_v61 = vsel %vm945_vm5, %v5927_v58, %v5929_v60  ;;  %6006 = vmatprep.mubr.f32.mxu1 %v25848_v0  ;;  %v5932_v2 = vsel %vm945_vm5, %v5929_v60, %v5931_v56  ;;  %v6382_v4 = vpop.permute.xlu1 %6381 }
 0x60c   : > { %6013 = vmatprep.subr.mxu1 %v5933_v61  ;;  %v6394_v13 = vsel %vm1405_vm6, %v6382_v4, %v6384_v1 }
 0x60e   : > { %24060 = vmatmul.mubr.msk.f32.vlgmr.msra.gmra.mrb[6].mxu1 %vm476_vm1, %v24059_v62  ;;  %v6386_v3 = vpop.permute.xlu0 %6385 }
 0x60f   : > { %6014 = vmatpush1.msra.mxu1 %v5934_v63  ;;  %6077 = vmatprep.mubr.f32.mxu1 %v25848_v0  ;;  %v6390_v9 = vpop.permute.xlu1 %6389  ;;  %v6393_v10 = vsel %vm1405_vm6, %v6384_v1, %v6386_v3 }
 0x610   : > { %24699 = vmatprep.subr.mxu1 %v25848_v0  ;;  %v6395_v20 = vsel %vm1405_vm6, %v6390_v9, %v6382_v4 }
 0x612   : > { %24061 = vmatmul.mubr.msk.f32.vlgmr.msra.gmra.mrb[8].mxu1 %vm476_vm1, %v24059_v62  ;;  %v6388_v6 = vpop.permute.xlu0 %6387 }
 0x613   : > { %24700 = vmatpush3.msra.mxu1 %v5932_v2  ;;  %24701 = vmatprep.mubr.msk.f32.mxu1 %vm25857_vm4, %v25848_v0  ;;  %v6391_v14 = vsel %vm1405_vm6, %v6388_v6, %v6390_v9  ;;  %v6392_v18 = vsel %vm1405_vm6, %v6386_v3, %v6388_v6  ;;  %v24079_v2 = vld [vmem:[%s29172_s4 + $0x20] sm:$0xff] }
 0x614   : > { %6164 = vmatprep.subr.mxu1 %v26686_v15  ;;  %v24067_v15 = vld [vmem:[%s29171_s3 + $0xc8] sm:$0xff] }
 0x616   : > { %24702 = vmatmul.mubr.msk.f32.vlgmr.msra.gmra.mrb[10].mxu1 %vm476_vm1, %v24059_v62  ;;  %v6621_v11 = vpop.permute.xlu0 %6620 }
 0x617   : > { %6165 = vmatpush1.msra.mxu1 %v26683_v12  ;;  %6228 = vmatprep.mubr.f32.mxu1 %v25848_v0  ;;  %v6623_v12 = vpop.permute.xlu1 %6622 }
 0x618   : > { %6235 = vmatprep.subr.mxu1 %v26705_v28  ;;  %v6630_v21 = vsel %vm1643_vm7, %v6621_v11, %v6623_v12  ;;  %v24071_v28 = vld [vmem:[%s29171_s3 + $0xd0] sm:$0xff] }
 0x61a   : > { %24064 = vmatmul.mubr.msk.f32.vlgmr.msra.gmra.mrb[6].mxu1 %vm476_vm1, %v24063_v5  ;;  %v6619_v17 = vpop.permute.xlu0 %6618 }
 0x61b   : > { %6236 = vmatpush1.msra.mxu1 %v26693_v19  ;;  %6299 = vmatprep.mubr.f32.mxu1 %v25848_v0  ;;  %v6625_v19 = vpop.permute.xlu1 %6624  ;;  %v6631_v24 = vsel %vm1643_vm7, %v6619_v17, %v6621_v11 }
 0x61c   : > { %24704 = vmatprep.subr.mxu1 %v25848_v0  ;;  %v6629_v30 = vsel %vm1643_vm7, %v6623_v12, %v6625_v19 }
 0x61e   : > { %24065 = vmatmul.mubr.msk.f32.vlgmr.msra.gmra.mrb[8].mxu1 %vm476_vm1, %v24063_v5  ;;  %v6627_v22 = vpop.permute.xlu0 %6626 }
 0x61f   : > { %24705 = vmatpush3.msra.mxu1 %v26698_v26  ;;  %24706 = vmatprep.mubr.msk.f32.mxu1 %vm25857_vm4, %v25848_v0  ;;  %v6858_v23 = vpop.permute.xlu1 %6857  ;;  %v6628_v26 = vsel %vm1643_vm7, %v6625_v19, %v6627_v22  ;;  %v6632_v32 = vsel %vm1643_vm7, %v6627_v22, %v6619_v17 }
 0x620   : > { %6401 = vmatprep.subr.mxu1 %v6393_v10  ;;  %v24080_v10 = vld [vmem:[%s29171_s3 + $0xe0] sm:$0xff] }
 0x622   : > { %24707 = vmatmul.mubr.msk.f32.vlgmr.msra.gmra.mrb[10].mxu1 %vm476_vm1, %v24063_v5  ;;  %v6860_v29 = vpop.permute.xlu0 %6859 }
 0x623   : > { %6402 = vmatpush1.msra.mxu1 %v6394_v13  ;;  %6465 = vmatprep.mubr.f32.mxu1 %v25848_v0  ;;  %v6856_v31 = vpop.permute.xlu1 %6855  ;;  %v6867_v34 = vsel %vm1881_vm8, %v6858_v23, %v6860_v29 }
 0x624   : > { %6472 = vmatprep.subr.mxu1 %v6391_v14  ;;  %v6868_v38 = vsel %vm1881_vm8, %v6856_v31, %v6858_v23 }
 0x626   : > { %24068 = vmatmul.mubr.msk.f32.vlgmr.msra.gmra.mrb[6].mxu1 %vm476_vm1, %v24067_v15  ;;  %v6862_v35 = vpop.permute.xlu0 %6861 }
 0x627   : > { %6473 = vmatpush1.msra.mxu1 %v6392_v18  ;;  %6536 = vmatprep.mubr.f32.mxu1 %v25848_v0  ;;  %v6864_v36 = vpop.permute.xlu1 %6863  ;;  %v6866_v41 = vsel %vm1881_vm8, %v6860_v29, %v6862_v35 }
 0x628   : > { %24709 = vmatprep.subr.mxu1 %v25848_v0  ;;  %v6865_v39 = vsel %vm1881_vm8, %v6862_v35, %v6864_v36  ;;  %v6869_v42 = vsel %vm1881_vm8, %v6864_v36, %v6856_v31 }
 0x62a   : > { %24069 = vmatmul.mubr.msk.f32.vlgmr.msra.gmra.mrb[8].mxu1 %vm476_vm1, %v24067_v15 }
 0x62b   : > { %24710 = vmatpush3.msra.mxu1 %v6395_v20  ;;  %24711 = vmatprep.mubr.msk.f32.mxu1 %vm25857_vm4, %v25848_v0 }
 0x62c   : > { %6638 = vmatprep.subr.mxu1 %v6630_v21 }
 0x62e   : > { %24712 = vmatmul.mubr.msk.f32.vlgmr.msra.gmra.mrb[10].mxu1 %vm476_vm1, %v24067_v15 }
 0x62f   : > { %6639 = vmatpush1.msra.mxu1 %v6631_v24  ;;  %6702 = vmatprep.mubr.f32.mxu1 %v25848_v0 }
 0x630   : > { %6709 = vmatprep.subr.mxu1 %v6628_v26  ;;  %v24084_v26 = vld [vmem:[%s29171_s3 + $0xe8] sm:$0xff] }
 0x632   : > { %24072 = vmatmul.mubr.msk.f32.vlgmr.msra.gmra.mrb[6].mxu1 %vm476_vm1, %v24071_v28 }
 0x633   : > { %6710 = vmatpush1.msra.mxu1 %v6629_v30  ;;  %6773 = vmatprep.mubr.f32.mxu1 %v25848_v0 }
 0x634   : > { %24714 = vmatprep.subr.mxu1 %v25848_v0 }
 0x636   : > { %24073 = vmatmul.mubr.msk.f32.vlgmr.msra.gmra.mrb[8].mxu1 %vm476_vm1, %v24071_v28 }
 0x637   : > { %24715 = vmatpush3.msra.mxu1 %v6632_v32  ;;  %24716 = vmatprep.mubr.msk.f32.mxu1 %vm25857_vm4, %v25848_v0  ;;  %v5446_v43 = vpop.permute.xlu0 %5445 }
 0x638   : > { %6875 = vmatprep.subr.mxu1 %v6867_v34 }
 0x63a   : > { %24717 = vmatmul.mubr.msk.f32.vlgmr.msra.gmra.mrb[10].mxu1 %vm476_vm1, %v24071_v28 }
 0x63b   : > { %6876 = vmatpush1.msra.mxu1 %v6868_v38  ;;  %6939 = vmatprep.mubr.f32.mxu1 %v25848_v0 }
 0x63c   : > { %6946 = vmatprep.subr.mxu1 %v6865_v39 }
 0x63e   : > { %24076 = vmatmul.mubr.msk.f32.vlgmr.msra.gmra.mrb[6].mxu1 %vm476_vm1, %v24075_v40 }
 0x63f   : > { %6947 = vmatpush1.msra.mxu1 %v6866_v41  ;;  %7010 = vmatprep.mubr.f32.mxu1 %v25848_v0 }
 0x640   : > { %24719 = vmatprep.subr.mxu1 %v25848_v0 }
 0x642   : > { %24077 = vmatmul.mubr.msk.f32.vlgmr.msra.gmra.mrb[8].mxu1 %vm476_vm1, %v24075_v40 }
 0x643   : > { %24720 = vmatpush3.msra.mxu1 %v6869_v42  ;;  %24721 = vmatprep.mubr.msk.f32.mxu1 %vm25857_vm4, %v25848_v0 }
 0x646   : > { %24722 = vmatmul.mubr.msk.f32.vlgmr.msra.gmra.mrb[10].mxu1 %vm476_vm1, %v24075_v40  ;;  %v24088_v40 = vld [vmem:[%s29171_s3 + $0xf0] sm:$0xff] }
 0x647   : > { %8854 = vmatprep.mubr.f32.mxu1 %v25848_v0 }
 0x711   : > { %v6941_v44 = vpop.f32.mrb[6].mxu1 }
 0x712   : > { %v25089_v45 = vadd.f32 %v6941_v44, %v5446_v43  ;;  %v6943_v46 = vpop.f32.mrb[7].mxu1 }
 0x713   : > { %v25090_v47 = vadd.f32 %v6943_v46, %v5446_v43  ;;  %v24092_v46 = vld [vmem:[%s29171_s3 + $0xf8] sm:$0xff] }
 0x714   : > { %v7092_v48 = vmax.f32 %v25089_v45, 0.0 }
 0x715   : > { %v7093_v49 = vmax.f32 %v25090_v47, 0.0  ;;  %v7012_v50 = vpop.f32.mrb[8].mxu1 }
 0x716   : > { %v26903_v51 = vmul.f32 %v26006_v25, %v7092_v48  ;;  %v25091_v52 = vadd.f32 %v7012_v50, %v5446_v43  ;;  %v7014_v53 = vpop.f32.mrb[9].mxu1 }
 0x717   : > { %v26906_v54 = vmul.f32 %v25996_v16, %v7093_v49  ;;  %v25092_v58 = vadd.f32 %v7014_v53, %v5446_v43 }
 0x718   : > { %v7094_v55 = vmax.f32 %v25091_v52, 0.0  ;;  %7109 = vrot.lane.b32.xlu1 %v26903_v51, %s25850_s0 }
 0x719   : > { %v7083_v56 = vpop.f32.mrb[10].mxu1  ;;  %7111 = vrot.lane.b32.xlu0 %v26906_v54, %s25850_s0  ;;  %v7095_v62 = vmax.f32 %v25092_v58, 0.0 }
 0x71a   : > { %v26913_v57 = vmul.f32 %v26009_v27, %v7094_v55  ;;  %v25093_v59 = vadd.f32 %v7083_v56, %v5446_v43  ;;  %v24723_v60 = vpop.f32.mrb[11].mxu1 }
 0x71b   : > { %v26925_v1 = vmul.f32 %v26031_v37, %v7095_v62 }
 0x71c   : > { %v7096_v61 = vmax.f32 %v25093_v59, 0.0 }
 0x71d   : > { %7113 = vrot.lane.b32.xlu0 %v26913_v57, %s25850_s0 }
 0x71e   : > { %v26918_v63 = vmul.f32 %v26022_v33, %v7096_v61 }
 0x720   : > { %7117 = vrot.lane.b32.xlu1 %v26918_v63, %s25850_s0 }
 0x721   : > { %7346 = vrot.lane.b32.xlu0 %v26903_v51, %s25851_s21 }
 0x724   : > { %7115 = vrot.lane.b32.xlu1 %v26925_v1, %s25850_s0 }
 0x725   : > { %7354 = vrot.lane.b32.xlu0 %v26918_v63, %s25851_s21 }
 0x728   : > { %7348 = vrot.lane.b32.xlu1 %v26906_v54, %s25851_s21 }
 0x729   : > { %7352 = vrot.lane.b32.xlu0 %v26925_v1, %s25851_s21 }
 0x72c   : > { %7350 = vrot.lane.b32.xlu1 %v26913_v57, %s25851_s21 }
 0x72d   : > { %7585 = vrot.lane.b32.xlu0 %v26906_v54, %s25852_s28 }
 0x730   : > { %7583 = vrot.lane.b32.xlu1 %v26903_v51, %s25852_s28 }
 0x731   : > { %7587 = vrot.lane.b32.xlu0 %v26913_v57, %s25852_s28 }
 0x734   : > { %7591 = vrot.lane.b32.xlu1 %v26918_v63, %s25852_s28 }
 0x735   : > { %8044 = vrot.lane.b32.xlu0 %v26906_v54, %s25853_s29 }
 0x738   : > { %7589 = vrot.lane.b32.xlu1 %v26925_v1, %s25852_s28 }
 0x739   : > { %8042 = vrot.lane.b32.xlu0 %v26903_v51, %s25853_s29 }
 0x73c   : > { %8046 = vrot.lane.b32.xlu1 %v26913_v57, %s25853_s29 }
 0x73d   : > { %8050 = vrot.lane.b32.xlu0 %v26918_v63, %s25853_s29 }
 0x740   : > { %8048 = vrot.lane.b32.xlu1 %v26925_v1, %s25853_s29 }
 0x741   : > { %8283 = vrot.lane.b32.xlu0 %v26913_v57, %s25854_s15 }
 0x744   : > { %8281 = vrot.lane.b32.xlu1 %v26906_v54, %s25854_s15 }
 0x745   : > { %8285 = vrot.lane.b32.xlu0 %v26925_v1, %s25854_s15 }
 0x748   : > { %8279 = vrot.lane.b32.xlu1 %v26903_v51, %s25854_s15 }
 0x749   : > { %8518 = vrot.lane.b32.xlu0 %v26906_v54, %s25855_s9 }
 0x74c   : > { %8287 = vrot.lane.b32.xlu1 %v26918_v63, %s25854_s15 }
 0x74d   : > { %8516 = vrot.lane.b32.xlu0 %v26903_v51, %s25855_s9 }
 0x750   : > { %8520 = vrot.lane.b32.xlu1 %v26913_v57, %s25855_s9 }
 0x751   : > { %8524 = vrot.lane.b32.xlu0 %v26918_v63, %s25855_s9 }
 0x754   : > { %8522 = vrot.lane.b32.xlu1 %v26925_v1, %s25855_s9 }
 0x758   : > { %7106 = vperm.xlu1 %25731, %v24079_v2  }
 0x78a   : > { %v7110_v3 = vpop.permute.xlu1 %7109 }
 0x78b   : > { %v7112_v4 = vpop.permute.xlu0 %7111 }
 0x78c   : > { %v7122_v5 = vsel %vm469_vm0, %v7110_v3, %v7112_v4 }
 0x78d   : > { %7129 = vmatprep.subr.mxu0 %v7122_v5 }
 0x78f   : > { %v7114_v6 = vpop.permute.xlu0 %7113 }
 0x790   : > { %v7121_v17 = vsel %vm469_vm0, %v7112_v4, %v7114_v6 }
 0x792   : > { %v7118_v9 = vpop.permute.xlu1 %7117 }
 0x793   : > { %v7347_v11 = vpop.permute.xlu0 %7346  ;;  %v7123_v12 = vsel %vm469_vm0, %v7118_v9, %v7110_v3 }
 0x794   : > { %7130 = vmatpush1.msra.mxu0 %v7123_v12 }
 0x795   : > { %24081 = vmatmul.mubr.msk.f32.vlgmr.msra.gmra.mrb[12].mxu0 %vm476_vm1, %v24080_v10 }
 0x796   : > { %v7116_v13 = vpop.permute.xlu1 %7115  ;;  %7264 = vmatprep.mubr.f32.mxu0 %v25848_v0 }
 0x797   : > { %v7120_v14 = vsel %vm469_vm0, %v7114_v6, %v7116_v13  ;;  %v7355_v15 = vpop.permute.xlu0 %7354  ;;  %v7119_v19 = vsel %vm469_vm0, %v7116_v13, %v7118_v9  ;;  %v24104_v13 = vld [vmem:[%s29171_s3 + $0x110] sm:$0xff] }
 0x798   : > { %7200 = vmatprep.subr.mxu0 %v7120_v14  ;;  %v7360_v22 = vsel %vm707_vm2, %v7355_v15, %v7347_v11 }
 0x799   : > { %7201 = vmatpush1.msra.mxu0 %v7121_v17 }
 0x79a   : > { %24082 = vmatmul.mubr.msk.f32.vlgmr.msra.gmra.mrb[14].mxu0 %vm476_vm1, %v24080_v10  ;;  %24724 = vmatprep.subr.mxu0 %v25848_v0  ;;  %v7349_v18 = vpop.permute.xlu1 %7348 }
 0x79b   : > { %24725 = vmatpush3.msra.mxu0 %v7119_v19  ;;  %v7359_v20 = vsel %vm707_vm2, %v7347_v11, %v7349_v18  ;;  %24726 = vmatprep.mubr.msk.f32.mxu0 %vm25857_vm4, %v25848_v0  ;;  %v7353_v21 = vpop.permute.xlu0 %7352 }
 0x79c   : > { %7366 = vmatprep.subr.mxu0 %v7359_v20  ;;  %v7356_v31 = vsel %vm707_vm2, %v7353_v21, %v7355_v15 }
 0x79e   : > { %24727 = vmatmul.mubr.msk.f32.vlgmr.msra.gmra.mrb[16].mxu0 %vm476_vm1, %v24080_v10  ;;  %v7351_v23 = vpop.permute.xlu1 %7350 }
 0x79f   : > { %7367 = vmatpush1.msra.mxu0 %v7360_v22  ;;  %v7357_v24 = vsel %vm707_vm2, %v7351_v23, %v7353_v21  ;;  %7430 = vmatprep.mubr.f32.mxu0 %v25848_v0  ;;  %v7358_v28 = vsel %vm707_vm2, %v7349_v18, %v7351_v23  ;;  %v7586_v30 = vpop.permute.xlu0 %7585 }
 0x7a0   : > { %7437 = vmatprep.subr.mxu0 %v7357_v24 }
 0x7a2   : > { %24085 = vmatmul.mubr.msk.f32.vlgmr.msra.gmra.mrb[12].mxu0 %vm476_vm1, %v24084_v26  ;;  %v7584_v29 = vpop.permute.xlu1 %7583 }
 0x7a3   : > { %7438 = vmatpush1.msra.mxu0 %v7358_v28  ;;  %7501 = vmatprep.mubr.f32.mxu0 %v25848_v0  ;;  %v7596_v34 = vsel %vm945_vm5, %v7584_v29, %v7586_v30  ;;  %v7588_v35 = vpop.permute.xlu0 %7587 }
 0x7a4   : > { %24729 = vmatprep.subr.mxu0 %v25848_v0  ;;  %v7595_v41 = vsel %vm945_vm5, %v7586_v30, %v7588_v35 }
 0x7a6   : > { %24086 = vmatmul.mubr.msk.f32.vlgmr.msra.gmra.mrb[14].mxu0 %vm476_vm1, %v24084_v26  ;;  %v7592_v32 = vpop.permute.xlu1 %7591 }
 0x7a7   : > { %24730 = vmatpush3.msra.mxu0 %v7356_v31  ;;  %24731 = vmatprep.mubr.msk.f32.mxu0 %vm25857_vm4, %v25848_v0  ;;  %v7597_v36 = vsel %vm945_vm5, %v7592_v32, %v7584_v29  ;;  %v8045_v42 = vpop.permute.xlu0 %8044 }
 0x7a8   : > { %7603 = vmatprep.subr.mxu0 %v7596_v34 }
 0x7aa   : > { %24732 = vmatmul.mubr.msk.f32.vlgmr.msra.gmra.mrb[16].mxu0 %vm476_vm1, %v24084_v26  ;;  %v7590_v38 = vpop.permute.xlu1 %7589 }
 0x7ab   : > { %7604 = vmatpush1.msra.mxu0 %v7597_v36  ;;  %v7594_v39 = vsel %vm945_vm5, %v7588_v35, %v7590_v38  ;;  %7667 = vmatprep.mubr.f32.mxu0 %v25848_v0  ;;  %v7593_v43 = vsel %vm945_vm5, %v7590_v38, %v7592_v32  ;;  %v8043_v45 = vpop.permute.xlu0 %8042 }
 0x7ac   : > { %7674 = vmatprep.subr.mxu0 %v7594_v39  ;;  %v8055_v52 = vsel %vm1405_vm6, %v8043_v45, %v8045_v42 }
 0x7ae   : > { %24089 = vmatmul.mubr.msk.f32.vlgmr.msra.gmra.mrb[12].mxu0 %vm476_vm1, %v24088_v40  ;;  %v8047_v44 = vpop.permute.xlu1 %8046 }
 0x7af   : > { %7675 = vmatpush1.msra.mxu0 %v7595_v41  ;;  %7738 = vmatprep.mubr.f32.mxu0 %v25848_v0  ;;  %v8051_v48 = vpop.permute.xlu0 %8050  ;;  %v8054_v49 = vsel %vm1405_vm6, %v8045_v42, %v8047_v44 }
 0x7b0   : > { %24734 = vmatprep.subr.mxu0 %v25848_v0  ;;  %v8056_v58 = vsel %vm1405_vm6, %v8051_v48, %v8043_v45 }
 0x7b2   : > { %24090 = vmatmul.mubr.msk.f32.vlgmr.msra.gmra.mrb[14].mxu0 %vm476_vm1, %v24088_v40  ;;  %v8049_v47 = vpop.permute.xlu1 %8048 }
 0x7b3   : > { %24735 = vmatpush3.msra.mxu0 %v7593_v43  ;;  %24736 = vmatprep.mubr.msk.f32.mxu0 %vm25857_vm4, %v25848_v0  ;;  %v8052_v53 = vsel %vm1405_vm6, %v8049_v47, %v8051_v48  ;;  %v8053_v56 = vsel %vm1405_vm6, %v8047_v44, %v8049_v47  ;;  %v24108_v43 = vld [vmem:[%s29172_s4 + $0x28] sm:$0xff] }
 0x7b4   : > { %7825 = vmatprep.subr.mxu0 %v26906_v54  ;;  %v24096_v54 = vld [vmem:[%s29171_s3 + $0x100] sm:$0xff] }
 0x7b6   : > { %24737 = vmatmul.mubr.msk.f32.vlgmr.msra.gmra.mrb[16].mxu0 %vm476_vm1, %v24088_v40  ;;  %v8282_v50 = vpop.permute.xlu1 %8281 }
 0x7b7   : > { %7826 = vmatpush1.msra.mxu0 %v26903_v51  ;;  %7889 = vmatprep.mubr.f32.mxu0 %v25848_v0  ;;  %v8284_v51 = vpop.permute.xlu0 %8283 }
 0x7b8   : > { %7896 = vmatprep.subr.mxu0 %v26925_v1  ;;  %v8291_v59 = vsel %vm1643_vm7, %v8282_v50, %v8284_v51  ;;  %v24100_v1 = vld [vmem:[%s29171_s3 + $0x108] sm:$0xff] }
 0x7ba   : > { %24093 = vmatmul.mubr.msk.f32.vlgmr.msra.gmra.mrb[12].mxu0 %vm476_vm1, %v24092_v46  ;;  %v8280_v55 = vpop.permute.xlu1 %8279 }
 0x7bb   : > { %7897 = vmatpush1.msra.mxu0 %v26913_v57  ;;  %7960 = vmatprep.mubr.f32.mxu0 %v25848_v0  ;;  %v8286_v57 = vpop.permute.xlu0 %8285  ;;  %v8292_v62 = vsel %vm1643_vm7, %v8280_v55, %v8282_v50 }
 0x7bc   : > { %24739 = vmatprep.subr.mxu0 %v25848_v0  ;;  %v8290_v3 = vsel %vm1643_vm7, %v8284_v51, %v8286_v57 }
 0x7be   : > { %24094 = vmatmul.mubr.msk.f32.vlgmr.msra.gmra.mrb[14].mxu0 %vm476_vm1, %v24092_v46  ;;  %v8288_v60 = vpop.permute.xlu1 %8287 }
 0x7bf   : > { %24740 = vmatpush3.msra.mxu0 %v26918_v63  ;;  %24741 = vmatprep.mubr.msk.f32.mxu0 %vm25857_vm4, %v25848_v0  ;;  %v8519_v61 = vpop.permute.xlu0 %8518  ;;  %v8289_v63 = vsel %vm1643_vm7, %v8286_v57, %v8288_v60  ;;  %v8293_v5 = vsel %vm1643_vm7, %v8288_v60, %v8280_v55 }
 0x7c0   : > { %8062 = vmatprep.subr.mxu0 %v8054_v49  ;;  %v24109_v49 = vld [vmem:[%s29171_s3 + $0x118] sm:$0xff] }
 0x7c2   : > { %24742 = vmatmul.mubr.msk.f32.vlgmr.msra.gmra.mrb[16].mxu0 %vm476_vm1, %v24092_v46  ;;  %v8521_v2 = vpop.permute.xlu1 %8520 }
 0x7c3   : > { %8063 = vmatpush1.msra.mxu0 %v8055_v52  ;;  %8126 = vmatprep.mubr.f32.mxu0 %v25848_v0  ;;  %v8517_v4 = vpop.permute.xlu0 %8516  ;;  %v8528_v6 = vsel %vm1881_vm8, %v8519_v61, %v8521_v2 }
 0x7c4   : > { %8133 = vmatprep.subr.mxu0 %v8052_v53  ;;  %v8529_v11 = vsel %vm1881_vm8, %v8517_v4, %v8519_v61 }
 0x7c6   : > { %24097 = vmatmul.mubr.msk.f32.vlgmr.msra.gmra.mrb[12].mxu0 %vm476_vm1, %v24096_v54  ;;  %v8523_v9 = vpop.permute.xlu1 %8522 }
 0x7c7   : > { %8134 = vmatpush1.msra.mxu0 %v8053_v56  ;;  %8197 = vmatprep.mubr.f32.mxu0 %v25848_v0  ;;  %v8525_v10 = vpop.permute.xlu0 %8524  ;;  %v8527_v14 = vsel %vm1881_vm8, %v8521_v2, %v8523_v9 }
 0x7c8   : > { %24744 = vmatprep.subr.mxu0 %v25848_v0  ;;  %v8526_v12 = vsel %vm1881_vm8, %v8523_v9, %v8525_v10  ;;  %v8530_v15 = vsel %vm1881_vm8, %v8525_v10, %v8517_v4 }
 0x7ca   : > { %24098 = vmatmul.mubr.msk.f32.vlgmr.msra.gmra.mrb[14].mxu0 %vm476_vm1, %v24096_v54 }
 0x7cb   : > { %24745 = vmatpush3.msra.mxu0 %v8056_v58  ;;  %24746 = vmatprep.mubr.msk.f32.mxu0 %vm25857_vm4, %v25848_v0 }
 0x7cc   : > { %8299 = vmatprep.subr.mxu0 %v8291_v59 }
 0x7ce   : > { %24747 = vmatmul.mubr.msk.f32.vlgmr.msra.gmra.mrb[16].mxu0 %vm476_vm1, %v24096_v54 }
 0x7cf   : > { %8300 = vmatpush1.msra.mxu0 %v8292_v62  ;;  %8363 = vmatprep.mubr.f32.mxu0 %v25848_v0 }
 0x7d0   : > { %8370 = vmatprep.subr.mxu0 %v8289_v63  ;;  %v24113_v63 = vld [vmem:[%s29171_s3 + $0x120] sm:$0xff] }
 0x7d2   : > { %24101 = vmatmul.mubr.msk.f32.vlgmr.msra.gmra.mrb[12].mxu0 %vm476_vm1, %v24100_v1 }
 0x7d3   : > { %8371 = vmatpush1.msra.mxu0 %v8290_v3  ;;  %8434 = vmatprep.mubr.f32.mxu0 %v25848_v0 }
 0x7d4   : > { %24749 = vmatprep.subr.mxu0 %v25848_v0 }
 0x7d6   : > { %24102 = vmatmul.mubr.msk.f32.vlgmr.msra.gmra.mrb[14].mxu0 %vm476_vm1, %v24100_v1 }
 0x7d7   : > { %24750 = vmatpush3.msra.mxu0 %v8293_v5  ;;  %24751 = vmatprep.mubr.msk.f32.mxu0 %vm25857_vm4, %v25848_v0  ;;  %v7107_v17 = vpop.permute.xlu1 %7106 }
 0x7d8   : > { %8536 = vmatprep.subr.mxu0 %v8528_v6 }
 0x7da   : > { %24752 = vmatmul.mubr.msk.f32.vlgmr.msra.gmra.mrb[16].mxu0 %vm476_vm1, %v24100_v1 }
 0x7db   : > { %8537 = vmatpush1.msra.mxu0 %v8529_v11  ;;  %8600 = vmatprep.mubr.f32.mxu0 %v25848_v0 }
 0x7dc   : > { %8607 = vmatprep.subr.mxu0 %v8526_v12 }
 0x7de   : > { %24105 = vmatmul.mubr.msk.f32.vlgmr.msra.gmra.mrb[12].mxu0 %vm476_vm1, %v24104_v13 }
 0x7df   : > { %8608 = vmatpush1.msra.mxu0 %v8527_v14  ;;  %8671 = vmatprep.mubr.f32.mxu0 %v25848_v0 }
 0x7e0   : > { %24754 = vmatprep.subr.mxu0 %v25848_v0 }
 0x7e2   : > { %24106 = vmatmul.mubr.msk.f32.vlgmr.msra.gmra.mrb[14].mxu0 %vm476_vm1, %v24104_v13 }
 0x7e3   : > { %24755 = vmatpush3.msra.mxu0 %v8530_v15  ;;  %24756 = vmatprep.mubr.msk.f32.mxu0 %vm25857_vm4, %v25848_v0 }
 0x7e6   : > { %24757 = vmatmul.mubr.msk.f32.vlgmr.msra.gmra.mrb[16].mxu0 %vm476_vm1, %v24104_v13  ;;  %v24117_v13 = vld [vmem:[%s29171_s3 + $0x128] sm:$0xff] }
 0x7e7   : > { %10515 = vmatprep.mubr.f32.mxu0 %v25848_v0 }
 0x8b1   : > { %v8602_v18 = vpop.f32.mrb[12].mxu0 }
 0x8b2   : > { %v25094_v19 = vadd.f32 %v8602_v18, %v7107_v17  ;;  %v8604_v20 = vpop.f32.mrb[13].mxu0 }
 0x8b3   : > { %v25095_v21 = vadd.f32 %v8604_v20, %v7107_v17  ;;  %v24121_v20 = vld [vmem:[%s29171_s3 + $0x130] sm:$0xff] }
 0x8b4   : > { %v8753_v22 = vmax.f32 %v25094_v19, 0.0 }
 0x8b5   : > { %v8754_v23 = vmax.f32 %v25095_v21, 0.0  ;;  %v8673_v24 = vpop.f32.mrb[14].mxu0 }
 0x8b6   : > { %v27123_v26 = vmul.f32 %v26006_v25, %v8753_v22  ;;  %v25096_v28 = vadd.f32 %v8673_v24, %v7107_v17  ;;  %v8675_v29 = vpop.f32.mrb[15].mxu0 }
 0x8b7   : > { %v27126_v30 = vmul.f32 %v25996_v16, %v8754_v23  ;;  %v25097_v35 = vadd.f32 %v8675_v29, %v7107_v17 }
 0x8b8   : > { %v8755_v31 = vmax.f32 %v25096_v28, 0.0  ;;  %8770 = vrot.lane.b32.xlu0 %v27123_v26, %s25850_s0 }
 0x8b9   : > { %v8744_v32 = vpop.f32.mrb[16].mxu0  ;;  %8772 = vrot.lane.b32.xlu1 %v27126_v30, %s25850_s0  ;;  %v8756_v40 = vmax.f32 %v25097_v35, 0.0 }
 0x8ba   : > { %v27133_v34 = vmul.f32 %v26009_v27, %v8755_v31  ;;  %v25098_v36 = vadd.f32 %v8744_v32, %v7107_v17  ;;  %v24758_v38 = vpop.f32.mrb[17].mxu0 }
 0x8bb   : > { %v27145_v42 = vmul.f32 %v26031_v37, %v8756_v40 }
 0x8bc   : > { %v8757_v39 = vmax.f32 %v25098_v36, 0.0 }
 0x8bd   : > { %8774 = vrot.lane.b32.xlu1 %v27133_v34, %s25850_s0 }
 0x8be   : > { %v27138_v41 = vmul.f32 %v26022_v33, %v8757_v39 }
 0x8c0   : > { %8778 = vrot.lane.b32.xlu0 %v27138_v41, %s25850_s0 }
 0x8c1   : > { %9007 = vrot.lane.b32.xlu1 %v27123_v26, %s25851_s21 }
 0x8c4   : > { %8776 = vrot.lane.b32.xlu0 %v27145_v42, %s25850_s0 }
 0x8c5   : > { %9015 = vrot.lane.b32.xlu1 %v27138_v41, %s25851_s21 }
 0x8c8   : > { %9009 = vrot.lane.b32.xlu0 %v27126_v30, %s25851_s21 }
 0x8c9   : > { %9013 = vrot.lane.b32.xlu1 %v27145_v42, %s25851_s21 }
 0x8cc   : > { %9011 = vrot.lane.b32.xlu0 %v27133_v34, %s25851_s21 }
 0x8cd   : > { %9246 = vrot.lane.b32.xlu1 %v27126_v30, %s25852_s28 }
 0x8d0   : > { %9244 = vrot.lane.b32.xlu0 %v27123_v26, %s25852_s28 }
 0x8d1   : > { %9248 = vrot.lane.b32.xlu1 %v27133_v34, %s25852_s28 }
 0x8d4   : > { %9252 = vrot.lane.b32.xlu0 %v27138_v41, %s25852_s28 }
 0x8d5   : > { %9705 = vrot.lane.b32.xlu1 %v27126_v30, %s25853_s29 }
 0x8d8   : > { %9250 = vrot.lane.b32.xlu0 %v27145_v42, %s25852_s28 }
 0x8d9   : > { %9703 = vrot.lane.b32.xlu1 %v27123_v26, %s25853_s29 }
 0x8dc   : > { %9707 = vrot.lane.b32.xlu0 %v27133_v34, %s25853_s29 }
 0x8dd   : > { %9711 = vrot.lane.b32.xlu1 %v27138_v41, %s25853_s29 }
 0x8e0   : > { %9709 = vrot.lane.b32.xlu0 %v27145_v42, %s25853_s29 }
 0x8e1   : > { %9944 = vrot.lane.b32.xlu1 %v27133_v34, %s25854_s15 }
 0x8e4   : > { %9942 = vrot.lane.b32.xlu0 %v27126_v30, %s25854_s15 }
 0x8e5   : > { %9946 = vrot.lane.b32.xlu1 %v27145_v42, %s25854_s15 }
 0x8e8   : > { %9940 = vrot.lane.b32.xlu0 %v27123_v26, %s25854_s15 }
 0x8e9   : > { %10179 = vrot.lane.b32.xlu1 %v27126_v30, %s25855_s9 }
 0x8ec   : > { %9948 = vrot.lane.b32.xlu0 %v27138_v41, %s25854_s15 }
 0x8ed   : > { %10177 = vrot.lane.b32.xlu1 %v27123_v26, %s25855_s9 }
 0x8f0   : > { %10181 = vrot.lane.b32.xlu0 %v27133_v34, %s25855_s9 }
 0x8f1   : > { %10185 = vrot.lane.b32.xlu1 %v27138_v41, %s25855_s9 }
 0x8f4   : > { %10183 = vrot.lane.b32.xlu0 %v27145_v42, %s25855_s9 }
 0x8f8   : > { %8767 = vperm.xlu0 %25730, %v24108_v43  }
 0x92a   : > { %v8771_v44 = vpop.permute.xlu0 %8770 }
 0x92b   : > { %v8773_v45 = vpop.permute.xlu1 %8772 }
 0x92c   : > { %v8783_v46 = vsel %vm469_vm0, %v8771_v44, %v8773_v45 }
 0x92d   : > { %8790 = vmatprep.subr.mxu1 %v8783_v46 }
 0x92f   : > { %v8775_v47 = vpop.permute.xlu1 %8774 }
 0x930   : > { %v8782_v55 = vsel %vm469_vm0, %v8773_v45, %v8775_v47 }
 0x932   : > { %v8779_v48 = vpop.permute.xlu0 %8778 }
 0x933   : > { %v9008_v50 = vpop.permute.xlu1 %9007  ;;  %v8784_v51 = vsel %vm469_vm0, %v8779_v48, %v8771_v44 }
 0x934   : > { %8791 = vmatpush1.msra.mxu1 %v8784_v51 }
 0x935   : > { %24110 = vmatmul.mubr.msk.f32.vlgmr.msra.gmra.mrb[12].mxu1 %vm476_vm1, %v24109_v49 }
 0x936   : > { %v8777_v52 = vpop.permute.xlu0 %8776  ;;  %8925 = vmatprep.mubr.f32.mxu1 %v25848_v0 }
 0x937   : > { %v8781_v53 = vsel %vm469_vm0, %v8775_v47, %v8777_v52  ;;  %v9016_v54 = vpop.permute.xlu1 %9015  ;;  %v8780_v57 = vsel %vm469_vm0, %v8777_v52, %v8779_v48  ;;  %v24133_v52 = vld [vmem:[%s29171_s3 + $0x148] sm:$0xff] }
 0x938   : > { %8861 = vmatprep.subr.mxu1 %v8781_v53  ;;  %v9021_v60 = vsel %vm707_vm2, %v9016_v54, %v9008_v50 }
 0x939   : > { %8862 = vmatpush1.msra.mxu1 %v8782_v55 }
 0x93a   : > { %24111 = vmatmul.mubr.msk.f32.vlgmr.msra.gmra.mrb[14].mxu1 %vm476_vm1, %v24109_v49  ;;  %24759 = vmatprep.subr.mxu1 %v25848_v0  ;;  %v9010_v56 = vpop.permute.xlu0 %9009 }
 0x93b   : > { %24760 = vmatpush3.msra.mxu1 %v8780_v57  ;;  %v9020_v58 = vsel %vm707_vm2, %v9008_v50, %v9010_v56  ;;  %24761 = vmatprep.mubr.msk.f32.mxu1 %vm25857_vm4, %v25848_v0  ;;  %v9014_v59 = vpop.permute.xlu1 %9013 }
 0x93c   : > { %9027 = vmatprep.subr.mxu1 %v9020_v58  ;;  %v9017_v4 = vsel %vm707_vm2, %v9014_v59, %v9016_v54 }
 0x93e   : > { %24762 = vmatmul.mubr.msk.f32.vlgmr.msra.gmra.mrb[16].mxu1 %vm476_vm1, %v24109_v49  ;;  %v9012_v61 = vpop.permute.xlu0 %9011 }
 0x93f   : > { %9028 = vmatpush1.msra.mxu1 %v9021_v60  ;;  %v9018_v62 = vsel %vm707_vm2, %v9012_v61, %v9014_v59  ;;  %9091 = vmatprep.mubr.f32.mxu1 %v25848_v0  ;;  %v9019_v1 = vsel %vm707_vm2, %v9010_v56, %v9012_v61  ;;  %v9247_v3 = vpop.permute.xlu1 %9246 }
 0x940   : > { %9098 = vmatprep.subr.mxu1 %v9018_v62 }
 0x942   : > { %24114 = vmatmul.mubr.msk.f32.vlgmr.msra.gmra.mrb[12].mxu1 %vm476_vm1, %v24113_v63  ;;  %v9245_v2 = vpop.permute.xlu0 %9244 }
 0x943   : > { %9099 = vmatpush1.msra.mxu1 %v9019_v1  ;;  %9162 = vmatprep.mubr.f32.mxu1 %v25848_v0  ;;  %v9257_v6 = vsel %vm945_vm5, %v9245_v2, %v9247_v3  ;;  %v9249_v9 = vpop.permute.xlu1 %9248 }
 0x944   : > { %24764 = vmatprep.subr.mxu1 %v25848_v0  ;;  %v9256_v14 = vsel %vm945_vm5, %v9247_v3, %v9249_v9 }
 0x946   : > { %24115 = vmatmul.mubr.msk.f32.vlgmr.msra.gmra.mrb[14].mxu1 %vm476_vm1, %v24113_v63  ;;  %v9253_v5 = vpop.permute.xlu0 %9252 }
 0x947   : > { %24765 = vmatpush3.msra.mxu1 %v9017_v4  ;;  %24766 = vmatprep.mubr.msk.f32.mxu1 %vm25857_vm4, %v25848_v0  ;;  %v9258_v10 = vsel %vm945_vm5, %v9253_v5, %v9245_v2  ;;  %v9706_v15 = vpop.permute.xlu1 %9705 }
 0x948   : > { %9264 = vmatprep.subr.mxu1 %v9257_v6 }
 0x94a   : > { %24767 = vmatmul.mubr.msk.f32.vlgmr.msra.gmra.mrb[16].mxu1 %vm476_vm1, %v24113_v63  ;;  %v9251_v11 = vpop.permute.xlu0 %9250 }
 0x94b   : > { %9265 = vmatpush1.msra.mxu1 %v9258_v10  ;;  %v9255_v12 = vsel %vm945_vm5, %v9249_v9, %v9251_v11  ;;  %9328 = vmatprep.mubr.f32.mxu1 %v25848_v0  ;;  %v9254_v17 = vsel %vm945_vm5, %v9251_v11, %v9253_v5  ;;  %v9704_v19 = vpop.permute.xlu1 %9703 }
 0x94c   : > { %9335 = vmatprep.subr.mxu1 %v9255_v12  ;;  %v9716_v28 = vsel %vm1405_vm6, %v9704_v19, %v9706_v15 }
 0x94e   : > { %24118 = vmatmul.mubr.msk.f32.vlgmr.msra.gmra.mrb[12].mxu1 %vm476_vm1, %v24117_v13  ;;  %v9708_v18 = vpop.permute.xlu0 %9707 }
 0x94f   : > { %9336 = vmatpush1.msra.mxu1 %v9256_v14  ;;  %9399 = vmatprep.mubr.f32.mxu1 %v25848_v0  ;;  %v9712_v22 = vpop.permute.xlu1 %9711  ;;  %v9715_v23 = vsel %vm1405_vm6, %v9706_v15, %v9708_v18 }
 0x950   : > { %24769 = vmatprep.subr.mxu1 %v25848_v0  ;;  %v9717_v35 = vsel %vm1405_vm6, %v9712_v22, %v9704_v19 }
 0x952   : > { %24119 = vmatmul.mubr.msk.f32.vlgmr.msra.gmra.mrb[14].mxu1 %vm476_vm1, %v24117_v13  ;;  %v9710_v21 = vpop.permute.xlu0 %9709 }
 0x953   : > { %24770 = vmatpush3.msra.mxu1 %v9254_v17  ;;  %24771 = vmatprep.mubr.msk.f32.mxu1 %vm25857_vm4, %v25848_v0  ;;  %v9713_v29 = vsel %vm1405_vm6, %v9710_v21, %v9712_v22  ;;  %v9714_v32 = vsel %vm1405_vm6, %v9708_v18, %v9710_v21  ;;  %v24137_v17 = vld [vmem:[%s29172_s4 + $0x30] sm:$0xff] }
 0x954   : > { %9486 = vmatprep.subr.mxu1 %v27126_v30  ;;  %v24125_v30 = vld [vmem:[%s29171_s3 + $0x138] sm:$0xff] }
 0x956   : > { %24772 = vmatmul.mubr.msk.f32.vlgmr.msra.gmra.mrb[16].mxu1 %vm476_vm1, %v24117_v13  ;;  %v9943_v24 = vpop.permute.xlu0 %9942 }
 0x957   : > { %9487 = vmatpush1.msra.mxu1 %v27123_v26  ;;  %9550 = vmatprep.mubr.f32.mxu1 %v25848_v0  ;;  %v9945_v26 = vpop.permute.xlu1 %9944 }
 0x958   : > { %9557 = vmatprep.subr.mxu1 %v27145_v42  ;;  %v9952_v36 = vsel %vm1643_vm7, %v9943_v24, %v9945_v26  ;;  %v24129_v42 = vld [vmem:[%s29171_s3 + $0x140] sm:$0xff] }
 0x95a   : > { %24122 = vmatmul.mubr.msk.f32.vlgmr.msra.gmra.mrb[12].mxu1 %vm476_vm1, %v24121_v20  ;;  %v9941_v31 = vpop.permute.xlu0 %9940 }
 0x95b   : > { %9558 = vmatpush1.msra.mxu1 %v27133_v34  ;;  %9621 = vmatprep.mubr.f32.mxu1 %v25848_v0  ;;  %v9947_v34 = vpop.permute.xlu1 %9946  ;;  %v9953_v40 = vsel %vm1643_vm7, %v9941_v31, %v9943_v24 }
 0x95c   : > { %24774 = vmatprep.subr.mxu1 %v25848_v0  ;;  %v9951_v44 = vsel %vm1643_vm7, %v9945_v26, %v9947_v34 }
 0x95e   : > { %24123 = vmatmul.mubr.msk.f32.vlgmr.msra.gmra.mrb[14].mxu1 %vm476_vm1, %v24121_v20  ;;  %v9949_v38 = vpop.permute.xlu0 %9948 }
 0x95f   : > { %24775 = vmatpush3.msra.mxu1 %v27138_v41  ;;  %24776 = vmatprep.mubr.msk.f32.mxu1 %vm25857_vm4, %v25848_v0  ;;  %v10180_v39 = vpop.permute.xlu1 %10179  ;;  %v9950_v41 = vsel %vm1643_vm7, %v9947_v34, %v9949_v38  ;;  %v9954_v46 = vsel %vm1643_vm7, %v9949_v38, %v9941_v31 }
 0x960   : > { %9723 = vmatprep.subr.mxu1 %v9715_v23  ;;  %v24138_v23 = vld [vmem:[%s29171_s3 + $0x150] sm:$0xff] }
 0x962   : > { %24777 = vmatmul.mubr.msk.f32.vlgmr.msra.gmra.mrb[16].mxu1 %vm476_vm1, %v24121_v20  ;;  %v10182_v43 = vpop.permute.xlu0 %10181 }
 0x963   : > { %9724 = vmatpush1.msra.mxu1 %v9716_v28  ;;  %9787 = vmatprep.mubr.f32.mxu1 %v25848_v0  ;;  %v10178_v45 = vpop.permute.xlu1 %10177  ;;  %v10189_v47 = vsel %vm1881_vm8, %v10180_v39, %v10182_v43 }
 0x964   : > { %9794 = vmatprep.subr.mxu1 %v9713_v29  ;;  %v10190_v50 = vsel %vm1881_vm8, %v10178_v45, %v10180_v39 }
 0x966   : > { %24126 = vmatmul.mubr.msk.f32.vlgmr.msra.gmra.mrb[12].mxu1 %vm476_vm1, %v24125_v30  ;;  %v10184_v48 = vpop.permute.xlu0 %10183 }
 0x967   : > { %9795 = vmatpush1.msra.mxu1 %v9714_v32  ;;  %9858 = vmatprep.mubr.f32.mxu1 %v25848_v0  ;;  %v10186_v49 = vpop.permute.xlu1 %10185  ;;  %v10188_v53 = vsel %vm1881_vm8, %v10182_v43, %v10184_v48 }
 0x968   : > { %24779 = vmatprep.subr.mxu1 %v25848_v0  ;;  %v10187_v51 = vsel %vm1881_vm8, %v10184_v48, %v10186_v49  ;;  %v10191_v54 = vsel %vm1881_vm8, %v10186_v49, %v10178_v45 }
 0x96a   : > { %24127 = vmatmul.mubr.msk.f32.vlgmr.msra.gmra.mrb[14].mxu1 %vm476_vm1, %v24125_v30 }
 0x96b   : > { %24780 = vmatpush3.msra.mxu1 %v9717_v35  ;;  %24781 = vmatprep.mubr.msk.f32.mxu1 %vm25857_vm4, %v25848_v0 }
 0x96c   : > { %9960 = vmatprep.subr.mxu1 %v9952_v36 }
 0x96e   : > { %24782 = vmatmul.mubr.msk.f32.vlgmr.msra.gmra.mrb[16].mxu1 %vm476_vm1, %v24125_v30 }
 0x96f   : > { %9961 = vmatpush1.msra.mxu1 %v9953_v40  ;;  %10024 = vmatprep.mubr.f32.mxu1 %v25848_v0 }
 0x970   : > { %10031 = vmatprep.subr.mxu1 %v9950_v41  ;;  %v24142_v41 = vld [vmem:[%s29171_s3 + $0x158] sm:$0xff] }
 0x972   : > { %24130 = vmatmul.mubr.msk.f32.vlgmr.msra.gmra.mrb[12].mxu1 %vm476_vm1, %v24129_v42 }
 0x973   : > { %10032 = vmatpush1.msra.mxu1 %v9951_v44  ;;  %10095 = vmatprep.mubr.f32.mxu1 %v25848_v0 }
 0x974   : > { %24784 = vmatprep.subr.mxu1 %v25848_v0 }
 0x976   : > { %24131 = vmatmul.mubr.msk.f32.vlgmr.msra.gmra.mrb[14].mxu1 %vm476_vm1, %v24129_v42 }
 0x977   : > { %24785 = vmatpush3.msra.mxu1 %v9954_v46  ;;  %24786 = vmatprep.mubr.msk.f32.mxu1 %vm25857_vm4, %v25848_v0  ;;  %v8768_v55 = vpop.permute.xlu0 %8767 }
 0x978   : > { %10197 = vmatprep.subr.mxu1 %v10189_v47 }
 0x97a   : > { %24787 = vmatmul.mubr.msk.f32.vlgmr.msra.gmra.mrb[16].mxu1 %vm476_vm1, %v24129_v42 }
 0x97b   : > { %10198 = vmatpush1.msra.mxu1 %v10190_v50  ;;  %10261 = vmatprep.mubr.f32.mxu1 %v25848_v0 }
 0x97c   : > { %10268 = vmatprep.subr.mxu1 %v10187_v51 }
 0x97e   : > { %24134 = vmatmul.mubr.msk.f32.vlgmr.msra.gmra.mrb[12].mxu1 %vm476_vm1, %v24133_v52 }
 0x97f   : > { %10269 = vmatpush1.msra.mxu1 %v10188_v53  ;;  %10332 = vmatprep.mubr.f32.mxu1 %v25848_v0 }
 0x980   : > { %24789 = vmatprep.subr.mxu1 %v25848_v0 }
 0x982   : > { %24135 = vmatmul.mubr.msk.f32.vlgmr.msra.gmra.mrb[14].mxu1 %vm476_vm1, %v24133_v52 }
 0x983   : > { %24790 = vmatpush3.msra.mxu1 %v10191_v54  ;;  %24791 = vmatprep.mubr.msk.f32.mxu1 %vm25857_vm4, %v25848_v0 }
 0x986   : > { %24792 = vmatmul.mubr.msk.f32.vlgmr.msra.gmra.mrb[16].mxu1 %vm476_vm1, %v24133_v52  ;;  %v24146_v52 = vld [vmem:[%s29171_s3 + $0x160] sm:$0xff] }
 0x987   : > { %12176 = vmatprep.mubr.f32.mxu1 %v25848_v0 }
 0xa51   : > { %v10263_v56 = vpop.f32.mrb[12].mxu1 }
 0xa52   : > { %v25099_v57 = vadd.f32 %v10263_v56, %v8768_v55  ;;  %v10265_v58 = vpop.f32.mrb[13].mxu1 }
 0xa53   : > { %v25100_v59 = vadd.f32 %v10265_v58, %v8768_v55  ;;  %v24150_v58 = vld [vmem:[%s29171_s3 + $0x168] sm:$0xff] }
 0xa54   : > { %v10414_v60 = vmax.f32 %v25099_v57, 0.0 }
 0xa55   : > { %v10415_v61 = vmax.f32 %v25100_v59, 0.0  ;;  %v10334_v62 = vpop.f32.mrb[14].mxu1 }
 0xa56   : > { %v27343_v63 = vmul.f32 %v26006_v25, %v10414_v60  ;;  %v25101_v1 = vadd.f32 %v10334_v62, %v8768_v55  ;;  %v10336_v2 = vpop.f32.mrb[15].mxu1 }
 0xa57   : > { %v27346_v3 = vmul.f32 %v25996_v16, %v10415_v61  ;;  %v25102_v9 = vadd.f32 %v10336_v2, %v8768_v55 }
 0xa58   : > { %v10416_v4 = vmax.f32 %v25101_v1, 0.0  ;;  %10431 = vrot.lane.b32.xlu1 %v27343_v63, %s25850_s0 }
 0xa59   : > { %v10405_v5 = vpop.f32.mrb[16].mxu1  ;;  %10433 = vrot.lane.b32.xlu0 %v27346_v3, %s25850_s0  ;;  %v10417_v13 = vmax.f32 %v25102_v9, 0.0 }
 0xa5a   : > { %v27353_v6 = vmul.f32 %v26009_v27, %v10416_v4  ;;  %v25103_v10 = vadd.f32 %v10405_v5, %v8768_v55  ;;  %v24793_v11 = vpop.f32.mrb[17].mxu1 }
 0xa5b   : > { %v27365_v15 = vmul.f32 %v26031_v37, %v10417_v13 }
 0xa5c   : > { %v10418_v12 = vmax.f32 %v25103_v10, 0.0 }
 0xa5d   : > { %10435 = vrot.lane.b32.xlu0 %v27353_v6, %s25850_s0 }
 0xa5e   : > { %v27358_v14 = vmul.f32 %v26022_v33, %v10418_v12 }
 0xa60   : > { %10439 = vrot.lane.b32.xlu1 %v27358_v14, %s25850_s0 }
 0xa61   : > { %10668 = vrot.lane.b32.xlu0 %v27343_v63, %s25851_s21 }
 0xa64   : > { %10437 = vrot.lane.b32.xlu1 %v27365_v15, %s25850_s0 }
 0xa65   : > { %10676 = vrot.lane.b32.xlu0 %v27358_v14, %s25851_s21 }
 0xa68   : > { %10670 = vrot.lane.b32.xlu1 %v27346_v3, %s25851_s21 }
 0xa69   : > { %10674 = vrot.lane.b32.xlu0 %v27365_v15, %s25851_s21 }
 0xa6c   : > { %10672 = vrot.lane.b32.xlu1 %v27353_v6, %s25851_s21 }
 0xa6d   : > { %10907 = vrot.lane.b32.xlu0 %v27346_v3, %s25852_s28 }
 0xa70   : > { %10905 = vrot.lane.b32.xlu1 %v27343_v63, %s25852_s28 }
 0xa71   : > { %10909 = vrot.lane.b32.xlu0 %v27353_v6, %s25852_s28 }
 0xa74   : > { %10913 = vrot.lane.b32.xlu1 %v27358_v14, %s25852_s28 }
 0xa75   : > { %11366 = vrot.lane.b32.xlu0 %v27346_v3, %s25853_s29 }
 0xa78   : > { %10911 = vrot.lane.b32.xlu1 %v27365_v15, %s25852_s28 }
 0xa79   : > { %11364 = vrot.lane.b32.xlu0 %v27343_v63, %s25853_s29 }
 0xa7c   : > { %11368 = vrot.lane.b32.xlu1 %v27353_v6, %s25853_s29 }
 0xa7d   : > { %11372 = vrot.lane.b32.xlu0 %v27358_v14, %s25853_s29 }
 0xa80   : > { %11370 = vrot.lane.b32.xlu1 %v27365_v15, %s25853_s29 }
 0xa81   : > { %11605 = vrot.lane.b32.xlu0 %v27353_v6, %s25854_s15 }
 0xa84   : > { %11603 = vrot.lane.b32.xlu1 %v27346_v3, %s25854_s15 }
 0xa85   : > { %11607 = vrot.lane.b32.xlu0 %v27365_v15, %s25854_s15 }
 0xa88   : > { %11601 = vrot.lane.b32.xlu1 %v27343_v63, %s25854_s15 }
 0xa89   : > { %11840 = vrot.lane.b32.xlu0 %v27346_v3, %s25855_s9 }
 0xa8c   : > { %11609 = vrot.lane.b32.xlu1 %v27358_v14, %s25854_s15 }
 0xa8d   : > { %11838 = vrot.lane.b32.xlu0 %v27343_v63, %s25855_s9 }
 0xa90   : > { %11842 = vrot.lane.b32.xlu1 %v27353_v6, %s25855_s9 }
 0xa91   : > { %11846 = vrot.lane.b32.xlu0 %v27358_v14, %s25855_s9 }
 0xa94   : > { %11844 = vrot.lane.b32.xlu1 %v27365_v15, %s25855_s9 }
 0xa98   : > { %10428 = vperm.xlu1 %25731, %v24137_v17  }
 0xaca   : > { %v10432_v18 = vpop.permute.xlu1 %10431 }
 0xacb   : > { %v10434_v19 = vpop.permute.xlu0 %10433 }
 0xacc   : > { %v10444_v20 = vsel %vm469_vm0, %v10432_v18, %v10434_v19 }
 0xacd   : > { %10451 = vmatprep.subr.mxu0 %v10444_v20 }
 0xacf   : > { %v10436_v21 = vpop.permute.xlu0 %10435 }
 0xad0   : > { %v10443_v31 = vsel %vm469_vm0, %v10434_v19, %v10436_v21 }
 0xad2   : > { %v10440_v22 = vpop.permute.xlu1 %10439 }
 0xad3   : > { %v10669_v24 = vpop.permute.xlu0 %10668  ;;  %v10445_v26 = vsel %vm469_vm0, %v10440_v22, %v10432_v18 }
 0xad4   : > { %10452 = vmatpush1.msra.mxu0 %v10445_v26 }
 0xad5   : > { %24139 = vmatmul.mubr.msk.f32.vlgmr.msra.gmra.mrb[18].mxu0 %vm476_vm1, %v24138_v23 }
 0xad6   : > { %v10438_v28 = vpop.permute.xlu1 %10437  ;;  %10586 = vmatprep.mubr.f32.mxu0 %v25848_v0 }
 0xad7   : > { %v10442_v29 = vsel %vm469_vm0, %v10436_v21, %v10438_v28  ;;  %v10677_v30 = vpop.permute.xlu0 %10676  ;;  %v10441_v34 = vsel %vm469_vm0, %v10438_v28, %v10440_v22  ;;  %v24162_v28 = vld [vmem:[%s29171_s3 + $0x180] sm:$0xff] }
 0xad8   : > { %10522 = vmatprep.subr.mxu0 %v10442_v29  ;;  %v10682_v38 = vsel %vm707_vm2, %v10677_v30, %v10669_v24 }
 0xad9   : > { %10523 = vmatpush1.msra.mxu0 %v10443_v31 }
 0xada   : > { %24140 = vmatmul.mubr.msk.f32.vlgmr.msra.gmra.mrb[20].mxu0 %vm476_vm1, %v24138_v23  ;;  %24794 = vmatprep.subr.mxu0 %v25848_v0  ;;  %v10671_v32 = vpop.permute.xlu1 %10670 }
 0xadb   : > { %24795 = vmatpush3.msra.mxu0 %v10441_v34  ;;  %v10681_v35 = vsel %vm707_vm2, %v10669_v24, %v10671_v32  ;;  %24796 = vmatprep.mubr.msk.f32.mxu0 %vm25857_vm4, %v25848_v0  ;;  %v10675_v36 = vpop.permute.xlu0 %10674 }
 0xadc   : > { %10688 = vmatprep.subr.mxu0 %v10681_v35  ;;  %v10678_v45 = vsel %vm707_vm2, %v10675_v36, %v10677_v30 }
 0xade   : > { %24797 = vmatmul.mubr.msk.f32.vlgmr.msra.gmra.mrb[22].mxu0 %vm476_vm1, %v24138_v23  ;;  %v10673_v39 = vpop.permute.xlu1 %10672 }
 0xadf   : > { %10689 = vmatpush1.msra.mxu0 %v10682_v38  ;;  %v10679_v40 = vsel %vm707_vm2, %v10673_v39, %v10675_v36  ;;  %10752 = vmatprep.mubr.f32.mxu0 %v25848_v0  ;;  %v10680_v42 = vsel %vm707_vm2, %v10671_v32, %v10673_v39  ;;  %v10908_v44 = vpop.permute.xlu0 %10907 }
 0xae0   : > { %10759 = vmatprep.subr.mxu0 %v10679_v40 }
 0xae2   : > { %24143 = vmatmul.mubr.msk.f32.vlgmr.msra.gmra.mrb[18].mxu0 %vm476_vm1, %v24142_v41  ;;  %v10906_v43 = vpop.permute.xlu1 %10905 }
 0xae3   : > { %10760 = vmatpush1.msra.mxu0 %v10680_v42  ;;  %10823 = vmatprep.mubr.f32.mxu0 %v25848_v0  ;;  %v10918_v47 = vsel %vm945_vm5, %v10906_v43, %v10908_v44  ;;  %v10910_v48 = vpop.permute.xlu0 %10909 }
 0xae4   : > { %24799 = vmatprep.subr.mxu0 %v25848_v0  ;;  %v10917_v53 = vsel %vm945_vm5, %v10908_v44, %v10910_v48 }
 0xae6   : > { %24144 = vmatmul.mubr.msk.f32.vlgmr.msra.gmra.mrb[20].mxu0 %vm476_vm1, %v24142_v41  ;;  %v10914_v46 = vpop.permute.xlu1 %10913 }
 0xae7   : > { %24800 = vmatpush3.msra.mxu0 %v10678_v45  ;;  %24801 = vmatprep.mubr.msk.f32.mxu0 %vm25857_vm4, %v25848_v0  ;;  %v10919_v49 = vsel %vm945_vm5, %v10914_v46, %v10906_v43  ;;  %v11367_v54 = vpop.permute.xlu0 %11366 }
 0xae8   : > { %10925 = vmatprep.subr.mxu0 %v10918_v47 }
 0xaea   : > { %24802 = vmatmul.mubr.msk.f32.vlgmr.msra.gmra.mrb[22].mxu0 %vm476_vm1, %v24142_v41  ;;  %v10912_v50 = vpop.permute.xlu1 %10911 }
 0xaeb   : > { %10926 = vmatpush1.msra.mxu0 %v10919_v49  ;;  %v10916_v51 = vsel %vm945_vm5, %v10910_v48, %v10912_v50  ;;  %10989 = vmatprep.mubr.f32.mxu0 %v25848_v0  ;;  %v10915_v55 = vsel %vm945_vm5, %v10912_v50, %v10914_v46  ;;  %v11365_v57 = vpop.permute.xlu0 %11364 }
 0xaec   : > { %10996 = vmatprep.subr.mxu0 %v10916_v51  ;;  %v11377_v1 = vsel %vm1405_vm6, %v11365_v57, %v11367_v54 }
 0xaee   : > { %24147 = vmatmul.mubr.msk.f32.vlgmr.msra.gmra.mrb[18].mxu0 %vm476_vm1, %v24146_v52  ;;  %v11369_v56 = vpop.permute.xlu1 %11368 }
 0xaef   : > { %10997 = vmatpush1.msra.mxu0 %v10917_v53  ;;  %11060 = vmatprep.mubr.f32.mxu0 %v25848_v0  ;;  %v11373_v60 = vpop.permute.xlu0 %11372  ;;  %v11376_v61 = vsel %vm1405_vm6, %v11367_v54, %v11369_v56 }
 0xaf0   : > { %24804 = vmatprep.subr.mxu0 %v25848_v0  ;;  %v11378_v9 = vsel %vm1405_vm6, %v11373_v60, %v11365_v57 }
 0xaf2   : > { %24148 = vmatmul.mubr.msk.f32.vlgmr.msra.gmra.mrb[20].mxu0 %vm476_vm1, %v24146_v52  ;;  %v11371_v59 = vpop.permute.xlu1 %11370 }
 0xaf3   : > { %24805 = vmatpush3.msra.mxu0 %v10915_v55  ;;  %24806 = vmatprep.mubr.msk.f32.mxu0 %vm25857_vm4, %v25848_v0  ;;  %v11374_v2 = vsel %vm1405_vm6, %v11371_v59, %v11373_v60  ;;  %v11375_v5 = vsel %vm1405_vm6, %v11369_v56, %v11371_v59  ;;  %v24166_v55 = vld [vmem:[%s29172_s4 + $0x38] sm:$0xff] }
 0xaf4   : > { %11147 = vmatprep.subr.mxu0 %v27346_v3  ;;  %v24154_v3 = vld [vmem:[%s29171_s3 + $0x170] sm:$0xff] }
 0xaf6   : > { %24807 = vmatmul.mubr.msk.f32.vlgmr.msra.gmra.mrb[22].mxu0 %vm476_vm1, %v24146_v52  ;;  %v11604_v62 = vpop.permute.xlu1 %11603 }
 0xaf7   : > { %11148 = vmatpush1.msra.mxu0 %v27343_v63  ;;  %11211 = vmatprep.mubr.f32.mxu0 %v25848_v0  ;;  %v11606_v63 = vpop.permute.xlu0 %11605 }
 0xaf8   : > { %11218 = vmatprep.subr.mxu0 %v27365_v15  ;;  %v11613_v10 = vsel %vm1643_vm7, %v11604_v62, %v11606_v63  ;;  %v24158_v15 = vld [vmem:[%s29171_s3 + $0x178] sm:$0xff] }
 0xafa   : > { %24151 = vmatmul.mubr.msk.f32.vlgmr.msra.gmra.mrb[18].mxu0 %vm476_vm1, %v24150_v58  ;;  %v11602_v4 = vpop.permute.xlu1 %11601 }
 0xafb   : > { %11219 = vmatpush1.msra.mxu0 %v27353_v6  ;;  %11282 = vmatprep.mubr.f32.mxu0 %v25848_v0  ;;  %v11608_v6 = vpop.permute.xlu0 %11607  ;;  %v11614_v13 = vsel %vm1643_vm7, %v11602_v4, %v11604_v62 }
 0xafc   : > { %24809 = vmatprep.subr.mxu0 %v25848_v0  ;;  %v11612_v18 = vsel %vm1643_vm7, %v11606_v63, %v11608_v6 }
 0xafe   : > { %24152 = vmatmul.mubr.msk.f32.vlgmr.msra.gmra.mrb[20].mxu0 %vm476_vm1, %v24150_v58  ;;  %v11610_v11 = vpop.permute.xlu1 %11609 }
 0xaff   : > { %24810 = vmatpush3.msra.mxu0 %v27358_v14  ;;  %24811 = vmatprep.mubr.msk.f32.mxu0 %vm25857_vm4, %v25848_v0  ;;  %v11841_v12 = vpop.permute.xlu0 %11840  ;;  %v11611_v14 = vsel %vm1643_vm7, %v11608_v6, %v11610_v11  ;;  %v11615_v20 = vsel %vm1643_vm7, %v11610_v11, %v11602_v4 }
 0xb00   : > { %11384 = vmatprep.subr.mxu0 %v11376_v61  ;;  %v24167_v61 = vld [vmem:[%s29171_s3 + $0x188] sm:$0xff] }
 0xb02   : > { %24812 = vmatmul.mubr.msk.f32.vlgmr.msra.gmra.mrb[22].mxu0 %vm476_vm1, %v24150_v58  ;;  %v11843_v17 = vpop.permute.xlu1 %11842 }
 0xb03   : > { %11385 = vmatpush1.msra.mxu0 %v11377_v1  ;;  %11448 = vmatprep.mubr.f32.mxu0 %v25848_v0  ;;  %v11839_v19 = vpop.permute.xlu0 %11838  ;;  %v11850_v21 = vsel %vm1881_vm8, %v11841_v12, %v11843_v17 }
 0xb04   : > { %11455 = vmatprep.subr.mxu0 %v11374_v2  ;;  %v11851_v24 = vsel %vm1881_vm8, %v11839_v19, %v11841_v12 }
 0xb06   : > { %24155 = vmatmul.mubr.msk.f32.vlgmr.msra.gmra.mrb[18].mxu0 %vm476_vm1, %v24154_v3  ;;  %v11845_v22 = vpop.permute.xlu1 %11844 }
 0xb07   : > { %11456 = vmatpush1.msra.mxu0 %v11375_v5  ;;  %11519 = vmatprep.mubr.f32.mxu0 %v25848_v0  ;;  %v11847_v23 = vpop.permute.xlu0 %11846  ;;  %v11849_v29 = vsel %vm1881_vm8, %v11843_v17, %v11845_v22 }
 0xb08   : > { %24814 = vmatprep.subr.mxu0 %v25848_v0  ;;  %v11848_v26 = vsel %vm1881_vm8, %v11845_v22, %v11847_v23  ;;  %v11852_v30 = vsel %vm1881_vm8, %v11847_v23, %v11839_v19 }
 0xb0a   : > { %24156 = vmatmul.mubr.msk.f32.vlgmr.msra.gmra.mrb[20].mxu0 %vm476_vm1, %v24154_v3 }
 0xb0b   : > { %24815 = vmatpush3.msra.mxu0 %v11378_v9  ;;  %24816 = vmatprep.mubr.msk.f32.mxu0 %vm25857_vm4, %v25848_v0 }
 0xb0c   : > { %11621 = vmatprep.subr.mxu0 %v11613_v10 }
 0xb0e   : > { %24817 = vmatmul.mubr.msk.f32.vlgmr.msra.gmra.mrb[22].mxu0 %vm476_vm1, %v24154_v3 }
 0xb0f   : > { %11622 = vmatpush1.msra.mxu0 %v11614_v13  ;;  %11685 = vmatprep.mubr.f32.mxu0 %v25848_v0 }
 0xb10   : > { %11692 = vmatprep.subr.mxu0 %v11611_v14  ;;  %v24171_v14 = vld [vmem:[%s29171_s3 + $0x190] sm:$0xff] }
 0xb12   : > { %24159 = vmatmul.mubr.msk.f32.vlgmr.msra.gmra.mrb[18].mxu0 %vm476_vm1, %v24158_v15 }
 0xb13   : > { %11693 = vmatpush1.msra.mxu0 %v11612_v18  ;;  %11756 = vmatprep.mubr.f32.mxu0 %v25848_v0 }
 0xb14   : > { %24819 = vmatprep.subr.mxu0 %v25848_v0 }
 0xb16   : > { %24160 = vmatmul.mubr.msk.f32.vlgmr.msra.gmra.mrb[20].mxu0 %vm476_vm1, %v24158_v15 }
 0xb17   : > { %24820 = vmatpush3.msra.mxu0 %v11615_v20  ;;  %24821 = vmatprep.mubr.msk.f32.mxu0 %vm25857_vm4, %v25848_v0  ;;  %v10429_v31 = vpop.permute.xlu1 %10428 }
 0xb18   : > { %11858 = vmatprep.subr.mxu0 %v11850_v21 }
 0xb1a   : > { %24822 = vmatmul.mubr.msk.f32.vlgmr.msra.gmra.mrb[22].mxu0 %vm476_vm1, %v24158_v15 }
 0xb1b   : > { %11859 = vmatpush1.msra.mxu0 %v11851_v24  ;;  %11922 = vmatprep.mubr.f32.mxu0 %v25848_v0 }
 0xb1c   : > { %11929 = vmatprep.subr.mxu0 %v11848_v26 }
 0xb1e   : > { %24163 = vmatmul.mubr.msk.f32.vlgmr.msra.gmra.mrb[18].mxu0 %vm476_vm1, %v24162_v28 }
 0xb1f   : > { %11930 = vmatpush1.msra.mxu0 %v11849_v29  ;;  %11993 = vmatprep.mubr.f32.mxu0 %v25848_v0 }
 0xb20   : > { %24824 = vmatprep.subr.mxu0 %v25848_v0 }
 0xb22   : > { %24164 = vmatmul.mubr.msk.f32.vlgmr.msra.gmra.mrb[20].mxu0 %vm476_vm1, %v24162_v28 }
 0xb23   : > { %24825 = vmatpush3.msra.mxu0 %v11852_v30  ;;  %24826 = vmatprep.mubr.msk.f32.mxu0 %vm25857_vm4, %v25848_v0 }
 0xb26   : > { %24827 = vmatmul.mubr.msk.f32.vlgmr.msra.gmra.mrb[22].mxu0 %vm476_vm1, %v24162_v28  ;;  %v24175_v28 = vld [vmem:[%s29171_s3 + $0x198] sm:$0xff] }
 0xb27   : > { %13837 = vmatprep.mubr.f32.mxu0 %v25848_v0 }
 0xbf1   : > { %v11924_v32 = vpop.f32.mrb[18].mxu0 }
 0xbf2   : > { %v25104_v34 = vadd.f32 %v11924_v32, %v10429_v31  ;;  %v11926_v35 = vpop.f32.mrb[19].mxu0 }
 0xbf3   : > { %v25105_v36 = vadd.f32 %v11926_v35, %v10429_v31  ;;  %v24179_v35 = vld [vmem:[%s29171_s3 + $0x1a0] sm:$0xff] }
 0xbf4   : > { %v12075_v38 = vmax.f32 %v25104_v34, 0.0 }
 0xbf5   : > { %v12076_v39 = vmax.f32 %v25105_v36, 0.0  ;;  %v11995_v40 = vpop.f32.mrb[20].mxu0 }
 0xbf6   : > { %v27563_v41 = vmul.f32 %v26006_v25, %v12075_v38  ;;  %v25106_v42 = vadd.f32 %v11995_v40, %v10429_v31  ;;  %v11997_v43 = vpop.f32.mrb[21].mxu0 }
 0xbf7   : > { %v27566_v44 = vmul.f32 %v25996_v16, %v12076_v39  ;;  %v25107_v48 = vadd.f32 %v11997_v43, %v10429_v31 }
 0xbf8   : > { %v12077_v45 = vmax.f32 %v25106_v42, 0.0  ;;  %12092 = vrot.lane.b32.xlu0 %v27563_v41, %s25850_s0 }
 0xbf9   : > { %v12066_v46 = vpop.f32.mrb[22].mxu0  ;;  %12094 = vrot.lane.b32.xlu1 %v27566_v44, %s25850_s0  ;;  %v12078_v52 = vmax.f32 %v25107_v48, 0.0 }
 0xbfa   : > { %v27573_v47 = vmul.f32 %v26009_v27, %v12077_v45  ;;  %v25108_v49 = vadd.f32 %v12066_v46, %v10429_v31  ;;  %v24828_v50 = vpop.f32.mrb[23].mxu0 }
 0xbfb   : > { %v27585_v54 = vmul.f32 %v26031_v37, %v12078_v52 }
 0xbfc   : > { %v12079_v51 = vmax.f32 %v25108_v49, 0.0 }
 0xbfd   : > { %12096 = vrot.lane.b32.xlu1 %v27573_v47, %s25850_s0 }
 0xbfe   : > { %v27578_v53 = vmul.f32 %v26022_v33, %v12079_v51 }
 0xc00   : > { %12100 = vrot.lane.b32.xlu0 %v27578_v53, %s25850_s0 }
 0xc01   : > { %12329 = vrot.lane.b32.xlu1 %v27563_v41, %s25851_s21 }
 0xc04   : > { %12098 = vrot.lane.b32.xlu0 %v27585_v54, %s25850_s0 }
 0xc05   : > { %12337 = vrot.lane.b32.xlu1 %v27578_v53, %s25851_s21 }
 0xc08   : > { %12331 = vrot.lane.b32.xlu0 %v27566_v44, %s25851_s21 }
 0xc09   : > { %12335 = vrot.lane.b32.xlu1 %v27585_v54, %s25851_s21 }
 0xc0c   : > { %12333 = vrot.lane.b32.xlu0 %v27573_v47, %s25851_s21 }
 0xc0d   : > { %12568 = vrot.lane.b32.xlu1 %v27566_v44, %s25852_s28 }
 0xc10   : > { %12566 = vrot.lane.b32.xlu0 %v27563_v41, %s25852_s28 }
 0xc11   : > { %12570 = vrot.lane.b32.xlu1 %v27573_v47, %s25852_s28 }
 0xc14   : > { %12574 = vrot.lane.b32.xlu0 %v27578_v53, %s25852_s28 }
 0xc15   : > { %13027 = vrot.lane.b32.xlu1 %v27566_v44, %s25853_s29 }
 0xc18   : > { %12572 = vrot.lane.b32.xlu0 %v27585_v54, %s25852_s28 }
 0xc19   : > { %13025 = vrot.lane.b32.xlu1 %v27563_v41, %s25853_s29 }
 0xc1c   : > { %13029 = vrot.lane.b32.xlu0 %v27573_v47, %s25853_s29 }
 0xc1d   : > { %13033 = vrot.lane.b32.xlu1 %v27578_v53, %s25853_s29 }
 0xc20   : > { %13031 = vrot.lane.b32.xlu0 %v27585_v54, %s25853_s29 }
 0xc21   : > { %13266 = vrot.lane.b32.xlu1 %v27573_v47, %s25854_s15 }
 0xc24   : > { %13264 = vrot.lane.b32.xlu0 %v27566_v44, %s25854_s15 }
 0xc25   : > { %13268 = vrot.lane.b32.xlu1 %v27585_v54, %s25854_s15 }
 0xc28   : > { %13262 = vrot.lane.b32.xlu0 %v27563_v41, %s25854_s15 }
 0xc29   : > { %13501 = vrot.lane.b32.xlu1 %v27566_v44, %s25855_s9 }
 0xc2c   : > { %13270 = vrot.lane.b32.xlu0 %v27578_v53, %s25854_s15 }
 0xc2d   : > { %13499 = vrot.lane.b32.xlu1 %v27563_v41, %s25855_s9 }
 0xc30   : > { %13503 = vrot.lane.b32.xlu0 %v27573_v47, %s25855_s9 }
 0xc31   : > { %13507 = vrot.lane.b32.xlu1 %v27578_v53, %s25855_s9 }
 0xc34   : > { %13505 = vrot.lane.b32.xlu0 %v27585_v54, %s25855_s9 }
 0xc38   : > { %12089 = vperm.xlu0 %25730, %v24166_v55  }
 0xc6a   : > { %v12093_v56 = vpop.permute.xlu0 %12092 }
 0xc6b   : > { %v12095_v57 = vpop.permute.xlu1 %12094 }
 0xc6c   : > { %v12105_v58 = vsel %vm469_vm0, %v12093_v56, %v12095_v57 }
 0xc6d   : > { %12112 = vmatprep.subr.mxu1 %v12105_v58 }
 0xc6f   : > { %v12097_v59 = vpop.permute.xlu1 %12096 }
 0xc70   : > { %v12104_v4 = vsel %vm469_vm0, %v12095_v57, %v12097_v59 }
 0xc72   : > { %v12101_v60 = vpop.permute.xlu0 %12100 }
 0xc73   : > { %v12330_v62 = vpop.permute.xlu1 %12329  ;;  %v12106_v63 = vsel %vm469_vm0, %v12101_v60, %v12093_v56 }
 0xc74   : > { %12113 = vmatpush1.msra.mxu1 %v12106_v63 }
 0xc75   : > { %24168 = vmatmul.mubr.msk.f32.vlgmr.msra.gmra.mrb[18].mxu1 %vm476_vm1, %v24167_v61 }
 0xc76   : > { %v12099_v1 = vpop.permute.xlu0 %12098  ;;  %12247 = vmatprep.mubr.f32.mxu1 %v25848_v0 }
 0xc77   : > { %v12103_v2 = vsel %vm469_vm0, %v12097_v59, %v12099_v1  ;;  %v12338_v3 = vpop.permute.xlu1 %12337  ;;  %v12102_v6 = vsel %vm469_vm0, %v12099_v1, %v12101_v60  ;;  %v24191_v1 = vld [vmem:[%s29171_s3 + $0x1b8] sm:$0xff] }
 0xc78   : > { %12183 = vmatprep.subr.mxu1 %v12103_v2  ;;  %v12343_v11 = vsel %vm707_vm2, %v12338_v3, %v12330_v62 }
 0xc79   : > { %12184 = vmatpush1.msra.mxu1 %v12104_v4 }
 0xc7a   : > { %24169 = vmatmul.mubr.msk.f32.vlgmr.msra.gmra.mrb[20].mxu1 %vm476_vm1, %v24167_v61  ;;  %24829 = vmatprep.subr.mxu1 %v25848_v0  ;;  %v12332_v5 = vpop.permute.xlu0 %12331 }
 0xc7b   : > { %24830 = vmatpush3.msra.mxu1 %v12102_v6  ;;  %v12342_v9 = vsel %vm707_vm2, %v12330_v62, %v12332_v5  ;;  %24831 = vmatprep.mubr.msk.f32.mxu1 %vm25857_vm4, %v25848_v0  ;;  %v12336_v10 = vpop.permute.xlu1 %12335 }
 0xc7c   : > { %12349 = vmatprep.subr.mxu1 %v12342_v9  ;;  %v12339_v19 = vsel %vm707_vm2, %v12336_v10, %v12338_v3 }
 0xc7e   : > { %24832 = vmatmul.mubr.msk.f32.vlgmr.msra.gmra.mrb[22].mxu1 %vm476_vm1, %v24167_v61  ;;  %v12334_v12 = vpop.permute.xlu0 %12333 }
 0xc7f   : > { %12350 = vmatpush1.msra.mxu1 %v12343_v11  ;;  %v12340_v13 = vsel %vm707_vm2, %v12334_v12, %v12336_v10  ;;  %12413 = vmatprep.mubr.f32.mxu1 %v25848_v0  ;;  %v12341_v15 = vsel %vm707_vm2, %v12332_v5, %v12334_v12  ;;  %v12569_v18 = vpop.permute.xlu1 %12568 }
 0xc80   : > { %12420 = vmatprep.subr.mxu1 %v12340_v13 }
 0xc82   : > { %24172 = vmatmul.mubr.msk.f32.vlgmr.msra.gmra.mrb[18].mxu1 %vm476_vm1, %v24171_v14  ;;  %v12567_v17 = vpop.permute.xlu0 %12566 }
 0xc83   : > { %12421 = vmatpush1.msra.mxu1 %v12341_v15  ;;  %12484 = vmatprep.mubr.f32.mxu1 %v25848_v0  ;;  %v12579_v21 = vsel %vm945_vm5, %v12567_v17, %v12569_v18  ;;  %v12571_v22 = vpop.permute.xlu1 %12570 }
 0xc84   : > { %24834 = vmatprep.subr.mxu1 %v25848_v0  ;;  %v12578_v29 = vsel %vm945_vm5, %v12569_v18, %v12571_v22 }
 0xc86   : > { %24173 = vmatmul.mubr.msk.f32.vlgmr.msra.gmra.mrb[20].mxu1 %vm476_vm1, %v24171_v14  ;;  %v12575_v20 = vpop.permute.xlu0 %12574 }
 0xc87   : > { %24835 = vmatpush3.msra.mxu1 %v12339_v19  ;;  %24836 = vmatprep.mubr.msk.f32.mxu1 %vm25857_vm4, %v25848_v0  ;;  %v12580_v23 = vsel %vm945_vm5, %v12575_v20, %v12567_v17  ;;  %v13028_v30 = vpop.permute.xlu1 %13027 }
 0xc88   : > { %12586 = vmatprep.subr.mxu1 %v12579_v21 }
 0xc8a   : > { %24837 = vmatmul.mubr.msk.f32.vlgmr.msra.gmra.mrb[22].mxu1 %vm476_vm1, %v24171_v14  ;;  %v12573_v24 = vpop.permute.xlu0 %12572 }
 0xc8b   : > { %12587 = vmatpush1.msra.mxu1 %v12580_v23  ;;  %v12577_v26 = vsel %vm945_vm5, %v12571_v22, %v12573_v24  ;;  %12650 = vmatprep.mubr.f32.mxu1 %v25848_v0  ;;  %v12576_v31 = vsel %vm945_vm5, %v12573_v24, %v12575_v20  ;;  %v13026_v34 = vpop.permute.xlu1 %13025 }
 0xc8c   : > { %12657 = vmatprep.subr.mxu1 %v12577_v26  ;;  %v13038_v42 = vsel %vm1405_vm6, %v13026_v34, %v13028_v30 }
 0xc8e   : > { %24176 = vmatmul.mubr.msk.f32.vlgmr.msra.gmra.mrb[18].mxu1 %vm476_vm1, %v24175_v28  ;;  %v13030_v32 = vpop.permute.xlu0 %13029 }
 0xc8f   : > { %12658 = vmatpush1.msra.mxu1 %v12578_v29  ;;  %12721 = vmatprep.mubr.f32.mxu1 %v25848_v0  ;;  %v13034_v38 = vpop.permute.xlu1 %13033  ;;  %v13037_v39 = vsel %vm1405_vm6, %v13028_v30, %v13030_v32 }
 0xc90   : > { %24839 = vmatprep.subr.mxu1 %v25848_v0  ;;  %v13039_v48 = vsel %vm1405_vm6, %v13034_v38, %v13026_v34 }
 0xc92   : > { %24177 = vmatmul.mubr.msk.f32.vlgmr.msra.gmra.mrb[20].mxu1 %vm476_vm1, %v24175_v28  ;;  %v13032_v36 = vpop.permute.xlu0 %13031 }
 0xc93   : > { %24840 = vmatpush3.msra.mxu1 %v12576_v31  ;;  %24841 = vmatprep.mubr.msk.f32.mxu1 %vm25857_vm4, %v25848_v0  ;;  %v13035_v43 = vsel %vm1405_vm6, %v13032_v36, %v13034_v38  ;;  %v13036_v46 = vsel %vm1405_vm6, %v13030_v32, %v13032_v36  ;;  %v24195_v31 = vld [vmem:[%s29172_s4 + $0x40] sm:$0xff] }
 0xc94   : > { %12808 = vmatprep.subr.mxu1 %v27566_v44  ;;  %v24183_v44 = vld [vmem:[%s29171_s3 + $0x1a8] sm:$0xff] }
 0xc96   : > { %24842 = vmatmul.mubr.msk.f32.vlgmr.msra.gmra.mrb[22].mxu1 %vm476_vm1, %v24175_v28  ;;  %v13265_v40 = vpop.permute.xlu0 %13264 }
 0xc97   : > { %12809 = vmatpush1.msra.mxu1 %v27563_v41  ;;  %12872 = vmatprep.mubr.f32.mxu1 %v25848_v0  ;;  %v13267_v41 = vpop.permute.xlu1 %13266 }
 0xc98   : > { %12879 = vmatprep.subr.mxu1 %v27585_v54  ;;  %v13274_v49 = vsel %vm1643_vm7, %v13265_v40, %v13267_v41  ;;  %v24187_v54 = vld [vmem:[%s29171_s3 + $0x1b0] sm:$0xff] }
 0xc9a   : > { %24180 = vmatmul.mubr.msk.f32.vlgmr.msra.gmra.mrb[18].mxu1 %vm476_vm1, %v24179_v35  ;;  %v13263_v45 = vpop.permute.xlu0 %13262 }
 0xc9b   : > { %12880 = vmatpush1.msra.mxu1 %v27573_v47  ;;  %12943 = vmatprep.mubr.f32.mxu1 %v25848_v0  ;;  %v13269_v47 = vpop.permute.xlu1 %13268  ;;  %v13275_v52 = vsel %vm1643_vm7, %v13263_v45, %v13265_v40 }
 0xc9c   : > { %24844 = vmatprep.subr.mxu1 %v25848_v0  ;;  %v13273_v56 = vsel %vm1643_vm7, %v13267_v41, %v13269_v47 }
 0xc9e   : > { %24181 = vmatmul.mubr.msk.f32.vlgmr.msra.gmra.mrb[20].mxu1 %vm476_vm1, %v24179_v35  ;;  %v13271_v50 = vpop.permute.xlu0 %13270 }
 0xc9f   : > { %24845 = vmatpush3.msra.mxu1 %v27578_v53  ;;  %24846 = vmatprep.mubr.msk.f32.mxu1 %vm25857_vm4, %v25848_v0  ;;  %v13502_v51 = vpop.permute.xlu1 %13501  ;;  %v13272_v53 = vsel %vm1643_vm7, %v13269_v47, %v13271_v50  ;;  %v13276_v58 = vsel %vm1643_vm7, %v13271_v50, %v13263_v45 }
 0xca0   : > { %13045 = vmatprep.subr.mxu1 %v13037_v39  ;;  %v24196_v39 = vld [vmem:[%s29171_s3 + $0x1c0] sm:$0xff] }
 0xca2   : > { %24847 = vmatmul.mubr.msk.f32.vlgmr.msra.gmra.mrb[22].mxu1 %vm476_vm1, %v24179_v35  ;;  %v13504_v55 = vpop.permute.xlu0 %13503 }
 0xca3   : > { %13046 = vmatpush1.msra.mxu1 %v13038_v42  ;;  %13109 = vmatprep.mubr.f32.mxu1 %v25848_v0  ;;  %v13500_v57 = vpop.permute.xlu1 %13499  ;;  %v13511_v59 = vsel %vm1881_vm8, %v13502_v51, %v13504_v55 }
 0xca4   : > { %13116 = vmatprep.subr.mxu1 %v13035_v43  ;;  %v13512_v62 = vsel %vm1881_vm8, %v13500_v57, %v13502_v51 }
 0xca6   : > { %24184 = vmatmul.mubr.msk.f32.vlgmr.msra.gmra.mrb[18].mxu1 %vm476_vm1, %v24183_v44  ;;  %v13506_v60 = vpop.permute.xlu0 %13505 }
 0xca7   : > { %13117 = vmatpush1.msra.mxu1 %v13036_v46  ;;  %13180 = vmatprep.mubr.f32.mxu1 %v25848_v0  ;;  %v13508_v61 = vpop.permute.xlu1 %13507  ;;  %v13510_v2 = vsel %vm1881_vm8, %v13504_v55, %v13506_v60 }
 0xca8   : > { %24849 = vmatprep.subr.mxu1 %v25848_v0  ;;  %v13509_v63 = vsel %vm1881_vm8, %v13506_v60, %v13508_v61  ;;  %v13513_v3 = vsel %vm1881_vm8, %v13508_v61, %v13500_v57 }
 0xcaa   : > { %24185 = vmatmul.mubr.msk.f32.vlgmr.msra.gmra.mrb[20].mxu1 %vm476_vm1, %v24183_v44 }
 0xcab   : > { %24850 = vmatpush3.msra.mxu1 %v13039_v48  ;;  %24851 = vmatprep.mubr.msk.f32.mxu1 %vm25857_vm4, %v25848_v0 }
 0xcac   : > { %13282 = vmatprep.subr.mxu1 %v13274_v49 }
 0xcae   : > { %24852 = vmatmul.mubr.msk.f32.vlgmr.msra.gmra.mrb[22].mxu1 %vm476_vm1, %v24183_v44 }
 0xcaf   : > { %13283 = vmatpush1.msra.mxu1 %v13275_v52  ;;  %13346 = vmatprep.mubr.f32.mxu1 %v25848_v0 }
 0xcb0   : > { %13353 = vmatprep.subr.mxu1 %v13272_v53  ;;  %v24200_v53 = vld [vmem:[%s29171_s3 + $0x1c8] sm:$0xff] }
 0xcb2   : > { %24188 = vmatmul.mubr.msk.f32.vlgmr.msra.gmra.mrb[18].mxu1 %vm476_vm1, %v24187_v54 }
 0xcb3   : > { %13354 = vmatpush1.msra.mxu1 %v13273_v56  ;;  %13417 = vmatprep.mubr.f32.mxu1 %v25848_v0 }
 0xcb4   : > { %24854 = vmatprep.subr.mxu1 %v25848_v0 }
 0xcb6   : > { %24189 = vmatmul.mubr.msk.f32.vlgmr.msra.gmra.mrb[20].mxu1 %vm476_vm1, %v24187_v54 }
 0xcb7   : > { %24855 = vmatpush3.msra.mxu1 %v13276_v58  ;;  %24856 = vmatprep.mubr.msk.f32.mxu1 %vm25857_vm4, %v25848_v0  ;;  %v12090_v4 = vpop.permute.xlu0 %12089 }
 0xcb8   : > { %13519 = vmatprep.subr.mxu1 %v13511_v59 }
 0xcba   : > { %24857 = vmatmul.mubr.msk.f32.vlgmr.msra.gmra.mrb[22].mxu1 %vm476_vm1, %v24187_v54 }
 0xcbb   : > { %13520 = vmatpush1.msra.mxu1 %v13512_v62  ;;  %13583 = vmatprep.mubr.f32.mxu1 %v25848_v0 }
 0xcbc   : > { %13590 = vmatprep.subr.mxu1 %v13509_v63 }
 0xcbe   : > { %24192 = vmatmul.mubr.msk.f32.vlgmr.msra.gmra.mrb[18].mxu1 %vm476_vm1, %v24191_v1 }
 0xcbf   : > { %13591 = vmatpush1.msra.mxu1 %v13510_v2  ;;  %13654 = vmatprep.mubr.f32.mxu1 %v25848_v0 }
 0xcc0   : > { %24859 = vmatprep.subr.mxu1 %v25848_v0 }
 0xcc2   : > { %24193 = vmatmul.mubr.msk.f32.vlgmr.msra.gmra.mrb[20].mxu1 %vm476_vm1, %v24191_v1 }
 0xcc3   : > { %24860 = vmatpush3.msra.mxu1 %v13513_v3  ;;  %24861 = vmatprep.mubr.msk.f32.mxu1 %vm25857_vm4, %v25848_v0 }
 0xcc6   : > { %24862 = vmatmul.mubr.msk.f32.vlgmr.msra.gmra.mrb[22].mxu1 %vm476_vm1, %v24191_v1  ;;  %v24204_v1 = vld [vmem:[%s29171_s3 + $0x1d0] sm:$0xff] }
 0xcc7   : > { %15498 = vmatprep.mubr.f32.mxu1 %v25848_v0 }
 0xd91   : > { %v13585_v5 = vpop.f32.mrb[18].mxu1 }
 0xd92   : > { %v25109_v6 = vadd.f32 %v13585_v5, %v12090_v4  ;;  %v13587_v9 = vpop.f32.mrb[19].mxu1 }
 0xd93   : > { %v25110_v10 = vadd.f32 %v13587_v9, %v12090_v4  ;;  %v24208_v9 = vld [vmem:[%s29171_s3 + $0x1d8] sm:$0xff] }
 0xd94   : > { %v13736_v11 = vmax.f32 %v25109_v6, 0.0 }
 0xd95   : > { %v13737_v12 = vmax.f32 %v25110_v10, 0.0  ;;  %v13656_v13 = vpop.f32.mrb[20].mxu1 }
 0xd96   : > { %v27783_v14 = vmul.f32 %v26006_v25, %v13736_v11  ;;  %v25111_v15 = vadd.f32 %v13656_v13, %v12090_v4  ;;  %v13658_v17 = vpop.f32.mrb[21].mxu1 }
 0xd97   : > { %v27786_v18 = vmul.f32 %v25996_v16, %v13737_v12  ;;  %v25112_v22 = vadd.f32 %v13658_v17, %v12090_v4 }
 0xd98   : > { %v13738_v19 = vmax.f32 %v25111_v15, 0.0  ;;  %13753 = vrot.lane.b32.xlu1 %v27783_v14, %s25850_s0 }
 0xd99   : > { %v13727_v20 = vpop.f32.mrb[22].mxu1  ;;  %13755 = vrot.lane.b32.xlu0 %v27786_v18, %s25850_s0  ;;  %v13739_v28 = vmax.f32 %v25112_v22, 0.0 }
 0xd9a   : > { %v27793_v21 = vmul.f32 %v26009_v27, %v13738_v19  ;;  %v25113_v23 = vadd.f32 %v13727_v20, %v12090_v4  ;;  %v24863_v24 = vpop.f32.mrb[23].mxu1 }
 0xd9b   : > { %v27805_v30 = vmul.f32 %v26031_v37, %v13739_v28 }
 0xd9c   : > { %v13740_v26 = vmax.f32 %v25113_v23, 0.0 }
 0xd9d   : > { %13757 = vrot.lane.b32.xlu0 %v27793_v21, %s25850_s0 }
 0xd9e   : > { %v27798_v29 = vmul.f32 %v26022_v33, %v13740_v26 }
 0xda0   : > { %13761 = vrot.lane.b32.xlu1 %v27798_v29, %s25850_s0 }
 0xda1   : > { %13990 = vrot.lane.b32.xlu0 %v27783_v14, %s25851_s21 }
 0xda4   : > { %13759 = vrot.lane.b32.xlu1 %v27805_v30, %s25850_s0 }
 0xda5   : > { %13998 = vrot.lane.b32.xlu0 %v27798_v29, %s25851_s21 }
 0xda8   : > { %13992 = vrot.lane.b32.xlu1 %v27786_v18, %s25851_s21 }
 0xda9   : > { %13996 = vrot.lane.b32.xlu0 %v27805_v30, %s25851_s21 }
 0xdac   : > { %13994 = vrot.lane.b32.xlu1 %v27793_v21, %s25851_s21 }
 0xdad   : > { %14229 = vrot.lane.b32.xlu0 %v27786_v18, %s25852_s28 }
 0xdb0   : > { %14227 = vrot.lane.b32.xlu1 %v27783_v14, %s25852_s28 }
 0xdb1   : > { %14231 = vrot.lane.b32.xlu0 %v27793_v21, %s25852_s28 }
 0xdb4   : > { %14235 = vrot.lane.b32.xlu1 %v27798_v29, %s25852_s28 }
 0xdb5   : > { %14688 = vrot.lane.b32.xlu0 %v27786_v18, %s25853_s29 }
 0xdb8   : > { %14233 = vrot.lane.b32.xlu1 %v27805_v30, %s25852_s28 }
 0xdb9   : > { %14686 = vrot.lane.b32.xlu0 %v27783_v14, %s25853_s29 }
 0xdbc   : > { %14690 = vrot.lane.b32.xlu1 %v27793_v21, %s25853_s29 }
 0xdbd   : > { %14694 = vrot.lane.b32.xlu0 %v27798_v29, %s25853_s29 }
 0xdc0   : > { %14692 = vrot.lane.b32.xlu1 %v27805_v30, %s25853_s29 }
 0xdc1   : > { %14927 = vrot.lane.b32.xlu0 %v27793_v21, %s25854_s15 }
 0xdc4   : > { %14925 = vrot.lane.b32.xlu1 %v27786_v18, %s25854_s15 }
 0xdc5   : > { %14929 = vrot.lane.b32.xlu0 %v27805_v30, %s25854_s15 }
 0xdc8   : > { %14923 = vrot.lane.b32.xlu1 %v27783_v14, %s25854_s15 }
 0xdc9   : > { %15162 = vrot.lane.b32.xlu0 %v27786_v18, %s25855_s9 }
 0xdcc   : > { %14931 = vrot.lane.b32.xlu1 %v27798_v29, %s25854_s15 }
 0xdcd   : > { %15160 = vrot.lane.b32.xlu0 %v27783_v14, %s25855_s9 }
 0xdd0   : > { %15164 = vrot.lane.b32.xlu1 %v27793_v21, %s25855_s9 }
 0xdd1   : > { %15168 = vrot.lane.b32.xlu0 %v27798_v29, %s25855_s9 }
 0xdd4   : > { %15166 = vrot.lane.b32.xlu1 %v27805_v30, %s25855_s9 }
 0xdd8   : > { %13750 = vperm.xlu1 %25731, %v24195_v31  }
 0xe0a   : > { %v13754_v32 = vpop.permute.xlu1 %13753 }
 0xe0b   : > { %v13756_v34 = vpop.permute.xlu0 %13755 }
 0xe0c   : > { %v13766_v35 = vsel %vm469_vm0, %v13754_v32, %v13756_v34 }
 0xe0d   : > { %13773 = vmatprep.subr.mxu0 %v13766_v35 }
 0xe0f   : > { %v13758_v36 = vpop.permute.xlu0 %13757 }
 0xe10   : > { %v13765_v45 = vsel %vm469_vm0, %v13756_v34, %v13758_v36 }
 0xe12   : > { %v13762_v38 = vpop.permute.xlu1 %13761 }
 0xe13   : > { %v13991_v40 = vpop.permute.xlu0 %13990  ;;  %v13767_v41 = vsel %vm469_vm0, %v13762_v38, %v13754_v32 }
 0xe14   : > { %13774 = vmatpush1.msra.mxu0 %v13767_v41 }
 0xe15   : > { %24197 = vmatmul.mubr.msk.f32.vlgmr.msra.gmra.mrb[24].mxu0 %vm476_vm1, %v24196_v39 }
 0xe16   : > { %v13760_v42 = vpop.permute.xlu1 %13759  ;;  %13908 = vmatprep.mubr.f32.mxu0 %v25848_v0 }
 0xe17   : > { %v13764_v43 = vsel %vm469_vm0, %v13758_v36, %v13760_v42  ;;  %v13999_v44 = vpop.permute.xlu0 %13998  ;;  %v13763_v47 = vsel %vm469_vm0, %v13760_v42, %v13762_v38  ;;  %v24220_v42 = vld [vmem:[%s29171_s3 + $0x1f0] sm:$0xff] }
 0xe18   : > { %13844 = vmatprep.subr.mxu0 %v13764_v43  ;;  %v14004_v50 = vsel %vm707_vm2, %v13999_v44, %v13991_v40 }
 0xe19   : > { %13845 = vmatpush1.msra.mxu0 %v13765_v45 }
 0xe1a   : > { %24198 = vmatmul.mubr.msk.f32.vlgmr.msra.gmra.mrb[26].mxu0 %vm476_vm1, %v24196_v39  ;;  %24864 = vmatprep.subr.mxu0 %v25848_v0  ;;  %v13993_v46 = vpop.permute.xlu1 %13992 }
 0xe1b   : > { %24865 = vmatpush3.msra.mxu0 %v13763_v47  ;;  %v14003_v48 = vsel %vm707_vm2, %v13991_v40, %v13993_v46  ;;  %24866 = vmatprep.mubr.msk.f32.mxu0 %vm25857_vm4, %v25848_v0  ;;  %v13997_v49 = vpop.permute.xlu0 %13996 }
 0xe1c   : > { %14010 = vmatprep.subr.mxu0 %v14003_v48  ;;  %v14000_v57 = vsel %vm707_vm2, %v13997_v49, %v13999_v44 }
 0xe1e   : > { %24867 = vmatmul.mubr.msk.f32.vlgmr.msra.gmra.mrb[28].mxu0 %vm476_vm1, %v24196_v39  ;;  %v13995_v51 = vpop.permute.xlu1 %13994 }
 0xe1f   : > { %14011 = vmatpush1.msra.mxu0 %v14004_v50  ;;  %v14001_v52 = vsel %vm707_vm2, %v13995_v51, %v13997_v49  ;;  %14074 = vmatprep.mubr.f32.mxu0 %v25848_v0  ;;  %v14002_v54 = vsel %vm707_vm2, %v13993_v46, %v13995_v51  ;;  %v14230_v56 = vpop.permute.xlu0 %14229 }
 0xe20   : > { %14081 = vmatprep.subr.mxu0 %v14001_v52 }
 0xe22   : > { %24201 = vmatmul.mubr.msk.f32.vlgmr.msra.gmra.mrb[24].mxu0 %vm476_vm1, %v24200_v53  ;;  %v14228_v55 = vpop.permute.xlu1 %14227 }
 0xe23   : > { %14082 = vmatpush1.msra.mxu0 %v14002_v54  ;;  %14145 = vmatprep.mubr.f32.mxu0 %v25848_v0  ;;  %v14240_v59 = vsel %vm945_vm5, %v14228_v55, %v14230_v56  ;;  %v14232_v60 = vpop.permute.xlu0 %14231 }
 0xe24   : > { %24869 = vmatprep.subr.mxu0 %v25848_v0  ;;  %v14239_v2 = vsel %vm945_vm5, %v14230_v56, %v14232_v60 }
 0xe26   : > { %24202 = vmatmul.mubr.msk.f32.vlgmr.msra.gmra.mrb[26].mxu0 %vm476_vm1, %v24200_v53  ;;  %v14236_v58 = vpop.permute.xlu1 %14235 }
 0xe27   : > { %24870 = vmatpush3.msra.mxu0 %v14000_v57  ;;  %24871 = vmatprep.mubr.msk.f32.mxu0 %vm25857_vm4, %v25848_v0  ;;  %v14241_v61 = vsel %vm945_vm5, %v14236_v58, %v14228_v55  ;;  %v14689_v3 = vpop.permute.xlu0 %14688 }
 0xe28   : > { %14247 = vmatprep.subr.mxu0 %v14240_v59 }
 0xe2a   : > { %24872 = vmatmul.mubr.msk.f32.vlgmr.msra.gmra.mrb[28].mxu0 %vm476_vm1, %v24200_v53  ;;  %v14234_v62 = vpop.permute.xlu1 %14233 }
 0xe2b   : > { %14248 = vmatpush1.msra.mxu0 %v14241_v61  ;;  %v14238_v63 = vsel %vm945_vm5, %v14232_v60, %v14234_v62  ;;  %14311 = vmatprep.mubr.f32.mxu0 %v25848_v0  ;;  %v14237_v4 = vsel %vm945_vm5, %v14234_v62, %v14236_v58  ;;  %v14687_v6 = vpop.permute.xlu0 %14686 }
 0xe2c   : > { %14318 = vmatprep.subr.mxu0 %v14238_v63  ;;  %v14699_v15 = vsel %vm1405_vm6, %v14687_v6, %v14689_v3 }
 0xe2e   : > { %24205 = vmatmul.mubr.msk.f32.vlgmr.msra.gmra.mrb[24].mxu0 %vm476_vm1, %v24204_v1  ;;  %v14691_v5 = vpop.permute.xlu1 %14690 }
 0xe2f   : > { %14319 = vmatpush1.msra.mxu0 %v14239_v2  ;;  %14382 = vmatprep.mubr.f32.mxu0 %v25848_v0  ;;  %v14695_v11 = vpop.permute.xlu0 %14694  ;;  %v14698_v12 = vsel %vm1405_vm6, %v14689_v3, %v14691_v5 }
 0xe30   : > { %24874 = vmatprep.subr.mxu0 %v25848_v0  ;;  %v14700_v22 = vsel %vm1405_vm6, %v14695_v11, %v14687_v6 }
 0xe32   : > { %24206 = vmatmul.mubr.msk.f32.vlgmr.msra.gmra.mrb[26].mxu0 %vm476_vm1, %v24204_v1  ;;  %v14693_v10 = vpop.permute.xlu1 %14692 }
 0xe33   : > { %24875 = vmatpush3.msra.mxu0 %v14237_v4  ;;  %24876 = vmatprep.mubr.msk.f32.mxu0 %vm25857_vm4, %v25848_v0  ;;  %v14696_v17 = vsel %vm1405_vm6, %v14693_v10, %v14695_v11  ;;  %v14697_v20 = vsel %vm1405_vm6, %v14691_v5, %v14693_v10  ;;  %v24224_v4 = vld [vmem:[%s29172_s4 + $0x48] sm:$0xff] }
 0xe34   : > { %14469 = vmatprep.subr.mxu0 %v27786_v18  ;;  %v24212_v18 = vld [vmem:[%s29171_s3 + $0x1e0] sm:$0xff] }
 0xe36   : > { %24877 = vmatmul.mubr.msk.f32.vlgmr.msra.gmra.mrb[28].mxu0 %vm476_vm1, %v24204_v1  ;;  %v14926_v13 = vpop.permute.xlu1 %14925 }
 0xe37   : > { %14470 = vmatpush1.msra.mxu0 %v27783_v14  ;;  %14533 = vmatprep.mubr.f32.mxu0 %v25848_v0  ;;  %v14928_v14 = vpop.permute.xlu0 %14927 }
 0xe38   : > { %14540 = vmatprep.subr.mxu0 %v27805_v30  ;;  %v14935_v23 = vsel %vm1643_vm7, %v14926_v13, %v14928_v14  ;;  %v24216_v30 = vld [vmem:[%s29171_s3 + $0x1e8] sm:$0xff] }
 0xe3a   : > { %24209 = vmatmul.mubr.msk.f32.vlgmr.msra.gmra.mrb[24].mxu0 %vm476_vm1, %v24208_v9  ;;  %v14924_v19 = vpop.permute.xlu1 %14923 }
 0xe3b   : > { %14541 = vmatpush1.msra.mxu0 %v27793_v21  ;;  %14604 = vmatprep.mubr.f32.mxu0 %v25848_v0  ;;  %v14930_v21 = vpop.permute.xlu0 %14929  ;;  %v14936_v28 = vsel %vm1643_vm7, %v14924_v19, %v14926_v13 }
 0xe3c   : > { %24879 = vmatprep.subr.mxu0 %v25848_v0  ;;  %v14934_v32 = vsel %vm1643_vm7, %v14928_v14, %v14930_v21 }
 0xe3e   : > { %24210 = vmatmul.mubr.msk.f32.vlgmr.msra.gmra.mrb[26].mxu0 %vm476_vm1, %v24208_v9  ;;  %v14932_v24 = vpop.permute.xlu1 %14931 }
 0xe3f   : > { %24880 = vmatpush3.msra.mxu0 %v27798_v29  ;;  %24881 = vmatprep.mubr.msk.f32.mxu0 %vm25857_vm4, %v25848_v0  ;;  %v15163_v26 = vpop.permute.xlu0 %15162  ;;  %v14933_v29 = vsel %vm1643_vm7, %v14930_v21, %v14932_v24  ;;  %v14937_v35 = vsel %vm1643_vm7, %v14932_v24, %v14924_v19 }
 0xe40   : > { %14706 = vmatprep.subr.mxu0 %v14698_v12  ;;  %v24225_v12 = vld [vmem:[%s29171_s3 + $0x1f8] sm:$0xff] }
 0xe42   : > { %24882 = vmatmul.mubr.msk.f32.vlgmr.msra.gmra.mrb[28].mxu0 %vm476_vm1, %v24208_v9  ;;  %v15165_v31 = vpop.permute.xlu1 %15164 }
 0xe43   : > { %14707 = vmatpush1.msra.mxu0 %v14699_v15  ;;  %14770 = vmatprep.mubr.f32.mxu0 %v25848_v0  ;;  %v15161_v34 = vpop.permute.xlu0 %15160  ;;  %v15172_v36 = vsel %vm1881_vm8, %v15163_v26, %v15165_v31 }
 0xe44   : > { %14777 = vmatprep.subr.mxu0 %v14696_v17  ;;  %v15173_v40 = vsel %vm1881_vm8, %v15161_v34, %v15163_v26 }
 0xe46   : > { %24213 = vmatmul.mubr.msk.f32.vlgmr.msra.gmra.mrb[24].mxu0 %vm476_vm1, %v24212_v18  ;;  %v15167_v38 = vpop.permute.xlu1 %15166 }
 0xe47   : > { %14778 = vmatpush1.msra.mxu0 %v14697_v20  ;;  %14841 = vmatprep.mubr.f32.mxu0 %v25848_v0  ;;  %v15169_v39 = vpop.permute.xlu0 %15168  ;;  %v15171_v43 = vsel %vm1881_vm8, %v15165_v31, %v15167_v38 }
 0xe48   : > { %24884 = vmatprep.subr.mxu0 %v25848_v0  ;;  %v15170_v41 = vsel %vm1881_vm8, %v15167_v38, %v15169_v39  ;;  %v15174_v44 = vsel %vm1881_vm8, %v15169_v39, %v15161_v34 }
 0xe4a   : > { %24214 = vmatmul.mubr.msk.f32.vlgmr.msra.gmra.mrb[26].mxu0 %vm476_vm1, %v24212_v18 }
 0xe4b   : > { %24885 = vmatpush3.msra.mxu0 %v14700_v22  ;;  %24886 = vmatprep.mubr.msk.f32.mxu0 %vm25857_vm4, %v25848_v0 }
 0xe4c   : > { %14943 = vmatprep.subr.mxu0 %v14935_v23 }
 0xe4e   : > { %24887 = vmatmul.mubr.msk.f32.vlgmr.msra.gmra.mrb[28].mxu0 %vm476_vm1, %v24212_v18 }
 0xe4f   : > { %14944 = vmatpush1.msra.mxu0 %v14936_v28  ;;  %15007 = vmatprep.mubr.f32.mxu0 %v25848_v0 }
 0xe50   : > { %15014 = vmatprep.subr.mxu0 %v14933_v29  ;;  %v24229_v29 = vld [vmem:[%s29171_s3 + $0x200] sm:$0xff] }
 0xe52   : > { %24217 = vmatmul.mubr.msk.f32.vlgmr.msra.gmra.mrb[24].mxu0 %vm476_vm1, %v24216_v30 }
 0xe53   : > { %15015 = vmatpush1.msra.mxu0 %v14934_v32  ;;  %15078 = vmatprep.mubr.f32.mxu0 %v25848_v0 }
 0xe54   : > { %24889 = vmatprep.subr.mxu0 %v25848_v0 }
 0xe56   : > { %24218 = vmatmul.mubr.msk.f32.vlgmr.msra.gmra.mrb[26].mxu0 %vm476_vm1, %v24216_v30 }
 0xe57   : > { %24890 = vmatpush3.msra.mxu0 %v14937_v35  ;;  %24891 = vmatprep.mubr.msk.f32.mxu0 %vm25857_vm4, %v25848_v0  ;;  %v13751_v45 = vpop.permute.xlu1 %13750 }
 0xe58   : > { %15180 = vmatprep.subr.mxu0 %v15172_v36 }
 0xe5a   : > { %24892 = vmatmul.mubr.msk.f32.vlgmr.msra.gmra.mrb[28].mxu0 %vm476_vm1, %v24216_v30 }
 0xe5b   : > { %15181 = vmatpush1.msra.mxu0 %v15173_v40  ;;  %15244 = vmatprep.mubr.f32.mxu0 %v25848_v0 }
 0xe5c   : > { %15251 = vmatprep.subr.mxu0 %v15170_v41 }
 0xe5e   : > { %24221 = vmatmul.mubr.msk.f32.vlgmr.msra.gmra.mrb[24].mxu0 %vm476_vm1, %v24220_v42 }
 0xe5f   : > { %15252 = vmatpush1.msra.mxu0 %v15171_v43  ;;  %15315 = vmatprep.mubr.f32.mxu0 %v25848_v0 }
 0xe60   : > { %24894 = vmatprep.subr.mxu0 %v25848_v0 }
 0xe62   : > { %24222 = vmatmul.mubr.msk.f32.vlgmr.msra.gmra.mrb[26].mxu0 %vm476_vm1, %v24220_v42 }
 0xe63   : > { %24895 = vmatpush3.msra.mxu0 %v15174_v44  ;;  %24896 = vmatprep.mubr.msk.f32.mxu0 %vm25857_vm4, %v25848_v0 }
 0xe66   : > { %24897 = vmatmul.mubr.msk.f32.vlgmr.msra.gmra.mrb[28].mxu0 %vm476_vm1, %v24220_v42  ;;  %v24233_v42 = vld [vmem:[%s29171_s3 + $0x208] sm:$0xff] }
 0xe67   : > { %17159 = vmatprep.mubr.f32.mxu0 %v25848_v0 }
 0xf31   : > { %v15246_v46 = vpop.f32.mrb[24].mxu0 }
 0xf32   : > { %v25114_v47 = vadd.f32 %v15246_v46, %v13751_v45  ;;  %v15248_v48 = vpop.f32.mrb[25].mxu0 }
 0xf33   : > { %v25115_v49 = vadd.f32 %v15248_v48, %v13751_v45  ;;  %v24237_v48 = vld [vmem:[%s29171_s3 + $0x210] sm:$0xff] }
 0xf34   : > { %v15397_v50 = vmax.f32 %v25114_v47, 0.0 }
 0xf35   : > { %v15398_v51 = vmax.f32 %v25115_v49, 0.0  ;;  %v15317_v52 = vpop.f32.mrb[26].mxu0 }
 0xf36   : > { %v28003_v53 = vmul.f32 %v26006_v25, %v15397_v50  ;;  %v25116_v54 = vadd.f32 %v15317_v52, %v13751_v45  ;;  %v15319_v55 = vpop.f32.mrb[27].mxu0 }
 0xf37   : > { %v28006_v56 = vmul.f32 %v25996_v16, %v15398_v51  ;;  %v25117_v60 = vadd.f32 %v15319_v55, %v13751_v45 }
 0xf38   : > { %v15399_v57 = vmax.f32 %v25116_v54, 0.0  ;;  %15414 = vrot.lane.b32.xlu0 %v28003_v53, %s25850_s0 }
 0xf39   : > { %v15388_v58 = vpop.f32.mrb[28].mxu0  ;;  %15416 = vrot.lane.b32.xlu1 %v28006_v56, %s25850_s0  ;;  %v15400_v1 = vmax.f32 %v25117_v60, 0.0 }
 0xf3a   : > { %v28013_v59 = vmul.f32 %v26009_v27, %v15399_v57  ;;  %v25118_v61 = vadd.f32 %v15388_v58, %v13751_v45  ;;  %v24898_v62 = vpop.f32.mrb[29].mxu0 }
 0xf3b   : > { %v28025_v3 = vmul.f32 %v26031_v37, %v15400_v1 }
 0xf3c   : > { %v15401_v63 = vmax.f32 %v25118_v61, 0.0 }
 0xf3d   : > { %15418 = vrot.lane.b32.xlu1 %v28013_v59, %s25850_s0 }
 0xf3e   : > { %v28018_v2 = vmul.f32 %v26022_v33, %v15401_v63 }
 0xf40   : > { %15422 = vrot.lane.b32.xlu0 %v28018_v2, %s25850_s0 }
 0xf41   : > { %15651 = vrot.lane.b32.xlu1 %v28003_v53, %s25851_s21 }
 0xf44   : > { %15420 = vrot.lane.b32.xlu0 %v28025_v3, %s25850_s0 }
 0xf45   : > { %15659 = vrot.lane.b32.xlu1 %v28018_v2, %s25851_s21 }
 0xf48   : > { %15653 = vrot.lane.b32.xlu0 %v28006_v56, %s25851_s21 }
 0xf49   : > { %15657 = vrot.lane.b32.xlu1 %v28025_v3, %s25851_s21 }
 0xf4c   : > { %15655 = vrot.lane.b32.xlu0 %v28013_v59, %s25851_s21 }
 0xf4d   : > { %15890 = vrot.lane.b32.xlu1 %v28006_v56, %s25852_s28 }
 0xf50   : > { %15888 = vrot.lane.b32.xlu0 %v28003_v53, %s25852_s28 }
 0xf51   : > { %15892 = vrot.lane.b32.xlu1 %v28013_v59, %s25852_s28 }
 0xf54   : > { %15896 = vrot.lane.b32.xlu0 %v28018_v2, %s25852_s28 }
 0xf55   : > { %16349 = vrot.lane.b32.xlu1 %v28006_v56, %s25853_s29 }
 0xf58   : > { %15894 = vrot.lane.b32.xlu0 %v28025_v3, %s25852_s28 }
 0xf59   : > { %16347 = vrot.lane.b32.xlu1 %v28003_v53, %s25853_s29 }
 0xf5c   : > { %16351 = vrot.lane.b32.xlu0 %v28013_v59, %s25853_s29 }
 0xf5d   : > { %16355 = vrot.lane.b32.xlu1 %v28018_v2, %s25853_s29 }
 0xf60   : > { %16353 = vrot.lane.b32.xlu0 %v28025_v3, %s25853_s29 }
 0xf61   : > { %16588 = vrot.lane.b32.xlu1 %v28013_v59, %s25854_s15 }
 0xf64   : > { %16586 = vrot.lane.b32.xlu0 %v28006_v56, %s25854_s15 }
 0xf65   : > { %16590 = vrot.lane.b32.xlu1 %v28025_v3, %s25854_s15 }
 0xf68   : > { %16584 = vrot.lane.b32.xlu0 %v28003_v53, %s25854_s15 }
 0xf69   : > { %16823 = vrot.lane.b32.xlu1 %v28006_v56, %s25855_s9 }
 0xf6c   : > { %16592 = vrot.lane.b32.xlu0 %v28018_v2, %s25854_s15 }
 0xf6d   : > { %16821 = vrot.lane.b32.xlu1 %v28003_v53, %s25855_s9 }
 0xf70   : > { %16825 = vrot.lane.b32.xlu0 %v28013_v59, %s25855_s9 }
 0xf71   : > { %16829 = vrot.lane.b32.xlu1 %v28018_v2, %s25855_s9 }
 0xf74   : > { %16827 = vrot.lane.b32.xlu0 %v28025_v3, %s25855_s9 }
 0xf78   : > { %15411 = vperm.xlu0 %25730, %v24224_v4  }
 0xfaa   : > { %v15415_v5 = vpop.permute.xlu0 %15414 }
 0xfab   : > { %v15417_v6 = vpop.permute.xlu1 %15416 }
 0xfac   : > { %v15427_v9 = vsel %vm469_vm0, %v15415_v5, %v15417_v6 }
 0xfad   : > { %15434 = vmatprep.subr.mxu1 %v15427_v9 }
 0xfaf   : > { %v15419_v10 = vpop.permute.xlu1 %15418 }
 0xfb0   : > { %v15426_v19 = vsel %vm469_vm0, %v15417_v6, %v15419_v10 }
 0xfb2   : > { %v15423_v11 = vpop.permute.xlu0 %15422 }
 0xfb3   : > { %v15652_v13 = vpop.permute.xlu1 %15651  ;;  %v15428_v14 = vsel %vm469_vm0, %v15423_v11, %v15415_v5 }
 0xfb4   : > { %15435 = vmatpush1.msra.mxu1 %v15428_v14 }
 0xfb5   : > { %24226 = vmatmul.mubr.msk.f32.vlgmr.msra.gmra.mrb[24].mxu1 %vm476_vm1, %v24225_v12 }
 0xfb6   : > { %v15421_v15 = vpop.permute.xlu0 %15420  ;;  %15569 = vmatprep.mubr.f32.mxu1 %v25848_v0 }
 0xfb7   : > { %v15425_v17 = vsel %vm469_vm0, %v15419_v10, %v15421_v15  ;;  %v15660_v18 = vpop.permute.xlu1 %15659  ;;  %v15424_v21 = vsel %vm469_vm0, %v15421_v15, %v15423_v11  ;;  %v24249_v15 = vld [vmem:[%s29171_s3 + $0x228] sm:$0xff] }
 0xfb8   : > { %15505 = vmatprep.subr.mxu1 %v15425_v17  ;;  %v15665_v24 = vsel %vm707_vm2, %v15660_v18, %v15652_v13 }
 0xfb9   : > { %15506 = vmatpush1.msra.mxu1 %v15426_v19 }
 0xfba   : > { %24227 = vmatmul.mubr.msk.f32.vlgmr.msra.gmra.mrb[26].mxu1 %vm476_vm1, %v24225_v12  ;;  %24899 = vmatprep.subr.mxu1 %v25848_v0  ;;  %v15654_v20 = vpop.permute.xlu0 %15653 }
 0xfbb   : > { %24900 = vmatpush3.msra.mxu1 %v15424_v21  ;;  %v15664_v22 = vsel %vm707_vm2, %v15652_v13, %v15654_v20  ;;  %24901 = vmatprep.mubr.msk.f32.mxu1 %vm25857_vm4, %v25848_v0  ;;  %v15658_v23 = vpop.permute.xlu1 %15657 }
 0xfbc   : > { %15671 = vmatprep.subr.mxu1 %v15664_v22  ;;  %v15661_v34 = vsel %vm707_vm2, %v15658_v23, %v15660_v18 }
 0xfbe   : > { %24902 = vmatmul.mubr.msk.f32.vlgmr.msra.gmra.mrb[28].mxu1 %vm476_vm1, %v24225_v12  ;;  %v15656_v26 = vpop.permute.xlu0 %15655 }
 0xfbf   : > { %15672 = vmatpush1.msra.mxu1 %v15665_v24  ;;  %v15662_v28 = vsel %vm707_vm2, %v15656_v26, %v15658_v23  ;;  %15735 = vmatprep.mubr.f32.mxu1 %v25848_v0  ;;  %v15663_v30 = vsel %vm707_vm2, %v15654_v20, %v15656_v26  ;;  %v15891_v32 = vpop.permute.xlu1 %15890 }
 0xfc0   : > { %15742 = vmatprep.subr.mxu1 %v15662_v28 }
 0xfc2   : > { %24230 = vmatmul.mubr.msk.f32.vlgmr.msra.gmra.mrb[24].mxu1 %vm476_vm1, %v24229_v29  ;;  %v15889_v31 = vpop.permute.xlu0 %15888 }
 0xfc3   : > { %15743 = vmatpush1.msra.mxu1 %v15663_v30  ;;  %15806 = vmatprep.mubr.f32.mxu1 %v25848_v0  ;;  %v15901_v36 = vsel %vm945_vm5, %v15889_v31, %v15891_v32  ;;  %v15893_v38 = vpop.permute.xlu1 %15892 }
 0xfc4   : > { %24904 = vmatprep.subr.mxu1 %v25848_v0  ;;  %v15900_v43 = vsel %vm945_vm5, %v15891_v32, %v15893_v38 }
 0xfc6   : > { %24231 = vmatmul.mubr.msk.f32.vlgmr.msra.gmra.mrb[26].mxu1 %vm476_vm1, %v24229_v29  ;;  %v15897_v35 = vpop.permute.xlu0 %15896 }
 0xfc7   : > { %24905 = vmatpush3.msra.mxu1 %v15661_v34  ;;  %24906 = vmatprep.mubr.msk.f32.mxu1 %vm25857_vm4, %v25848_v0  ;;  %v15902_v39 = vsel %vm945_vm5, %v15897_v35, %v15889_v31  ;;  %v16350_v44 = vpop.permute.xlu1 %16349 }
 0xfc8   : > { %15908 = vmatprep.subr.mxu1 %v15901_v36 }
 0xfca   : > { %24907 = vmatmul.mubr.msk.f32.vlgmr.msra.gmra.mrb[28].mxu1 %vm476_vm1, %v24229_v29  ;;  %v15895_v40 = vpop.permute.xlu0 %15894 }
 0xfcb   : > { %15909 = vmatpush1.msra.mxu1 %v15902_v39  ;;  %v15899_v41 = vsel %vm945_vm5, %v15893_v38, %v15895_v40  ;;  %15972 = vmatprep.mubr.f32.mxu1 %v25848_v0  ;;  %v15898_v45 = vsel %vm945_vm5, %v15895_v40, %v15897_v35  ;;  %v16348_v47 = vpop.permute.xlu1 %16347 }
 0xfcc   : > { %15979 = vmatprep.subr.mxu1 %v15899_v41  ;;  %v16360_v54 = vsel %vm1405_vm6, %v16348_v47, %v16350_v44 }
 0xfce   : > { %24234 = vmatmul.mubr.msk.f32.vlgmr.msra.gmra.mrb[24].mxu1 %vm476_vm1, %v24233_v42  ;;  %v16352_v46 = vpop.permute.xlu0 %16351 }
 0xfcf   : > { %15980 = vmatpush1.msra.mxu1 %v15900_v43  ;;  %16043 = vmatprep.mubr.f32.mxu1 %v25848_v0  ;;  %v16356_v50 = vpop.permute.xlu1 %16355  ;;  %v16359_v51 = vsel %vm1405_vm6, %v16350_v44, %v16352_v46 }
 0xfd0   : > { %24909 = vmatprep.subr.mxu1 %v25848_v0  ;;  %v16361_v60 = vsel %vm1405_vm6, %v16356_v50, %v16348_v47 }
 0xfd2   : > { %24235 = vmatmul.mubr.msk.f32.vlgmr.msra.gmra.mrb[26].mxu1 %vm476_vm1, %v24233_v42  ;;  %v16354_v49 = vpop.permute.xlu0 %16353 }
 0xfd3   : > { %24910 = vmatpush3.msra.mxu1 %v15898_v45  ;;  %24911 = vmatprep.mubr.msk.f32.mxu1 %vm25857_vm4, %v25848_v0  ;;  %v16357_v55 = vsel %vm1405_vm6, %v16354_v49, %v16356_v50  ;;  %v16358_v58 = vsel %vm1405_vm6, %v16352_v46, %v16354_v49  ;;  %v24253_v45 = vld [vmem:[%s29172_s4 + $0x50] sm:$0xff] }
 0xfd4   : > { %16130 = vmatprep.subr.mxu1 %v28006_v56  ;;  %v24241_v56 = vld [vmem:[%s29171_s3 + $0x218] sm:$0xff] }
 0xfd6   : > { %24912 = vmatmul.mubr.msk.f32.vlgmr.msra.gmra.mrb[28].mxu1 %vm476_vm1, %v24233_v42  ;;  %v16587_v52 = vpop.permute.xlu0 %16586 }
 0xfd7   : > { %16131 = vmatpush1.msra.mxu1 %v28003_v53  ;;  %16194 = vmatprep.mubr.f32.mxu1 %v25848_v0  ;;  %v16589_v53 = vpop.permute.xlu1 %16588 }
 0xfd8   : > { %16201 = vmatprep.subr.mxu1 %v28025_v3  ;;  %v16596_v61 = vsel %vm1643_vm7, %v16587_v52, %v16589_v53  ;;  %v24245_v3 = vld [vmem:[%s29171_s3 + $0x220] sm:$0xff] }
 0xfda   : > { %24238 = vmatmul.mubr.msk.f32.vlgmr.msra.gmra.mrb[24].mxu1 %vm476_vm1, %v24237_v48  ;;  %v16585_v57 = vpop.permute.xlu0 %16584 }
 0xfdb   : > { %16202 = vmatpush1.msra.mxu1 %v28013_v59  ;;  %16265 = vmatprep.mubr.f32.mxu1 %v25848_v0  ;;  %v16591_v59 = vpop.permute.xlu1 %16590  ;;  %v16597_v1 = vsel %vm1643_vm7, %v16585_v57, %v16587_v52 }
 0xfdc   : > { %24914 = vmatprep.subr.mxu1 %v25848_v0  ;;  %v16595_v5 = vsel %vm1643_vm7, %v16589_v53, %v16591_v59 }
 0xfde   : > { %24239 = vmatmul.mubr.msk.f32.vlgmr.msra.gmra.mrb[26].mxu1 %vm476_vm1, %v24237_v48  ;;  %v16593_v62 = vpop.permute.xlu0 %16592 }
 0xfdf   : > { %24915 = vmatpush3.msra.mxu1 %v28018_v2  ;;  %24916 = vmatprep.mubr.msk.f32.mxu1 %vm25857_vm4, %v25848_v0  ;;  %v16824_v63 = vpop.permute.xlu1 %16823  ;;  %v16594_v2 = vsel %vm1643_vm7, %v16591_v59, %v16593_v62  ;;  %v16598_v9 = vsel %vm1643_vm7, %v16593_v62, %v16585_v57 }
 0xfe0   : > { %16367 = vmatprep.subr.mxu1 %v16359_v51  ;;  %v24254_v51 = vld [vmem:[%s29171_s3 + $0x230] sm:$0xff] }
 0xfe2   : > { %24917 = vmatmul.mubr.msk.f32.vlgmr.msra.gmra.mrb[28].mxu1 %vm476_vm1, %v24237_v48  ;;  %v16826_v4 = vpop.permute.xlu0 %16825 }
 0xfe3   : > { %16368 = vmatpush1.msra.mxu1 %v16360_v54  ;;  %16431 = vmatprep.mubr.f32.mxu1 %v25848_v0  ;;  %v16822_v6 = vpop.permute.xlu1 %16821  ;;  %v16833_v10 = vsel %vm1881_vm8, %v16824_v63, %v16826_v4 }
 0xfe4   : > { %16438 = vmatprep.subr.mxu1 %v16357_v55  ;;  %v16834_v13 = vsel %vm1881_vm8, %v16822_v6, %v16824_v63 }
 0xfe6   : > { %24242 = vmatmul.mubr.msk.f32.vlgmr.msra.gmra.mrb[24].mxu1 %vm476_vm1, %v24241_v56  ;;  %v16828_v11 = vpop.permute.xlu0 %16827 }
 0xfe7   : > { %16439 = vmatpush1.msra.mxu1 %v16358_v58  ;;  %16502 = vmatprep.mubr.f32.mxu1 %v25848_v0  ;;  %v16830_v12 = vpop.permute.xlu1 %16829  ;;  %v16832_v17 = vsel %vm1881_vm8, %v16826_v4, %v16828_v11 }
 0xfe8   : > { %24919 = vmatprep.subr.mxu1 %v25848_v0  ;;  %v16831_v14 = vsel %vm1881_vm8, %v16828_v11, %v16830_v12  ;;  %v16835_v18 = vsel %vm1881_vm8, %v16830_v12, %v16822_v6 }
 0xfea   : > { %24243 = vmatmul.mubr.msk.f32.vlgmr.msra.gmra.mrb[26].mxu1 %vm476_vm1, %v24241_v56 }
 0xfeb   : > { %24920 = vmatpush3.msra.mxu1 %v16361_v60  ;;  %24921 = vmatprep.mubr.msk.f32.mxu1 %vm25857_vm4, %v25848_v0 }
 0xfec   : > { %16604 = vmatprep.subr.mxu1 %v16596_v61 }
 0xfee   : > { %24922 = vmatmul.mubr.msk.f32.vlgmr.msra.gmra.mrb[28].mxu1 %vm476_vm1, %v24241_v56 }
 0xfef   : > { %16605 = vmatpush1.msra.mxu1 %v16597_v1  ;;  %16668 = vmatprep.mubr.f32.mxu1 %v25848_v0 }
 0xff0   : > { %16675 = vmatprep.subr.mxu1 %v16594_v2  ;;  %v24258_v2 = vld [vmem:[%s29171_s3 + $0x238] sm:$0xff] }
 0xff2   : > { %24246 = vmatmul.mubr.msk.f32.vlgmr.msra.gmra.mrb[24].mxu1 %vm476_vm1, %v24245_v3 }
 0xff3   : > { %16676 = vmatpush1.msra.mxu1 %v16595_v5  ;;  %16739 = vmatprep.mubr.f32.mxu1 %v25848_v0 }
 0xff4   : > { %24924 = vmatprep.subr.mxu1 %v25848_v0 }
 0xff6   : > { %24247 = vmatmul.mubr.msk.f32.vlgmr.msra.gmra.mrb[26].mxu1 %vm476_vm1, %v24245_v3 }
 0xff7   : > { %24925 = vmatpush3.msra.mxu1 %v16598_v9  ;;  %24926 = vmatprep.mubr.msk.f32.mxu1 %vm25857_vm4, %v25848_v0  ;;  %v15412_v19 = vpop.permute.xlu0 %15411 }
 0xff8   : > { %16841 = vmatprep.subr.mxu1 %v16833_v10 }
 0xffa   : > { %24927 = vmatmul.mubr.msk.f32.vlgmr.msra.gmra.mrb[28].mxu1 %vm476_vm1, %v24245_v3 }
 0xffb   : > { %16842 = vmatpush1.msra.mxu1 %v16834_v13  ;;  %16905 = vmatprep.mubr.f32.mxu1 %v25848_v0 }
 0xffc   : > { %16912 = vmatprep.subr.mxu1 %v16831_v14 }
 0xffe   : > { %24250 = vmatmul.mubr.msk.f32.vlgmr.msra.gmra.mrb[24].mxu1 %vm476_vm1, %v24249_v15 }
 0xfff   : > { %16913 = vmatpush1.msra.mxu1 %v16832_v17  ;;  %16976 = vmatprep.mubr.f32.mxu1 %v25848_v0 }
0x1000   : > { %24929 = vmatprep.subr.mxu1 %v25848_v0 }
0x1002   : > { %24251 = vmatmul.mubr.msk.f32.vlgmr.msra.gmra.mrb[26].mxu1 %vm476_vm1, %v24249_v15 }
0x1003   : > { %24930 = vmatpush3.msra.mxu1 %v16835_v18  ;;  %24931 = vmatprep.mubr.msk.f32.mxu1 %vm25857_vm4, %v25848_v0 }
0x1006   : > { %24932 = vmatmul.mubr.msk.f32.vlgmr.msra.gmra.mrb[28].mxu1 %vm476_vm1, %v24249_v15  ;;  %v24262_v15 = vld [vmem:[%s29171_s3 + $0x240] sm:$0xff] }
0x1007   : > { %18820 = vmatprep.mubr.f32.mxu1 %v25848_v0 }
0x10d1   : > { %v16907_v20 = vpop.f32.mrb[24].mxu1 }
0x10d2   : > { %v25119_v21 = vadd.f32 %v16907_v20, %v15412_v19  ;;  %v16909_v22 = vpop.f32.mrb[25].mxu1 }
0x10d3   : > { %v25120_v23 = vadd.f32 %v16909_v22, %v15412_v19  ;;  %v24266_v22 = vld [vmem:[%s29171_s3 + $0x248] sm:$0xff] }
0x10d4   : > { %v17058_v24 = vmax.f32 %v25119_v21, 0.0 }
0x10d5   : > { %v17059_v26 = vmax.f32 %v25120_v23, 0.0  ;;  %v16978_v28 = vpop.f32.mrb[26].mxu1 }
0x10d6   : > { %v28223_v29 = vmul.f32 %v26006_v25, %v17058_v24  ;;  %v25121_v30 = vadd.f32 %v16978_v28, %v15412_v19  ;;  %v16980_v31 = vpop.f32.mrb[27].mxu1 }
0x10d7   : > { %v28226_v32 = vmul.f32 %v25996_v16, %v17059_v26  ;;  %v25122_v38 = vadd.f32 %v16980_v31, %v15412_v19 }
0x10d8   : > { %v17060_v34 = vmax.f32 %v25121_v30, 0.0  ;;  %17075 = vrot.lane.b32.xlu1 %v28223_v29, %s25850_s0 }
0x10d9   : > { %v17049_v35 = vpop.f32.mrb[28].mxu1  ;;  %17077 = vrot.lane.b32.xlu0 %v28226_v32, %s25850_s0  ;;  %v17061_v42 = vmax.f32 %v25122_v38, 0.0 }
0x10da   : > { %v28233_v36 = vmul.f32 %v26009_v27, %v17060_v34  ;;  %v25123_v39 = vadd.f32 %v17049_v35, %v15412_v19  ;;  %v24933_v40 = vpop.f32.mrb[29].mxu1 }
0x10db   : > { %v28245_v44 = vmul.f32 %v26031_v37, %v17061_v42 }
0x10dc   : > { %v17062_v41 = vmax.f32 %v25123_v39, 0.0 }
0x10dd   : > { %17079 = vrot.lane.b32.xlu0 %v28233_v36, %s25850_s0 }
0x10de   : > { %v28238_v43 = vmul.f32 %v26022_v33, %v17062_v41 }
0x10e0   : > { %17083 = vrot.lane.b32.xlu1 %v28238_v43, %s25850_s0 }
0x10e1   : > { %17312 = vrot.lane.b32.xlu0 %v28223_v29, %s25851_s21 }
0x10e4   : > { %17081 = vrot.lane.b32.xlu1 %v28245_v44, %s25850_s0 }
0x10e5   : > { %17320 = vrot.lane.b32.xlu0 %v28238_v43, %s25851_s21 }
0x10e8   : > { %17314 = vrot.lane.b32.xlu1 %v28226_v32, %s25851_s21 }
0x10e9   : > { %17318 = vrot.lane.b32.xlu0 %v28245_v44, %s25851_s21 }
0x10ec   : > { %17316 = vrot.lane.b32.xlu1 %v28233_v36, %s25851_s21 }
0x10ed   : > { %17551 = vrot.lane.b32.xlu0 %v28226_v32, %s25852_s28 }
0x10f0   : > { %17549 = vrot.lane.b32.xlu1 %v28223_v29, %s25852_s28 }
0x10f1   : > { %17553 = vrot.lane.b32.xlu0 %v28233_v36, %s25852_s28 }
0x10f4   : > { %17557 = vrot.lane.b32.xlu1 %v28238_v43, %s25852_s28 }
0x10f5   : > { %18010 = vrot.lane.b32.xlu0 %v28226_v32, %s25853_s29 }
0x10f8   : > { %17555 = vrot.lane.b32.xlu1 %v28245_v44, %s25852_s28 }
0x10f9   : > { %18008 = vrot.lane.b32.xlu0 %v28223_v29, %s25853_s29 }
0x10fc   : > { %18012 = vrot.lane.b32.xlu1 %v28233_v36, %s25853_s29 }
0x10fd   : > { %18016 = vrot.lane.b32.xlu0 %v28238_v43, %s25853_s29 }
0x1100   : > { %18014 = vrot.lane.b32.xlu1 %v28245_v44, %s25853_s29 }
0x1101   : > { %18249 = vrot.lane.b32.xlu0 %v28233_v36, %s25854_s15 }
0x1104   : > { %18247 = vrot.lane.b32.xlu1 %v28226_v32, %s25854_s15 }
0x1105   : > { %18251 = vrot.lane.b32.xlu0 %v28245_v44, %s25854_s15 }
0x1108   : > { %18245 = vrot.lane.b32.xlu1 %v28223_v29, %s25854_s15 }
0x1109   : > { %18484 = vrot.lane.b32.xlu0 %v28226_v32, %s25855_s9 }
0x110c   : > { %18253 = vrot.lane.b32.xlu1 %v28238_v43, %s25854_s15 }
0x110d   : > { %18482 = vrot.lane.b32.xlu0 %v28223_v29, %s25855_s9 }
0x1110   : > { %18486 = vrot.lane.b32.xlu1 %v28233_v36, %s25855_s9 }
0x1111   : > { %18490 = vrot.lane.b32.xlu0 %v28238_v43, %s25855_s9 }
0x1114   : > { %18488 = vrot.lane.b32.xlu1 %v28245_v44, %s25855_s9 }
0x1118   : > { %17072 = vperm.xlu1 %25731, %v24253_v45  }
0x114a   : > { %v17076_v46 = vpop.permute.xlu1 %17075 }
0x114b   : > { %v17078_v47 = vpop.permute.xlu0 %17077 }
0x114c   : > { %v17088_v48 = vsel %vm469_vm0, %v17076_v46, %v17078_v47 }
0x114d   : > { %17095 = vmatprep.subr.mxu0 %v17088_v48 }
0x114f   : > { %v17080_v49 = vpop.permute.xlu0 %17079 }
0x1150   : > { %v17087_v57 = vsel %vm469_vm0, %v17078_v47, %v17080_v49 }
0x1152   : > { %v17084_v50 = vpop.permute.xlu1 %17083 }
0x1153   : > { %v17313_v52 = vpop.permute.xlu0 %17312  ;;  %v17089_v53 = vsel %vm469_vm0, %v17084_v50, %v17076_v46 }
0x1154   : > { %17096 = vmatpush1.msra.mxu0 %v17089_v53 }
0x1155   : > { %24255 = vmatmul.mubr.msk.f32.vlgmr.msra.gmra.mrb[30].mxu0 %vm476_vm1, %v24254_v51 }
0x1156   : > { %v17082_v54 = vpop.permute.xlu1 %17081  ;;  %17230 = vmatprep.mubr.f32.mxu0 %v25848_v0 }
0x1157   : > { %v17086_v55 = vsel %vm469_vm0, %v17080_v49, %v17082_v54  ;;  %v17321_v56 = vpop.permute.xlu0 %17320  ;;  %v17085_v59 = vsel %vm469_vm0, %v17082_v54, %v17084_v50  ;;  %v24278_v54 = vld [vmem:[%s29171_s3 + $0x260] sm:$0xff] }
0x1158   : > { %17166 = vmatprep.subr.mxu0 %v17086_v55  ;;  %v17326_v62 = vsel %vm707_vm2, %v17321_v56, %v17313_v52 }
0x1159   : > { %17167 = vmatpush1.msra.mxu0 %v17087_v57 }
0x115a   : > { %24256 = vmatmul.mubr.msk.f32.vlgmr.msra.gmra.mrb[32].mxu0 %vm476_vm1, %v24254_v51  ;;  %24934 = vmatprep.subr.mxu0 %v25848_v0  ;;  %v17315_v58 = vpop.permute.xlu1 %17314 }
0x115b   : > { %24935 = vmatpush3.msra.mxu0 %v17085_v59  ;;  %v17325_v60 = vsel %vm707_vm2, %v17313_v52, %v17315_v58  ;;  %24936 = vmatprep.mubr.msk.f32.mxu0 %vm25857_vm4, %v25848_v0  ;;  %v17319_v61 = vpop.permute.xlu0 %17318 }
0x115c   : > { %17332 = vmatprep.subr.mxu0 %v17325_v60  ;;  %v17322_v6 = vsel %vm707_vm2, %v17319_v61, %v17321_v56 }
0x115e   : > { %24937 = vmatmul.mubr.msk.f32.vlgmr.msra.gmra.mrb[34].mxu0 %vm476_vm1, %v24254_v51  ;;  %v17317_v63 = vpop.permute.xlu1 %17316 }
0x115f   : > { %17333 = vmatpush1.msra.mxu0 %v17326_v62  ;;  %v17323_v1 = vsel %vm707_vm2, %v17317_v63, %v17319_v61  ;;  %17396 = vmatprep.mubr.f32.mxu0 %v25848_v0  ;;  %v17324_v3 = vsel %vm707_vm2, %v17315_v58, %v17317_v63  ;;  %v17552_v5 = vpop.permute.xlu0 %17551 }
0x1160   : > { %17403 = vmatprep.subr.mxu0 %v17323_v1 }
0x1162   : > { %24259 = vmatmul.mubr.msk.f32.vlgmr.msra.gmra.mrb[30].mxu0 %vm476_vm1, %v24258_v2  ;;  %v17550_v4 = vpop.permute.xlu1 %17549 }
0x1163   : > { %17404 = vmatpush1.msra.mxu0 %v17324_v3  ;;  %17467 = vmatprep.mubr.f32.mxu0 %v25848_v0  ;;  %v17562_v10 = vsel %vm945_vm5, %v17550_v4, %v17552_v5  ;;  %v17554_v11 = vpop.permute.xlu0 %17553 }
0x1164   : > { %24939 = vmatprep.subr.mxu0 %v25848_v0  ;;  %v17561_v17 = vsel %vm945_vm5, %v17552_v5, %v17554_v11 }
0x1166   : > { %24260 = vmatmul.mubr.msk.f32.vlgmr.msra.gmra.mrb[32].mxu0 %vm476_vm1, %v24258_v2  ;;  %v17558_v9 = vpop.permute.xlu1 %17557 }
0x1167   : > { %24940 = vmatpush3.msra.mxu0 %v17322_v6  ;;  %24941 = vmatprep.mubr.msk.f32.mxu0 %vm25857_vm4, %v25848_v0  ;;  %v17563_v12 = vsel %vm945_vm5, %v17558_v9, %v17550_v4  ;;  %v18011_v18 = vpop.permute.xlu0 %18010 }
0x1168   : > { %17569 = vmatprep.subr.mxu0 %v17562_v10 }
0x116a   : > { %24942 = vmatmul.mubr.msk.f32.vlgmr.msra.gmra.mrb[34].mxu0 %vm476_vm1, %v24258_v2  ;;  %v17556_v13 = vpop.permute.xlu1 %17555 }
0x116b   : > { %17570 = vmatpush1.msra.mxu0 %v17563_v12  ;;  %v17560_v14 = vsel %vm945_vm5, %v17554_v11, %v17556_v13  ;;  %17633 = vmatprep.mubr.f32.mxu0 %v25848_v0  ;;  %v17559_v19 = vsel %vm945_vm5, %v17556_v13, %v17558_v9  ;;  %v18009_v21 = vpop.permute.xlu0 %18008 }
0x116c   : > { %17640 = vmatprep.subr.mxu0 %v17560_v14  ;;  %v18021_v30 = vsel %vm1405_vm6, %v18009_v21, %v18011_v18 }
0x116e   : > { %24263 = vmatmul.mubr.msk.f32.vlgmr.msra.gmra.mrb[30].mxu0 %vm476_vm1, %v24262_v15  ;;  %v18013_v20 = vpop.permute.xlu1 %18012 }
0x116f   : > { %17641 = vmatpush1.msra.mxu0 %v17561_v17  ;;  %17704 = vmatprep.mubr.f32.mxu0 %v25848_v0  ;;  %v18017_v24 = vpop.permute.xlu0 %18016  ;;  %v18020_v26 = vsel %vm1405_vm6, %v18011_v18, %v18013_v20 }
0x1170   : > { %24944 = vmatprep.subr.mxu0 %v25848_v0  ;;  %v18022_v38 = vsel %vm1405_vm6, %v18017_v24, %v18009_v21 }
0x1172   : > { %24264 = vmatmul.mubr.msk.f32.vlgmr.msra.gmra.mrb[32].mxu0 %vm476_vm1, %v24262_v15  ;;  %v18015_v23 = vpop.permute.xlu1 %18014 }
0x1173   : > { %24945 = vmatpush3.msra.mxu0 %v17559_v19  ;;  %24946 = vmatprep.mubr.msk.f32.mxu0 %vm25857_vm4, %v25848_v0  ;;  %v18018_v31 = vsel %vm1405_vm6, %v18015_v23, %v18017_v24  ;;  %v18019_v35 = vsel %vm1405_vm6, %v18013_v20, %v18015_v23  ;;  %v24282_v19 = vld [vmem:[%s29172_s4 + $0x58] sm:$0xff] }
0x1174   : > { %17791 = vmatprep.subr.mxu0 %v28226_v32  ;;  %v24270_v32 = vld [vmem:[%s29171_s3 + $0x250] sm:$0xff] }
0x1176   : > { %24947 = vmatmul.mubr.msk.f32.vlgmr.msra.gmra.mrb[34].mxu0 %vm476_vm1, %v24262_v15  ;;  %v18248_v28 = vpop.permute.xlu1 %18247 }
0x1177   : > { %17792 = vmatpush1.msra.mxu0 %v28223_v29  ;;  %17855 = vmatprep.mubr.f32.mxu0 %v25848_v0  ;;  %v18250_v29 = vpop.permute.xlu0 %18249 }
0x1178   : > { %17862 = vmatprep.subr.mxu0 %v28245_v44  ;;  %v18257_v39 = vsel %vm1643_vm7, %v18248_v28, %v18250_v29  ;;  %v24274_v44 = vld [vmem:[%s29171_s3 + $0x258] sm:$0xff] }
0x117a   : > { %24267 = vmatmul.mubr.msk.f32.vlgmr.msra.gmra.mrb[30].mxu0 %vm476_vm1, %v24266_v22  ;;  %v18246_v34 = vpop.permute.xlu1 %18245 }
0x117b   : > { %17863 = vmatpush1.msra.mxu0 %v28233_v36  ;;  %17926 = vmatprep.mubr.f32.mxu0 %v25848_v0  ;;  %v18252_v36 = vpop.permute.xlu0 %18251  ;;  %v18258_v42 = vsel %vm1643_vm7, %v18246_v34, %v18248_v28 }
0x117c   : > { %24949 = vmatprep.subr.mxu0 %v25848_v0  ;;  %v18256_v46 = vsel %vm1643_vm7, %v18250_v29, %v18252_v36 }
0x117e   : > { %24268 = vmatmul.mubr.msk.f32.vlgmr.msra.gmra.mrb[32].mxu0 %vm476_vm1, %v24266_v22  ;;  %v18254_v40 = vpop.permute.xlu1 %18253 }
0x117f   : > { %24950 = vmatpush3.msra.mxu0 %v28238_v43  ;;  %24951 = vmatprep.mubr.msk.f32.mxu0 %vm25857_vm4, %v25848_v0  ;;  %v18485_v41 = vpop.permute.xlu0 %18484  ;;  %v18255_v43 = vsel %vm1643_vm7, %v18252_v36, %v18254_v40  ;;  %v18259_v48 = vsel %vm1643_vm7, %v18254_v40, %v18246_v34 }
0x1180   : > { %18028 = vmatprep.subr.mxu0 %v18020_v26  ;;  %v24283_v26 = vld [vmem:[%s29171_s3 + $0x268] sm:$0xff] }
0x1182   : > { %24952 = vmatmul.mubr.msk.f32.vlgmr.msra.gmra.mrb[34].mxu0 %vm476_vm1, %v24266_v22  ;;  %v18487_v45 = vpop.permute.xlu1 %18486 }
0x1183   : > { %18029 = vmatpush1.msra.mxu0 %v18021_v30  ;;  %18092 = vmatprep.mubr.f32.mxu0 %v25848_v0  ;;  %v18483_v47 = vpop.permute.xlu0 %18482  ;;  %v18494_v49 = vsel %vm1881_vm8, %v18485_v41, %v18487_v45 }
0x1184   : > { %18099 = vmatprep.subr.mxu0 %v18018_v31  ;;  %v18495_v51 = vsel %vm1881_vm8, %v18483_v47, %v18485_v41 }
0x1186   : > { %24271 = vmatmul.mubr.msk.f32.vlgmr.msra.gmra.mrb[30].mxu0 %vm476_vm1, %v24270_v32  ;;  %v18489_v50 = vpop.permute.xlu1 %18488 }
0x1187   : > { %18100 = vmatpush1.msra.mxu0 %v18019_v35  ;;  %18163 = vmatprep.mubr.f32.mxu0 %v25848_v0  ;;  %v18491_v52 = vpop.permute.xlu0 %18490  ;;  %v18493_v55 = vsel %vm1881_vm8, %v18487_v45, %v18489_v50 }
0x1188   : > { %24954 = vmatprep.subr.mxu0 %v25848_v0  ;;  %v18492_v53 = vsel %vm1881_vm8, %v18489_v50, %v18491_v52  ;;  %v18496_v56 = vsel %vm1881_vm8, %v18491_v52, %v18483_v47 }
0x118a   : > { %24272 = vmatmul.mubr.msk.f32.vlgmr.msra.gmra.mrb[32].mxu0 %vm476_vm1, %v24270_v32 }
0x118b   : > { %24955 = vmatpush3.msra.mxu0 %v18022_v38  ;;  %24956 = vmatprep.mubr.msk.f32.mxu0 %vm25857_vm4, %v25848_v0 }
0x118c   : > { %18265 = vmatprep.subr.mxu0 %v18257_v39 }
0x118e   : > { %24957 = vmatmul.mubr.msk.f32.vlgmr.msra.gmra.mrb[34].mxu0 %vm476_vm1, %v24270_v32 }
0x118f   : > { %18266 = vmatpush1.msra.mxu0 %v18258_v42  ;;  %18329 = vmatprep.mubr.f32.mxu0 %v25848_v0 }
0x1190   : > { %18336 = vmatprep.subr.mxu0 %v18255_v43  ;;  %v24287_v43 = vld [vmem:[%s29171_s3 + $0x270] sm:$0xff] }
0x1192   : > { %24275 = vmatmul.mubr.msk.f32.vlgmr.msra.gmra.mrb[30].mxu0 %vm476_vm1, %v24274_v44 }
0x1193   : > { %18337 = vmatpush1.msra.mxu0 %v18256_v46  ;;  %18400 = vmatprep.mubr.f32.mxu0 %v25848_v0 }
0x1194   : > { %24959 = vmatprep.subr.mxu0 %v25848_v0 }
0x1196   : > { %24276 = vmatmul.mubr.msk.f32.vlgmr.msra.gmra.mrb[32].mxu0 %vm476_vm1, %v24274_v44 }
0x1197   : > { %24960 = vmatpush3.msra.mxu0 %v18259_v48  ;;  %24961 = vmatprep.mubr.msk.f32.mxu0 %vm25857_vm4, %v25848_v0  ;;  %v17073_v57 = vpop.permute.xlu1 %17072 }
0x1198   : > { %18502 = vmatprep.subr.mxu0 %v18494_v49 }
0x119a   : > { %24962 = vmatmul.mubr.msk.f32.vlgmr.msra.gmra.mrb[34].mxu0 %vm476_vm1, %v24274_v44 }
0x119b   : > { %18503 = vmatpush1.msra.mxu0 %v18495_v51  ;;  %18566 = vmatprep.mubr.f32.mxu0 %v25848_v0 }
0x119c   : > { %18573 = vmatprep.subr.mxu0 %v18492_v53 }
0x119e   : > { %24279 = vmatmul.mubr.msk.f32.vlgmr.msra.gmra.mrb[30].mxu0 %vm476_vm1, %v24278_v54 }
0x119f   : > { %18574 = vmatpush1.msra.mxu0 %v18493_v55  ;;  %18637 = vmatprep.mubr.f32.mxu0 %v25848_v0 }
0x11a0   : > { %24964 = vmatprep.subr.mxu0 %v25848_v0 }
0x11a2   : > { %24280 = vmatmul.mubr.msk.f32.vlgmr.msra.gmra.mrb[32].mxu0 %vm476_vm1, %v24278_v54 }
0x11a3   : > { %24965 = vmatpush3.msra.mxu0 %v18496_v56  ;;  %24966 = vmatprep.mubr.msk.f32.mxu0 %vm25857_vm4, %v25848_v0 }
0x11a6   : > { %24967 = vmatmul.mubr.msk.f32.vlgmr.msra.gmra.mrb[34].mxu0 %vm476_vm1, %v24278_v54  ;;  %v24291_v54 = vld [vmem:[%s29171_s3 + $0x278] sm:$0xff] }
0x11a7   : > { %20481 = vmatprep.mubr.f32.mxu0 %v25848_v0 }
0x1271   : > { %v18568_v58 = vpop.f32.mrb[30].mxu0 }
0x1272   : > { %v25124_v59 = vadd.f32 %v18568_v58, %v17073_v57  ;;  %v18570_v60 = vpop.f32.mrb[31].mxu0 }
0x1273   : > { %v25125_v61 = vadd.f32 %v18570_v60, %v17073_v57  ;;  %v24295_v60 = vld [vmem:[%s29171_s3 + $0x280] sm:$0xff] }
0x1274   : > { %v18719_v62 = vmax.f32 %v25124_v59, 0.0 }
0x1275   : > { %v18720_v63 = vmax.f32 %v25125_v61, 0.0  ;;  %v18639_v1 = vpop.f32.mrb[32].mxu0 }
0x1276   : > { %v28443_v2 = vmul.f32 %v26006_v25, %v18719_v62  ;;  %v25126_v3 = vadd.f32 %v18639_v1, %v17073_v57  ;;  %v18641_v4 = vpop.f32.mrb[33].mxu0 }
0x1277   : > { %v28446_v5 = vmul.f32 %v25996_v16, %v18720_v63  ;;  %v25127_v11 = vadd.f32 %v18641_v4, %v17073_v57 }
0x1278   : > { %v18721_v6 = vmax.f32 %v25126_v3, 0.0  ;;  %18736 = vrot.lane.b32.xlu0 %v28443_v2, %s25850_s0 }
0x1279   : > { %v18710_v9 = vpop.f32.mrb[34].mxu0  ;;  %18738 = vrot.lane.b32.xlu1 %v28446_v5, %s25850_s0  ;;  %v18722_v15 = vmax.f32 %v25127_v11, 0.0 }
0x127a   : > { %v28453_v10 = vmul.f32 %v26009_v27, %v18721_v6  ;;  %v25128_v12 = vadd.f32 %v18710_v9, %v17073_v57  ;;  %v24968_v13 = vpop.f32.mrb[35].mxu0 }
0x127b   : > { %v28465_v18 = vmul.f32 %v26031_v37, %v18722_v15 }
0x127c   : > { %v18723_v14 = vmax.f32 %v25128_v12, 0.0 }
0x127d   : > { %18740 = vrot.lane.b32.xlu1 %v28453_v10, %s25850_s0 }
0x127e   : > { %v28458_v17 = vmul.f32 %v26022_v33, %v18723_v14 }
0x1280   : > { %18744 = vrot.lane.b32.xlu0 %v28458_v17, %s25850_s0 }
0x1281   : > { %18973 = vrot.lane.b32.xlu1 %v28443_v2, %s25851_s21 }
0x1284   : > { %18742 = vrot.lane.b32.xlu0 %v28465_v18, %s25850_s0 }
0x1285   : > { %18981 = vrot.lane.b32.xlu1 %v28458_v17, %s25851_s21 }
0x1288   : > { %18975 = vrot.lane.b32.xlu0 %v28446_v5, %s25851_s21 }
0x1289   : > { %18979 = vrot.lane.b32.xlu1 %v28465_v18, %s25851_s21 }
0x128c   : > { %18977 = vrot.lane.b32.xlu0 %v28453_v10, %s25851_s21 }
0x128d   : > { %19212 = vrot.lane.b32.xlu1 %v28446_v5, %s25852_s28 }
0x1290   : > { %19210 = vrot.lane.b32.xlu0 %v28443_v2, %s25852_s28 }
0x1291   : > { %19214 = vrot.lane.b32.xlu1 %v28453_v10, %s25852_s28 }
0x1294   : > { %19218 = vrot.lane.b32.xlu0 %v28458_v17, %s25852_s28 }
0x1295   : > { %19671 = vrot.lane.b32.xlu1 %v28446_v5, %s25853_s29 }
0x1298   : > { %19216 = vrot.lane.b32.xlu0 %v28465_v18, %s25852_s28 }
0x1299   : > { %19669 = vrot.lane.b32.xlu1 %v28443_v2, %s25853_s29 }
0x129c   : > { %19673 = vrot.lane.b32.xlu0 %v28453_v10, %s25853_s29 }
0x129d   : > { %19677 = vrot.lane.b32.xlu1 %v28458_v17, %s25853_s29 }
0x12a0   : > { %19675 = vrot.lane.b32.xlu0 %v28465_v18, %s25853_s29 }
0x12a1   : > { %19910 = vrot.lane.b32.xlu1 %v28453_v10, %s25854_s15 }
0x12a4   : > { %19908 = vrot.lane.b32.xlu0 %v28446_v5, %s25854_s15 }
0x12a5   : > { %19912 = vrot.lane.b32.xlu1 %v28465_v18, %s25854_s15 }
0x12a8   : > { %19906 = vrot.lane.b32.xlu0 %v28443_v2, %s25854_s15 }
0x12a9   : > { %20145 = vrot.lane.b32.xlu1 %v28446_v5, %s25855_s9 }
0x12ac   : > { %19914 = vrot.lane.b32.xlu0 %v28458_v17, %s25854_s15 }
0x12ad   : > { %20143 = vrot.lane.b32.xlu1 %v28443_v2, %s25855_s9 }
0x12b0   : > { %20147 = vrot.lane.b32.xlu0 %v28453_v10, %s25855_s9 }
0x12b1   : > { %20151 = vrot.lane.b32.xlu1 %v28458_v17, %s25855_s9 }
0x12b4   : > { %20149 = vrot.lane.b32.xlu0 %v28465_v18, %s25855_s9 }
0x12b8   : > { %18733 = vperm.xlu0 %25730, %v24282_v19  }
0x12ea   : > { %v18737_v20 = vpop.permute.xlu0 %18736 }
0x12eb   : > { %v18739_v21 = vpop.permute.xlu1 %18738 }
0x12ec   : > { %v18749_v22 = vsel %vm469_vm0, %v18737_v20, %v18739_v21 }
0x12ed   : > { %18756 = vmatprep.subr.mxu1 %v18749_v22 }
0x12ef   : > { %v18741_v23 = vpop.permute.xlu1 %18740 }
0x12f0   : > { %v18748_v32 = vsel %vm469_vm0, %v18739_v21, %v18741_v23 }
0x12f2   : > { %v18745_v24 = vpop.permute.xlu0 %18744 }
0x12f3   : > { %v18750_v28 = vsel %vm469_vm0, %v18745_v24, %v18737_v20  ;;  %v18974_v29 = vpop.permute.xlu1 %18973 }
0x12f4   : > { %18757 = vmatpush1.msra.mxu1 %v18750_v28 }
0x12f5   : > { %24284 = vmatmul.mubr.msk.f32.vlgmr.msra.gmra.mrb[30].mxu1 %vm476_vm1, %v24283_v26 }
0x12f6   : > { %v18743_v30 = vpop.permute.xlu0 %18742  ;;  %18891 = vmatprep.mubr.f32.mxu1 %v25848_v0 }
0x12f7   : > { %v18747_v31 = vsel %vm469_vm0, %v18741_v23, %v18743_v30  ;;  %v18982_v34 = vpop.permute.xlu1 %18981  ;;  %v18746_v35 = vsel %vm469_vm0, %v18743_v30, %v18745_v24  ;;  %v24307_v30 = vld [vmem:[%s29171_s3 + $0x298] sm:$0xff] }
0x12f8   : > { %18827 = vmatprep.subr.mxu1 %v18747_v31  ;;  %v18987_v39 = vsel %vm707_vm2, %v18982_v34, %v18974_v29 }
0x12f9   : > { %18828 = vmatpush1.msra.mxu1 %v18748_v32 }
0x12fa   : > { %24285 = vmatmul.mubr.msk.f32.vlgmr.msra.gmra.mrb[32].mxu1 %vm476_vm1, %v24283_v26  ;;  %24969 = vmatprep.subr.mxu1 %v25848_v0  ;;  %v18976_v36 = vpop.permute.xlu0 %18975 }
0x12fb   : > { %24970 = vmatpush3.msra.mxu1 %v18746_v35  ;;  %v18986_v38 = vsel %vm707_vm2, %v18974_v29, %v18976_v36  ;;  %24971 = vmatprep.mubr.msk.f32.mxu1 %vm25857_vm4, %v25848_v0  ;;  %v18980_v40 = vpop.permute.xlu1 %18979 }
0x12fc   : > { %18993 = vmatprep.subr.mxu1 %v18986_v38  ;;  %v18983_v47 = vsel %vm707_vm2, %v18980_v40, %v18982_v34 }
0x12fe   : > { %24972 = vmatmul.mubr.msk.f32.vlgmr.msra.gmra.mrb[34].mxu1 %vm476_vm1, %v24283_v26  ;;  %v18978_v41 = vpop.permute.xlu0 %18977 }
0x12ff   : > { %18994 = vmatpush1.msra.mxu1 %v18987_v39  ;;  %v18984_v42 = vsel %vm707_vm2, %v18978_v41, %v18980_v40  ;;  %19057 = vmatprep.mubr.f32.mxu1 %v25848_v0  ;;  %v18985_v44 = vsel %vm707_vm2, %v18976_v36, %v18978_v41  ;;  %v19213_v46 = vpop.permute.xlu1 %19212 }
0x1300   : > { %19064 = vmatprep.subr.mxu1 %v18984_v42 }
0x1302   : > { %24288 = vmatmul.mubr.msk.f32.vlgmr.msra.gmra.mrb[30].mxu1 %vm476_vm1, %v24287_v43  ;;  %v19211_v45 = vpop.permute.xlu0 %19210 }
0x1303   : > { %19065 = vmatpush1.msra.mxu1 %v18985_v44  ;;  %19128 = vmatprep.mubr.f32.mxu1 %v25848_v0  ;;  %v19223_v49 = vsel %vm945_vm5, %v19211_v45, %v19213_v46  ;;  %v19215_v50 = vpop.permute.xlu1 %19214 }
0x1304   : > { %24974 = vmatprep.subr.mxu1 %v25848_v0  ;;  %v19222_v55 = vsel %vm945_vm5, %v19213_v46, %v19215_v50 }
0x1306   : > { %24289 = vmatmul.mubr.msk.f32.vlgmr.msra.gmra.mrb[32].mxu1 %vm476_vm1, %v24287_v43  ;;  %v19219_v48 = vpop.permute.xlu0 %19218 }
0x1307   : > { %24975 = vmatpush3.msra.mxu1 %v18983_v47  ;;  %24976 = vmatprep.mubr.msk.f32.mxu1 %vm25857_vm4, %v25848_v0  ;;  %v19224_v51 = vsel %vm945_vm5, %v19219_v48, %v19211_v45  ;;  %v19672_v56 = vpop.permute.xlu1 %19671 }
0x1308   : > { %19230 = vmatprep.subr.mxu1 %v19223_v49 }
0x130a   : > { %24977 = vmatmul.mubr.msk.f32.vlgmr.msra.gmra.mrb[34].mxu1 %vm476_vm1, %v24287_v43  ;;  %v19217_v52 = vpop.permute.xlu0 %19216 }
0x130b   : > { %19231 = vmatpush1.msra.mxu1 %v19224_v51  ;;  %v19221_v53 = vsel %vm945_vm5, %v19215_v50, %v19217_v52  ;;  %19294 = vmatprep.mubr.f32.mxu1 %v25848_v0  ;;  %v19220_v57 = vsel %vm945_vm5, %v19217_v52, %v19219_v48  ;;  %v19670_v59 = vpop.permute.xlu1 %19669 }
0x130c   : > { %19301 = vmatprep.subr.mxu1 %v19221_v53 }
0x130e   : > { %24292 = vmatmul.mubr.msk.f32.vlgmr.msra.gmra.mrb[30].mxu1 %vm476_vm1, %v24291_v54  ;;  %v19674_v58 = vpop.permute.xlu0 %19673 }
0x130f   : > { %19302 = vmatpush1.msra.mxu1 %v19222_v55  ;;  %19365 = vmatprep.mubr.f32.mxu1 %v25848_v0  ;;  %v19678_v62 = vpop.permute.xlu1 %19677  ;;  %v19681_v63 = vsel %vm1405_vm6, %v19672_v56, %v19674_v58 }
0x1310   : > { %24979 = vmatprep.subr.mxu1 %v25848_v0  ;;  %v19683_v11 = vsel %vm1405_vm6, %v19678_v62, %v19670_v59 }
0x1312   : > { %24293 = vmatmul.mubr.msk.f32.vlgmr.msra.gmra.mrb[32].mxu1 %vm476_vm1, %v24291_v54  ;;  %v19676_v61 = vpop.permute.xlu0 %19675 }
0x1313   : > { %24980 = vmatpush3.msra.mxu1 %v19220_v57  ;;  %24981 = vmatprep.mubr.msk.f32.mxu1 %vm25857_vm4, %v25848_v0  ;;  %v19911_v3 = vpop.permute.xlu1 %19910  ;;  %v19679_v4 = vsel %vm1405_vm6, %v19676_v61, %v19678_v62  ;;  %v19680_v6 = vsel %vm1405_vm6, %v19674_v58, %v19676_v61  ;;  %v24311_v57 = vld [vmem:[%s29172_s4 + $0x60] sm:$0xff] }
0x1314   : > { %19452 = vmatprep.subr.mxu1 %v28446_v5  ;;  %v24299_v5 = vld [vmem:[%s29171_s3 + $0x288] sm:$0xff] }
0x1316   : > { %24982 = vmatmul.mubr.msk.f32.vlgmr.msra.gmra.mrb[34].mxu1 %vm476_vm1, %v24291_v54  ;;  %v19909_v1 = vpop.permute.xlu0 %19908 }
0x1317   : > { %19453 = vmatpush1.msra.mxu1 %v28443_v2  ;;  %19516 = vmatprep.mubr.f32.mxu1 %v25848_v0  ;;  %v19682_v2 = vsel %vm1405_vm6, %v19670_v59, %v19672_v56  ;;  %v19918_v12 = vsel %vm1643_vm7, %v19909_v1, %v19911_v3 }
0x1318   : > { %19523 = vmatprep.subr.mxu1 %v28465_v18  ;;  %v24303_v18 = vld [vmem:[%s29171_s3 + $0x290] sm:$0xff] }
0x131a   : > { %24296 = vmatmul.mubr.msk.f32.vlgmr.msra.gmra.mrb[30].mxu1 %vm476_vm1, %v24295_v60  ;;  %v19907_v9 = vpop.permute.xlu0 %19906 }
0x131b   : > { %19524 = vmatpush1.msra.mxu1 %v28453_v10  ;;  %19587 = vmatprep.mubr.f32.mxu1 %v25848_v0  ;;  %v19913_v10 = vpop.permute.xlu1 %19912  ;;  %v19919_v14 = vsel %vm1643_vm7, %v19907_v9, %v19909_v1 }
0x131c   : > { %24984 = vmatprep.subr.mxu1 %v25848_v0  ;;  %v19917_v19 = vsel %vm1643_vm7, %v19911_v3, %v19913_v10 }
0x131e   : > { %24297 = vmatmul.mubr.msk.f32.vlgmr.msra.gmra.mrb[32].mxu1 %vm476_vm1, %v24295_v60  ;;  %v19915_v13 = vpop.permute.xlu0 %19914 }
0x131f   : > { %24985 = vmatpush3.msra.mxu1 %v28458_v17  ;;  %24986 = vmatprep.mubr.msk.f32.mxu1 %vm25857_vm4, %v25848_v0  ;;  %v20146_v15 = vpop.permute.xlu1 %20145  ;;  %v19916_v17 = vsel %vm1643_vm7, %v19913_v10, %v19915_v13  ;;  %v19920_v22 = vsel %vm1643_vm7, %v19915_v13, %v19907_v9 }
0x1320   : > { %19689 = vmatprep.subr.mxu1 %v19681_v63  ;;  %v24312_v63 = vld [vmem:[%s29171_s3 + $0x2a0] sm:$0xff] }
0x1322   : > { %24987 = vmatmul.mubr.msk.f32.vlgmr.msra.gmra.mrb[34].mxu1 %vm476_vm1, %v24295_v60  ;;  %v20148_v20 = vpop.permute.xlu0 %20147 }
0x1323   : > { %19690 = vmatpush1.msra.mxu1 %v19682_v2  ;;  %19753 = vmatprep.mubr.f32.mxu1 %v25848_v0  ;;  %v20144_v21 = vpop.permute.xlu1 %20143  ;;  %v20155_v23 = vsel %vm1881_vm8, %v20146_v15, %v20148_v20 }
0x1324   : > { %19760 = vmatprep.subr.mxu1 %v19679_v4  ;;  %v20156_v26 = vsel %vm1881_vm8, %v20144_v21, %v20146_v15 }
0x1326   : > { %24300 = vmatmul.mubr.msk.f32.vlgmr.msra.gmra.mrb[30].mxu1 %vm476_vm1, %v24299_v5  ;;  %v20150_v24 = vpop.permute.xlu0 %20149 }
0x1327   : > { %19761 = vmatpush1.msra.mxu1 %v19680_v6  ;;  %19824 = vmatprep.mubr.f32.mxu1 %v25848_v0  ;;  %v20152_v28 = vpop.permute.xlu1 %20151  ;;  %v20154_v31 = vsel %vm1881_vm8, %v20148_v20, %v20150_v24 }
0x1328   : > { %24989 = vmatprep.subr.mxu1 %v25848_v0  ;;  %v20153_v29 = vsel %vm1881_vm8, %v20150_v24, %v20152_v28  ;;  %v20157_v32 = vsel %vm1881_vm8, %v20152_v28, %v20144_v21 }
0x132a   : > { %24301 = vmatmul.mubr.msk.f32.vlgmr.msra.gmra.mrb[32].mxu1 %vm476_vm1, %v24299_v5 }
0x132b   : > { %24990 = vmatpush3.msra.mxu1 %v19683_v11  ;;  %24991 = vmatprep.mubr.msk.f32.mxu1 %vm25857_vm4, %v25848_v0 }
0x132c   : > { %19926 = vmatprep.subr.mxu1 %v19918_v12 }
0x132e   : > { %24992 = vmatmul.mubr.msk.f32.vlgmr.msra.gmra.mrb[34].mxu1 %vm476_vm1, %v24299_v5 }
0x132f   : > { %19927 = vmatpush1.msra.mxu1 %v19919_v14  ;;  %19990 = vmatprep.mubr.f32.mxu1 %v25848_v0 }
0x1330   : > { %19997 = vmatprep.subr.mxu1 %v19916_v17  ;;  %v24316_v17 = vld [vmem:[%s29171_s3 + $0x2a8] sm:$0xff] }
0x1332   : > { %24304 = vmatmul.mubr.msk.f32.vlgmr.msra.gmra.mrb[30].mxu1 %vm476_vm1, %v24303_v18 }
0x1333   : > { %19998 = vmatpush1.msra.mxu1 %v19917_v19  ;;  %20061 = vmatprep.mubr.f32.mxu1 %v25848_v0 }
0x1334   : > { %24994 = vmatprep.subr.mxu1 %v25848_v0 }
0x1336   : > { %24305 = vmatmul.mubr.msk.f32.vlgmr.msra.gmra.mrb[32].mxu1 %vm476_vm1, %v24303_v18 }
0x1337   : > { %24995 = vmatpush3.msra.mxu1 %v19920_v22  ;;  %24996 = vmatprep.mubr.msk.f32.mxu1 %vm25857_vm4, %v25848_v0  ;;  %v18734_v34 = vpop.permute.xlu0 %18733 }
0x1338   : > { %20163 = vmatprep.subr.mxu1 %v20155_v23 }
0x133a   : > { %24997 = vmatmul.mubr.msk.f32.vlgmr.msra.gmra.mrb[34].mxu1 %vm476_vm1, %v24303_v18 }
0x133b   : > { %20164 = vmatpush1.msra.mxu1 %v20156_v26  ;;  %20227 = vmatprep.mubr.f32.mxu1 %v25848_v0 }
0x133c   : > { %20234 = vmatprep.subr.mxu1 %v20153_v29 }
0x133e   : > { %24308 = vmatmul.mubr.msk.f32.vlgmr.msra.gmra.mrb[30].mxu1 %vm476_vm1, %v24307_v30 }
0x133f   : > { %20235 = vmatpush1.msra.mxu1 %v20154_v31  ;;  %20298 = vmatprep.mubr.f32.mxu1 %v25848_v0 }
0x1340   : > { %24999 = vmatprep.subr.mxu1 %v25848_v0 }
0x1342   : > { %24309 = vmatmul.mubr.msk.f32.vlgmr.msra.gmra.mrb[32].mxu1 %vm476_vm1, %v24307_v30 }
0x1343   : > { %25000 = vmatpush3.msra.mxu1 %v20157_v32  ;;  %25001 = vmatprep.mubr.msk.f32.mxu1 %vm25857_vm4, %v25848_v0 }
0x1346   : > { %25002 = vmatmul.mubr.msk.f32.vlgmr.msra.gmra.mrb[34].mxu1 %vm476_vm1, %v24307_v30  ;;  %v24320_v30 = vld [vmem:[%s29171_s3 + $0x2b0] sm:$0xff] }
0x1347   : > { %22142 = vmatprep.mubr.f32.mxu1 %v25848_v0 }
0x1411   : > { %v20229_v35 = vpop.f32.mrb[30].mxu1 }
0x1412   : > { %v25129_v36 = vadd.f32 %v20229_v35, %v18734_v34  ;;  %v20231_v38 = vpop.f32.mrb[31].mxu1 }
0x1413   : > { %v25130_v39 = vadd.f32 %v20231_v38, %v18734_v34  ;;  %v24324_v38 = vld [vmem:[%s29171_s3 + $0x2b8] sm:$0xff] }
0x1414   : > { %v20380_v40 = vmax.f32 %v25129_v36, 0.0 }
0x1415   : > { %v20381_v41 = vmax.f32 %v25130_v39, 0.0  ;;  %v20300_v42 = vpop.f32.mrb[32].mxu1 }
0x1416   : > { %v28663_v43 = vmul.f32 %v26006_v25, %v20380_v40  ;;  %v25131_v44 = vadd.f32 %v20300_v42, %v18734_v34  ;;  %v20302_v45 = vpop.f32.mrb[33].mxu1 }
0x1417   : > { %v28666_v46 = vmul.f32 %v25996_v16, %v20381_v41  ;;  %v25132_v50 = vadd.f32 %v20302_v45, %v18734_v34 }
0x1418   : > { %v20382_v47 = vmax.f32 %v25131_v44, 0.0  ;;  %20397 = vrot.lane.b32.xlu1 %v28663_v43, %s25850_s0 }
0x1419   : > { %v20371_v48 = vpop.f32.mrb[34].mxu1  ;;  %20399 = vrot.lane.b32.xlu0 %v28666_v46, %s25850_s0  ;;  %v20383_v54 = vmax.f32 %v25132_v50, 0.0 }
0x141a   : > { %v28673_v49 = vmul.f32 %v26009_v27, %v20382_v47  ;;  %v25133_v51 = vadd.f32 %v20371_v48, %v18734_v34  ;;  %v25003_v52 = vpop.f32.mrb[35].mxu1 }
0x141b   : > { %v28685_v56 = vmul.f32 %v26031_v37, %v20383_v54 }
0x141c   : > { %v20384_v53 = vmax.f32 %v25133_v51, 0.0 }
0x141d   : > { %20401 = vrot.lane.b32.xlu0 %v28673_v49, %s25850_s0 }
0x141e   : > { %v28678_v55 = vmul.f32 %v26022_v33, %v20384_v53 }
0x1420   : > { %20405 = vrot.lane.b32.xlu1 %v28678_v55, %s25850_s0 }
0x1421   : > { %20634 = vrot.lane.b32.xlu0 %v28663_v43, %s25851_s21 }
0x1424   : > { %20403 = vrot.lane.b32.xlu1 %v28685_v56, %s25850_s0 }
0x1425   : > { %20642 = vrot.lane.b32.xlu0 %v28678_v55, %s25851_s21 }
0x1428   : > { %20636 = vrot.lane.b32.xlu1 %v28666_v46, %s25851_s21 }
0x1429   : > { %20640 = vrot.lane.b32.xlu0 %v28685_v56, %s25851_s21 }
0x142c   : > { %20638 = vrot.lane.b32.xlu1 %v28673_v49, %s25851_s21 }
0x142d   : > { %20873 = vrot.lane.b32.xlu0 %v28666_v46, %s25852_s28 }
0x1430   : > { %20871 = vrot.lane.b32.xlu1 %v28663_v43, %s25852_s28 }
0x1431   : > { %20875 = vrot.lane.b32.xlu0 %v28673_v49, %s25852_s28 }
0x1434   : > { %20879 = vrot.lane.b32.xlu1 %v28678_v55, %s25852_s28 }
0x1435   : > { %21332 = vrot.lane.b32.xlu0 %v28666_v46, %s25853_s29 }
0x1438   : > { %20877 = vrot.lane.b32.xlu1 %v28685_v56, %s25852_s28 }
0x1439   : > { %21330 = vrot.lane.b32.xlu0 %v28663_v43, %s25853_s29 }
0x143c   : > { %21334 = vrot.lane.b32.xlu1 %v28673_v49, %s25853_s29 }
0x143d   : > { %21338 = vrot.lane.b32.xlu0 %v28678_v55, %s25853_s29 }
0x1440   : > { %21336 = vrot.lane.b32.xlu1 %v28685_v56, %s25853_s29 }
0x1441   : > { %21571 = vrot.lane.b32.xlu0 %v28673_v49, %s25854_s15 }
0x1444   : > { %21569 = vrot.lane.b32.xlu1 %v28666_v46, %s25854_s15 }
0x1445   : > { %21573 = vrot.lane.b32.xlu0 %v28685_v56, %s25854_s15 }
0x1448   : > { %21567 = vrot.lane.b32.xlu1 %v28663_v43, %s25854_s15 }
0x1449   : > { %21806 = vrot.lane.b32.xlu0 %v28666_v46, %s25855_s9 }
0x144c   : > { %21575 = vrot.lane.b32.xlu1 %v28678_v55, %s25854_s15 }
0x144d   : > { %21804 = vrot.lane.b32.xlu0 %v28663_v43, %s25855_s9 }
0x1450   : > { %21808 = vrot.lane.b32.xlu1 %v28673_v49, %s25855_s9 }
0x1451   : > { %21812 = vrot.lane.b32.xlu0 %v28678_v55, %s25855_s9 }
0x1454   : > { %21810 = vrot.lane.b32.xlu1 %v28685_v56, %s25855_s9 }
0x1458   : > { %20394 = vperm.xlu1 %25731, %v24311_v57  }
0x148a   : > { %v20398_v58 = vpop.permute.xlu1 %20397 }
0x148b   : > { %v20400_v59 = vpop.permute.xlu0 %20399 }
0x148c   : > { %v20410_v60 = vsel %vm469_vm0, %v20398_v58, %v20400_v59 }
0x148d   : > { %20417 = vmatprep.subr.mxu0 %v20410_v60 }
0x148f   : > { %v20402_v61 = vpop.permute.xlu0 %20401 }
0x1490   : > { %v20409_v5 = vsel %vm469_vm0, %v20400_v59, %v20402_v61 }
0x1492   : > { %v20406_v62 = vpop.permute.xlu1 %20405 }
0x1493   : > { %v20411_v1 = vsel %vm469_vm0, %v20406_v62, %v20398_v58  ;;  %v20635_v2 = vpop.permute.xlu0 %20634 }
0x1494   : > { %20418 = vmatpush1.msra.mxu0 %v20411_v1 }
0x1495   : > { %24313 = vmatmul.mubr.msk.f32.vlgmr.msra.gmra.mrb[36].mxu0 %vm476_vm1, %v24312_v63 }
0x1496   : > { %v20404_v3 = vpop.permute.xlu1 %20403  ;;  %20552 = vmatprep.mubr.f32.mxu0 %v25848_v0 }
0x1497   : > { %v20408_v4 = vsel %vm469_vm0, %v20402_v61, %v20404_v3  ;;  %v20643_v6 = vpop.permute.xlu0 %20642  ;;  %v20407_v9 = vsel %vm469_vm0, %v20404_v3, %v20406_v62  ;;  %v24336_v3 = vld [vmem:[%s29171_s3 + $0x2d0] sm:$0xff] }
0x1498   : > { %20488 = vmatprep.subr.mxu0 %v20408_v4  ;;  %v20648_v12 = vsel %vm707_vm2, %v20643_v6, %v20635_v2 }
0x1499   : > { %20489 = vmatpush1.msra.mxu0 %v20409_v5 }
0x149a   : > { %24314 = vmatmul.mubr.msk.f32.vlgmr.msra.gmra.mrb[38].mxu0 %vm476_vm1, %v24312_v63  ;;  %25004 = vmatprep.subr.mxu0 %v25848_v0  ;;  %v20637_v10 = vpop.permute.xlu1 %20636 }
0x149b   : > { %25005 = vmatpush3.msra.mxu0 %v20407_v9  ;;  %v20647_v11 = vsel %vm707_vm2, %v20635_v2, %v20637_v10  ;;  %25006 = vmatprep.mubr.msk.f32.mxu0 %vm25857_vm4, %v25848_v0  ;;  %v20641_v13 = vpop.permute.xlu0 %20640 }
0x149c   : > { %20654 = vmatprep.subr.mxu0 %v20647_v11  ;;  %v20644_v21 = vsel %vm707_vm2, %v20641_v13, %v20643_v6 }
0x149e   : > { %25007 = vmatmul.mubr.msk.f32.vlgmr.msra.gmra.mrb[40].mxu0 %vm476_vm1, %v24312_v63  ;;  %v20639_v14 = vpop.permute.xlu1 %20638 }
0x149f   : > { %20655 = vmatpush1.msra.mxu0 %v20648_v12  ;;  %v20645_v15 = vsel %vm707_vm2, %v20639_v14, %v20641_v13  ;;  %20718 = vmatprep.mubr.f32.mxu0 %v25848_v0  ;;  %v20646_v18 = vsel %vm707_vm2, %v20637_v10, %v20639_v14  ;;  %v20874_v20 = vpop.permute.xlu0 %20873 }
0x14a0   : > { %20725 = vmatprep.subr.mxu0 %v20645_v15 }
0x14a2   : > { %24317 = vmatmul.mubr.msk.f32.vlgmr.msra.gmra.mrb[36].mxu0 %vm476_vm1, %v24316_v17  ;;  %v20872_v19 = vpop.permute.xlu1 %20871 }
0x14a3   : > { %20726 = vmatpush1.msra.mxu0 %v20646_v18  ;;  %20789 = vmatprep.mubr.f32.mxu0 %v25848_v0  ;;  %v20884_v23 = vsel %vm945_vm5, %v20872_v19, %v20874_v20  ;;  %v20876_v24 = vpop.permute.xlu0 %20875 }
0x14a4   : > { %25009 = vmatprep.subr.mxu0 %v25848_v0  ;;  %v20883_v31 = vsel %vm945_vm5, %v20874_v20, %v20876_v24 }
0x14a6   : > { %24318 = vmatmul.mubr.msk.f32.vlgmr.msra.gmra.mrb[38].mxu0 %vm476_vm1, %v24316_v17  ;;  %v20880_v22 = vpop.permute.xlu1 %20879 }
0x14a7   : > { %25010 = vmatpush3.msra.mxu0 %v20644_v21  ;;  %25011 = vmatprep.mubr.msk.f32.mxu0 %vm25857_vm4, %v25848_v0  ;;  %v20885_v26 = vsel %vm945_vm5, %v20880_v22, %v20872_v19  ;;  %v21333_v32 = vpop.permute.xlu0 %21332 }
0x14a8   : > { %20891 = vmatprep.subr.mxu0 %v20884_v23 }
0x14aa   : > { %25012 = vmatmul.mubr.msk.f32.vlgmr.msra.gmra.mrb[40].mxu0 %vm476_vm1, %v24316_v17  ;;  %v20878_v28 = vpop.permute.xlu1 %20877 }
0x14ab   : > { %20892 = vmatpush1.msra.mxu0 %v20885_v26  ;;  %v20882_v29 = vsel %vm945_vm5, %v20876_v24, %v20878_v28  ;;  %20955 = vmatprep.mubr.f32.mxu0 %v25848_v0  ;;  %v20881_v34 = vsel %vm945_vm5, %v20878_v28, %v20880_v22  ;;  %v21331_v36 = vpop.permute.xlu0 %21330 }
0x14ac   : > { %20962 = vmatprep.subr.mxu0 %v20882_v29 }
0x14ae   : > { %24321 = vmatmul.mubr.msk.f32.vlgmr.msra.gmra.mrb[36].mxu0 %vm476_vm1, %v24320_v30  ;;  %v21335_v35 = vpop.permute.xlu1 %21334 }
0x14af   : > { %20963 = vmatpush1.msra.mxu0 %v20883_v31  ;;  %21026 = vmatprep.mubr.f32.mxu0 %v25848_v0  ;;  %v21339_v40 = vpop.permute.xlu0 %21338  ;;  %v21342_v41 = vsel %vm1405_vm6, %v21333_v32, %v21335_v35 }
0x14b0   : > { %25014 = vmatprep.subr.mxu0 %v25848_v0  ;;  %v21344_v50 = vsel %vm1405_vm6, %v21339_v40, %v21331_v36 }
0x14b2   : > { %24322 = vmatmul.mubr.msk.f32.vlgmr.msra.gmra.mrb[38].mxu0 %vm476_vm1, %v24320_v30  ;;  %v21337_v39 = vpop.permute.xlu1 %21336 }
0x14b3   : > { %25015 = vmatpush3.msra.mxu0 %v20881_v34  ;;  %25016 = vmatprep.mubr.msk.f32.mxu0 %vm25857_vm4, %v25848_v0  ;;  %v21572_v44 = vpop.permute.xlu0 %21571  ;;  %v21340_v45 = vsel %vm1405_vm6, %v21337_v39, %v21339_v40  ;;  %v21341_v47 = vsel %vm1405_vm6, %v21335_v35, %v21337_v39  ;;  %v24340_v34 = vld [vmem:[%s29172_s4 + $0x68] sm:$0xff] }
0x14b4   : > { %21113 = vmatprep.subr.mxu0 %v28666_v46  ;;  %v24328_v46 = vld [vmem:[%s29171_s3 + $0x2c0] sm:$0xff] }
0x14b6   : > { %25017 = vmatmul.mubr.msk.f32.vlgmr.msra.gmra.mrb[40].mxu0 %vm476_vm1, %v24320_v30  ;;  %v21570_v42 = vpop.permute.xlu1 %21569 }
0x14b7   : > { %21114 = vmatpush1.msra.mxu0 %v28663_v43  ;;  %21177 = vmatprep.mubr.f32.mxu0 %v25848_v0  ;;  %v21343_v43 = vsel %vm1405_vm6, %v21331_v36, %v21333_v32  ;;  %v21579_v51 = vsel %vm1643_vm7, %v21570_v42, %v21572_v44 }
0x14b8   : > { %21184 = vmatprep.subr.mxu0 %v28685_v56  ;;  %v24332_v56 = vld [vmem:[%s29171_s3 + $0x2c8] sm:$0xff] }
0x14ba   : > { %24325 = vmatmul.mubr.msk.f32.vlgmr.msra.gmra.mrb[36].mxu0 %vm476_vm1, %v24324_v38  ;;  %v21568_v48 = vpop.permute.xlu1 %21567 }
0x14bb   : > { %21185 = vmatpush1.msra.mxu0 %v28673_v49  ;;  %21248 = vmatprep.mubr.f32.mxu0 %v25848_v0  ;;  %v21574_v49 = vpop.permute.xlu0 %21573  ;;  %v21580_v53 = vsel %vm1643_vm7, %v21568_v48, %v21570_v42 }
0x14bc   : > { %25019 = vmatprep.subr.mxu0 %v25848_v0  ;;  %v21578_v57 = vsel %vm1643_vm7, %v21572_v44, %v21574_v49 }
0x14be   : > { %24326 = vmatmul.mubr.msk.f32.vlgmr.msra.gmra.mrb[38].mxu0 %vm476_vm1, %v24324_v38  ;;  %v21576_v52 = vpop.permute.xlu1 %21575 }
0x14bf   : > { %25020 = vmatpush3.msra.mxu0 %v28678_v55  ;;  %25021 = vmatprep.mubr.msk.f32.mxu0 %vm25857_vm4, %v25848_v0  ;;  %v21807_v54 = vpop.permute.xlu0 %21806  ;;  %v21577_v55 = vsel %vm1643_vm7, %v21574_v49, %v21576_v52  ;;  %v21581_v60 = vsel %vm1643_vm7, %v21576_v52, %v21568_v48 }
0x14c0   : > { %21350 = vmatprep.subr.mxu0 %v21342_v41  ;;  %v24341_v41 = vld [vmem:[%s29171_s3 + $0x2d8] sm:$0xff] }
0x14c2   : > { %25022 = vmatmul.mubr.msk.f32.vlgmr.msra.gmra.mrb[40].mxu0 %vm476_vm1, %v24324_v38  ;;  %v21809_v58 = vpop.permute.xlu1 %21808 }
0x14c3   : > { %21351 = vmatpush1.msra.mxu0 %v21343_v43  ;;  %21414 = vmatprep.mubr.f32.mxu0 %v25848_v0  ;;  %v21805_v59 = vpop.permute.xlu0 %21804  ;;  %v21816_v61 = vsel %vm1881_vm8, %v21807_v54, %v21809_v58 }
0x14c4   : > { %21421 = vmatprep.subr.mxu0 %v21340_v45  ;;  %v21817_v63 = vsel %vm1881_vm8, %v21805_v59, %v21807_v54 }
0x14c6   : > { %24329 = vmatmul.mubr.msk.f32.vlgmr.msra.gmra.mrb[36].mxu0 %vm476_vm1, %v24328_v46  ;;  %v21811_v62 = vpop.permute.xlu1 %21810 }
0x14c7   : > { %21422 = vmatpush1.msra.mxu0 %v21341_v47  ;;  %21485 = vmatprep.mubr.f32.mxu0 %v25848_v0  ;;  %v21813_v1 = vpop.permute.xlu0 %21812  ;;  %v21815_v4 = vsel %vm1881_vm8, %v21809_v58, %v21811_v62 }
0x14c8   : > { %25024 = vmatprep.subr.mxu0 %v25848_v0  ;;  %v21814_v2 = vsel %vm1881_vm8, %v21811_v62, %v21813_v1  ;;  %v21818_v5 = vsel %vm1881_vm8, %v21813_v1, %v21805_v59 }
0x14ca   : > { %24330 = vmatmul.mubr.msk.f32.vlgmr.msra.gmra.mrb[38].mxu0 %vm476_vm1, %v24328_v46 }
0x14cb   : > { %25025 = vmatpush3.msra.mxu0 %v21344_v50  ;;  %25026 = vmatprep.mubr.msk.f32.mxu0 %vm25857_vm4, %v25848_v0 }
0x14cc   : > { %21587 = vmatprep.subr.mxu0 %v21579_v51 }
0x14ce   : > { %25027 = vmatmul.mubr.msk.f32.vlgmr.msra.gmra.mrb[40].mxu0 %vm476_vm1, %v24328_v46 }
0x14cf   : > { %21588 = vmatpush1.msra.mxu0 %v21580_v53  ;;  %21651 = vmatprep.mubr.f32.mxu0 %v25848_v0 }
0x14d0   : > { %21658 = vmatprep.subr.mxu0 %v21577_v55  ;;  %v24345_v55 = vld [vmem:[%s29171_s3 + $0x2e0] sm:$0xff] }
0x14d2   : > { %24333 = vmatmul.mubr.msk.f32.vlgmr.msra.gmra.mrb[36].mxu0 %vm476_vm1, %v24332_v56 }
0x14d3   : > { %21659 = vmatpush1.msra.mxu0 %v21578_v57  ;;  %21722 = vmatprep.mubr.f32.mxu0 %v25848_v0 }
0x14d4   : > { %25029 = vmatprep.subr.mxu0 %v25848_v0 }
0x14d6   : > { %24334 = vmatmul.mubr.msk.f32.vlgmr.msra.gmra.mrb[38].mxu0 %vm476_vm1, %v24332_v56 }
0x14d7   : > { %25030 = vmatpush3.msra.mxu0 %v21581_v60  ;;  %25031 = vmatprep.mubr.msk.f32.mxu0 %vm25857_vm4, %v25848_v0  ;;  %v20395_v6 = vpop.permute.xlu1 %20394 }
0x14d8   : > { %21824 = vmatprep.subr.mxu0 %v21816_v61 }
0x14da   : > { %25032 = vmatmul.mubr.msk.f32.vlgmr.msra.gmra.mrb[40].mxu0 %vm476_vm1, %v24332_v56 }
0x14db   : > { %21825 = vmatpush1.msra.mxu0 %v21817_v63  ;;  %21888 = vmatprep.mubr.f32.mxu0 %v25848_v0 }
0x14dc   : > { %21895 = vmatprep.subr.mxu0 %v21814_v2 }
0x14de   : > { %24337 = vmatmul.mubr.msk.f32.vlgmr.msra.gmra.mrb[36].mxu0 %vm476_vm1, %v24336_v3 }
0x14df   : > { %21896 = vmatpush1.msra.mxu0 %v21815_v4  ;;  %21959 = vmatprep.mubr.f32.mxu0 %v25848_v0 }
0x14e0   : > { %25034 = vmatprep.subr.mxu0 %v25848_v0 }
0x14e2   : > { %24338 = vmatmul.mubr.msk.f32.vlgmr.msra.gmra.mrb[38].mxu0 %vm476_vm1, %v24336_v3 }
0x14e3   : > { %25035 = vmatpush3.msra.mxu0 %v21818_v5  ;;  %25036 = vmatprep.mubr.msk.f32.mxu0 %vm25857_vm4, %v25848_v0 }
0x14e6   : > { %25037 = vmatmul.mubr.msk.f32.vlgmr.msra.gmra.mrb[40].mxu0 %vm476_vm1, %v24336_v3  ;;  %v24349_v3 = vld [vmem:[%s29171_s3 + $0x2e8] sm:$0xff] }
0x15b1   : > { %v21890_v9 = vpop.f32.mrb[36].mxu0 }
0x15b2   : > { %v25134_v10 = vadd.f32 %v21890_v9, %v20395_v6  ;;  %v21892_v11 = vpop.f32.mrb[37].mxu0 }
0x15b3   : > { %v25135_v12 = vadd.f32 %v21892_v11, %v20395_v6  ;;  %v24353_v11 = vld [vmem:[%s29171_s3 + $0x2f0] sm:$0xff] }
0x15b4   : > { %v22041_v13 = vmax.f32 %v25134_v10, 0.0 }
0x15b5   : > { %v22042_v14 = vmax.f32 %v25135_v12, 0.0  ;;  %v21961_v15 = vpop.f32.mrb[38].mxu0 }
0x15b6   : > { %v28882_v17 = vmul.f32 %v26006_v25, %v22041_v13  ;;  %v25136_v18 = vadd.f32 %v21961_v15, %v20395_v6  ;;  %v21963_v19 = vpop.f32.mrb[39].mxu0 }
0x15b7   : > { %v28885_v20 = vmul.f32 %v25996_v16, %v22042_v14  ;;  %v25137_v24 = vadd.f32 %v21963_v19, %v20395_v6 }
0x15b8   : > { %v22043_v21 = vmax.f32 %v25136_v18, 0.0  ;;  %22058 = vrot.lane.b32.xlu0 %v28882_v17, %s25850_s0 }
0x15b9   : > { %v22032_v22 = vpop.f32.mrb[40].mxu0  ;;  %22060 = vrot.lane.b32.xlu1 %v28885_v20, %s25850_s0  ;;  %v22044_v30 = vmax.f32 %v25137_v24, 0.0 }
0x15ba   : > { %v28892_v23 = vmul.f32 %v26009_v27, %v22043_v21  ;;  %v25138_v26 = vadd.f32 %v22032_v22, %v20395_v6  ;;  %v25038_v28 = vpop.f32.mrb[41].mxu0 }
0x15bb   : > { %v28904_v32 = vmul.f32 %v26031_v37, %v22044_v30 }
0x15bc   : > { %v22045_v29 = vmax.f32 %v25138_v26, 0.0 }
0x15bd   : > { %22062 = vrot.lane.b32.xlu1 %v28892_v23, %s25850_s0 }
0x15be   : > { %v28897_v31 = vmul.f32 %v26022_v33, %v22045_v29 }
0x15c0   : > { %22066 = vrot.lane.b32.xlu0 %v28897_v31, %s25850_s0 }
0x15c1   : > { %22295 = vrot.lane.b32.xlu1 %v28882_v17, %s25851_s21 }
0x15c4   : > { %22064 = vrot.lane.b32.xlu0 %v28904_v32, %s25850_s0 }
0x15c5   : > { %22303 = vrot.lane.b32.xlu1 %v28897_v31, %s25851_s21 }
0x15c8   : > { %22297 = vrot.lane.b32.xlu0 %v28885_v20, %s25851_s21 }
0x15c9   : > { %22301 = vrot.lane.b32.xlu1 %v28904_v32, %s25851_s21 }
0x15cc   : > { %22299 = vrot.lane.b32.xlu0 %v28892_v23, %s25851_s21 }
0x15cd   : > { %22534 = vrot.lane.b32.xlu1 %v28885_v20, %s25852_s28 }
0x15d0   : > { %22532 = vrot.lane.b32.xlu0 %v28882_v17, %s25852_s28 }
0x15d1   : > { %22536 = vrot.lane.b32.xlu1 %v28892_v23, %s25852_s28 }
0x15d4   : > { %22540 = vrot.lane.b32.xlu0 %v28897_v31, %s25852_s28 }
0x15d5   : > { %22993 = vrot.lane.b32.xlu1 %v28885_v20, %s25853_s29 }
0x15d8   : > { %22538 = vrot.lane.b32.xlu0 %v28904_v32, %s25852_s28  ;;  %s326_s28 = sand.u32 1, %s25822_s19  }
0x15d9   : > { %22991 = vrot.lane.b32.xlu1 %v28882_v17, %s25853_s29 }
0x15dc   : > { %22995 = vrot.lane.b32.xlu0 %v28892_v23, %s25853_s29 }
0x15dd   : > { %22999 = vrot.lane.b32.xlu1 %v28897_v31, %s25853_s29 }
0x15e0   : > { %22997 = vrot.lane.b32.xlu0 %v28904_v32, %s25853_s29  ;;  %s23939_s29 = sshll.u32 %s326_s28, 2 }
0x15e1   : > { %23232 = vrot.lane.b32.xlu1 %v28892_v23, %s25854_s15  ;;  %s328_s17 = scalar_lea.vmem [#allocation2], %s23939_s29 }
0x15e2   : > { %s23813_s26 = sshll.u32 %s328_s17, 4  ;;  %s29116_s26 = int_to_ptr.vmem [resolvable:$true] %s23813_s26 }
0x15e4   : > { %23230 = vrot.lane.b32.xlu0 %v28885_v20, %s25854_s15 }
0x15e5   : > { %23234 = vrot.lane.b32.xlu1 %v28904_v32, %s25854_s15 }
0x15e8   : > { %23228 = vrot.lane.b32.xlu0 %v28882_v17, %s25854_s15 }
0x15e9   : > { %23467 = vrot.lane.b32.xlu1 %v28885_v20, %s25855_s9 }
0x15ec   : > { %23236 = vrot.lane.b32.xlu0 %v28897_v31, %s25854_s15  ;;  %s24376_s15 = sshll.u32 %s25834_s22, 3  ;;  %s23797_s22 = scalar_lea.sflag [#allocation3], %s326_s28 }
0x15ed   : > { %23465 = vrot.lane.b32.xlu1 %v28882_v17, %s25855_s9 }
0x15f0   : > { %23469 = vrot.lane.b32.xlu0 %v28892_v23, %s25855_s9 }
0x15f1   : > { %23473 = vrot.lane.b32.xlu1 %v28897_v31, %s25855_s9 }
0x15f4   : > { %23471 = vrot.lane.b32.xlu0 %v28904_v32, %s25855_s9  ;;  %s23809_s9 = sadd.s32 %s24376_s15, %s25962_s12  ;;  %s25752_s12 = scalar_lea.vmem %s29116_s26, 64 }
0x15f5   : > { %s24377_s14 = sshll.u32 %s23809_s9, 4  ;;  %p25753_p4 = scmp.ne.s32.totalorder %s29116_s26, %s25752_s12 }
0x15f6   : > { %s29114_s16 = scalar_lea.hbm %s29173_s5, %s24377_s14 }
0x15f7   : > { %p25754_p5 = pnand %p25753_p4, %p25941_p3 }
0x15f8   : > { %22055 = vperm.xlu0 %25730, %v24340_v34  }
0x15f9   : > { %p25755_p6 = pneg %p25754_p5 }
0x162a   : > { %v22059_v35 = vpop.permute.xlu0 %22058 }
0x162b   : > { %v22061_v36 = vpop.permute.xlu1 %22060 }
0x162c   : > { %v22071_v38 = vsel %vm469_vm0, %v22059_v35, %v22061_v36 }
0x162d   : > { %22078 = vmatprep.subr.mxu1 %v22071_v38 }
0x162f   : > { %v22063_v39 = vpop.permute.xlu1 %22062 }
0x1630   : > { %v22070_v46 = vsel %vm469_vm0, %v22061_v36, %v22063_v39 }
0x1632   : > { %v22067_v40 = vpop.permute.xlu0 %22066 }
0x1633   : > { %v22072_v42 = vsel %vm469_vm0, %v22067_v40, %v22059_v35  ;;  %v22296_v43 = vpop.permute.xlu1 %22295 }
0x1634   : > { %22079 = vmatpush1.msra.mxu1 %v22072_v42 }
0x1635   : > { %24342 = vmatmul.mubr.msk.f32.vlgmr.msra.gmra.mrb[36].mxu1 %vm476_vm1, %v24341_v41 }
0x1636   : > { %v22065_v44 = vpop.permute.xlu0 %22064  ;;  %22213 = vmatprep.mubr.f32.mxu1 %v25848_v0 }
0x1637   : > { %v22069_v45 = vsel %vm469_vm0, %v22063_v39, %v22065_v44  ;;  %v22304_v47 = vpop.permute.xlu1 %22303  ;;  %v22068_v48 = vsel %vm469_vm0, %v22065_v44, %v22067_v40  ;;  %v24365_v44 = vld [vmem:[%s29171_s3 + $0x308] sm:$0xff] }
0x1638   : > { %22149 = vmatprep.subr.mxu1 %v22069_v45  ;;  %v22309_v51 = vsel %vm707_vm2, %v22304_v47, %v22296_v43 }
0x1639   : > { %22150 = vmatpush1.msra.mxu1 %v22070_v46 }
0x163a   : > { %24343 = vmatmul.mubr.msk.f32.vlgmr.msra.gmra.mrb[38].mxu1 %vm476_vm1, %v24341_v41  ;;  %25039 = vmatprep.subr.mxu1 %v25848_v0  ;;  %v22298_v49 = vpop.permute.xlu0 %22297 }
0x163b   : > { %25040 = vmatpush3.msra.mxu1 %v22068_v48  ;;  %v22308_v50 = vsel %vm707_vm2, %v22296_v43, %v22298_v49  ;;  %25041 = vmatprep.mubr.msk.f32.mxu1 %vm25857_vm4, %v25848_v0  ;;  %v22302_v52 = vpop.permute.xlu1 %22301 }
0x163c   : > { %22315 = vmatprep.subr.mxu1 %v22308_v50  ;;  %v22305_v59 = vsel %vm707_vm2, %v22302_v52, %v22304_v47 }
0x163e   : > { %25042 = vmatmul.mubr.msk.f32.vlgmr.msra.gmra.mrb[40].mxu1 %vm476_vm1, %v24341_v41  ;;  %v22300_v53 = vpop.permute.xlu0 %22299 }
0x163f   : > { %22316 = vmatpush1.msra.mxu1 %v22309_v51  ;;  %v22306_v54 = vsel %vm707_vm2, %v22300_v53, %v22302_v52  ;;  %22379 = vmatprep.mubr.f32.mxu1 %v25848_v0  ;;  %v22307_v56 = vsel %vm707_vm2, %v22298_v49, %v22300_v53  ;;  %v22535_v58 = vpop.permute.xlu1 %22534 }
0x1640   : > { %22386 = vmatprep.subr.mxu1 %v22306_v54 }
0x1642   : > { %24346 = vmatmul.mubr.msk.f32.vlgmr.msra.gmra.mrb[36].mxu1 %vm476_vm1, %v24345_v55  ;;  %v22533_v57 = vpop.permute.xlu0 %22532 }
0x1643   : > { %22387 = vmatpush1.msra.mxu1 %v22307_v56  ;;  %22450 = vmatprep.mubr.f32.mxu1 %v25848_v0  ;;  %v22545_v61 = vsel %vm945_vm5, %v22533_v57, %v22535_v58  ;;  %v22537_v62 = vpop.permute.xlu1 %22536 }
0x1644   : > { %25044 = vmatprep.subr.mxu1 %v25848_v0  ;;  %v22544_v4 = vsel %vm945_vm5, %v22535_v58, %v22537_v62 }
0x1646   : > { %24347 = vmatmul.mubr.msk.f32.vlgmr.msra.gmra.mrb[38].mxu1 %vm476_vm1, %v24345_v55  ;;  %v22541_v60 = vpop.permute.xlu0 %22540 }
0x1647   : > { %25045 = vmatpush3.msra.mxu1 %v22305_v59  ;;  %25046 = vmatprep.mubr.msk.f32.mxu1 %vm25857_vm4, %v25848_v0  ;;  %v22546_v63 = vsel %vm945_vm5, %v22541_v60, %v22533_v57  ;;  %v22994_v5 = vpop.permute.xlu1 %22993 }
0x1648   : > { %22552 = vmatprep.subr.mxu1 %v22545_v61 }
0x164a   : > { %25047 = vmatmul.mubr.msk.f32.vlgmr.msra.gmra.mrb[40].mxu1 %vm476_vm1, %v24345_v55  ;;  %v22539_v1 = vpop.permute.xlu0 %22538 }
0x164b   : > { %22553 = vmatpush1.msra.mxu1 %v22546_v63  ;;  %v22543_v2 = vsel %vm945_vm5, %v22537_v62, %v22539_v1  ;;  %22616 = vmatprep.mubr.f32.mxu1 %v25848_v0  ;;  %v22542_v6 = vsel %vm945_vm5, %v22539_v1, %v22541_v60  ;;  %v22992_v10 = vpop.permute.xlu1 %22991 }
0x164c   : > { %22623 = vmatprep.subr.mxu1 %v22543_v2 }
0x164e   : > { %24350 = vmatmul.mubr.msk.f32.vlgmr.msra.gmra.mrb[36].mxu1 %vm476_vm1, %v24349_v3  ;;  %v22996_v9 = vpop.permute.xlu0 %22995 }
0x164f   : > { %22624 = vmatpush1.msra.mxu1 %v22544_v4  ;;  %22687 = vmatprep.mubr.f32.mxu1 %v25848_v0  ;;  %v23000_v13 = vpop.permute.xlu1 %22999  ;;  %v23003_v14 = vsel %vm1405_vm6, %v22994_v5, %v22996_v9 }
0x1650   : > { %25049 = vmatprep.subr.mxu1 %v25848_v0  ;;  %v23005_v24 = vsel %vm1405_vm6, %v23000_v13, %v22992_v10 }
0x1652   : > { %24351 = vmatmul.mubr.msk.f32.vlgmr.msra.gmra.mrb[38].mxu1 %vm476_vm1, %v24349_v3  ;;  %v22998_v12 = vpop.permute.xlu0 %22997 }
0x1653   : > { %25050 = vmatpush3.msra.mxu1 %v22542_v6  ;;  %25051 = vmatprep.mubr.msk.f32.mxu1 %vm25857_vm4, %v25848_v0  ;;  %v23233_v18 = vpop.permute.xlu1 %23232  ;;  %v23001_v19 = vsel %vm1405_vm6, %v22998_v12, %v23000_v13  ;;  %v23002_v21 = vsel %vm1405_vm6, %v22996_v9, %v22998_v12 }
0x1654   : > { %22774 = vmatprep.subr.mxu1 %v28885_v20  ;;  %v24357_v20 = vld [vmem:[%s29171_s3 + $0x2f8] sm:$0xff] }
0x1656   : > { %25052 = vmatmul.mubr.msk.f32.vlgmr.msra.gmra.mrb[40].mxu1 %vm476_vm1, %v24349_v3  ;;  %v23231_v15 = vpop.permute.xlu0 %23230 }
0x1657   : > { %22775 = vmatpush1.msra.mxu1 %v28882_v17  ;;  %22838 = vmatprep.mubr.f32.mxu1 %v25848_v0  ;;  %v23004_v17 = vsel %vm1405_vm6, %v22992_v10, %v22994_v5  ;;  %v23240_v26 = vsel %vm1643_vm7, %v23231_v15, %v23233_v18 }
0x1658   : > { %22845 = vmatprep.subr.mxu1 %v28904_v32  ;;  %v24361_v32 = vld [vmem:[%s29171_s3 + $0x300] sm:$0xff] }
0x165a   : > { %24354 = vmatmul.mubr.msk.f32.vlgmr.msra.gmra.mrb[36].mxu1 %vm476_vm1, %v24353_v11  ;;  %v23229_v22 = vpop.permute.xlu0 %23228 }
0x165b   : > { %22846 = vmatpush1.msra.mxu1 %v28892_v23  ;;  %22909 = vmatprep.mubr.f32.mxu1 %v25848_v0  ;;  %v23235_v23 = vpop.permute.xlu1 %23234  ;;  %v23241_v29 = vsel %vm1643_vm7, %v23229_v22, %v23231_v15 }
0x165c   : > { %25054 = vmatprep.subr.mxu1 %v25848_v0  ;;  %v23239_v34 = vsel %vm1643_vm7, %v23233_v18, %v23235_v23  ;;  %v25858_v18 = vmov 1966171168  }
0x165e   : > { %24355 = vmatmul.mubr.msk.f32.vlgmr.msra.gmra.mrb[38].mxu1 %vm476_vm1, %v24353_v11  ;;  %v23237_v28 = vpop.permute.xlu0 %23236 }
0x165f   : > { %25055 = vmatpush3.msra.mxu1 %v28897_v31  ;;  %25056 = vmatprep.mubr.msk.f32.mxu1 %vm25857_vm4, %v25848_v0  ;;  %v23468_v30 = vpop.permute.xlu1 %23467  ;;  %v23238_v31 = vsel %vm1643_vm7, %v23235_v23, %v23237_v28  ;;  %v23242_v38 = vsel %vm1643_vm7, %v23237_v28, %v23229_v22 }
0x1660   : > { %23011 = vmatprep.subr.mxu1 %v23003_v14 }
0x1662   : > { %25057 = vmatmul.mubr.msk.f32.vlgmr.msra.gmra.mrb[40].mxu1 %vm476_vm1, %v24353_v11  ;;  %v23470_v35 = vpop.permute.xlu0 %23469 }
0x1663   : > { %23012 = vmatpush1.msra.mxu1 %v23004_v17  ;;  %23075 = vmatprep.mubr.f32.mxu1 %v25848_v0  ;;  %v23466_v36 = vpop.permute.xlu1 %23465  ;;  %v23477_v39 = vsel %vm1881_vm8, %v23468_v30, %v23470_v35 }
0x1664   : > { %23082 = vmatprep.subr.mxu1 %v23001_v19  ;;  %v23478_v41 = vsel %vm1881_vm8, %v23466_v36, %v23468_v30  ;;  %v23750_v19 = vunpack.c.l.s4 %v25858_v18 }
0x1666   : > { %24358 = vmatmul.mubr.msk.f32.vlgmr.msra.gmra.mrb[36].mxu1 %vm476_vm1, %v24357_v20  ;;  %v23472_v40 = vpop.permute.xlu0 %23471 }
0x1667   : > { %23083 = vmatpush1.msra.mxu1 %v23002_v21  ;;  %23146 = vmatprep.mubr.f32.mxu1 %v25848_v0  ;;  %v23474_v42 = vpop.permute.xlu1 %23473  ;;  %v23476_v45 = vsel %vm1881_vm8, %v23470_v35, %v23472_v40  ;;  %v23753_v21 = vshrl.u32 %v409_v7, 7 }
0x1668   : > { %25059 = vmatprep.subr.mxu1 %v25848_v0  ;;  %v23475_v43 = vsel %vm1881_vm8, %v23472_v40, %v23474_v42  ;;  %v23479_v46 = vsel %vm1881_vm8, %v23474_v42, %v23466_v36 }
0x166a   : > { %24359 = vmatmul.mubr.msk.f32.vlgmr.msra.gmra.mrb[38].mxu1 %vm476_vm1, %v24357_v20 }
0x166b   : > { %25060 = vmatpush3.msra.mxu1 %v23005_v24  ;;  %25061 = vmatprep.mubr.msk.f32.mxu1 %vm25857_vm4, %v25848_v0 }
0x166c   : > { %23248 = vmatprep.subr.mxu1 %v23240_v26 }
0x166e   : > { %25062 = vmatmul.mubr.msk.f32.vlgmr.msra.gmra.mrb[40].mxu1 %vm476_vm1, %v24357_v20  ;;  %v23751_v20 = vunpack.c.0.s8 %v23750_v19 }
0x166f   : > { %23249 = vmatpush1.msra.mxu1 %v23241_v29  ;;  %23312 = vmatprep.mubr.f32.mxu1 %v25848_v0 }
0x1670   : > { %23319 = vmatprep.subr.mxu1 %v23238_v31  ;;  %v23754_v26 = vsub.s32 %v23751_v20, %v23753_v21 }
0x1672   : > { %24362 = vmatmul.mubr.msk.f32.vlgmr.msra.gmra.mrb[36].mxu1 %vm476_vm1, %v24361_v32 }
0x1673   : > { %23320 = vmatpush1.msra.mxu1 %v23239_v34  ;;  %23383 = vmatprep.mubr.f32.mxu1 %v25848_v0 }
0x1674   : > { %25064 = vmatprep.subr.mxu1 %v25848_v0 }
0x1676   : > { %24363 = vmatmul.mubr.msk.f32.vlgmr.msra.gmra.mrb[38].mxu1 %vm476_vm1, %v24361_v32 }
0x1677   : > { %25065 = vmatpush3.msra.mxu1 %v23242_v38  ;;  %25066 = vmatprep.mubr.msk.f32.mxu1 %vm25857_vm4, %v25848_v0  ;;  %v22056_v47 = vpop.permute.xlu0 %22055 }
0x1678   : > { %23485 = vmatprep.subr.mxu1 %v23477_v39 }
0x167a   : > { %25067 = vmatmul.mubr.msk.f32.vlgmr.msra.gmra.mrb[40].mxu1 %vm476_vm1, %v24361_v32 }
0x167b   : > { %23486 = vmatpush1.msra.mxu1 %v23478_v41  ;;  %23549 = vmatprep.mubr.f32.mxu1 %v25848_v0 }
0x167c   : > { %23556 = vmatprep.subr.mxu1 %v23475_v43 }
0x167e   : > { %24366 = vmatmul.mubr.msk.f32.vlgmr.msra.gmra.mrb[36].mxu1 %vm476_vm1, %v24365_v44 }
0x167f   : > { %23557 = vmatpush1.msra.mxu1 %v23476_v45  ;;  %23620 = vmatprep.mubr.f32.mxu1 %v25848_v0 }
0x1680   : > { %25069 = vmatprep.subr.mxu1 %v25848_v0 }
0x1682   : > { %24367 = vmatmul.mubr.msk.f32.vlgmr.msra.gmra.mrb[38].mxu1 %vm476_vm1, %v24365_v44 }
0x1683   : > { %25070 = vmatpush3.msra.mxu1 %v23479_v46  ;;  %25071 = vmatprep.mubr.msk.f32.mxu1 %vm25857_vm4, %v25848_v0 }
0x1686   : > { %25072 = vmatmul.mubr.msk.f32.vlgmr.msra.gmra.mrb[40].mxu1 %vm476_vm1, %v24365_v44 }
0x1751   : > { %v23551_v48 = vpop.f32.mrb[36].mxu1 }
0x1752   : > { %v25139_v49 = vadd.f32 %v23551_v48, %v22056_v47  ;;  %v23553_v50 = vpop.f32.mrb[37].mxu1 }
0x1753   : > { %v25140_v51 = vadd.f32 %v23553_v50, %v22056_v47 }
0x1754   : > { %v23702_v52 = vmax.f32 %v25139_v49, 0.0 }
0x1755   : > { %v23703_v53 = vmax.f32 %v25140_v51, 0.0  ;;  %v23622_v54 = vpop.f32.mrb[38].mxu1 }
0x1756   : > { %v23707_v55 = vmul.f32 %v26006_v25, %v23702_v52  ;;  %v25141_v8 = vadd.f32 %v23622_v54, %v22056_v47  ;;  %v23624_v56 = vpop.f32.mrb[39].mxu1 }
0x1757   : > { %v23708_v57 = vmul.f32 %v25996_v16, %v23703_v53  ;;  %v25142_v58 = vadd.f32 %v23624_v56, %v22056_v47 }
0x1758   : > { %v24369_v59 = vmul.f32 -1.442695, %v23707_v55  ;;  %v23704_v60 = vmax.f32 %v25141_v8, 0.0 }
0x1759   : > { %v24370_v0 = vmul.f32 -1.442695, %v23708_v57  ;;  %v23705_v61 = vmax.f32 %v25142_v58, 0.0  ;;  %v23693_v62 = vpop.f32.mrb[40].mxu1 }
0x175a   : > { %25732 = vpow2.f32 %v24369_v59  ;;  %v23709_v63 = vmul.f32 %v26009_v27, %v23704_v60  ;;  %v25143_v1 = vadd.f32 %v23693_v62, %v22056_v47  ;;  %v25073_v2 = vpop.f32.mrb[41].mxu1 }
0x175b   : > { %25734 = vpow2.f32 %v24370_v0  ;;  %v23710_v3 = vmul.f32 %v26031_v37, %v23705_v61 }
0x175c   : > { %v24371_v4 = vmul.f32 -1.442695, %v23709_v63  ;;  %v23706_v25 = vmax.f32 %v25143_v1, 0.0 }
0x175d   : > { %v24372_v5 = vmul.f32 -1.442695, %v23710_v3 }
0x175e   : > { %25736 = vpow2.f32 %v24371_v4  ;;  %v23711_v16 = vmul.f32 %v26022_v33, %v23706_v25 }
0x175f   : > { %25738 = vpow2.f32 %v24372_v5 }
0x1760   : > { %v24373_v6 = vmul.f32 -1.442695, %v23711_v16 }
0x1762   : > { %25740 = vpow2.f32 %v24373_v6 }
0x1764   : > { %v25733_v9 = vpop.eup %25732 }
0x1765   : > { %v25735_v10 = vpop.eup %25734  ;;  %v23727_v11 = vadd.f32 1.0, %v25733_v9 }
0x1766   : > { %v23728_v12 = vadd.f32 1.0, %v25735_v10 }
0x1767   : > { %25742 = vrcp.f32 %v23727_v11 }
0x1768   : > { %v25737_v27 = vpop.eup %25736  ;;  %25744 = vrcp.f32 %v23728_v12 }
0x1769   : > { %v25739_v13 = vpop.eup %25738  ;;  %v23729_v14 = vadd.f32 1.0, %v25737_v27 }
0x176a   : > { %v23730_v15 = vadd.f32 1.0, %v25739_v13 }
0x176b   : > { %25746 = vrcp.f32 %v23729_v14 }
0x176c   : > { %v25741_v37 = vpop.eup %25740  ;;  %25748 = vrcp.f32 %v23730_v15 }
0x176d   : > { %v23731_v17 = vadd.f32 1.0, %v25741_v37 }
0x176f   : > { %25750 = vrcp.f32 %v23731_v17 }
0x1771   : > { %v25743_v33 = vpop.eup %25742 }
0x1772   : > { %v25745_v22 = vpop.eup %25744 }
0x1773   : > { %v23747_v23 = vcombine.low %v25743_v33, %v25745_v22 }
0x1775   : > { %v25747_v24 = vpop.eup %25746  ;;  %v23755_v31 = vrot.slane %v23747_v23, %v23754_v26 }
0x1776   : > { %v25749_v28 = vpop.eup %25748 }
0x1777   : > { %v23748_v29 = vcombine.low %v25747_v24, %v25749_v28 }
0x1779   : > { %v25751_v30 = vpop.eup %25750  ;;  %v23762_v32 = vrot.slane %v23748_v29, %v23754_v26 }
0x177a   : > { %v23769_v34 = vrot.slane %v25751_v30, %v23754_v26 }
0x177b   : > { %v23770_v35 = vcombine.low %v23755_v31, %v23762_v32 }
0x177c   : > { %v23784_v36 = vrot.slane %v23769_v34, %v23754_v26 }
0x177d   : > { %v23777_v38 = vrot.slane %v23770_v35, %v23754_v26 }
0x177f   : > { %v23785_v39 = vcombine.low %v23777_v38, %v23784_v36 }
0x1781   : > { %23786 = vrot.lane.b32.xlu1 %v23785_v39, %s25849_s10  ;;  %s25859_s10 = smov [#allocation2]  }
0x1782   : > { %s25756_s13 = sshll.u32 %s25859_s10, 4  ;;  %s25757_s13 = int_to_ptr.vmem [resolvable:$false] %s25756_s13 }
0x1783   : > { %s25758_s8 = scalar_lea.vmem %s25757_s13, 128  ;;  %p25759_p7 = scmp.lt.s32.totalorder %s29116_s26, %s25757_s13 }
0x1784   : > { %p25760_p9 = scmp.lt.s32.totalorder %s25758_s8, %s25752_s12 }
0x1786   : > { %p25761_p10 = por %p25760_p9, %p25759_p7 }
0x1788   : > { %p25762_p11 = pnand %p25761_p10, %p25755_p6 }
0x17f3   : > { %v23787_v40 = vpop.permute.xlu1 %23786 }
0x17f4   : > { %v23788_v41 = vrot.slane %v23787_v40, 1 }
0x17f6   : > { %v23789_v42 = vsel %vm394_vm3, %v23787_v40, %v23788_v41 }
0x17f7   : > { %23795 = vst.msk [vmem:[%s328_s17] sm:$0xf] %vm23793_vm9, %v23789_v42 }
0x17f8   : > { %25765 = shalt.err (!%p25762_p11)
}
0x17f9   : > { %s25766_s0 = scalar_lea.hbm %s29114_s16, 64  ;;  %s25770_s29 = scalar_lea.hbm %s29173_s5, 256 }
0x17fa   : > { %p25767_p12 = scmp.ne.s32.totalorder %s29114_s16, %s25766_s0  ;;  %p25771_p1 = scmp.lt.u32.totalorder %s29114_s16, %s29173_s5 }
0x17fb   : > { %p25772_p2 = scmp.lt.u32.totalorder %s25770_s29, %s25766_s0  ;;  %p25774_p5 = scmp.lt.u32.totalorder %s25766_s0, %s29114_s16 }
0x17fc   : > { %p25768_p13 = pnand %p25767_p12, %p25941_p3 }
0x17fd   : > { %p25773_p4 = por %p25772_p2, %p25771_p1 }
0x17fe   : > { %p25769_p0 = pneg %p25768_p13 }
0x17ff   : > { %p25775_p6 = por %p25774_p5, %p25773_p4 }
0x1801   : > { %p25776_p7 = pnand %p25775_p6, %p25769_p0 }
0x1803   : > { %25779 = shalt.err (!%p25776_p7)
}
0x1804   : > { %25648 = dma.vmem_to_hbm [thread:$0]  (%p25941_p3), %s29116_s26, 64, %s29114_s16, %s23797_s22  }
0x1805 PF: > { %p25654_p9 = scmp.ge.s32.totalorder %s25846_s25, 2  ;;  %s23825_s14 = sand.u32 1, %s25818_s18  }
0x1806   : > { %s23826_s17 = scalar_lea.sflag [#allocation3], %s23825_s14 }
0x1807   : > { %p25651_p10 = pnand %p25654_p9, %p25950_p8 }
0x1809   : > { %25813 = dma.done.wait (!%p25651_p10), %s23826_s17, 64  }
0x180a   : > { %25815 = vsyncadd (!%p25651_p10), %s23826_s17, 4294967232  ;;  %s18_s25 = sadd.s32 1, %s25846_s25   ;;  %s29182_s6 = sld [smem:[#allocation5_spill]] }
0x180b   : > { %p15_p11 = scmp.ge.s32.totalorder %s18_s25, 6   ;;  %s29183_s26 = sld [smem:[#allocation6_spill]] }
0x180c   : > { %s29184_s18 = smov %s25822_s19  ;;  %s29185_s19 = smov %s25826_s20 }
0x180d   : > { %s29186_s20 = smov %s25959_s11  ;;  %s29187_s21 = smov %s25838_s23 }
0x180e   : > { %s29188_s22 = smov %s25842_s24  ;;  %17 = sbr.rel (!%p15_p11) target bundleno = 7 (0x7), region = 191 }
0x1810   : > { %s29189_s23 = smov %s29182_s6 }
0x1811   : > { %s29190_s24 = smov %s29183_s26 }
0x1815   :  { %23831 = vsyncpa [#allocation3], 1 }
0x1816   :  { %23833 = vsyncpa [#allocation3 + $0x1], 1 }

</bundles_post_ra>
